<compile_context>
chip_gen: v5e
topology: v5e:2x2
jax: 0.10.0
libtpu: 0.0.40
codegen_flags: <defaults>
</compile_context>

<pallas_src>
import numpy as np
import jax
import jax.numpy as jnp
from jax.experimental import pallas as pl
from jax.experimental.pallas import tpu as pltpu

# ----------------------------- model hyper-params ---------------------------
INPUT_DIM = 16     # post_embed_dim (no categorical features)
OUTPUT_DIM = 4
N_D = 8
N_A = 8
N_STEPS = 3
GAMMA = 1.3
EPSILON = 1e-15
BN_EPS = 1e-5      # torch.nn.BatchNorm1d default eps
N_IND = 2          # n_independent GLU layers per FeatTransformer
N_SHARED = 2       # shared GLU layers per FeatTransformer

N_HIDDEN = N_D + N_A          # 16
TWO_H = 2 * N_HIDDEN          # 32
N_TRANSFORMERS = N_STEPS + 1  # initial splitter + one per step
GLU_PER_TR = N_SHARED + N_IND # 4
N_RES = (N_SHARED - 1) + N_IND  # residual GLU layers per transformer

BATCH = 256
TILE_B = 128


# ----------------------------- reference math (B, D layout) -----------------
def _tabnet_compute(x, bn0_s, bn0_b, w_sh0, w_sh1, w_ind, glu_s, glu_b,
                    w_att, att_s, att_b, w_fin):
    """Pure-jnp TabNet forward in the original (batch, feature) layout.
    Used only as the numerical reference."""
    nd = N_D
    nh = N_HIDDEN
    sqrt_half = jnp.sqrt(jnp.float32(0.5))

    x = x * bn0_s + bn0_b   # initial BatchNorm1d (eval mode, folded to affine)

    def glu_layer(h, w, s, b):
        z = jnp.dot(h, w, preferred_element_type=jnp.float32)   # Linear(bias=False)
        z = z * s + b                                            # GBN (eval, affine)
        return z[:, :nh] * jax.nn.sigmoid(z[:, nh:])             # GLU

    def feat_transformer(h, t):
        h = glu_layer(h, w_sh0, glu_s[GLU_PER_TR * t + 0], glu_b[GLU_PER_TR * t + 0])
        h = (h + glu_layer(h, w_sh1, glu_s[GLU_PER_TR * t + 1],
                           glu_b[GLU_PER_TR * t + 1])) * sqrt_half
        for l in range(N_IND):
            h = (h + glu_layer(h, w_ind[N_IND * t + l],
                               glu_s[GLU_PER_TR * t + N_SHARED + l],
                               glu_b[GLU_PER_TR * t + N_SHARED + l])) * sqrt_half
        return h

    def sparsemax(z):
        zi = z[:, :, None]
        zj = z[:, None, :]
        ge = (zj >= zi).astype(jnp.float32)
        k = jnp.sum(ge, axis=-1)
        s = jnp.sum(ge * zj, axis=-1)
        support = (1.0 + k * z > s).astype(jnp.float32)
        k_star = jnp.sum(support, axis=-1, keepdims=True)
        s_star = jnp.sum(support * z, axis=-1, keepdims=True)
        tau = (s_star - 1.0) / k_star
        return jnp.maximum(z - tau, 0.0)

    att = feat_transformer(x, 0)[:, nd:]
    prior = jnp.ones_like(x)
    res = jnp.zeros((x.shape[0], nd), jnp.float32)
    ent_rows = jnp.zeros((x.shape[0], 1), jnp.float32)

    for step in range(N_STEPS):
        a = jnp.dot(att, w_att[step], preferred_element_type=jnp.float32)
        a = a * att_s[step] + att_b[step]
        a = a * prior
        M = sparsemax(a)
        ent_rows = ent_rows + jnp.sum(M * jnp.log(M + EPSILON), axis=1, keepdims=True)
        prior = (GAMMA - M) * prior
        masked_x = M * x
        out = feat_transformer(masked_x, step + 1)
        res = res + jnp.maximum(out[:, :nd], 0.0)
        att = out[:, nd:]

    m_loss = jnp.sum(ent_rows, axis=0, keepdims=True) / (x.shape[0] * N_STEPS)
    y = jnp.dot(res, w_fin, preferred_element_type=jnp.float32)
    return y, m_loss


# ----------------------------- kernel math (D, B layout) --------------------
def _tabnet_compute_t(xT, bn0_s, bn0_b, w0l, w0g, b0l, b0g,
                      wrl, wrg, brl, brg, w_att, att_b, w_fin):
    """Transposed (feature-on-sublane, batch-on-lane) TabNet forward on a
    VMEM tile.  Weights are pre-folded (GBN scale), pre-split (GLU lin/gate)
    and pre-transposed to (out, in)."""
    nd = N_D
    bt = xT.shape[1]
    sqrt_half = jnp.float32(np.sqrt(0.5))

    xT = xT * bn0_s + bn0_b   # initial BN (eval), per-feature, broadcast over lanes

    def glu(hT, wl, wg, bl, bg):
        # z_lin / z_gate computed with separate half-weights: no unaligned slice.
        zl = jnp.dot(wl, hT, preferred_element_type=jnp.float32) + bl
        zg = jnp.dot(wg, hT, preferred_element_type=jnp.float32) + bg
        return zl * jax.nn.sigmoid(zg)       # sigmoid -> EUP (free slot)

    def feat_tr(hT, t):
        h = glu(hT, w0l[t], w0g[t], b0l[t], b0g[t])
        for l in range(N_RES):
            h = (h + glu(h, wrl[t, l], wrg[t, l], brl[t, l], brg[t, l])) * sqrt_half
        return h

    def sparsemax_t(z):
        # sparsemax over the feature (sublane) axis 0 of z: (D, Bt).
        # Pairwise tensor is (D, D, Bt) -> lane-dense, reductions over sublanes.
        zi = z[:, None, :]
        zj = z[None, :, :]
        ge = (zj >= zi).astype(jnp.float32)
        k = jnp.sum(ge, axis=1)                               # (D, Bt)
        s = jnp.sum(ge * zj, axis=1)                          # (D, Bt)
        support = (1.0 + k * z > s).astype(jnp.float32)
        k_star = jnp.sum(support, axis=0, keepdims=True)      # (1, Bt)
        s_star = jnp.sum(support * z, axis=0, keepdims=True)  # (1, Bt)
        tau = (s_star - 1.0) / k_star
        return jnp.maximum(z - tau, 0.0)

    att = feat_tr(xT, 0)[nd:, :]                 # aligned sublane slice
    prior = jnp.ones_like(xT)
    res = jnp.zeros((nd, bt), jnp.float32)
    ent = jnp.zeros((1, bt), jnp.float32)

    for step in range(N_STEPS):
        a = jnp.dot(w_att[step], att, preferred_element_type=jnp.float32) + att_b[step]
        a = a * prior
        M = sparsemax_t(a)
        ent = ent + jnp.sum(M * jnp.log(M + EPSILON), axis=0, keepdims=True)
        prior = (GAMMA - M) * prior
        masked = M * xT
        out = feat_tr(masked, step + 1)
        res = res + jnp.maximum(out[:nd, :], 0.0)
        att = out[nd:, :]

    yT = jnp.dot(w_fin, res, preferred_element_type=jnp.float32)   # (OUTPUT_DIM, Bt)
    return yT, ent


# ----------------------------- Pallas kernel --------------------------------
def tabnet_kernel(xT_ref, bn0_s_ref, bn0_b_ref,
                  w0l_ref, w0g_ref, b0l_ref, b0g_ref,
                  wrl_ref, wrg_ref, brl_ref, brg_ref,
                  w_att_ref, att_b_ref, w_fin_ref,
                  out_ref, ent_ref):
    yT, ent = _tabnet_compute_t(
        xT_ref[...].astype(jnp.float32),
        bn0_s_ref[...], bn0_b_ref[...],
        w0l_ref[...], w0g_ref[...], b0l_ref[...], b0g_ref[...],
        wrl_ref[...], wrg_ref[...], brl_ref[...], brg_ref[...],
        w_att_ref[...], att_b_ref[...], w_fin_ref[...])
    out_ref[...] = yT.astype(out_ref.dtype)
    ent_ref[...] = ent.astype(ent_ref.dtype)


def pack_kernel_params(ref_params):
    """Fold eval-mode GBN scales into the linear weights, split GLU weights
    into lin/gate halves, and transpose everything to (out, in) for the
    batch-on-lanes kernel layout.  Done once on host."""
    (bn0_s, bn0_b, w_sh0, w_sh1, w_ind, glu_s, glu_b,
     w_att, att_s, att_b, w_fin) = ref_params
    nh = N_HIDDEN

    bn0_s_t = bn0_s.reshape(INPUT_DIM, 1)
    bn0_b_t = bn0_b.reshape(INPUT_DIM, 1)

    def fold_split_t(w, s, b):
        # (h @ W) * s + b == h @ (W * s) + b   (Linear has no bias)
        wf = w * s                        # (in, 2NH)
        wl = wf[:, :nh].T                 # (NH, in)
        wg = wf[:, nh:].T                 # (NH, in)
        bl = b[0, :nh].reshape(nh, 1)
        bg = b[0, nh:].reshape(nh, 1)
        return wl, wg, bl, bg

    w0l, w0g, b0l, b0g = [], [], [], []
    wrl, wrg, brl, brg = [], [], [], []
    for t in range(N_TRANSFORMERS):
        # layer 0: shared fc0, per-transformer GBN -> per-transformer folded copy
        l0 = GLU_PER_TR * t
        a = fold_split_t(w_sh0, glu_s[l0], glu_b[l0])
        w0l.append(a[0]); w0g.append(a[1]); b0l.append(a[2]); b0g.append(a[3])
        # residual layers: shared fc1 then the independent fcs
        res_w = [w_sh1] + [w_ind[N_IND * t + l] for l in range(N_IND)]
        rl, rg, rbl, rbg = [], [], [], []
        for j, w in enumerate(res_w):
            li = GLU_PER_TR * t + 1 + j
            a = fold_split_t(w, glu_s[li], glu_b[li])
            rl.append(a[0]); rg.append(a[1]); rbl.append(a[2]); rbg.append(a[3])
        wrl.append(jnp.stack(rl)); wrg.append(jnp.stack(rg))
        brl.append(jnp.stack(rbl)); brg.append(jnp.stack(rbg))

    w0l = jnp.stack(w0l); w0g = jnp.stack(w0g)            # (T, NH, IN)
    b0l = jnp.stack(b0l); b0g = jnp.stack(b0g)            # (T, NH, 1)
    wrl = jnp.stack(wrl); wrg = jnp.stack(wrg)            # (T, N_RES, NH, NH)
    brl = jnp.stack(brl); brg = jnp.stack(brg)            # (T, N_RES, NH, 1)

    # attentive transformers: fold GBN scale into the weight, transpose
    w_att_t = jnp.stack([(w_att[s] * att_s[s]).T for s in range(N_STEPS)])            # (S, IN, NA)
    att_b_t = jnp.stack([att_b[s][0].reshape(INPUT_DIM, 1) for s in range(N_STEPS)])  # (S, IN, 1)

    w_fin_t = w_fin.T                                      # (OUT, N_D)

    return (bn0_s_t, bn0_b_t, w0l, w0g, b0l, b0g, wrl, wrg, brl, brg,
            w_att_t, att_b_t, w_fin_t)


def tabnet_forward(x, ref_params, tile_b=TILE_B):
    B = x.shape[0]
    assert B % tile_b == 0, "batch must be a multiple of the batch tile"
    kp = pack_kernel_params(ref_params)
    xT = x.T  # (D, B): batch on lanes (lane-dense compute and stores)

    x_spec = pl.BlockSpec((INPUT_DIM, tile_b), lambda i: (0, i))

    def _resident(arr):
        # full-extent block + constant index_map: weight stays VMEM-resident,
        # never re-DMA'd across batch grid steps.
        zeros = (0,) * arr.ndim
        return pl.BlockSpec(arr.shape, lambda i, z=zeros: z)

    yT, ent = pl.pallas_call(
        tabnet_kernel,
        out_shape=(jax.ShapeDtypeStruct((OUTPUT_DIM, B), jnp.float32),
                   jax.ShapeDtypeStruct((1, B), jnp.float32)),
        grid=(B // tile_b,),
        in_specs=[x_spec] + [_resident(p) for p in kp],
        out_specs=(pl.BlockSpec((OUTPUT_DIM, tile_b), lambda i: (0, i)),
                   pl.BlockSpec((1, tile_b), lambda i: (0, i))),
        compiler_params=pltpu.CompilerParams(
            dimension_semantics=("parallel",)),
    )(xT, *kp)

    y = yT.T                                                  # (B, OUTPUT_DIM)
    # per-sample entropy partials -> global mean in the wrapper (true batch B)
    m_loss = (jnp.sum(ent) / (B * N_STEPS)).reshape(1, 1)
    return y, m_loss


# ----------------------------- parameter init -------------------------------
def glu_gain(fan_in, fan_out):
    return float(np.sqrt((fan_in + fan_out) / np.sqrt(4.0 * fan_in)))


def nonglu_gain(fan_in, fan_out):
    return float(np.sqrt((fan_in + fan_out) / np.sqrt(fan_in)))


def xavier_normal_t(key, fan_in, fan_out, gain):
    # Returns weight already transposed to (in, out).
    std = gain * np.sqrt(2.0 / (fan_in + fan_out))
    return std * jax.random.normal(key, (fan_in, fan_out), jnp.float32)


def init_params(key):
    keys = jax.random.split(key, 2 + 2 * N_TRANSFORMERS + N_STEPS + 1)
    ki = iter(keys)
    bn_scale = np.float32(1.0 / np.sqrt(1.0 + BN_EPS))

    # initial BatchNorm1d(input_dim) folded affine
    bn0_s = jnp.full((1, INPUT_DIM), bn_scale, jnp.float32)
    bn0_b = jnp.zeros((1, INPUT_DIM), jnp.float32)

    # shared GLU fc layers (reused by every FeatTransformer)
    w_sh0 = xavier_normal_t(next(ki), INPUT_DIM, TWO_H, glu_gain(INPUT_DIM, TWO_H))
    w_sh1 = xavier_normal_t(next(ki), N_HIDDEN, TWO_H, glu_gain(N_HIDDEN, TWO_H))

    # independent GLU fc layers: 2 per transformer, 4 transformers
    w_ind = jnp.stack([
        xavier_normal_t(next(ki), N_HIDDEN, TWO_H, glu_gain(N_HIDDEN, TWO_H))
        for _ in range(N_TRANSFORMERS * N_IND)])                       # (8, 16, 32)

    # GBN (eval) per GLU layer: 4 layers per transformer
    glu_s = jnp.full((N_TRANSFORMERS * GLU_PER_TR, 1, TWO_H), bn_scale, jnp.float32)
    glu_b = jnp.zeros((N_TRANSFORMERS * GLU_PER_TR, 1, TWO_H), jnp.float32)

    # attentive transformers: Linear(n_a, input_dim, bias=False) + GBN(input_dim)
    w_att = jnp.stack([
        xavier_normal_t(next(ki), N_A, INPUT_DIM, nonglu_gain(N_A, INPUT_DIM))
        for _ in range(N_STEPS)])                                      # (3, 8, 16)
    att_s = jnp.full((N_STEPS, 1, INPUT_DIM), bn_scale, jnp.float32)
    att_b = jnp.zeros((N_STEPS, 1, INPUT_DIM), jnp.float32)

    # final mapping: Linear(n_d, output_dim, bias=False)
    w_fin = xavier_normal_t(next(ki), N_D, OUTPUT_DIM, nonglu_gain(N_D, OUTPUT_DIM))

    return (bn0_s, bn0_b, w_sh0, w_sh1, w_ind, glu_s, glu_b,
            w_att, att_s, att_b, w_fin)


# ----------------------------- main ------------------------------------------
if __name__ == "__main__":
    key = jax.random.PRNGKey(0)
    kx, kp = jax.random.split(key)
    x = jax.random.normal(kx, (BATCH, INPUT_DIM), jnp.float32)
    ref_params = init_params(kp)

    out, m_loss = tabnet_forward(x, ref_params)
    out = jax.block_until_ready(out)
    m_loss = jax.block_until_ready(m_loss)

    # pure-JAX reference (original layout, unfolded / unsplit params)
    ref_out, ref_mloss = _tabnet_compute(x, *ref_params)
    np.testing.assert_allclose(np.asarray(out), np.asarray(ref_out),
                               rtol=1e-3, atol=1e-3)
    np.testing.assert_allclose(np.asarray(m_loss), np.asarray(ref_mloss),
                               rtol=1e-3, atol=1e-3)

    assert out.shape == (BATCH, OUTPUT_DIM)
    assert m_loss.shape == (1, 1)
    print("KERNEL_OK")
</pallas_src>

<mosaic_0001>
module attributes {stable_mosaic.version = 11 : i64} {
  func.func @tabnet_kernel(%arg0: i32, %arg1: memref<16x128xf32, #tpu.memory_space<vmem>>, %arg2: memref<16x1xf32, #tpu.memory_space<vmem>>, %arg3: memref<16x1xf32, #tpu.memory_space<vmem>>, %arg4: memref<4x16x16xf32, #tpu.memory_space<vmem>>, %arg5: memref<4x16x16xf32, #tpu.memory_space<vmem>>, %arg6: memref<4x16x1xf32, #tpu.memory_space<vmem>>, %arg7: memref<4x16x1xf32, #tpu.memory_space<vmem>>, %arg8: memref<4x3x16x16xf32, #tpu.memory_space<vmem>>, %arg9: memref<4x3x16x16xf32, #tpu.memory_space<vmem>>, %arg10: memref<4x3x16x1xf32, #tpu.memory_space<vmem>>, %arg11: memref<4x3x16x1xf32, #tpu.memory_space<vmem>>, %arg12: memref<3x16x8xf32, #tpu.memory_space<vmem>>, %arg13: memref<3x16x1xf32, #tpu.memory_space<vmem>>, %arg14: memref<4x8xf32, #tpu.memory_space<vmem>>, %arg15: memref<4x128xf32, #tpu.memory_space<vmem>>, %arg16: memref<1x128xf32, #tpu.memory_space<vmem>>) attributes {dimension_semantics = [#tpu.dimension_semantics<parallel>], iteration_bounds = array<i64: 2>, scalar_prefetch = 0 : i64, scratch_operands = 0 : i64, tpu.core_type = #tpu.core_type<tc>, window_params = [{transform_indices = @transform_0, window_bounds = array<i64: 16, 128>}, {pipeline_mode = #tpu.pipeline_mode<synchronous>, transform_indices = @transform_1, window_bounds = array<i64: 16, 1>}, {pipeline_mode = #tpu.pipeline_mode<synchronous>, transform_indices = @transform_2, window_bounds = array<i64: 16, 1>}, {pipeline_mode = #tpu.pipeline_mode<synchronous>, transform_indices = @transform_3, window_bounds = array<i64: 4, 16, 16>}, {pipeline_mode = #tpu.pipeline_mode<synchronous>, transform_indices = @transform_4, window_bounds = array<i64: 4, 16, 16>}, {pipeline_mode = #tpu.pipeline_mode<synchronous>, transform_indices = @transform_5, window_bounds = array<i64: 4, 16, 1>}, {pipeline_mode = #tpu.pipeline_mode<synchronous>, transform_indices = @transform_6, window_bounds = array<i64: 4, 16, 1>}, {pipeline_mode = #tpu.pipeline_mode<synchronous>, transform_indices = @transform_7, window_bounds = array<i64: 4, 3, 16, 16>}, {pipeline_mode = #tpu.pipeline_mode<synchronous>, transform_indices = @transform_8, window_bounds = array<i64: 4, 3, 16, 16>}, {pipeline_mode = #tpu.pipeline_mode<synchronous>, transform_indices = @transform_9, window_bounds = array<i64: 4, 3, 16, 1>}, {pipeline_mode = #tpu.pipeline_mode<synchronous>, transform_indices = @transform_10, window_bounds = array<i64: 4, 3, 16, 1>}, {pipeline_mode = #tpu.pipeline_mode<synchronous>, transform_indices = @transform_11, window_bounds = array<i64: 3, 16, 8>}, {pipeline_mode = #tpu.pipeline_mode<synchronous>, transform_indices = @transform_12, window_bounds = array<i64: 3, 16, 1>}, {pipeline_mode = #tpu.pipeline_mode<synchronous>, transform_indices = @transform_13, window_bounds = array<i64: 4, 8>}, {transform_indices = @transform_14, window_bounds = array<i64: 4, 128>}, {transform_indices = @transform_15, window_bounds = array<i64: 1, 128>}]} {
    %c0 = arith.constant 0 : index
    %c0_0 = arith.constant 0 : index
    %0 = vector.load %arg1[%c0, %c0_0] : memref<16x128xf32, #tpu.memory_space<vmem>>, vector<16x128xf32>
    %c0_1 = arith.constant 0 : index
    %c0_2 = arith.constant 0 : index
    %1 = vector.load %arg2[%c0_1, %c0_2] : memref<16x1xf32, #tpu.memory_space<vmem>>, vector<16x1xf32>
    %c0_3 = arith.constant 0 : index
    %c0_4 = arith.constant 0 : index
    %2 = vector.load %arg3[%c0_3, %c0_4] : memref<16x1xf32, #tpu.memory_space<vmem>>, vector<16x1xf32>
    %c0_5 = arith.constant 0 : index
    %c0_6 = arith.constant 0 : index
    %c0_7 = arith.constant 0 : index
    %3 = vector.load %arg4[%c0_5, %c0_6, %c0_7] : memref<4x16x16xf32, #tpu.memory_space<vmem>>, vector<4x16x16xf32>
    %c0_8 = arith.constant 0 : index
    %c0_9 = arith.constant 0 : index
    %c0_10 = arith.constant 0 : index
    %4 = vector.load %arg5[%c0_8, %c0_9, %c0_10] : memref<4x16x16xf32, #tpu.memory_space<vmem>>, vector<4x16x16xf32>
    %c0_11 = arith.constant 0 : index
    %c0_12 = arith.constant 0 : index
    %c0_13 = arith.constant 0 : index
    %5 = vector.load %arg6[%c0_11, %c0_12, %c0_13] : memref<4x16x1xf32, #tpu.memory_space<vmem>>, vector<4x16x1xf32>
    %c0_14 = arith.constant 0 : index
    %c0_15 = arith.constant 0 : index
    %c0_16 = arith.constant 0 : index
    %6 = vector.load %arg7[%c0_14, %c0_15, %c0_16] : memref<4x16x1xf32, #tpu.memory_space<vmem>>, vector<4x16x1xf32>
    %c0_17 = arith.constant 0 : index
    %c0_18 = arith.constant 0 : index
    %c0_19 = arith.constant 0 : index
    %c0_20 = arith.constant 0 : index
    %7 = vector.load %arg8[%c0_17, %c0_18, %c0_19, %c0_20] : memref<4x3x16x16xf32, #tpu.memory_space<vmem>>, vector<4x3x16x16xf32>
    %c0_21 = arith.constant 0 : index
    %c0_22 = arith.constant 0 : index
    %c0_23 = arith.constant 0 : index
    %c0_24 = arith.constant 0 : index
    %8 = vector.load %arg9[%c0_21, %c0_22, %c0_23, %c0_24] : memref<4x3x16x16xf32, #tpu.memory_space<vmem>>, vector<4x3x16x16xf32>
    %c0_25 = arith.constant 0 : index
    %c0_26 = arith.constant 0 : index
    %c0_27 = arith.constant 0 : index
    %c0_28 = arith.constant 0 : index
    %9 = vector.load %arg10[%c0_25, %c0_26, %c0_27, %c0_28] : memref<4x3x16x1xf32, #tpu.memory_space<vmem>>, vector<4x3x16x1xf32>
    %c0_29 = arith.constant 0 : index
    %c0_30 = arith.constant 0 : index
    %c0_31 = arith.constant 0 : index
    %c0_32 = arith.constant 0 : index
    %10 = vector.load %arg11[%c0_29, %c0_30, %c0_31, %c0_32] : memref<4x3x16x1xf32, #tpu.memory_space<vmem>>, vector<4x3x16x1xf32>
    %c0_33 = arith.constant 0 : index
    %c0_34 = arith.constant 0 : index
    %c0_35 = arith.constant 0 : index
    %11 = vector.load %arg12[%c0_33, %c0_34, %c0_35] : memref<3x16x8xf32, #tpu.memory_space<vmem>>, vector<3x16x8xf32>
    %c0_36 = arith.constant 0 : index
    %c0_37 = arith.constant 0 : index
    %c0_38 = arith.constant 0 : index
    %12 = vector.load %arg13[%c0_36, %c0_37, %c0_38] : memref<3x16x1xf32, #tpu.memory_space<vmem>>, vector<3x16x1xf32>
    %c0_39 = arith.constant 0 : index
    %c0_40 = arith.constant 0 : index
    %13 = vector.load %arg14[%c0_39, %c0_40] : memref<4x8xf32, #tpu.memory_space<vmem>>, vector<4x8xf32>
    %14 = vector.broadcast %1 : vector<16x1xf32> to vector<16x128xf32>
    %15 = arith.mulf %0, %14 : vector<16x128xf32>
    %16 = vector.broadcast %2 : vector<16x1xf32> to vector<16x128xf32>
    %17 = arith.addf %15, %16 : vector<16x128xf32>
    %18 = vector.extract_strided_slice %3 {offsets = [0, 0, 0], sizes = [1, 16, 16], strides = [1, 1, 1]} : vector<4x16x16xf32> to vector<1x16x16xf32>
    %19 = vector.shape_cast %18 : vector<1x16x16xf32> to vector<16x16xf32>
    %20 = vector.extract_strided_slice %4 {offsets = [0, 0, 0], sizes = [1, 16, 16], strides = [1, 1, 1]} : vector<4x16x16xf32> to vector<1x16x16xf32>
    %21 = vector.shape_cast %20 : vector<1x16x16xf32> to vector<16x16xf32>
    %22 = vector.extract_strided_slice %5 {offsets = [0, 0, 0], sizes = [1, 16, 1], strides = [1, 1, 1]} : vector<4x16x1xf32> to vector<1x16x1xf32>
    %23 = vector.shape_cast %22 : vector<1x16x1xf32> to vector<16x1xf32>
    %24 = vector.extract_strided_slice %6 {offsets = [0, 0, 0], sizes = [1, 16, 1], strides = [1, 1, 1]} : vector<4x16x1xf32> to vector<1x16x1xf32>
    %25 = vector.shape_cast %24 : vector<1x16x1xf32> to vector<16x1xf32>
    %cst = arith.constant dense<0.000000e+00> : vector<16x128xf32>
    %26 = tpu.matmul %19, %17, %cst {dimension_numbers = #tpu.dot_dimension_numbers<[1], [0], [0], [1], [0, 0, 1, 1], [], []>} : vector<16x16xf32>, vector<16x128xf32>, vector<16x128xf32> -> vector<16x128xf32>
    %27 = vector.broadcast %23 : vector<16x1xf32> to vector<16x128xf32>
    %28 = arith.addf %26, %27 : vector<16x128xf32>
    %cst_41 = arith.constant dense<0.000000e+00> : vector<16x128xf32>
    %29 = tpu.matmul %21, %17, %cst_41 {dimension_numbers = #tpu.dot_dimension_numbers<[1], [0], [0], [1], [0, 0, 1, 1], [], []>} : vector<16x16xf32>, vector<16x128xf32>, vector<16x128xf32> -> vector<16x128xf32>
    %30 = vector.broadcast %25 : vector<16x1xf32> to vector<16x128xf32>
    %31 = arith.addf %29, %30 : vector<16x128xf32>
    %32 = arith.negf %31 : vector<16x128xf32>
    %33 = math.exp %32 : vector<16x128xf32>
    %cst_42 = arith.constant 1.000000e+00 : f32
    %34 = vector.broadcast %cst_42 : f32 to vector<16x128xf32>
    %35 = arith.addf %34, %33 : vector<16x128xf32>
    %36 = arith.divf %34, %35 : vector<16x128xf32>
    %37 = arith.mulf %28, %36 : vector<16x128xf32>
    %38 = vector.extract_strided_slice %7 {offsets = [0, 0, 0, 0], sizes = [1, 1, 16, 16], strides = [1, 1, 1, 1]} : vector<4x3x16x16xf32> to vector<1x1x16x16xf32>
    %39 = vector.shape_cast %38 : vector<1x1x16x16xf32> to vector<16x16xf32>
    %40 = vector.extract_strided_slice %8 {offsets = [0, 0, 0, 0], sizes = [1, 1, 16, 16], strides = [1, 1, 1, 1]} : vector<4x3x16x16xf32> to vector<1x1x16x16xf32>
    %41 = vector.shape_cast %40 : vector<1x1x16x16xf32> to vector<16x16xf32>
    %42 = vector.extract_strided_slice %9 {offsets = [0, 0, 0, 0], sizes = [1, 1, 16, 1], strides = [1, 1, 1, 1]} : vector<4x3x16x1xf32> to vector<1x1x16x1xf32>
    %43 = vector.shape_cast %42 : vector<1x1x16x1xf32> to vector<16x1xf32>
    %44 = vector.extract_strided_slice %10 {offsets = [0, 0, 0, 0], sizes = [1, 1, 16, 1], strides = [1, 1, 1, 1]} : vector<4x3x16x1xf32> to vector<1x1x16x1xf32>
    %45 = vector.shape_cast %44 : vector<1x1x16x1xf32> to vector<16x1xf32>
    %cst_43 = arith.constant dense<0.000000e+00> : vector<16x128xf32>
    %46 = tpu.matmul %39, %37, %cst_43 {dimension_numbers = #tpu.dot_dimension_numbers<[1], [0], [0], [1], [0, 0, 1, 1], [], []>} : vector<16x16xf32>, vector<16x128xf32>, vector<16x128xf32> -> vector<16x128xf32>
    %47 = vector.broadcast %43 : vector<16x1xf32> to vector<16x128xf32>
    %48 = arith.addf %46, %47 : vector<16x128xf32>
    %cst_44 = arith.constant dense<0.000000e+00> : vector<16x128xf32>
    %49 = tpu.matmul %41, %37, %cst_44 {dimension_numbers = #tpu.dot_dimension_numbers<[1], [0], [0], [1], [0, 0, 1, 1], [], []>} : vector<16x16xf32>, vector<16x128xf32>, vector<16x128xf32> -> vector<16x128xf32>
    %50 = vector.broadcast %45 : vector<16x1xf32> to vector<16x128xf32>
    %51 = arith.addf %49, %50 : vector<16x128xf32>
    %52 = arith.negf %51 : vector<16x128xf32>
    %53 = math.exp %52 : vector<16x128xf32>
    %cst_45 = arith.constant 1.000000e+00 : f32
    %54 = vector.broadcast %cst_45 : f32 to vector<16x128xf32>
    %55 = arith.addf %54, %53 : vector<16x128xf32>
    %56 = arith.divf %54, %55 : vector<16x128xf32>
    %57 = arith.mulf %48, %56 : vector<16x128xf32>
    %58 = arith.addf %37, %57 : vector<16x128xf32>
    %cst_46 = arith.constant 0.707106769 : f32
    %59 = vector.broadcast %cst_46 : f32 to vector<16x128xf32>
    %60 = arith.mulf %58, %59 : vector<16x128xf32>
    %61 = vector.extract_strided_slice %7 {offsets = [0, 1, 0, 0], sizes = [1, 1, 16, 16], strides = [1, 1, 1, 1]} : vector<4x3x16x16xf32> to vector<1x1x16x16xf32>
    %62 = vector.shape_cast %61 : vector<1x1x16x16xf32> to vector<16x16xf32>
    %63 = vector.extract_strided_slice %8 {offsets = [0, 1, 0, 0], sizes = [1, 1, 16, 16], strides = [1, 1, 1, 1]} : vector<4x3x16x16xf32> to vector<1x1x16x16xf32>
    %64 = vector.shape_cast %63 : vector<1x1x16x16xf32> to vector<16x16xf32>
    %65 = vector.extract_strided_slice %9 {offsets = [0, 1, 0, 0], sizes = [1, 1, 16, 1], strides = [1, 1, 1, 1]} : vector<4x3x16x1xf32> to vector<1x1x16x1xf32>
    %66 = vector.shape_cast %65 : vector<1x1x16x1xf32> to vector<16x1xf32>
    %67 = vector.extract_strided_slice %10 {offsets = [0, 1, 0, 0], sizes = [1, 1, 16, 1], strides = [1, 1, 1, 1]} : vector<4x3x16x1xf32> to vector<1x1x16x1xf32>
    %68 = vector.shape_cast %67 : vector<1x1x16x1xf32> to vector<16x1xf32>
    %cst_47 = arith.constant dense<0.000000e+00> : vector<16x128xf32>
    %69 = tpu.matmul %62, %60, %cst_47 {dimension_numbers = #tpu.dot_dimension_numbers<[1], [0], [0], [1], [0, 0, 1, 1], [], []>} : vector<16x16xf32>, vector<16x128xf32>, vector<16x128xf32> -> vector<16x128xf32>
    %70 = vector.broadcast %66 : vector<16x1xf32> to vector<16x128xf32>
    %71 = arith.addf %69, %70 : vector<16x128xf32>
    %cst_48 = arith.constant dense<0.000000e+00> : vector<16x128xf32>
    %72 = tpu.matmul %64, %60, %cst_48 {dimension_numbers = #tpu.dot_dimension_numbers<[1], [0], [0], [1], [0, 0, 1, 1], [], []>} : vector<16x16xf32>, vector<16x128xf32>, vector<16x128xf32> -> vector<16x128xf32>
    %73 = vector.broadcast %68 : vector<16x1xf32> to vector<16x128xf32>
    %74 = arith.addf %72, %73 : vector<16x128xf32>
    %75 = arith.negf %74 : vector<16x128xf32>
    %76 = math.exp %75 : vector<16x128xf32>
    %cst_49 = arith.constant 1.000000e+00 : f32
    %77 = vector.broadcast %cst_49 : f32 to vector<16x128xf32>
    %78 = arith.addf %77, %76 : vector<16x128xf32>
    %79 = arith.divf %77, %78 : vector<16x128xf32>
    %80 = arith.mulf %71, %79 : vector<16x128xf32>
    %81 = arith.addf %60, %80 : vector<16x128xf32>
    %cst_50 = arith.constant 0.707106769 : f32
    %82 = vector.broadcast %cst_50 : f32 to vector<16x128xf32>
    %83 = arith.mulf %81, %82 : vector<16x128xf32>
    %84 = vector.extract_strided_slice %7 {offsets = [0, 2, 0, 0], sizes = [1, 1, 16, 16], strides = [1, 1, 1, 1]} : vector<4x3x16x16xf32> to vector<1x1x16x16xf32>
    %85 = vector.shape_cast %84 : vector<1x1x16x16xf32> to vector<16x16xf32>
    %86 = vector.extract_strided_slice %8 {offsets = [0, 2, 0, 0], sizes = [1, 1, 16, 16], strides = [1, 1, 1, 1]} : vector<4x3x16x16xf32> to vector<1x1x16x16xf32>
    %87 = vector.shape_cast %86 : vector<1x1x16x16xf32> to vector<16x16xf32>
    %88 = vector.extract_strided_slice %9 {offsets = [0, 2, 0, 0], sizes = [1, 1, 16, 1], strides = [1, 1, 1, 1]} : vector<4x3x16x1xf32> to vector<1x1x16x1xf32>
    %89 = vector.shape_cast %88 : vector<1x1x16x1xf32> to vector<16x1xf32>
    %90 = vector.extract_strided_slice %10 {offsets = [0, 2, 0, 0], sizes = [1, 1, 16, 1], strides = [1, 1, 1, 1]} : vector<4x3x16x1xf32> to vector<1x1x16x1xf32>
    %91 = vector.shape_cast %90 : vector<1x1x16x1xf32> to vector<16x1xf32>
    %cst_51 = arith.constant dense<0.000000e+00> : vector<16x128xf32>
    %92 = tpu.matmul %85, %83, %cst_51 {dimension_numbers = #tpu.dot_dimension_numbers<[1], [0], [0], [1], [0, 0, 1, 1], [], []>} : vector<16x16xf32>, vector<16x128xf32>, vector<16x128xf32> -> vector<16x128xf32>
    %93 = vector.broadcast %89 : vector<16x1xf32> to vector<16x128xf32>
    %94 = arith.addf %92, %93 : vector<16x128xf32>
    %cst_52 = arith.constant dense<0.000000e+00> : vector<16x128xf32>
    %95 = tpu.matmul %87, %83, %cst_52 {dimension_numbers = #tpu.dot_dimension_numbers<[1], [0], [0], [1], [0, 0, 1, 1], [], []>} : vector<16x16xf32>, vector<16x128xf32>, vector<16x128xf32> -> vector<16x128xf32>
    %96 = vector.broadcast %91 : vector<16x1xf32> to vector<16x128xf32>
    %97 = arith.addf %95, %96 : vector<16x128xf32>
    %98 = arith.negf %97 : vector<16x128xf32>
    %99 = math.exp %98 : vector<16x128xf32>
    %cst_53 = arith.constant 1.000000e+00 : f32
    %100 = vector.broadcast %cst_53 : f32 to vector<16x128xf32>
    %101 = arith.addf %100, %99 : vector<16x128xf32>
    %102 = arith.divf %100, %101 : vector<16x128xf32>
    %103 = arith.mulf %94, %102 : vector<16x128xf32>
    %104 = arith.addf %83, %103 : vector<16x128xf32>
    %cst_54 = arith.constant 0.707106769 : f32
    %105 = vector.broadcast %cst_54 : f32 to vector<16x128xf32>
    %106 = arith.mulf %104, %105 : vector<16x128xf32>
    %107 = vector.extract_strided_slice %106 {offsets = [8, 0], sizes = [8, 128], strides = [1, 1]} : vector<16x128xf32> to vector<8x128xf32>
    %cst_55 = arith.constant 1.000000e+00 : f32
    %108 = vector.broadcast %cst_55 : f32 to vector<16x128xf32>
    %cst_56 = arith.constant 0.000000e+00 : f32
    %109 = vector.broadcast %cst_56 : f32 to vector<8x128xf32>
    %cst_57 = arith.constant 0.000000e+00 : f32
    %110 = vector.broadcast %cst_57 : f32 to vector<1x128xf32>
    %111 = vector.extract_strided_slice %11 {offsets = [0, 0, 0], sizes = [1, 16, 8], strides = [1, 1, 1]} : vector<3x16x8xf32> to vector<1x16x8xf32>
    %112 = vector.shape_cast %111 : vector<1x16x8xf32> to vector<16x8xf32>
    %cst_58 = arith.constant dense<0.000000e+00> : vector<16x128xf32>
    %113 = tpu.matmul %112, %107, %cst_58 {dimension_numbers = #tpu.dot_dimension_numbers<[1], [0], [0], [1], [0, 0, 1, 1], [], []>} : vector<16x8xf32>, vector<8x128xf32>, vector<16x128xf32> -> vector<16x128xf32>
    %114 = vector.extract_strided_slice %12 {offsets = [0, 0, 0], sizes = [1, 16, 1], strides = [1, 1, 1]} : vector<3x16x1xf32> to vector<1x16x1xf32>
    %115 = vector.shape_cast %114 : vector<1x16x1xf32> to vector<16x1xf32>
    %116 = vector.broadcast %115 : vector<16x1xf32> to vector<16x128xf32>
    %117 = arith.addf %113, %116 : vector<16x128xf32>
    %118 = arith.mulf %117, %108 : vector<16x128xf32>
    %119 = vector.shape_cast %118 : vector<16x128xf32> to vector<16x1x128xf32>
    %120 = vector.shape_cast %118 : vector<16x128xf32> to vector<1x16x128xf32>
    %121 = vector.broadcast %120 : vector<1x16x128xf32> to vector<16x16x128xf32>
    %122 = vector.broadcast %119 : vector<16x1x128xf32> to vector<16x16x128xf32>
    %123 = arith.cmpf oge, %121, %122 : vector<16x16x128xf32>
    %124 = arith.extui %123 : vector<16x16x128xi1> to vector<16x16x128xi32>
    %125 = arith.sitofp %124 : vector<16x16x128xi32> to vector<16x16x128xf32>
    %cst_59 = arith.constant dense<0.000000e+00> : vector<16x128xf32>
    %126 = vector.multi_reduction <add>, %125, %cst_59 [1] : vector<16x16x128xf32> to vector<16x128xf32>
    %127 = vector.broadcast %120 : vector<1x16x128xf32> to vector<16x16x128xf32>
    %128 = arith.mulf %125, %127 : vector<16x16x128xf32>
    %cst_60 = arith.constant dense<0.000000e+00> : vector<16x128xf32>
    %129 = vector.multi_reduction <add>, %128, %cst_60 [1] : vector<16x16x128xf32> to vector<16x128xf32>
    %130 = arith.mulf %126, %118 : vector<16x128xf32>
    %cst_61 = arith.constant 1.000000e+00 : f32
    %131 = vector.broadcast %cst_61 : f32 to vector<16x128xf32>
    %132 = arith.addf %131, %130 : vector<16x128xf32>
    %133 = arith.cmpf ogt, %132, %129 : vector<16x128xf32>
    %134 = arith.extui %133 : vector<16x128xi1> to vector<16x128xi32>
    %135 = arith.sitofp %134 : vector<16x128xi32> to vector<16x128xf32>
    %cst_62 = arith.constant dense<0.000000e+00> : vector<128xf32>
    %136 = vector.multi_reduction <add>, %135, %cst_62 [0] : vector<16x128xf32> to vector<128xf32>
    %137 = vector.shape_cast %136 : vector<128xf32> to vector<1x128xf32>
    %138 = arith.mulf %135, %118 : vector<16x128xf32>
    %cst_63 = arith.constant dense<0.000000e+00> : vector<128xf32>
    %139 = vector.multi_reduction <add>, %138, %cst_63 [0] : vector<16x128xf32> to vector<128xf32>
    %140 = vector.shape_cast %139 : vector<128xf32> to vector<1x128xf32>
    %cst_64 = arith.constant 1.000000e+00 : f32
    %141 = vector.broadcast %cst_64 : f32 to vector<1x128xf32>
    %142 = arith.subf %140, %141 : vector<1x128xf32>
    %143 = arith.divf %142, %137 : vector<1x128xf32>
    %144 = vector.broadcast %143 : vector<1x128xf32> to vector<16x128xf32>
    %145 = arith.subf %118, %144 : vector<16x128xf32>
    %cst_65 = arith.constant 0.000000e+00 : f32
    %146 = vector.broadcast %cst_65 : f32 to vector<16x128xf32>
    %147 = arith.maximumf %145, %146 : vector<16x128xf32>
    %cst_66 = arith.constant 1.000000e-15 : f32
    %148 = vector.broadcast %cst_66 : f32 to vector<16x128xf32>
    %149 = arith.addf %147, %148 : vector<16x128xf32>
    %150 = math.log %149 : vector<16x128xf32>
    %151 = arith.mulf %147, %150 : vector<16x128xf32>
    %cst_67 = arith.constant dense<0.000000e+00> : vector<128xf32>
    %152 = vector.multi_reduction <add>, %151, %cst_67 [0] : vector<16x128xf32> to vector<128xf32>
    %153 = vector.shape_cast %152 : vector<128xf32> to vector<1x128xf32>
    %154 = arith.addf %110, %153 : vector<1x128xf32>
    %cst_68 = arith.constant 1.300000e+00 : f32
    %155 = vector.broadcast %cst_68 : f32 to vector<16x128xf32>
    %156 = arith.subf %155, %147 : vector<16x128xf32>
    %157 = arith.mulf %156, %108 : vector<16x128xf32>
    %158 = arith.mulf %147, %17 : vector<16x128xf32>
    %159 = vector.extract_strided_slice %3 {offsets = [1, 0, 0], sizes = [1, 16, 16], strides = [1, 1, 1]} : vector<4x16x16xf32> to vector<1x16x16xf32>
    %160 = vector.shape_cast %159 : vector<1x16x16xf32> to vector<16x16xf32>
    %161 = vector.extract_strided_slice %4 {offsets = [1, 0, 0], sizes = [1, 16, 16], strides = [1, 1, 1]} : vector<4x16x16xf32> to vector<1x16x16xf32>
    %162 = vector.shape_cast %161 : vector<1x16x16xf32> to vector<16x16xf32>
    %163 = vector.extract_strided_slice %5 {offsets = [1, 0, 0], sizes = [1, 16, 1], strides = [1, 1, 1]} : vector<4x16x1xf32> to vector<1x16x1xf32>
    %164 = vector.shape_cast %163 : vector<1x16x1xf32> to vector<16x1xf32>
    %165 = vector.extract_strided_slice %6 {offsets = [1, 0, 0], sizes = [1, 16, 1], strides = [1, 1, 1]} : vector<4x16x1xf32> to vector<1x16x1xf32>
    %166 = vector.shape_cast %165 : vector<1x16x1xf32> to vector<16x1xf32>
    %cst_69 = arith.constant dense<0.000000e+00> : vector<16x128xf32>
    %167 = tpu.matmul %160, %158, %cst_69 {dimension_numbers = #tpu.dot_dimension_numbers<[1], [0], [0], [1], [0, 0, 1, 1], [], []>} : vector<16x16xf32>, vector<16x128xf32>, vector<16x128xf32> -> vector<16x128xf32>
    %168 = vector.broadcast %164 : vector<16x1xf32> to vector<16x128xf32>
    %169 = arith.addf %167, %168 : vector<16x128xf32>
    %cst_70 = arith.constant dense<0.000000e+00> : vector<16x128xf32>
    %170 = tpu.matmul %162, %158, %cst_70 {dimension_numbers = #tpu.dot_dimension_numbers<[1], [0], [0], [1], [0, 0, 1, 1], [], []>} : vector<16x16xf32>, vector<16x128xf32>, vector<16x128xf32> -> vector<16x128xf32>
    %171 = vector.broadcast %166 : vector<16x1xf32> to vector<16x128xf32>
    %172 = arith.addf %170, %171 : vector<16x128xf32>
    %173 = arith.negf %172 : vector<16x128xf32>
    %174 = math.exp %173 : vector<16x128xf32>
    %cst_71 = arith.constant 1.000000e+00 : f32
    %175 = vector.broadcast %cst_71 : f32 to vector<16x128xf32>
    %176 = arith.addf %175, %174 : vector<16x128xf32>
    %177 = arith.divf %175, %176 : vector<16x128xf32>
    %178 = arith.mulf %169, %177 : vector<16x128xf32>
    %179 = vector.extract_strided_slice %7 {offsets = [1, 0, 0, 0], sizes = [1, 1, 16, 16], strides = [1, 1, 1, 1]} : vector<4x3x16x16xf32> to vector<1x1x16x16xf32>
    %180 = vector.shape_cast %179 : vector<1x1x16x16xf32> to vector<16x16xf32>
    %181 = vector.extract_strided_slice %8 {offsets = [1, 0, 0, 0], sizes = [1, 1, 16, 16], strides = [1, 1, 1, 1]} : vector<4x3x16x16xf32> to vector<1x1x16x16xf32>
    %182 = vector.shape_cast %181 : vector<1x1x16x16xf32> to vector<16x16xf32>
    %183 = vector.extract_strided_slice %9 {offsets = [1, 0, 0, 0], sizes = [1, 1, 16, 1], strides = [1, 1, 1, 1]} : vector<4x3x16x1xf32> to vector<1x1x16x1xf32>
    %184 = vector.shape_cast %183 : vector<1x1x16x1xf32> to vector<16x1xf32>
    %185 = vector.extract_strided_slice %10 {offsets = [1, 0, 0, 0], sizes = [1, 1, 16, 1], strides = [1, 1, 1, 1]} : vector<4x3x16x1xf32> to vector<1x1x16x1xf32>
    %186 = vector.shape_cast %185 : vector<1x1x16x1xf32> to vector<16x1xf32>
    %cst_72 = arith.constant dense<0.000000e+00> : vector<16x128xf32>
    %187 = tpu.matmul %180, %178, %cst_72 {dimension_numbers = #tpu.dot_dimension_numbers<[1], [0], [0], [1], [0, 0, 1, 1], [], []>} : vector<16x16xf32>, vector<16x128xf32>, vector<16x128xf32> -> vector<16x128xf32>
    %188 = vector.broadcast %184 : vector<16x1xf32> to vector<16x128xf32>
    %189 = arith.addf %187, %188 : vector<16x128xf32>
    %cst_73 = arith.constant dense<0.000000e+00> : vector<16x128xf32>
    %190 = tpu.matmul %182, %178, %cst_73 {dimension_numbers = #tpu.dot_dimension_numbers<[1], [0], [0], [1], [0, 0, 1, 1], [], []>} : vector<16x16xf32>, vector<16x128xf32>, vector<16x128xf32> -> vector<16x128xf32>
    %191 = vector.broadcast %186 : vector<16x1xf32> to vector<16x128xf32>
    %192 = arith.addf %190, %191 : vector<16x128xf32>
    %193 = arith.negf %192 : vector<16x128xf32>
    %194 = math.exp %193 : vector<16x128xf32>
    %cst_74 = arith.constant 1.000000e+00 : f32
    %195 = vector.broadcast %cst_74 : f32 to vector<16x128xf32>
    %196 = arith.addf %195, %194 : vector<16x128xf32>
    %197 = arith.divf %195, %196 : vector<16x128xf32>
    %198 = arith.mulf %189, %197 : vector<16x128xf32>
    %199 = arith.addf %178, %198 : vector<16x128xf32>
    %cst_75 = arith.constant 0.707106769 : f32
    %200 = vector.broadcast %cst_75 : f32 to vector<16x128xf32>
    %201 = arith.mulf %199, %200 : vector<16x128xf32>
    %202 = vector.extract_strided_slice %7 {offsets = [1, 1, 0, 0], sizes = [1, 1, 16, 16], strides = [1, 1, 1, 1]} : vector<4x3x16x16xf32> to vector<1x1x16x16xf32>
    %203 = vector.shape_cast %202 : vector<1x1x16x16xf32> to vector<16x16xf32>
    %204 = vector.extract_strided_slice %8 {offsets = [1, 1, 0, 0], sizes = [1, 1, 16, 16], strides = [1, 1, 1, 1]} : vector<4x3x16x16xf32> to vector<1x1x16x16xf32>
    %205 = vector.shape_cast %204 : vector<1x1x16x16xf32> to vector<16x16xf32>
    %206 = vector.extract_strided_slice %9 {offsets = [1, 1, 0, 0], sizes = [1, 1, 16, 1], strides = [1, 1, 1, 1]} : vector<4x3x16x1xf32> to vector<1x1x16x1xf32>
    %207 = vector.shape_cast %206 : vector<1x1x16x1xf32> to vector<16x1xf32>
    %208 = vector.extract_strided_slice %10 {offsets = [1, 1, 0, 0], sizes = [1, 1, 16, 1], strides = [1, 1, 1, 1]} : vector<4x3x16x1xf32> to vector<1x1x16x1xf32>
    %209 = vector.shape_cast %208 : vector<1x1x16x1xf32> to vector<16x1xf32>
    %cst_76 = arith.constant dense<0.000000e+00> : vector<16x128xf32>
    %210 = tpu.matmul %203, %201, %cst_76 {dimension_numbers = #tpu.dot_dimension_numbers<[1], [0], [0], [1], [0, 0, 1, 1], [], []>} : vector<16x16xf32>, vector<16x128xf32>, vector<16x128xf32> -> vector<16x128xf32>
    %211 = vector.broadcast %207 : vector<16x1xf32> to vector<16x128xf32>
    %212 = arith.addf %210, %211 : vector<16x128xf32>
    %cst_77 = arith.constant dense<0.000000e+00> : vector<16x128xf32>
    %213 = tpu.matmul %205, %201, %cst_77 {dimension_numbers = #tpu.dot_dimension_numbers<[1], [0], [0], [1], [0, 0, 1, 1], [], []>} : vector<16x16xf32>, vector<16x128xf32>, vector<16x128xf32> -> vector<16x128xf32>
    %214 = vector.broadcast %209 : vector<16x1xf32> to vector<16x128xf32>
    %215 = arith.addf %213, %214 : vector<16x128xf32>
    %216 = arith.negf %215 : vector<16x128xf32>
    %217 = math.exp %216 : vector<16x128xf32>
    %cst_78 = arith.constant 1.000000e+00 : f32
    %218 = vector.broadcast %cst_78 : f32 to vector<16x128xf32>
    %219 = arith.addf %218, %217 : vector<16x128xf32>
    %220 = arith.divf %218, %219 : vector<16x128xf32>
    %221 = arith.mulf %212, %220 : vector<16x128xf32>
    %222 = arith.addf %201, %221 : vector<16x128xf32>
    %cst_79 = arith.constant 0.707106769 : f32
    %223 = vector.broadcast %cst_79 : f32 to vector<16x128xf32>
    %224 = arith.mulf %222, %223 : vector<16x128xf32>
    %225 = vector.extract_strided_slice %7 {offsets = [1, 2, 0, 0], sizes = [1, 1, 16, 16], strides = [1, 1, 1, 1]} : vector<4x3x16x16xf32> to vector<1x1x16x16xf32>
    %226 = vector.shape_cast %225 : vector<1x1x16x16xf32> to vector<16x16xf32>
    %227 = vector.extract_strided_slice %8 {offsets = [1, 2, 0, 0], sizes = [1, 1, 16, 16], strides = [1, 1, 1, 1]} : vector<4x3x16x16xf32> to vector<1x1x16x16xf32>
    %228 = vector.shape_cast %227 : vector<1x1x16x16xf32> to vector<16x16xf32>
    %229 = vector.extract_strided_slice %9 {offsets = [1, 2, 0, 0], sizes = [1, 1, 16, 1], strides = [1, 1, 1, 1]} : vector<4x3x16x1xf32> to vector<1x1x16x1xf32>
    %230 = vector.shape_cast %229 : vector<1x1x16x1xf32> to vector<16x1xf32>
    %231 = vector.extract_strided_slice %10 {offsets = [1, 2, 0, 0], sizes = [1, 1, 16, 1], strides = [1, 1, 1, 1]} : vector<4x3x16x1xf32> to vector<1x1x16x1xf32>
    %232 = vector.shape_cast %231 : vector<1x1x16x1xf32> to vector<16x1xf32>
    %cst_80 = arith.constant dense<0.000000e+00> : vector<16x128xf32>
    %233 = tpu.matmul %226, %224, %cst_80 {dimension_numbers = #tpu.dot_dimension_numbers<[1], [0], [0], [1], [0, 0, 1, 1], [], []>} : vector<16x16xf32>, vector<16x128xf32>, vector<16x128xf32> -> vector<16x128xf32>
    %234 = vector.broadcast %230 : vector<16x1xf32> to vector<16x128xf32>
    %235 = arith.addf %233, %234 : vector<16x128xf32>
    %cst_81 = arith.constant dense<0.000000e+00> : vector<16x128xf32>
    %236 = tpu.matmul %228, %224, %cst_81 {dimension_numbers = #tpu.dot_dimension_numbers<[1], [0], [0], [1], [0, 0, 1, 1], [], []>} : vector<16x16xf32>, vector<16x128xf32>, vector<16x128xf32> -> vector<16x128xf32>
    %237 = vector.broadcast %232 : vector<16x1xf32> to vector<16x128xf32>
    %238 = arith.addf %236, %237 : vector<16x128xf32>
    %239 = arith.negf %238 : vector<16x128xf32>
    %240 = math.exp %239 : vector<16x128xf32>
    %cst_82 = arith.constant 1.000000e+00 : f32
    %241 = vector.broadcast %cst_82 : f32 to vector<16x128xf32>
    %242 = arith.addf %241, %240 : vector<16x128xf32>
    %243 = arith.divf %241, %242 : vector<16x128xf32>
    %244 = arith.mulf %235, %243 : vector<16x128xf32>
    %245 = arith.addf %224, %244 : vector<16x128xf32>
    %cst_83 = arith.constant 0.707106769 : f32
    %246 = vector.broadcast %cst_83 : f32 to vector<16x128xf32>
    %247 = arith.mulf %245, %246 : vector<16x128xf32>
    %248 = vector.extract_strided_slice %247 {offsets = [0, 0], sizes = [8, 128], strides = [1, 1]} : vector<16x128xf32> to vector<8x128xf32>
    %cst_84 = arith.constant 0.000000e+00 : f32
    %249 = vector.broadcast %cst_84 : f32 to vector<8x128xf32>
    %250 = arith.maximumf %248, %249 : vector<8x128xf32>
    %251 = arith.addf %109, %250 : vector<8x128xf32>
    %252 = vector.extract_strided_slice %247 {offsets = [8, 0], sizes = [8, 128], strides = [1, 1]} : vector<16x128xf32> to vector<8x128xf32>
    %253 = vector.extract_strided_slice %11 {offsets = [1, 0, 0], sizes = [1, 16, 8], strides = [1, 1, 1]} : vector<3x16x8xf32> to vector<1x16x8xf32>
    %254 = vector.shape_cast %253 : vector<1x16x8xf32> to vector<16x8xf32>
    %cst_85 = arith.constant dense<0.000000e+00> : vector<16x128xf32>
    %255 = tpu.matmul %254, %252, %cst_85 {dimension_numbers = #tpu.dot_dimension_numbers<[1], [0], [0], [1], [0, 0, 1, 1], [], []>} : vector<16x8xf32>, vector<8x128xf32>, vector<16x128xf32> -> vector<16x128xf32>
    %256 = vector.extract_strided_slice %12 {offsets = [1, 0, 0], sizes = [1, 16, 1], strides = [1, 1, 1]} : vector<3x16x1xf32> to vector<1x16x1xf32>
    %257 = vector.shape_cast %256 : vector<1x16x1xf32> to vector<16x1xf32>
    %258 = vector.broadcast %257 : vector<16x1xf32> to vector<16x128xf32>
    %259 = arith.addf %255, %258 : vector<16x128xf32>
    %260 = arith.mulf %259, %157 : vector<16x128xf32>
    %261 = vector.shape_cast %260 : vector<16x128xf32> to vector<16x1x128xf32>
    %262 = vector.shape_cast %260 : vector<16x128xf32> to vector<1x16x128xf32>
    %263 = vector.broadcast %262 : vector<1x16x128xf32> to vector<16x16x128xf32>
    %264 = vector.broadcast %261 : vector<16x1x128xf32> to vector<16x16x128xf32>
    %265 = arith.cmpf oge, %263, %264 : vector<16x16x128xf32>
    %266 = arith.extui %265 : vector<16x16x128xi1> to vector<16x16x128xi32>
    %267 = arith.sitofp %266 : vector<16x16x128xi32> to vector<16x16x128xf32>
    %cst_86 = arith.constant dense<0.000000e+00> : vector<16x128xf32>
    %268 = vector.multi_reduction <add>, %267, %cst_86 [1] : vector<16x16x128xf32> to vector<16x128xf32>
    %269 = vector.broadcast %262 : vector<1x16x128xf32> to vector<16x16x128xf32>
    %270 = arith.mulf %267, %269 : vector<16x16x128xf32>
    %cst_87 = arith.constant dense<0.000000e+00> : vector<16x128xf32>
    %271 = vector.multi_reduction <add>, %270, %cst_87 [1] : vector<16x16x128xf32> to vector<16x128xf32>
    %272 = arith.mulf %268, %260 : vector<16x128xf32>
    %cst_88 = arith.constant 1.000000e+00 : f32
    %273 = vector.broadcast %cst_88 : f32 to vector<16x128xf32>
    %274 = arith.addf %273, %272 : vector<16x128xf32>
    %275 = arith.cmpf ogt, %274, %271 : vector<16x128xf32>
    %276 = arith.extui %275 : vector<16x128xi1> to vector<16x128xi32>
    %277 = arith.sitofp %276 : vector<16x128xi32> to vector<16x128xf32>
    %cst_89 = arith.constant dense<0.000000e+00> : vector<128xf32>
    %278 = vector.multi_reduction <add>, %277, %cst_89 [0] : vector<16x128xf32> to vector<128xf32>
    %279 = vector.shape_cast %278 : vector<128xf32> to vector<1x128xf32>
    %280 = arith.mulf %277, %260 : vector<16x128xf32>
    %cst_90 = arith.constant dense<0.000000e+00> : vector<128xf32>
    %281 = vector.multi_reduction <add>, %280, %cst_90 [0] : vector<16x128xf32> to vector<128xf32>
    %282 = vector.shape_cast %281 : vector<128xf32> to vector<1x128xf32>
    %cst_91 = arith.constant 1.000000e+00 : f32
    %283 = vector.broadcast %cst_91 : f32 to vector<1x128xf32>
    %284 = arith.subf %282, %283 : vector<1x128xf32>
    %285 = arith.divf %284, %279 : vector<1x128xf32>
    %286 = vector.broadcast %285 : vector<1x128xf32> to vector<16x128xf32>
    %287 = arith.subf %260, %286 : vector<16x128xf32>
    %cst_92 = arith.constant 0.000000e+00 : f32
    %288 = vector.broadcast %cst_92 : f32 to vector<16x128xf32>
    %289 = arith.maximumf %287, %288 : vector<16x128xf32>
    %cst_93 = arith.constant 1.000000e-15 : f32
    %290 = vector.broadcast %cst_93 : f32 to vector<16x128xf32>
    %291 = arith.addf %289, %290 : vector<16x128xf32>
    %292 = math.log %291 : vector<16x128xf32>
    %293 = arith.mulf %289, %292 : vector<16x128xf32>
    %cst_94 = arith.constant dense<0.000000e+00> : vector<128xf32>
    %294 = vector.multi_reduction <add>, %293, %cst_94 [0] : vector<16x128xf32> to vector<128xf32>
    %295 = vector.shape_cast %294 : vector<128xf32> to vector<1x128xf32>
    %296 = arith.addf %154, %295 : vector<1x128xf32>
    %cst_95 = arith.constant 1.300000e+00 : f32
    %297 = vector.broadcast %cst_95 : f32 to vector<16x128xf32>
    %298 = arith.subf %297, %289 : vector<16x128xf32>
    %299 = arith.mulf %298, %157 : vector<16x128xf32>
    %300 = arith.mulf %289, %17 : vector<16x128xf32>
    %301 = vector.extract_strided_slice %3 {offsets = [2, 0, 0], sizes = [1, 16, 16], strides = [1, 1, 1]} : vector<4x16x16xf32> to vector<1x16x16xf32>
    %302 = vector.shape_cast %301 : vector<1x16x16xf32> to vector<16x16xf32>
    %303 = vector.extract_strided_slice %4 {offsets = [2, 0, 0], sizes = [1, 16, 16], strides = [1, 1, 1]} : vector<4x16x16xf32> to vector<1x16x16xf32>
    %304 = vector.shape_cast %303 : vector<1x16x16xf32> to vector<16x16xf32>
    %305 = vector.extract_strided_slice %5 {offsets = [2, 0, 0], sizes = [1, 16, 1], strides = [1, 1, 1]} : vector<4x16x1xf32> to vector<1x16x1xf32>
    %306 = vector.shape_cast %305 : vector<1x16x1xf32> to vector<16x1xf32>
    %307 = vector.extract_strided_slice %6 {offsets = [2, 0, 0], sizes = [1, 16, 1], strides = [1, 1, 1]} : vector<4x16x1xf32> to vector<1x16x1xf32>
    %308 = vector.shape_cast %307 : vector<1x16x1xf32> to vector<16x1xf32>
    %cst_96 = arith.constant dense<0.000000e+00> : vector<16x128xf32>
    %309 = tpu.matmul %302, %300, %cst_96 {dimension_numbers = #tpu.dot_dimension_numbers<[1], [0], [0], [1], [0, 0, 1, 1], [], []>} : vector<16x16xf32>, vector<16x128xf32>, vector<16x128xf32> -> vector<16x128xf32>
    %310 = vector.broadcast %306 : vector<16x1xf32> to vector<16x128xf32>
    %311 = arith.addf %309, %310 : vector<16x128xf32>
    %cst_97 = arith.constant dense<0.000000e+00> : vector<16x128xf32>
    %312 = tpu.matmul %304, %300, %cst_97 {dimension_numbers = #tpu.dot_dimension_numbers<[1], [0], [0], [1], [0, 0, 1, 1], [], []>} : vector<16x16xf32>, vector<16x128xf32>, vector<16x128xf32> -> vector<16x128xf32>
    %313 = vector.broadcast %308 : vector<16x1xf32> to vector<16x128xf32>
    %314 = arith.addf %312, %313 : vector<16x128xf32>
    %315 = arith.negf %314 : vector<16x128xf32>
    %316 = math.exp %315 : vector<16x128xf32>
    %cst_98 = arith.constant 1.000000e+00 : f32
    %317 = vector.broadcast %cst_98 : f32 to vector<16x128xf32>
    %318 = arith.addf %317, %316 : vector<16x128xf32>
    %319 = arith.divf %317, %318 : vector<16x128xf32>
    %320 = arith.mulf %311, %319 : vector<16x128xf32>
    %321 = vector.extract_strided_slice %7 {offsets = [2, 0, 0, 0], sizes = [1, 1, 16, 16], strides = [1, 1, 1, 1]} : vector<4x3x16x16xf32> to vector<1x1x16x16xf32>
    %322 = vector.shape_cast %321 : vector<1x1x16x16xf32> to vector<16x16xf32>
    %323 = vector.extract_strided_slice %8 {offsets = [2, 0, 0, 0], sizes = [1, 1, 16, 16], strides = [1, 1, 1, 1]} : vector<4x3x16x16xf32> to vector<1x1x16x16xf32>
    %324 = vector.shape_cast %323 : vector<1x1x16x16xf32> to vector<16x16xf32>
    %325 = vector.extract_strided_slice %9 {offsets = [2, 0, 0, 0], sizes = [1, 1, 16, 1], strides = [1, 1, 1, 1]} : vector<4x3x16x1xf32> to vector<1x1x16x1xf32>
    %326 = vector.shape_cast %325 : vector<1x1x16x1xf32> to vector<16x1xf32>
    %327 = vector.extract_strided_slice %10 {offsets = [2, 0, 0, 0], sizes = [1, 1, 16, 1], strides = [1, 1, 1, 1]} : vector<4x3x16x1xf32> to vector<1x1x16x1xf32>
    %328 = vector.shape_cast %327 : vector<1x1x16x1xf32> to vector<16x1xf32>
    %cst_99 = arith.constant dense<0.000000e+00> : vector<16x128xf32>
    %329 = tpu.matmul %322, %320, %cst_99 {dimension_numbers = #tpu.dot_dimension_numbers<[1], [0], [0], [1], [0, 0, 1, 1], [], []>} : vector<16x16xf32>, vector<16x128xf32>, vector<16x128xf32> -> vector<16x128xf32>
    %330 = vector.broadcast %326 : vector<16x1xf32> to vector<16x128xf32>
    %331 = arith.addf %329, %330 : vector<16x128xf32>
    %cst_100 = arith.constant dense<0.000000e+00> : vector<16x128xf32>
    %332 = tpu.matmul %324, %320, %cst_100 {dimension_numbers = #tpu.dot_dimension_numbers<[1], [0], [0], [1], [0, 0, 1, 1], [], []>} : vector<16x16xf32>, vector<16x128xf32>, vector<16x128xf32> -> vector<16x128xf32>
    %333 = vector.broadcast %328 : vector<16x1xf32> to vector<16x128xf32>
    %334 = arith.addf %332, %333 : vector<16x128xf32>
    %335 = arith.negf %334 : vector<16x128xf32>
    %336 = math.exp %335 : vector<16x128xf32>
    %cst_101 = arith.constant 1.000000e+00 : f32
    %337 = vector.broadcast %cst_101 : f32 to vector<16x128xf32>
    %338 = arith.addf %337, %336 : vector<16x128xf32>
    %339 = arith.divf %337, %338 : vector<16x128xf32>
    %340 = arith.mulf %331, %339 : vector<16x128xf32>
    %341 = arith.addf %320, %340 : vector<16x128xf32>
    %cst_102 = arith.constant 0.707106769 : f32
    %342 = vector.broadcast %cst_102 : f32 to vector<16x128xf32>
    %343 = arith.mulf %341, %342 : vector<16x128xf32>
    %344 = vector.extract_strided_slice %7 {offsets = [2, 1, 0, 0], sizes = [1, 1, 16, 16], strides = [1, 1, 1, 1]} : vector<4x3x16x16xf32> to vector<1x1x16x16xf32>
    %345 = vector.shape_cast %344 : vector<1x1x16x16xf32> to vector<16x16xf32>
    %346 = vector.extract_strided_slice %8 {offsets = [2, 1, 0, 0], sizes = [1, 1, 16, 16], strides = [1, 1, 1, 1]} : vector<4x3x16x16xf32> to vector<1x1x16x16xf32>
    %347 = vector.shape_cast %346 : vector<1x1x16x16xf32> to vector<16x16xf32>
    %348 = vector.extract_strided_slice %9 {offsets = [2, 1, 0, 0], sizes = [1, 1, 16, 1], strides = [1, 1, 1, 1]} : vector<4x3x16x1xf32> to vector<1x1x16x1xf32>
    %349 = vector.shape_cast %348 : vector<1x1x16x1xf32> to vector<16x1xf32>
    %350 = vector.extract_strided_slice %10 {offsets = [2, 1, 0, 0], sizes = [1, 1, 16, 1], strides = [1, 1, 1, 1]} : vector<4x3x16x1xf32> to vector<1x1x16x1xf32>
    %351 = vector.shape_cast %350 : vector<1x1x16x1xf32> to vector<16x1xf32>
    %cst_103 = arith.constant dense<0.000000e+00> : vector<16x128xf32>
    %352 = tpu.matmul %345, %343, %cst_103 {dimension_numbers = #tpu.dot_dimension_numbers<[1], [0], [0], [1], [0, 0, 1, 1], [], []>} : vector<16x16xf32>, vector<16x128xf32>, vector<16x128xf32> -> vector<16x128xf32>
    %353 = vector.broadcast %349 : vector<16x1xf32> to vector<16x128xf32>
    %354 = arith.addf %352, %353 : vector<16x128xf32>
    %cst_104 = arith.constant dense<0.000000e+00> : vector<16x128xf32>
    %355 = tpu.matmul %347, %343, %cst_104 {dimension_numbers = #tpu.dot_dimension_numbers<[1], [0], [0], [1], [0, 0, 1, 1], [], []>} : vector<16x16xf32>, vector<16x128xf32>, vector<16x128xf32> -> vector<16x128xf32>
    %356 = vector.broadcast %351 : vector<16x1xf32> to vector<16x128xf32>
    %357 = arith.addf %355, %356 : vector<16x128xf32>
    %358 = arith.negf %357 : vector<16x128xf32>
    %359 = math.exp %358 : vector<16x128xf32>
    %cst_105 = arith.constant 1.000000e+00 : f32
    %360 = vector.broadcast %cst_105 : f32 to vector<16x128xf32>
    %361 = arith.addf %360, %359 : vector<16x128xf32>
    %362 = arith.divf %360, %361 : vector<16x128xf32>
    %363 = arith.mulf %354, %362 : vector<16x128xf32>
    %364 = arith.addf %343, %363 : vector<16x128xf32>
    %cst_106 = arith.constant 0.707106769 : f32
    %365 = vector.broadcast %cst_106 : f32 to vector<16x128xf32>
    %366 = arith.mulf %364, %365 : vector<16x128xf32>
    %367 = vector.extract_strided_slice %7 {offsets = [2, 2, 0, 0], sizes = [1, 1, 16, 16], strides = [1, 1, 1, 1]} : vector<4x3x16x16xf32> to vector<1x1x16x16xf32>
    %368 = vector.shape_cast %367 : vector<1x1x16x16xf32> to vector<16x16xf32>
    %369 = vector.extract_strided_slice %8 {offsets = [2, 2, 0, 0], sizes = [1, 1, 16, 16], strides = [1, 1, 1, 1]} : vector<4x3x16x16xf32> to vector<1x1x16x16xf32>
    %370 = vector.shape_cast %369 : vector<1x1x16x16xf32> to vector<16x16xf32>
    %371 = vector.extract_strided_slice %9 {offsets = [2, 2, 0, 0], sizes = [1, 1, 16, 1], strides = [1, 1, 1, 1]} : vector<4x3x16x1xf32> to vector<1x1x16x1xf32>
    %372 = vector.shape_cast %371 : vector<1x1x16x1xf32> to vector<16x1xf32>
    %373 = vector.extract_strided_slice %10 {offsets = [2, 2, 0, 0], sizes = [1, 1, 16, 1], strides = [1, 1, 1, 1]} : vector<4x3x16x1xf32> to vector<1x1x16x1xf32>
    %374 = vector.shape_cast %373 : vector<1x1x16x1xf32> to vector<16x1xf32>
    %cst_107 = arith.constant dense<0.000000e+00> : vector<16x128xf32>
    %375 = tpu.matmul %368, %366, %cst_107 {dimension_numbers = #tpu.dot_dimension_numbers<[1], [0], [0], [1], [0, 0, 1, 1], [], []>} : vector<16x16xf32>, vector<16x128xf32>, vector<16x128xf32> -> vector<16x128xf32>
    %376 = vector.broadcast %372 : vector<16x1xf32> to vector<16x128xf32>
    %377 = arith.addf %375, %376 : vector<16x128xf32>
    %cst_108 = arith.constant dense<0.000000e+00> : vector<16x128xf32>
    %378 = tpu.matmul %370, %366, %cst_108 {dimension_numbers = #tpu.dot_dimension_numbers<[1], [0], [0], [1], [0, 0, 1, 1], [], []>} : vector<16x16xf32>, vector<16x128xf32>, vector<16x128xf32> -> vector<16x128xf32>
    %379 = vector.broadcast %374 : vector<16x1xf32> to vector<16x128xf32>
    %380 = arith.addf %378, %379 : vector<16x128xf32>
    %381 = arith.negf %380 : vector<16x128xf32>
    %382 = math.exp %381 : vector<16x128xf32>
    %cst_109 = arith.constant 1.000000e+00 : f32
    %383 = vector.broadcast %cst_109 : f32 to vector<16x128xf32>
    %384 = arith.addf %383, %382 : vector<16x128xf32>
    %385 = arith.divf %383, %384 : vector<16x128xf32>
    %386 = arith.mulf %377, %385 : vector<16x128xf32>
    %387 = arith.addf %366, %386 : vector<16x128xf32>
    %cst_110 = arith.constant 0.707106769 : f32
    %388 = vector.broadcast %cst_110 : f32 to vector<16x128xf32>
    %389 = arith.mulf %387, %388 : vector<16x128xf32>
    %390 = vector.extract_strided_slice %389 {offsets = [0, 0], sizes = [8, 128], strides = [1, 1]} : vector<16x128xf32> to vector<8x128xf32>
    %cst_111 = arith.constant 0.000000e+00 : f32
    %391 = vector.broadcast %cst_111 : f32 to vector<8x128xf32>
    %392 = arith.maximumf %390, %391 : vector<8x128xf32>
    %393 = arith.addf %251, %392 : vector<8x128xf32>
    %394 = vector.extract_strided_slice %389 {offsets = [8, 0], sizes = [8, 128], strides = [1, 1]} : vector<16x128xf32> to vector<8x128xf32>
    %395 = vector.extract_strided_slice %11 {offsets = [2, 0, 0], sizes = [1, 16, 8], strides = [1, 1, 1]} : vector<3x16x8xf32> to vector<1x16x8xf32>
    %396 = vector.shape_cast %395 : vector<1x16x8xf32> to vector<16x8xf32>
    %cst_112 = arith.constant dense<0.000000e+00> : vector<16x128xf32>
    %397 = tpu.matmul %396, %394, %cst_112 {dimension_numbers = #tpu.dot_dimension_numbers<[1], [0], [0], [1], [0, 0, 1, 1], [], []>} : vector<16x8xf32>, vector<8x128xf32>, vector<16x128xf32> -> vector<16x128xf32>
    %398 = vector.extract_strided_slice %12 {offsets = [2, 0, 0], sizes = [1, 16, 1], strides = [1, 1, 1]} : vector<3x16x1xf32> to vector<1x16x1xf32>
    %399 = vector.shape_cast %398 : vector<1x16x1xf32> to vector<16x1xf32>
    %400 = vector.broadcast %399 : vector<16x1xf32> to vector<16x128xf32>
    %401 = arith.addf %397, %400 : vector<16x128xf32>
    %402 = arith.mulf %401, %299 : vector<16x128xf32>
    %403 = vector.shape_cast %402 : vector<16x128xf32> to vector<16x1x128xf32>
    %404 = vector.shape_cast %402 : vector<16x128xf32> to vector<1x16x128xf32>
    %405 = vector.broadcast %404 : vector<1x16x128xf32> to vector<16x16x128xf32>
    %406 = vector.broadcast %403 : vector<16x1x128xf32> to vector<16x16x128xf32>
    %407 = arith.cmpf oge, %405, %406 : vector<16x16x128xf32>
    %408 = arith.extui %407 : vector<16x16x128xi1> to vector<16x16x128xi32>
    %409 = arith.sitofp %408 : vector<16x16x128xi32> to vector<16x16x128xf32>
    %cst_113 = arith.constant dense<0.000000e+00> : vector<16x128xf32>
    %410 = vector.multi_reduction <add>, %409, %cst_113 [1] : vector<16x16x128xf32> to vector<16x128xf32>
    %411 = vector.broadcast %404 : vector<1x16x128xf32> to vector<16x16x128xf32>
    %412 = arith.mulf %409, %411 : vector<16x16x128xf32>
    %cst_114 = arith.constant dense<0.000000e+00> : vector<16x128xf32>
    %413 = vector.multi_reduction <add>, %412, %cst_114 [1] : vector<16x16x128xf32> to vector<16x128xf32>
    %414 = arith.mulf %410, %402 : vector<16x128xf32>
    %cst_115 = arith.constant 1.000000e+00 : f32
    %415 = vector.broadcast %cst_115 : f32 to vector<16x128xf32>
    %416 = arith.addf %415, %414 : vector<16x128xf32>
    %417 = arith.cmpf ogt, %416, %413 : vector<16x128xf32>
    %418 = arith.extui %417 : vector<16x128xi1> to vector<16x128xi32>
    %419 = arith.sitofp %418 : vector<16x128xi32> to vector<16x128xf32>
    %cst_116 = arith.constant dense<0.000000e+00> : vector<128xf32>
    %420 = vector.multi_reduction <add>, %419, %cst_116 [0] : vector<16x128xf32> to vector<128xf32>
    %421 = vector.shape_cast %420 : vector<128xf32> to vector<1x128xf32>
    %422 = arith.mulf %419, %402 : vector<16x128xf32>
    %cst_117 = arith.constant dense<0.000000e+00> : vector<128xf32>
    %423 = vector.multi_reduction <add>, %422, %cst_117 [0] : vector<16x128xf32> to vector<128xf32>
    %424 = vector.shape_cast %423 : vector<128xf32> to vector<1x128xf32>
    %cst_118 = arith.constant 1.000000e+00 : f32
    %425 = vector.broadcast %cst_118 : f32 to vector<1x128xf32>
    %426 = arith.subf %424, %425 : vector<1x128xf32>
    %427 = arith.divf %426, %421 : vector<1x128xf32>
    %428 = vector.broadcast %427 : vector<1x128xf32> to vector<16x128xf32>
    %429 = arith.subf %402, %428 : vector<16x128xf32>
    %cst_119 = arith.constant 0.000000e+00 : f32
    %430 = vector.broadcast %cst_119 : f32 to vector<16x128xf32>
    %431 = arith.maximumf %429, %430 : vector<16x128xf32>
    %cst_120 = arith.constant 1.000000e-15 : f32
    %432 = vector.broadcast %cst_120 : f32 to vector<16x128xf32>
    %433 = arith.addf %431, %432 : vector<16x128xf32>
    %434 = math.log %433 : vector<16x128xf32>
    %435 = arith.mulf %431, %434 : vector<16x128xf32>
    %cst_121 = arith.constant dense<0.000000e+00> : vector<128xf32>
    %436 = vector.multi_reduction <add>, %435, %cst_121 [0] : vector<16x128xf32> to vector<128xf32>
    %437 = vector.shape_cast %436 : vector<128xf32> to vector<1x128xf32>
    %438 = arith.addf %296, %437 : vector<1x128xf32>
    %439 = arith.mulf %431, %17 : vector<16x128xf32>
    %440 = vector.extract_strided_slice %3 {offsets = [3, 0, 0], sizes = [1, 16, 16], strides = [1, 1, 1]} : vector<4x16x16xf32> to vector<1x16x16xf32>
    %441 = vector.shape_cast %440 : vector<1x16x16xf32> to vector<16x16xf32>
    %442 = vector.extract_strided_slice %4 {offsets = [3, 0, 0], sizes = [1, 16, 16], strides = [1, 1, 1]} : vector<4x16x16xf32> to vector<1x16x16xf32>
    %443 = vector.shape_cast %442 : vector<1x16x16xf32> to vector<16x16xf32>
    %444 = vector.extract_strided_slice %5 {offsets = [3, 0, 0], sizes = [1, 16, 1], strides = [1, 1, 1]} : vector<4x16x1xf32> to vector<1x16x1xf32>
    %445 = vector.shape_cast %444 : vector<1x16x1xf32> to vector<16x1xf32>
    %446 = vector.extract_strided_slice %6 {offsets = [3, 0, 0], sizes = [1, 16, 1], strides = [1, 1, 1]} : vector<4x16x1xf32> to vector<1x16x1xf32>
    %447 = vector.shape_cast %446 : vector<1x16x1xf32> to vector<16x1xf32>
    %cst_122 = arith.constant dense<0.000000e+00> : vector<16x128xf32>
    %448 = tpu.matmul %441, %439, %cst_122 {dimension_numbers = #tpu.dot_dimension_numbers<[1], [0], [0], [1], [0, 0, 1, 1], [], []>} : vector<16x16xf32>, vector<16x128xf32>, vector<16x128xf32> -> vector<16x128xf32>
    %449 = vector.broadcast %445 : vector<16x1xf32> to vector<16x128xf32>
    %450 = arith.addf %448, %449 : vector<16x128xf32>
    %cst_123 = arith.constant dense<0.000000e+00> : vector<16x128xf32>
    %451 = tpu.matmul %443, %439, %cst_123 {dimension_numbers = #tpu.dot_dimension_numbers<[1], [0], [0], [1], [0, 0, 1, 1], [], []>} : vector<16x16xf32>, vector<16x128xf32>, vector<16x128xf32> -> vector<16x128xf32>
    %452 = vector.broadcast %447 : vector<16x1xf32> to vector<16x128xf32>
    %453 = arith.addf %451, %452 : vector<16x128xf32>
    %454 = arith.negf %453 : vector<16x128xf32>
    %455 = math.exp %454 : vector<16x128xf32>
    %cst_124 = arith.constant 1.000000e+00 : f32
    %456 = vector.broadcast %cst_124 : f32 to vector<16x128xf32>
    %457 = arith.addf %456, %455 : vector<16x128xf32>
    %458 = arith.divf %456, %457 : vector<16x128xf32>
    %459 = arith.mulf %450, %458 : vector<16x128xf32>
    %460 = vector.extract_strided_slice %7 {offsets = [3, 0, 0, 0], sizes = [1, 1, 16, 16], strides = [1, 1, 1, 1]} : vector<4x3x16x16xf32> to vector<1x1x16x16xf32>
    %461 = vector.shape_cast %460 : vector<1x1x16x16xf32> to vector<16x16xf32>
    %462 = vector.extract_strided_slice %8 {offsets = [3, 0, 0, 0], sizes = [1, 1, 16, 16], strides = [1, 1, 1, 1]} : vector<4x3x16x16xf32> to vector<1x1x16x16xf32>
    %463 = vector.shape_cast %462 : vector<1x1x16x16xf32> to vector<16x16xf32>
    %464 = vector.extract_strided_slice %9 {offsets = [3, 0, 0, 0], sizes = [1, 1, 16, 1], strides = [1, 1, 1, 1]} : vector<4x3x16x1xf32> to vector<1x1x16x1xf32>
    %465 = vector.shape_cast %464 : vector<1x1x16x1xf32> to vector<16x1xf32>
    %466 = vector.extract_strided_slice %10 {offsets = [3, 0, 0, 0], sizes = [1, 1, 16, 1], strides = [1, 1, 1, 1]} : vector<4x3x16x1xf32> to vector<1x1x16x1xf32>
    %467 = vector.shape_cast %466 : vector<1x1x16x1xf32> to vector<16x1xf32>
    %cst_125 = arith.constant dense<0.000000e+00> : vector<16x128xf32>
    %468 = tpu.matmul %461, %459, %cst_125 {dimension_numbers = #tpu.dot_dimension_numbers<[1], [0], [0], [1], [0, 0, 1, 1], [], []>} : vector<16x16xf32>, vector<16x128xf32>, vector<16x128xf32> -> vector<16x128xf32>
    %469 = vector.broadcast %465 : vector<16x1xf32> to vector<16x128xf32>
    %470 = arith.addf %468, %469 : vector<16x128xf32>
    %cst_126 = arith.constant dense<0.000000e+00> : vector<16x128xf32>
    %471 = tpu.matmul %463, %459, %cst_126 {dimension_numbers = #tpu.dot_dimension_numbers<[1], [0], [0], [1], [0, 0, 1, 1], [], []>} : vector<16x16xf32>, vector<16x128xf32>, vector<16x128xf32> -> vector<16x128xf32>
    %472 = vector.broadcast %467 : vector<16x1xf32> to vector<16x128xf32>
    %473 = arith.addf %471, %472 : vector<16x128xf32>
    %474 = arith.negf %473 : vector<16x128xf32>
    %475 = math.exp %474 : vector<16x128xf32>
    %cst_127 = arith.constant 1.000000e+00 : f32
    %476 = vector.broadcast %cst_127 : f32 to vector<16x128xf32>
    %477 = arith.addf %476, %475 : vector<16x128xf32>
    %478 = arith.divf %476, %477 : vector<16x128xf32>
    %479 = arith.mulf %470, %478 : vector<16x128xf32>
    %480 = arith.addf %459, %479 : vector<16x128xf32>
    %cst_128 = arith.constant 0.707106769 : f32
    %481 = vector.broadcast %cst_128 : f32 to vector<16x128xf32>
    %482 = arith.mulf %480, %481 : vector<16x128xf32>
    %483 = vector.extract_strided_slice %7 {offsets = [3, 1, 0, 0], sizes = [1, 1, 16, 16], strides = [1, 1, 1, 1]} : vector<4x3x16x16xf32> to vector<1x1x16x16xf32>
    %484 = vector.shape_cast %483 : vector<1x1x16x16xf32> to vector<16x16xf32>
    %485 = vector.extract_strided_slice %8 {offsets = [3, 1, 0, 0], sizes = [1, 1, 16, 16], strides = [1, 1, 1, 1]} : vector<4x3x16x16xf32> to vector<1x1x16x16xf32>
    %486 = vector.shape_cast %485 : vector<1x1x16x16xf32> to vector<16x16xf32>
    %487 = vector.extract_strided_slice %9 {offsets = [3, 1, 0, 0], sizes = [1, 1, 16, 1], strides = [1, 1, 1, 1]} : vector<4x3x16x1xf32> to vector<1x1x16x1xf32>
    %488 = vector.shape_cast %487 : vector<1x1x16x1xf32> to vector<16x1xf32>
    %489 = vector.extract_strided_slice %10 {offsets = [3, 1, 0, 0], sizes = [1, 1, 16, 1], strides = [1, 1, 1, 1]} : vector<4x3x16x1xf32> to vector<1x1x16x1xf32>
    %490 = vector.shape_cast %489 : vector<1x1x16x1xf32> to vector<16x1xf32>
    %cst_129 = arith.constant dense<0.000000e+00> : vector<16x128xf32>
    %491 = tpu.matmul %484, %482, %cst_129 {dimension_numbers = #tpu.dot_dimension_numbers<[1], [0], [0], [1], [0, 0, 1, 1], [], []>} : vector<16x16xf32>, vector<16x128xf32>, vector<16x128xf32> -> vector<16x128xf32>
    %492 = vector.broadcast %488 : vector<16x1xf32> to vector<16x128xf32>
    %493 = arith.addf %491, %492 : vector<16x128xf32>
    %cst_130 = arith.constant dense<0.000000e+00> : vector<16x128xf32>
    %494 = tpu.matmul %486, %482, %cst_130 {dimension_numbers = #tpu.dot_dimension_numbers<[1], [0], [0], [1], [0, 0, 1, 1], [], []>} : vector<16x16xf32>, vector<16x128xf32>, vector<16x128xf32> -> vector<16x128xf32>
    %495 = vector.broadcast %490 : vector<16x1xf32> to vector<16x128xf32>
    %496 = arith.addf %494, %495 : vector<16x128xf32>
    %497 = arith.negf %496 : vector<16x128xf32>
    %498 = math.exp %497 : vector<16x128xf32>
    %cst_131 = arith.constant 1.000000e+00 : f32
    %499 = vector.broadcast %cst_131 : f32 to vector<16x128xf32>
    %500 = arith.addf %499, %498 : vector<16x128xf32>
    %501 = arith.divf %499, %500 : vector<16x128xf32>
    %502 = arith.mulf %493, %501 : vector<16x128xf32>
    %503 = arith.addf %482, %502 : vector<16x128xf32>
    %cst_132 = arith.constant 0.707106769 : f32
    %504 = vector.broadcast %cst_132 : f32 to vector<16x128xf32>
    %505 = arith.mulf %503, %504 : vector<16x128xf32>
    %506 = vector.extract_strided_slice %7 {offsets = [3, 2, 0, 0], sizes = [1, 1, 16, 16], strides = [1, 1, 1, 1]} : vector<4x3x16x16xf32> to vector<1x1x16x16xf32>
    %507 = vector.shape_cast %506 : vector<1x1x16x16xf32> to vector<16x16xf32>
    %508 = vector.extract_strided_slice %8 {offsets = [3, 2, 0, 0], sizes = [1, 1, 16, 16], strides = [1, 1, 1, 1]} : vector<4x3x16x16xf32> to vector<1x1x16x16xf32>
    %509 = vector.shape_cast %508 : vector<1x1x16x16xf32> to vector<16x16xf32>
    %510 = vector.extract_strided_slice %9 {offsets = [3, 2, 0, 0], sizes = [1, 1, 16, 1], strides = [1, 1, 1, 1]} : vector<4x3x16x1xf32> to vector<1x1x16x1xf32>
    %511 = vector.shape_cast %510 : vector<1x1x16x1xf32> to vector<16x1xf32>
    %512 = vector.extract_strided_slice %10 {offsets = [3, 2, 0, 0], sizes = [1, 1, 16, 1], strides = [1, 1, 1, 1]} : vector<4x3x16x1xf32> to vector<1x1x16x1xf32>
    %513 = vector.shape_cast %512 : vector<1x1x16x1xf32> to vector<16x1xf32>
    %cst_133 = arith.constant dense<0.000000e+00> : vector<16x128xf32>
    %514 = tpu.matmul %507, %505, %cst_133 {dimension_numbers = #tpu.dot_dimension_numbers<[1], [0], [0], [1], [0, 0, 1, 1], [], []>} : vector<16x16xf32>, vector<16x128xf32>, vector<16x128xf32> -> vector<16x128xf32>
    %515 = vector.broadcast %511 : vector<16x1xf32> to vector<16x128xf32>
    %516 = arith.addf %514, %515 : vector<16x128xf32>
    %cst_134 = arith.constant dense<0.000000e+00> : vector<16x128xf32>
    %517 = tpu.matmul %509, %505, %cst_134 {dimension_numbers = #tpu.dot_dimension_numbers<[1], [0], [0], [1], [0, 0, 1, 1], [], []>} : vector<16x16xf32>, vector<16x128xf32>, vector<16x128xf32> -> vector<16x128xf32>
    %518 = vector.broadcast %513 : vector<16x1xf32> to vector<16x128xf32>
    %519 = arith.addf %517, %518 : vector<16x128xf32>
    %520 = arith.negf %519 : vector<16x128xf32>
    %521 = math.exp %520 : vector<16x128xf32>
    %cst_135 = arith.constant 1.000000e+00 : f32
    %522 = vector.broadcast %cst_135 : f32 to vector<16x128xf32>
    %523 = arith.addf %522, %521 : vector<16x128xf32>
    %524 = arith.divf %522, %523 : vector<16x128xf32>
    %525 = arith.mulf %516, %524 : vector<16x128xf32>
    %526 = arith.addf %505, %525 : vector<16x128xf32>
    %cst_136 = arith.constant 0.707106769 : f32
    %527 = vector.broadcast %cst_136 : f32 to vector<16x128xf32>
    %528 = arith.mulf %526, %527 : vector<16x128xf32>
    %529 = vector.extract_strided_slice %528 {offsets = [0, 0], sizes = [8, 128], strides = [1, 1]} : vector<16x128xf32> to vector<8x128xf32>
    %cst_137 = arith.constant 0.000000e+00 : f32
    %530 = vector.broadcast %cst_137 : f32 to vector<8x128xf32>
    %531 = arith.maximumf %529, %530 : vector<8x128xf32>
    %532 = arith.addf %393, %531 : vector<8x128xf32>
    %cst_138 = arith.constant dense<0.000000e+00> : vector<4x128xf32>
    %533 = tpu.matmul %13, %532, %cst_138 {dimension_numbers = #tpu.dot_dimension_numbers<[1], [0], [0], [1], [0, 0, 1, 1], [], []>} : vector<4x8xf32>, vector<8x128xf32>, vector<4x128xf32> -> vector<4x128xf32>
    %c0_139 = arith.constant 0 : index
    %c0_140 = arith.constant 0 : index
    %534 = vector.load %arg15[%c0_139, %c0_140] : memref<4x128xf32, #tpu.memory_space<vmem>>, vector<4x128xf32>
    tpu.vector_store %arg15[%c0_139, %c0_140], %533 {strides = array<i32>} : memref<4x128xf32, #tpu.memory_space<vmem>>, vector<4x128xf32>,
    %c0_141 = arith.constant 0 : index
    %c0_142 = arith.constant 0 : index
    %535 = vector.load %arg16[%c0_141, %c0_142] : memref<1x128xf32, #tpu.memory_space<vmem>>, vector<1x128xf32>
    tpu.vector_store %arg16[%c0_141, %c0_142], %438 {strides = array<i32>} : memref<1x128xf32, #tpu.memory_space<vmem>>, vector<1x128xf32>,
    return
  }
  func.func @transform_0(%arg0: i32) -> (i32, i32) {
    %c0_i32 = arith.constant 0 : i32
    %c0_i32_0 = arith.constant 0 : i32
    return %c0_i32, %arg0 : i32, i32
  }
  func.func @transform_1(%arg0: i32) -> (i32, i32) {
    %c0_i32 = arith.constant 0 : i32
    %c0_i32_0 = arith.constant 0 : i32
    %c0_i32_1 = arith.constant 0 : i32
    return %c0_i32, %c0_i32_0 : i32, i32
  }
  func.func @transform_2(%arg0: i32) -> (i32, i32) {
    %c0_i32 = arith.constant 0 : i32
    %c0_i32_0 = arith.constant 0 : i32
    %c0_i32_1 = arith.constant 0 : i32
    return %c0_i32, %c0_i32_0 : i32, i32
  }
  func.func @transform_3(%arg0: i32) -> (i32, i32, i32) {
    %c0_i32 = arith.constant 0 : i32
    %c0_i32_0 = arith.constant 0 : i32
    %c0_i32_1 = arith.constant 0 : i32
    %c0_i32_2 = arith.constant 0 : i32
    return %c0_i32, %c0_i32_0, %c0_i32_1 : i32, i32, i32
  }
  func.func @transform_4(%arg0: i32) -> (i32, i32, i32) {
    %c0_i32 = arith.constant 0 : i32
    %c0_i32_0 = arith.constant 0 : i32
    %c0_i32_1 = arith.constant 0 : i32
    %c0_i32_2 = arith.constant 0 : i32
    return %c0_i32, %c0_i32_0, %c0_i32_1 : i32, i32, i32
  }
  func.func @transform_5(%arg0: i32) -> (i32, i32, i32) {
    %c0_i32 = arith.constant 0 : i32
    %c0_i32_0 = arith.constant 0 : i32
    %c0_i32_1 = arith.constant 0 : i32
    %c0_i32_2 = arith.constant 0 : i32
    return %c0_i32, %c0_i32_0, %c0_i32_1 : i32, i32, i32
  }
  func.func @transform_6(%arg0: i32) -> (i32, i32, i32) {
    %c0_i32 = arith.constant 0 : i32
    %c0_i32_0 = arith.constant 0 : i32
    %c0_i32_1 = arith.constant 0 : i32
    %c0_i32_2 = arith.constant 0 : i32
    return %c0_i32, %c0_i32_0, %c0_i32_1 : i32, i32, i32
  }
  func.func @transform_7(%arg0: i32) -> (i32, i32, i32, i32) {
    %c0_i32 = arith.constant 0 : i32
    %c0_i32_0 = arith.constant 0 : i32
    %c0_i32_1 = arith.constant 0 : i32
    %c0_i32_2 = arith.constant 0 : i32
    %c0_i32_3 = arith.constant 0 : i32
    return %c0_i32, %c0_i32_0, %c0_i32_1, %c0_i32_2 : i32, i32, i32, i32
  }
  func.func @transform_8(%arg0: i32) -> (i32, i32, i32, i32) {
    %c0_i32 = arith.constant 0 : i32
    %c0_i32_0 = arith.constant 0 : i32
    %c0_i32_1 = arith.constant 0 : i32
    %c0_i32_2 = arith.constant 0 : i32
    %c0_i32_3 = arith.constant 0 : i32
    return %c0_i32, %c0_i32_0, %c0_i32_1, %c0_i32_2 : i32, i32, i32, i32
  }
  func.func @transform_9(%arg0: i32) -> (i32, i32, i32, i32) {
    %c0_i32 = arith.constant 0 : i32
    %c0_i32_0 = arith.constant 0 : i32
    %c0_i32_1 = arith.constant 0 : i32
    %c0_i32_2 = arith.constant 0 : i32
    %c0_i32_3 = arith.constant 0 : i32
    return %c0_i32, %c0_i32_0, %c0_i32_1, %c0_i32_2 : i32, i32, i32, i32
  }
  func.func @transform_10(%arg0: i32) -> (i32, i32, i32, i32) {
    %c0_i32 = arith.constant 0 : i32
    %c0_i32_0 = arith.constant 0 : i32
    %c0_i32_1 = arith.constant 0 : i32
    %c0_i32_2 = arith.constant 0 : i32
    %c0_i32_3 = arith.constant 0 : i32
    return %c0_i32, %c0_i32_0, %c0_i32_1, %c0_i32_2 : i32, i32, i32, i32
  }
  func.func @transform_11(%arg0: i32) -> (i32, i32, i32) {
    %c0_i32 = arith.constant 0 : i32
    %c0_i32_0 = arith.constant 0 : i32
    %c0_i32_1 = arith.constant 0 : i32
    %c0_i32_2 = arith.constant 0 : i32
    return %c0_i32, %c0_i32_0, %c0_i32_1 : i32, i32, i32
  }
  func.func @transform_12(%arg0: i32) -> (i32, i32, i32) {
    %c0_i32 = arith.constant 0 : i32
    %c0_i32_0 = arith.constant 0 : i32
    %c0_i32_1 = arith.constant 0 : i32
    %c0_i32_2 = arith.constant 0 : i32
    return %c0_i32, %c0_i32_0, %c0_i32_1 : i32, i32, i32
  }
  func.func @transform_13(%arg0: i32) -> (i32, i32) {
    %c0_i32 = arith.constant 0 : i32
    %c0_i32_0 = arith.constant 0 : i32
    %c0_i32_1 = arith.constant 0 : i32
    return %c0_i32, %c0_i32_0 : i32, i32
  }
  func.func @transform_14(%arg0: i32) -> (i32, i32) {
    %c0_i32 = arith.constant 0 : i32
    %c0_i32_0 = arith.constant 0 : i32
    return %c0_i32, %arg0 : i32, i32
  }
  func.func @transform_15(%arg0: i32) -> (i32, i32) {
    %c0_i32 = arith.constant 0 : i32
    %c0_i32_0 = arith.constant 0 : i32
    return %c0_i32, %arg0 : i32, i32
  }
}

</mosaic_0001>

<bundles_post_ra>
// kernel: tpu_custom_call.1
= control target key start
LH: loop header
LB: loop body
LE: loop exit
PB: predicated region body
PF: predicated region fallthrough
CT: control target
= control target key end

     0   :  { %s8462_s0 = inlined_call_operand.vmem [shape: f32[16,256], index: 0, kind: input, shape index: {}]   ;;  %s8463_s1 = inlined_call_operand.vmem [shape: f32[16,1], index: 1, kind: input, shape index: {}]   ;;  %s8464_s2 = inlined_call_operand.vmem [shape: f32[16,1], index: 2, kind: input, shape index: {}]   ;;  %s8465_s3 = inlined_call_operand.vmem [shape: f32[4,16,16], index: 3, kind: input, shape index: {}]   ;;  %s8466_s4 = inlined_call_operand.vmem [shape: f32[4,16,16], index: 4, kind: input, shape index: {}]   ;;  %s8467_s5 = inlined_call_operand.vmem [shape: f32[4,16,1], index: 5, kind: input, shape index: {}]   ;;  %s8468_s6 = inlined_call_operand.vmem [shape: f32[4,16,1], index: 6, kind: input, shape index: {}]   ;;  %s8469_s7 = inlined_call_operand.vmem [shape: f32[4,3,16,16], index: 7, kind: input, shape index: {}]   ;;  %s8470_s8 = inlined_call_operand.vmem [shape: f32[4,3,16,16], index: 8, kind: input, shape index: {}]   ;;  %s8471_s9 = inlined_call_operand.vmem [shape: f32[4,3,16,1], index: 9, kind: input, shape index: {}]   ;;  %s8472_s10 = inlined_call_operand.vmem [shape: f32[4,3,16,1], index: 10, kind: input, shape index: {}]   ;;  %s8473_s11 = inlined_call_operand.vmem [shape: f32[3,16,8], index: 11, kind: input, shape index: {}]   ;;  %s8474_s12 = inlined_call_operand.vmem [shape: f32[3,16,1], index: 12, kind: input, shape index: {}]   ;;  %s8475_s13 = inlined_call_operand.vmem [shape: f32[4,8], index: 13, kind: input, shape index: {}]   ;;  %s8476_s14 = inlined_call_operand.hbm [shape: f32[4,256], index: 14, kind: output, shape index: {0}]   ;;  %s8477_s15 = inlined_call_operand.hbm [shape: f32[1,256], index: 15, kind: output, shape index: {1}]  }
   0x1   :  { %8630 = sst [smem:[#allocation59_spill]] %s8462_s0 }
   0x2   :  { %8631 = sst [smem:[#allocation60_spill]] %s8463_s1 }
   0x3   :  { %8632 = sst [smem:[#allocation61_spill]] %s8464_s2 }
   0x4   :  { %8633 = sst [smem:[#allocation62_spill]] %s8465_s3 }
   0x5   :  { %8634 = sst [smem:[#allocation63_spill]] %s8466_s4 }
   0x6   :  { %21 = vsyncpa [#allocation4], 0 }
   0x7   :  { %23 = vsyncpa [#allocation4 + $0x1], 0 }
   0x8   :  { %24 = vsyncpa [#allocation6], 0 }
   0x9   :  { %26 = vsyncpa [#allocation6 + $0x1], 0  ;;  %s5486_s18 = smov 0   ;;  %s5488_s19 = smov 0  }
   0xa   :  { %s5490_s20 = smov 0   ;;  %s5492_s21 = smov 0  }
   0xb LB: > { %8635 = sst [smem:[#allocation9_spill]] %s5398_s20  ;;  %s5507_s22 = sadd.s32 4294967295, %s5402_s21   ;;  %s5402_s21 = sphi %s5492_s21, %s9186_s21   ;;  %s5398_s20 = sphi %s5490_s20, %s9188_s20   ;;  %s5394_s19 = sphi %s5488_s19, %s9190_s19   ;;  %s5390_s18 = sphi %s5486_s18, %s9189_s18  }
   0xc   : > { %s4861_s23 = sadd.s32 4294967294, %s5402_s21   ;;  %s5511_s24 = sadd.s32 1, %s5402_s21  }
   0xd   : > { %8636 = sst [smem:[#allocation10_spill]] %s5511_s24  ;;  %s39_s25 = sadd.s32 1, %s5398_s20 }
   0xe   : > { %s36_s26 = ssub.s32 %s5402_s21, %s5511_s24  ;;  %p46_p0 = scmp.ne.s32.totalorder %s5398_s20, %s5394_s19 }
   0xf   : > { %p37_p1 = scmp.eq.s32.totalorder %s36_s26, 0  ;;  %p47_p2 = scmp.eq.s32.totalorder %s5402_s21, 0 }
  0x10   : > { %p349_p3 = scmp.eq.s32.totalorder %s5507_s22, 1  ;;  %p354_p4 = scmp.ne.s32.totalorder %s5394_s19, %s5390_s18 }
  0x11   : > { %s5523_s27 = scalar_select %p37_p1, %s5398_s20, %s39_s25  }
  0x12   : > { %p48_p5 = por %p47_p2, %p46_p0  ;;  %p5525_p6 = por %p349_p3, %p46_p0 }
  0x13   : > { %8637 = sst [smem:[#allocation11_spill]] %s5523_s27  ;;  %p355_p7 = scmp.eq.s32.totalorder %s4861_s23, 1 }
  0x14   : > { %p4863_p9 = scmp.ge.s32.totalorder %s5402_s21, 2 }
  0x15   : > { %p5529_p8 = por %p355_p7, %p354_p4 }
  0x16   : > { %436 = sbr.rel (%p4863_p9) target bundleno = 39 (0x27), region = 68 }
  0x1b   : > { %439 = sbr.rel (!%p48_p5) target bundleno = 39 (0x27), region = 72  ;;  %s441_s30 = sand.u32 (%p48_p5), 1, %s5398_s20  }
  0x1c   : > { %s4865_s16 = sshll.u32 (%p48_p5), %s5402_s21, 3  ;;  %s4864_s17 = sshll.u32 (%p48_p5), %s441_s30, 4 }
  0x1d   : > { %s8640_s0 = sld [smem:[#allocation59_spill]] (%p48_p5)  ;;  %s443_s23 = scalar_lea.vmem (%p48_p5), [#allocation2], %s4864_s17 }
  0x23   : > { %s445_s27 = scalar_lea.vmem %s8640_s0, %s4865_s16 }
  0x24   : > { %v476_v0 = vld [vmem:[%s445_s27] sm:$0xff]  ;;  %v478_v1 = vld [vmem:[%s445_s27 + $0x10] sm:$0xff] }
  0x25   : > { %477 = vst [vmem:[%s443_s23] sm:$0xff] %v476_v0 }
  0x26   : > { %479 = vst [vmem:[%s443_s23 + $0x8] sm:$0xff] %v478_v1 }
  0x27 PF: > { %p4866_p10 = scmp.ge.s32.totalorder %s5402_s21, 1  ;;  %p484_p11 = scmp.lt.s32.totalorder %s5402_s21, 3 }
  0x29   : > { %p485_p12 = pnand %p4866_p10, %p484_p11 }
  0x2b   : > { %488 = sbr.rel (%p485_p12) target bundleno = 3994 (0xf9a), region = 110 }
  0x30   : > { %v573_v2 = vld [vmem:[%s8468_s6 + $0x8] sm:$0xff]  ;;  %s8641_s2 = sld [smem:[#allocation61_spill]]  ;;  %v5404_v5 = vmov 0   ;;  %v572_v6 = vld [vmem:[%s8468_s6] sm:$0xff]  ;;  %v631_v15 = vld [vmem:[%s8471_s9 + $0x18] sm:$0xff]  ;;  %s5670_s0 = sand.u32 1, %s5394_s19  }
  0x31   : > { %s8642_s1 = sld [smem:[#allocation60_spill]]  ;;  %5169 = vset.pattern.permute.xlu2 %v5404_v5  ;;  %5168 = vset.pattern.permute.xlu1 %v5404_v5  ;;  %v653_v9 = vld [vmem:[%s8472_s10 + $0x8] sm:$0xff]  ;;  %v564_v10 = vld [vmem:[%s8467_s5] sm:$0xff]  ;;  %v654_v16 = vld [vmem:[%s8472_s10 + $0x10] sm:$0xff]  ;;  %s4867_s16 = sshll.u32 %s5670_s0, 4  ;;  %vm8482_vm0 = vcmask 130048  }
  0x32   : > { %5167 = vset.pattern.permute.xlu0 %v5404_v5  ;;  %760 = vperm.xlu2 %5169, %v573_v2   ;;  %v565_v11 = vld [vmem:[%s8467_s5 + $0x8] sm:$0xff]  ;;  %v628_v12 = vld [vmem:[%s8471_s9] sm:$0xff]  ;;  %v655_v17 = vld [vmem:[%s8472_s10 + $0x18] sm:$0xff]  ;;  %s493_s25 = scalar_lea.vmem [#allocation2], %s4867_s16  ;;  %s8645_s3 = sld [smem:[#allocation62_spill]] }
  0x33   : > { %v629_v13 = vld [vmem:[%s8471_s9 + $0x8] sm:$0xff]  ;;  %v652_v14 = vld [vmem:[%s8472_s10] sm:$0xff]  ;;  %v630_v20 = vld [vmem:[%s8471_s9 + $0x10] sm:$0xff]  ;;  %s8646_s4 = sld [smem:[#allocation63_spill]]  ;;  %s541_s30 = scalar_lea.vmem [#allocation5], %s5670_s0 }
  0x34   : > { %v633_v18 = vld [vmem:[%s8471_s9 + $0x28] sm:$0xff]  ;;  %v575_v21 = vld [vmem:[%s8468_s6 + $0x18] sm:$0xff]  ;;  %v682_v23 = vld [vmem:[%s8474_s12] sm:$0xff]  ;;  %s4763_s17 = scalar_lea.hbm %s8477_s15, %s5507_s22  ;;  %s4765_s26 = sshll.u32 %s541_s30, 4  ;;  %s4766_s26 = int_to_ptr.vmem [resolvable:$true] %s4765_s26 }
  0x35   : > { %v657_v19 = vld [vmem:[%s8472_s10 + $0x28] sm:$0xff]  ;;  %v566_v24 = vld [vmem:[%s8467_s5 + $0x10] sm:$0xff]  ;;  %v567_v25 = vld [vmem:[%s8467_s5 + $0x18] sm:$0xff]  ;;  %s4767_s20 = sshll.u32 %s4763_s17, 4  ;;  %s4741_s24 = scalar_lea.sflag [#allocation6], %s5670_s0  ;;  %s4768_s20 = int_to_ptr.hbm [resolvable:$true] %s4767_s20 }
  0x36   : > { %v547_v3 = vld [vmem:[%s8641_s2 + $0x8] sm:$0xff]  ;;  %v546_v7 = vld [vmem:[%s8641_s2] sm:$0xff]  ;;  %v574_v26 = vld [vmem:[%s8468_s6 + $0x10] sm:$0xff] }
  0x37   : > { %v545_v4 = vld [vmem:[%s8642_s1 + $0x8] sm:$0xff]  ;;  %708 = vperm.xlu1 %5168, %v547_v3   ;;  %v544_v8 = vld [vmem:[%s8642_s1] sm:$0xff]  ;;  %v635_v27 = vld [vmem:[%s8471_s9 + $0x38] sm:$0xff]  ;;  %s5322_s1 = sshra.s32 %s4768_s20, 4  ;;  %s5323_s1 = int_to_ptr.hbm [resolvable:$true] %s5322_s1 }
  0x38   : > { %696 = vperm.xlu0 %5167, %v545_v4   ;;  %v683_v22 = vld [vmem:[%s8474_s12 + $0x8] sm:$0xff]  ;;  %v658_v28 = vld [vmem:[%s8472_s10 + $0x30] sm:$0xff]  ;;  %v659_v29 = vld [vmem:[%s8472_s10 + $0x38] sm:$0xff]  ;;  %s5324_s2 = scalar_lea.hbm %s5323_s1, 1  ;;  %p5329_p2 = scmp.lt.s32.totalorder %s5323_s1, %s8477_s15 }
  0x39   : > { %v660_v30 = vld [vmem:[%s8472_s10 + $0x40] sm:$0xff]  ;;  %v661_v31 = vld [vmem:[%s8472_s10 + $0x48] sm:$0xff]  ;;  %v634_v32 = vld [vmem:[%s8471_s9 + $0x30] sm:$0xff]  ;;  %p5325_p13 = scmp.ne.s32.totalorder %s5323_s1, %s5324_s2 }
  0x3a   : > { %755 = vperm.xlu2 %5169, %v572_v6   ;;  %v663_v33 = vld [vmem:[%s8472_s10 + $0x58] sm:$0xff]  ;;  %v636_v34 = vld [vmem:[%s8471_s9 + $0x40] sm:$0xff]  ;;  %v637_v35 = vld [vmem:[%s8471_s9 + $0x48] sm:$0xff] }
  0x3b   : > { %v685_v36 = vld [vmem:[%s8474_s12 + $0x18] sm:$0xff]  ;;  %v684_v37 = vld [vmem:[%s8474_s12 + $0x10] sm:$0xff]  ;;  %v569_v39 = vld [vmem:[%s8467_s5 + $0x28] sm:$0xff]  ;;  %p5326_p0 = pnand %p5325_p13, %p5525_p6 }
  0x3c   : > { %v639_v38 = vld [vmem:[%s8471_s9 + $0x58] sm:$0xff]  ;;  %v576_v40 = vld [vmem:[%s8468_s6 + $0x20] sm:$0xff]  ;;  %v577_v41 = vld [vmem:[%s8468_s6 + $0x28] sm:$0xff] }
  0x3d   : > { %v664_v42 = vld [vmem:[%s8472_s10 + $0x60] sm:$0xff]  ;;  %v665_v43 = vld [vmem:[%s8472_s10 + $0x68] sm:$0xff]  ;;  %v667_v45 = vld [vmem:[%s8472_s10 + $0x78] sm:$0xff]  ;;  %p5327_p1 = pneg %p5326_p0 }
  0x3e   : > { %v568_v44 = vld [vmem:[%s8467_s5 + $0x20] sm:$0xff]  ;;  %v641_v47 = vld [vmem:[%s8471_s9 + $0x68] sm:$0xff]  ;;  %v642_v53 = vld [vmem:[%s8471_s9 + $0x70] sm:$0xff] }
  0x3f   : > { %703 = vperm.xlu1 %5168, %v546_v7   ;;  %v640_v46 = vld [vmem:[%s8471_s9 + $0x60] sm:$0xff]  ;;  %v543_v48 = vld [vmem:[%s493_s25 + $0x8] sm:$0xff]  ;;  %v666_v55 = vld [vmem:[%s8472_s10 + $0x70] sm:$0xff] }
  0x40   : > { %691 = vperm.xlu0 %5167, %v544_v8   ;;  %v643_v54 = vld [vmem:[%s8471_s9 + $0x78] sm:$0xff]  ;;  %v542_v56 = vld [vmem:[%s493_s25] sm:$0xff]  ;;  %v645_v62 = vld [vmem:[%s8471_s9 + $0x88] sm:$0xff] }
  0x41   : > { %v686_v61 = vld [vmem:[%s8474_s12 + $0x20] sm:$0xff]  ;;  %v669_v63 = vld [vmem:[%s8472_s10 + $0x88] sm:$0xff]  ;;  %v578_v2 = vld [vmem:[%s8468_s6 + $0x30] sm:$0xff] }
  0x42   : > { %878 = vperm.xlu2 %5169, %v653_v9   ;;  %v548_v0 = vld [vmem:[%s8645_s3] sm:$0xff]  ;;  %v579_v3 = vld [vmem:[%s8468_s6 + $0x38] sm:$0xff]  ;;  %v687_v4 = vld [vmem:[%s8474_s12 + $0x28] sm:$0xff] }
  0x43   : > { %v556_v1 = vld [vmem:[%s8646_s4] sm:$0xff]  ;;  %v549_v5 = vld [vmem:[%s8645_s3 + $0x8] sm:$0xff]  ;;  %v671_v7 = vld [vmem:[%s8472_s10 + $0x98] sm:$0xff] }
  0x44   : > { %v557_v6 = vld [vmem:[%s8646_s4 + $0x8] sm:$0xff]  ;;  %v570_v8 = vld [vmem:[%s8467_s5 + $0x30] sm:$0xff]  ;;  %v571_v9 = vld [vmem:[%s8467_s5 + $0x38] sm:$0xff] }
  0x47   : > { %715 = vperm.xlu1 %5168, %v564_v10   ;;  %v646_v10 = vld [vmem:[%s8471_s9 + $0x90] sm:$0xff] }
  0x48   : > { %720 = vperm.xlu0 %5167, %v565_v11   ;;  %v647_v11 = vld [vmem:[%s8471_s9 + $0x98] sm:$0xff] }
  0x4a   : > { %834 = vperm.xlu2 %5169, %v628_v12   ;;  %v670_v12 = vld [vmem:[%s8472_s10 + $0x90] sm:$0xff] }
  0x4f   : > { %839 = vperm.xlu1 %5168, %v629_v13   ;;  %v649_v13 = vld [vmem:[%s8471_s9 + $0xa8] sm:$0xff] }
  0x50   : > { %873 = vperm.xlu0 %5167, %v652_v14   ;;  %v672_v14 = vld [vmem:[%s8472_s10 + $0xa0] sm:$0xff] }
  0x52   : > { %961 = vperm.xlu2 %5169, %v631_v15   ;;  %v673_v15 = vld [vmem:[%s8472_s10 + $0xa8] sm:$0xff] }
  0x57   : > { %995 = vperm.xlu1 %5168, %v654_v16   ;;  %v668_v16 = vld [vmem:[%s8472_s10 + $0x80] sm:$0xff] }
  0x58   : > { %1000 = vperm.xlu0 %5167, %v655_v17   ;;  %v662_v17 = vld [vmem:[%s8472_s10 + $0x50] sm:$0xff] }
  0x5a   : > { %1082 = vperm.xlu2 %5169, %v633_v18   ;;  %v648_v18 = vld [vmem:[%s8471_s9 + $0xa0] sm:$0xff] }
  0x5f   : > { %1119 = vperm.xlu1 %5168, %v657_v19   ;;  %v644_v19 = vld [vmem:[%s8471_s9 + $0x80] sm:$0xff] }
  0x60   : > { %956 = vperm.xlu0 %5167, %v630_v20   ;;  %v638_v20 = vld [vmem:[%s8471_s9 + $0x50] sm:$0xff] }
  0x62   : > { %1924 = vperm.xlu2 %5169, %v575_v21   ;;  %v674_v21 = vld [vmem:[%s8472_s10 + $0xb0] sm:$0xff] }
  0x67   : > { %1179 = vperm.xlu1 %5168, %v683_v22   ;;  %v650_v22 = vld [vmem:[%s8471_s9 + $0xb0] sm:$0xff] }
  0x68   : > { %1174 = vperm.xlu0 %5167, %v682_v23  }
  0x6a   : > { %1880 = vperm.xlu2 %5169, %v566_v24  }
  0x6f   : > { %1885 = vperm.xlu1 %5168, %v567_v25  }
  0x70   : > { %1919 = vperm.xlu0 %5167, %v574_v26  }
  0x72   : > { %2003 = vperm.xlu2 %5169, %v635_v27  }
  0x77   : > { %2037 = vperm.xlu1 %5168, %v658_v28  }
  0x78   : > { %2042 = vperm.xlu0 %5167, %v659_v29  }
  0x7a   : > { %2159 = vperm.xlu2 %5169, %v660_v30  }
  0x7f   : > { %2164 = vperm.xlu1 %5168, %v661_v31  }
  0x80   : > { %1998 = vperm.xlu0 %5167, %v634_v32  }
  0x82   : > { %2286 = vperm.xlu2 %5169, %v663_v33  }
  0x87   : > { %2120 = vperm.xlu1 %5168, %v636_v34  }
  0x88   : > { %2125 = vperm.xlu0 %5167, %v637_v35  }
  0x8a   : > { %2371 = vperm.xlu2 %5169, %v685_v36  }
  0x8c   : > { %v761_v23 = vpop.permute.xlu2 %760 }
  0x8f   : > { %2366 = vperm.xlu1 %5168, %v684_v37  }
  0x90   : > { %2247 = vperm.xlu0 %5167, %v639_v38  }
  0x92   : > { %3073 = vperm.xlu2 %5169, %v569_v39  }
  0x94   : > { %v756_v24 = vpop.permute.xlu2 %755 }
  0x97   : > { %3107 = vperm.xlu1 %5168, %v576_v40  }
  0x98   : > { %3112 = vperm.xlu0 %5167, %v577_v41  }
  0x9a   : > { %3225 = vperm.xlu2 %5169, %v664_v42  }
  0x9f   : > { %3230 = vperm.xlu1 %5168, %v665_v43  }
  0xa0   : > { %3068 = vperm.xlu0 %5167, %v568_v44  }
  0xa2   : > { %3352 = vperm.xlu2 %5169, %v667_v45  }
  0xa7   : > { %3186 = vperm.xlu1 %5168, %v640_v46  }
  0xa8   : > { %3191 = vperm.xlu0 %5167, %v641_v47  }
  0xa9   : > { %v709_v49 = vpop.permute.xlu1 %708 }
  0xaa   : > { %v697_v50 = vpop.permute.xlu0 %696  ;;  %3308 = vperm.xlu2 %5169, %v642_v53  }
  0xab   : > { %v700_v51 = vmul.f32 %v697_v50, %v543_v48 }
  0xad   : > { %v5682_v52 = vadd.f32 %v709_v49, %v700_v51 }
  0xaf   : > { %8643 = vst [vmem:[#allocation12_spill] sm:$0xff] %v5682_v52  ;;  %744 = vmatpush.msra.mxu0 %v5682_v52  ;;  %783 = vmatpush.msra.mxu1 %v5682_v52 }
  0xb0   : > { %3313 = vperm.xlu1 %5168, %v643_v54   ;;  %3347 = vperm.xlu0 %5167, %v666_v55  }
  0xb1   : > { %v704_v59 = vpop.permute.xlu1 %703 }
  0xb2   : > { %v692_v57 = vpop.permute.xlu0 %691  ;;  %3554 = vperm.xlu2 %5169, %v686_v61  }
  0xb3   : > { %v699_v58 = vmul.f32 %v692_v57, %v542_v56 }
  0xb5   : > { %v5695_v60 = vadd.f32 %v704_v59, %v699_v58 }
  0xb7   : > { %8644 = vst [vmem:[#allocation13_spill] sm:$0xff] %v5695_v60  ;;  %745 = vmatpush.msra.mxu0 %v5695_v60  ;;  %784 = vmatpush.msra.mxu1 %v5695_v60 }
  0xb8   : > { %3435 = vperm.xlu1 %5168, %v645_v62   ;;  %3474 = vperm.xlu0 %5167, %v669_v63  }
  0xb9   : > { %4869 = vmatmul.msk.f32.vlgmr.msra.gmra.mxu0 %vm8482_vm0, %v548_v0  ;;  %4871 = vmatmul.msk.f32.vlgmr.msra.gmra.mxu1 %vm8482_vm0, %v556_v1  ;;  %v716_v58 = vpop.permute.xlu1 %715  ;;  %v580_v1 = vld [vmem:[%s8469_s7] sm:$0xff] }
  0xba   : > { %4291 = vperm.xlu2 %5169, %v578_v2   ;;  %v721_v53 = vpop.permute.xlu0 %720  ;;  %v604_v2 = vld [vmem:[%s8470_s8] sm:$0xff] }
  0xc0   : > { %4296 = vperm.xlu1 %5168, %v579_v3   ;;  %3559 = vperm.xlu0 %5167, %v687_v4   ;;  %v581_v3 = vld [vmem:[%s8469_s7 + $0x8] sm:$0xff] }
  0xc1   : > { %4870 = vmatmul.msk.f32.gmra.mxu0 %vm8482_vm0, %v549_v5  ;;  %4872 = vmatmul.msk.f32.gmra.mxu1 %vm8482_vm0, %v557_v6  ;;  %v605_v4 = vld [vmem:[%s8470_s8 + $0x8] sm:$0xff] }
  0xc2   : > { %4414 = vperm.xlu2 %5169, %v671_v7   ;;  %v874_v5 = vpop.permute.xlu0 %873 }
  0xc8   : > { %4252 = vperm.xlu1 %5168, %v570_v8   ;;  %4257 = vperm.xlu0 %5167, %v571_v9   ;;  %v879_v9 = vpop.permute.xlu2 %878 }
  0xca   : > { %4370 = vperm.xlu2 %5169, %v646_v10  }
  0xd0   : > { %4375 = vperm.xlu1 %5168, %v647_v11   ;;  %4409 = vperm.xlu0 %5167, %v670_v12  }
  0xd2   : > { %4497 = vperm.xlu2 %5169, %v649_v13  }
  0xd8   : > { %4531 = vperm.xlu1 %5168, %v672_v14   ;;  %4536 = vperm.xlu0 %5167, %v673_v15  }
  0xda   : > { %3469 = vperm.xlu2 %5169, %v668_v16  }
  0xe0   : > { %2281 = vperm.xlu1 %5168, %v662_v17   ;;  %4492 = vperm.xlu0 %5167, %v648_v18  }
  0xe2   : > { %3430 = vperm.xlu2 %5169, %v644_v19  }
  0xe8   : > { %2242 = vperm.xlu1 %5168, %v638_v20   ;;  %4651 = vperm.xlu0 %5167, %v674_v21  }
  0xf0   : > { %4614 = vperm.xlu0 %5167, %v650_v22  }
 0x136   : > { %v786_v25 = vpop.f32.mrf.mxu1  ;;  %v747_v38 = vpop.f32.mrf.mxu0 }
 0x137   : > { %v787_v26 = vadd.f32 %v786_v25, %v756_v24  ;;  %v748_v62 = vadd.f32 %v747_v38, %v716_v58  ;;  %v840_v38 = vpop.permute.xlu1 %839  ;;  %v1001_v58 = vpop.permute.xlu0 %1000 }
 0x139   : > { %v4873_v27 = vmul.f32 -1.442695, %v787_v26 }
 0x13b   : > { %5170 = vpow2.f32 %v4873_v27 }
 0x13e   : > { %v789_v28 = vpop.f32.mrf.mxu1  ;;  %v750_v49 = vpop.f32.mrf.mxu0 }
 0x13f   : > { %v790_v29 = vadd.f32 %v789_v28, %v761_v23  ;;  %v751_v56 = vadd.f32 %v750_v49, %v721_v53  ;;  %v582_v49 = vld [vmem:[%s8469_s7 + $0x10] sm:$0xff]  ;;  %v607_v53 = vld [vmem:[%s8470_s8 + $0x18] sm:$0xff] }
 0x141   : > { %v5171_v30 = vpop.eup %5170  ;;  %v4874_v31 = vmul.f32 -1.442695, %v790_v29 }
 0x142   : > { %v798_v32 = vadd.f32 1.0, %v5171_v30 }
 0x143   : > { %5172 = vpow2.f32 %v4874_v31 }
 0x144   : > { %5174 = vrcp.f32 %v798_v32  ;;  %vm805_vm2 = vweird.f32 %v798_v32  ;;  %v811_v45 = vand.u32 2147483648, %v798_v32  ;;  %v809_v48 = vand.u32 2147483647, %v798_v32 }
 0x146   : > { %v812_v55 = vor.u32 1.1754944e-38, %v811_v45  ;;  %vm810_vm8 = vcmp.eq.f32.partialorder %v809_v48, 8.507059e+37 }
 0x149   : > { %v5173_v33 = vpop.eup %5172 }
 0x14a   : > { %v5175_v34 = vpop.eup %5174  ;;  %v799_v35 = vadd.f32 1.0, %v5173_v33  ;;  %v835_v33 = vpop.permute.xlu2 %834 }
 0x14b   : > { %v801_v36 = vmul.f32 %v5175_v34, %v798_v32  ;;  %vm806_vm1 = vweird.f32 %v5175_v34 }
 0x14c   : > { %5176 = vrcp.f32 %v799_v35  ;;  %v826_v44 = vand.u32 2147483648, %v799_v35  ;;  %v824_v47 = vand.u32 2147483647, %v799_v35  ;;  %vm807_vm4 = vmor %vm805_vm2, %vm806_vm1  ;;  %vm820_vm5 = vweird.f32 %v799_v35 }
 0x14d   : > { %v802_v37 = vsub.f32 1.0, %v801_v36 }
 0x14e   : > { %v827_v54 = vor.u32 1.1754944e-38, %v826_v44  ;;  %vm825_vm7 = vcmp.eq.f32.partialorder %v824_v47, 8.507059e+37 }
 0x14f   : > { %v803_v39 = vmul.f32 %v5175_v34, %v802_v37 }
 0x151   : > { %v804_v43 = vadd.f32 %v5175_v34, %v803_v39 }
 0x152   : > { %v5177_v40 = vpop.eup %5176 }
 0x153   : > { %v816_v41 = vmul.f32 %v5177_v40, %v799_v35  ;;  %vm821_vm3 = vweird.f32 %v5177_v40  ;;  %v808_v51 = vsel %vm807_vm4, %v5175_v34, %v804_v43 }
 0x154   : > { %vm822_vm6 = vmor %vm820_vm5, %vm821_vm3  ;;  %v813_v61 = vsel %vm810_vm8, %v812_v55, %v808_v51  ;;  %v583_v51 = vld [vmem:[%s8469_s7 + $0x18] sm:$0xff] }
 0x155   : > { %v817_v42 = vsub.f32 1.0, %v816_v41  ;;  %v5785_v0 = vmul.f32 %v813_v61, %v748_v62 }
 0x157   : > { %v818_v46 = vmul.f32 %v5177_v40, %v817_v42 }
 0x159   : > { %v819_v50 = vadd.f32 %v5177_v40, %v818_v46 }
 0x15b   : > { %v823_v57 = vsel %vm822_vm6, %v5177_v40, %v819_v50  ;;  %v606_v50 = vld [vmem:[%s8470_s8 + $0x10] sm:$0xff] }
 0x15c   : > { %v828_v59 = vsel %vm825_vm7, %v827_v54, %v823_v57  ;;  %v996_v54 = vpop.permute.xlu1 %995 }
 0x15d   : > { %v5781_v63 = vmul.f32 %v828_v59, %v751_v56 }
 0x15f   : > { %862 = vmatpush.msra.mxu2 %v5781_v63  ;;  %901 = vmatpush.msra.mxu3 %v5781_v63 }
 0x161   : > { %863 = vmatpush.msra.mxu2 %v5785_v0  ;;  %902 = vmatpush.msra.mxu3 %v5785_v0 }
 0x162   : > { %4875 = vmatmul.msk.f32.vlgmr.msra.gmra.mxu2 %vm8482_vm0, %v580_v1  ;;  %4877 = vmatmul.msk.f32.vlgmr.msra.gmra.mxu3 %vm8482_vm0, %v604_v2 }
 0x16a   : > { %4876 = vmatmul.msk.f32.gmra.mxu2 %vm8482_vm0, %v581_v3  ;;  %4878 = vmatmul.msk.f32.gmra.mxu3 %vm8482_vm0, %v605_v4 }
 0x1e5   : > { %v904_v6 = vpop.f32.mrf.mxu3  ;;  %v865_v20 = vpop.f32.mrf.mxu2 }
 0x1e6   : > { %v905_v7 = vadd.f32 %v904_v6, %v874_v5  ;;  %v866_v36 = vadd.f32 %v865_v20, %v835_v33 }
 0x1e8   : > { %v4879_v8 = vmul.f32 -1.442695, %v905_v7 }
 0x1ea   : > { %5178 = vpow2.f32 %v4879_v8 }
 0x1ed   : > { %v907_v10 = vpop.f32.mrf.mxu3  ;;  %v868_v34 = vpop.f32.mrf.mxu2 }
 0x1ee   : > { %v908_v11 = vadd.f32 %v907_v10, %v879_v9  ;;  %v869_v40 = vadd.f32 %v868_v34, %v840_v38  ;;  %v609_v38 = vld [vmem:[%s8470_s8 + $0x28] sm:$0xff] }
 0x1f0   : > { %v5179_v12 = vpop.eup %5178  ;;  %v4880_v13 = vmul.f32 -1.442695, %v908_v11 }
 0x1f1   : > { %v916_v14 = vadd.f32 1.0, %v5179_v12 }
 0x1f2   : > { %5180 = vpow2.f32 %v4880_v13 }
 0x1f3   : > { %5182 = vrcp.f32 %v916_v14  ;;  %v929_v24 = vand.u32 2147483648, %v916_v14  ;;  %vm923_vm10 = vweird.f32 %v916_v14  ;;  %v927_v26 = vand.u32 2147483647, %v916_v14 }
 0x1f5   : > { %v930_v30 = vor.u32 1.1754944e-38, %v929_v24  ;;  %vm928_vm13 = vcmp.eq.f32.partialorder %v927_v26, 8.507059e+37  ;;  %v962_v24 = vpop.permute.xlu2 %961 }
 0x1f8   : > { %v5181_v15 = vpop.eup %5180 }
 0x1f9   : > { %v5183_v16 = vpop.eup %5182  ;;  %v917_v17 = vadd.f32 1.0, %v5181_v15 }
 0x1fa   : > { %v919_v18 = vmul.f32 %v5183_v16, %v916_v14  ;;  %vm924_vm9 = vweird.f32 %v5183_v16 }
 0x1fb   : > { %5184 = vrcp.f32 %v917_v17  ;;  %vm925_vm11 = vmor %vm923_vm10, %vm924_vm9  ;;  %v944_v29 = vand.u32 2147483648, %v917_v17  ;;  %v942_v32 = vand.u32 2147483647, %v917_v17  ;;  %vm938_vm14 = vweird.f32 %v917_v17 }
 0x1fc   : > { %v920_v19 = vsub.f32 1.0, %v919_v18 }
 0x1fd   : > { %v945_v39 = vor.u32 1.1754944e-38, %v944_v29  ;;  %vm943_vm1 = vcmp.eq.f32.partialorder %v942_v32, 8.507059e+37 }
 0x1fe   : > { %v921_v21 = vmul.f32 %v5183_v16, %v920_v19  ;;  %v957_v19 = vpop.permute.xlu0 %956 }
 0x200   : > { %v922_v22 = vadd.f32 %v5183_v16, %v921_v21 }
 0x201   : > { %v5185_v23 = vpop.eup %5184 }
 0x202   : > { %v934_v25 = vmul.f32 %v5185_v23, %v917_v17  ;;  %v926_v28 = vsel %vm925_vm11, %v5183_v16, %v922_v22  ;;  %vm939_vm12 = vweird.f32 %v5185_v23 }
 0x203   : > { %v931_v35 = vsel %vm928_vm13, %v930_v30, %v926_v28  ;;  %vm940_vm15 = vmor %vm938_vm14, %vm939_vm12  ;;  %vm8481_vm14 = vcmask 64512  }
 0x204   : > { %v935_v27 = vsub.f32 1.0, %v934_v25  ;;  %v948_v42 = vmul.f32 %v931_v35, %v866_v36  ;;  %v584_v35 = vld [vmem:[%s8469_s7 + $0x20] sm:$0xff] }
 0x205   : > { %v608_v36 = vld [vmem:[%s8470_s8 + $0x20] sm:$0xff] }
 0x206   : > { %v936_v31 = vmul.f32 %v5185_v23, %v935_v27  ;;  %v950_v46 = vadd.f32 %v948_v42, %v5785_v0 }
 0x208   : > { %v937_v37 = vadd.f32 %v5185_v23, %v936_v31  ;;  %v5811_v48 = vmul.f32 0.70710677, %v950_v46 }
 0x20a   : > { %v941_v41 = vsel %vm940_vm15, %v5185_v23, %v937_v37  ;;  %v585_v37 = vld [vmem:[%s8469_s7 + $0x28] sm:$0xff] }
 0x20b   : > { %v946_v43 = vsel %vm943_vm1, %v945_v39, %v941_v41  ;;  %v1120_v41 = vpop.permute.xlu1 %1119 }
 0x20c   : > { %v949_v44 = vmul.f32 %v946_v43, %v869_v40 }
 0x20e   : > { %v951_v45 = vadd.f32 %v949_v44, %v5781_v63 }
 0x210   : > { %v5807_v47 = vmul.f32 0.70710677, %v951_v45 }
 0x212   : > { %984 = vmatpush.msrb.mxu0 %v5807_v47  ;;  %1023 = vmatpush.msrb.mxu1 %v5807_v47 }
 0x214   : > { %985 = vmatpush.msrb.mxu0 %v5811_v48  ;;  %1024 = vmatpush.msrb.mxu1 %v5811_v48 }
 0x215   : > { %4881 = vmatmul.msk.f32.vlgmr.msrb.gmra.mxu0 %vm8482_vm0, %v582_v49  ;;  %4883 = vmatmul.msk.f32.vlgmr.msrb.gmra.mxu1 %vm8482_vm0, %v606_v50 }
 0x21d   : > { %4882 = vmatmul.msk.f32.gmra.mxu0 %vm8482_vm0, %v583_v51  ;;  %4884 = vmatmul.msk.f32.gmra.mxu1 %vm8482_vm0, %v607_v53 }
 0x292   : > { %v1026_v55 = vpop.f32.mrf.mxu1  ;;  %v987_v6 = vpop.f32.mrf.mxu0 }
 0x293   : > { %v1027_v56 = vadd.f32 %v1026_v55, %v996_v54  ;;  %v988_v22 = vadd.f32 %v987_v6, %v957_v19 }
 0x295   : > { %v4885_v57 = vmul.f32 -1.442695, %v1027_v56  ;;  %v1083_v56 = vpop.permute.xlu2 %1082 }
 0x297   : > { %5186 = vpow2.f32 %v4885_v57 }
 0x29a   : > { %v1029_v59 = vpop.f32.mrf.mxu1  ;;  %v990_v20 = vpop.f32.mrf.mxu0 }
 0x29b   : > { %v1030_v61 = vadd.f32 %v1029_v59, %v1001_v58  ;;  %v991_v26 = vadd.f32 %v990_v20, %v962_v24 }
 0x29d   : > { %v5187_v62 = vpop.eup %5186  ;;  %v4886_v63 = vmul.f32 -1.442695, %v1030_v61 }
 0x29e   : > { %v1038_v0 = vadd.f32 1.0, %v5187_v62 }
 0x29f   : > { %5188 = vpow2.f32 %v4886_v63 }
 0x2a0   : > { %5190 = vrcp.f32 %v1038_v0  ;;  %v1051_v10 = vand.u32 2147483648, %v1038_v0  ;;  %vm1045_vm3 = vweird.f32 %v1038_v0  ;;  %v1049_v12 = vand.u32 2147483647, %v1038_v0 }
 0x2a2   : > { %v1052_v16 = vor.u32 1.1754944e-38, %v1051_v10  ;;  %vm1050_vm6 = vcmp.eq.f32.partialorder %v1049_v12, 8.507059e+37 }
 0x2a5   : > { %v5189_v1 = vpop.eup %5188 }
 0x2a6   : > { %v5191_v2 = vpop.eup %5190  ;;  %v1039_v3 = vadd.f32 1.0, %v5189_v1  ;;  %v676_v1 = vld [vmem:[%s8473_s11] sm:$0xff] }
 0x2a7   : > { %v1041_v4 = vmul.f32 %v5191_v2, %v1038_v0  ;;  %vm1046_vm2 = vweird.f32 %v5191_v2 }
 0x2a8   : > { %5192 = vrcp.f32 %v1039_v3  ;;  %vm1047_vm4 = vmor %vm1045_vm3, %vm1046_vm2  ;;  %v1066_v15 = vand.u32 2147483648, %v1039_v3  ;;  %v1064_v18 = vand.u32 2147483647, %v1039_v3  ;;  %vm1060_vm7 = vweird.f32 %v1039_v3 }
 0x2a9   : > { %v1042_v5 = vsub.f32 1.0, %v1041_v4 }
 0x2aa   : > { %v1067_v25 = vor.u32 1.1754944e-38, %v1066_v15  ;;  %vm1065_vm9 = vcmp.eq.f32.partialorder %v1064_v18, 8.507059e+37 }
 0x2ab   : > { %v1043_v7 = vmul.f32 %v5191_v2, %v1042_v5 }
 0x2ad   : > { %v1044_v8 = vadd.f32 %v5191_v2, %v1043_v7 }
 0x2ae   : > { %v5193_v9 = vpop.eup %5192 }
 0x2af   : > { %v1056_v11 = vmul.f32 %v5193_v9, %v1039_v3  ;;  %v1048_v14 = vsel %vm1047_vm4, %v5191_v2, %v1044_v8  ;;  %vm1061_vm5 = vweird.f32 %v5193_v9  ;;  %v677_v2 = vld [vmem:[%s8473_s11 + $0x8] sm:$0xff]  ;;  %v1175_v3 = vpop.permute.xlu0 %1174 }
 0x2b0   : > { %v1053_v21 = vsel %vm1050_vm6, %v1052_v16, %v1048_v14  ;;  %vm1062_vm8 = vmor %vm1060_vm7, %vm1061_vm5 }
 0x2b1   : > { %v1057_v13 = vsub.f32 1.0, %v1056_v11  ;;  %v1070_v28 = vmul.f32 %v1053_v21, %v988_v22  ;;  %v1180_v21 = vpop.permute.xlu1 %1179 }
 0x2b3   : > { %v1058_v17 = vmul.f32 %v5193_v9, %v1057_v13  ;;  %v1072_v32 = vadd.f32 %v1070_v28, %v5811_v48 }
 0x2b5   : > { %v1059_v23 = vadd.f32 %v5193_v9, %v1058_v17  ;;  %v1074_v34 = vmul.f32 0.70710677, %v1072_v32 }
 0x2b7   : > { %v1063_v27 = vsel %vm1062_vm8, %v5193_v9, %v1059_v23 }
 0x2b8   : > { %v1068_v29 = vsel %vm1065_vm9, %v1067_v25, %v1063_v27 }
 0x2b9   : > { %v1071_v30 = vmul.f32 %v1068_v29, %v991_v26 }
 0x2bb   : > { %v1073_v31 = vadd.f32 %v1071_v30, %v5807_v47  ;;  %v8483_v30 = vmov 0.0  }
 0x2bd   : > { %v1075_v33 = vmul.f32 0.70710677, %v1073_v31 }
 0x2bf   : > { %1105 = vmatpush.msrb.mxu2 %v1075_v33  ;;  %1142 = vmatpush.msrb.mxu3 %v1075_v33 }
 0x2c1   : > { %1106 = vmatpush.msrb.mxu2 %v1074_v34  ;;  %1143 = vmatpush.msrb.mxu3 %v1074_v34 }
 0x2c2   : > { %4887 = vmatmul.msk.f32.vlgmr.msrb.gmra.mxu2 %vm8482_vm0, %v584_v35  ;;  %4889 = vmatmul.msk.f32.vlgmr.msrb.gmra.mxu3 %vm8482_vm0, %v608_v36 }
 0x2ca   : > { %4888 = vmatmul.msk.f32.gmra.mxu2 %vm8482_vm0, %v585_v37  ;;  %4890 = vmatmul.msk.f32.gmra.mxu3 %vm8482_vm0, %v609_v38 }
 0x345   : > { %v1108_v39 = vpop.f32.mrf.mxu2  ;;  %v1145_v40 = vpop.f32.mrf.mxu3 }
 0x34d   : > { %v1147_v42 = vpop.f32.mrf.mxu3  ;;  %v1110_v54 = vpop.f32.mrf.mxu2 }
 0x34e   : > { %v1148_v43 = vadd.f32 %v1147_v42, %v1120_v41  ;;  %v1111_v58 = vadd.f32 %v1110_v54, %v1083_v56 }
 0x350   : > { %v4891_v44 = vmul.f32 -1.442695, %v1148_v43 }
 0x352   : > { %5194 = vpow2.f32 %v4891_v44 }
 0x358   : > { %v5195_v45 = vpop.eup %5194 }
 0x359   : > { %v1153_v46 = vadd.f32 1.0, %v5195_v45 }
 0x35b   : > { %5196 = vrcp.f32 %v1153_v46  ;;  %v1165_v50 = vand.u32 2147483648, %v1153_v46  ;;  %v1163_v53 = vand.u32 2147483647, %v1153_v46  ;;  %vm1159_vm11 = vweird.f32 %v1153_v46 }
 0x35d   : > { %v1166_v57 = vor.u32 1.1754944e-38, %v1165_v50  ;;  %vm1164_vm13 = vcmp.eq.f32.partialorder %v1163_v53, 8.507059e+37 }
 0x361   : > { %v5197_v47 = vpop.eup %5196 }
 0x362   : > { %v1155_v48 = vmul.f32 %v5197_v47, %v1153_v46  ;;  %vm1160_vm10 = vweird.f32 %v5197_v47 }
 0x363   : > { %vm1161_vm12 = vmor %vm1159_vm11, %vm1160_vm10 }
 0x364   : > { %v1156_v49 = vsub.f32 1.0, %v1155_v48 }
 0x366   : > { %v1157_v51 = vmul.f32 %v5197_v47, %v1156_v49 }
 0x368   : > { %v1158_v55 = vadd.f32 %v5197_v47, %v1157_v51 }
 0x36a   : > { %v1162_v59 = vsel %vm1161_vm12, %v5197_v47, %v1158_v55 }
 0x36b   : > { %v1167_v61 = vsel %vm1164_vm13, %v1166_v57, %v1162_v59 }
 0x36c   : > { %v1169_v62 = vmul.f32 %v1167_v61, %v1111_v58 }
 0x36e   : > { %v1170_v63 = vadd.f32 %v1169_v62, %v1075_v33 }
 0x370   : > { %v1171_v0 = vmul.f32 0.70710677, %v1170_v63 }
 0x372   : > { %1204 = vmatpush.msra.mxu0 %v1171_v0 }
 0x373   : > { %4892 = vmatmul.msk.f32.vlgmr.msra.gmra.mxu0 %vm8481_vm14, %v676_v1 }
 0x37b   : > { %4893 = vmatmul.msk.f32.gmra.mxu0 %vm8481_vm14, %v677_v2 }
 0x3f0   : > { %v1206_v4 = vpop.f32.mrf.mxu0 }
 0x3f1   : > { %v5857_v5 = vadd.f32 %v1206_v4, %v1175_v3  ;;  %v8697_v3 = vmov 0  ;;  %v8699_v4 = vmov 0 }
 0x3f3   : > { %v5860_v6 = vrot.slane %v5857_v5, 1  ;;  %v5863_v7 = vrot.slane %v5857_v5, 2  ;;  %v5866_v8 = vrot.slane %v5857_v5, 3  ;;  %v5869_v9 = vrot.slane %v5857_v5, 4 }
 0x3f4   : > { %v5872_v10 = vrot.slane %v5857_v5, 5  ;;  %v5875_v11 = vrot.slane %v5857_v5, 6  ;;  %v5878_v12 = vrot.slane %v5857_v5, 7  ;;  %v1228_v13 = vperm.slane %v5857_v5, 0 }
 0x3f5   : > { %8647 = vst [vmem:[#allocation14_spill] sm:$0xff] %v5860_v6  ;;  %v1229_v14 = vperm.slane %v5860_v6, 0  ;;  %v1230_v15 = vperm.slane %v5863_v7, 0  ;;  %v1231_v16 = vperm.slane %v5866_v8, 0  ;;  %v1232_v17 = vperm.slane %v5869_v9, 0 }
 0x3f6   : > { %8648 = vst [vmem:[#allocation15_spill] sm:$0xff] %v5863_v7  ;;  %v1233_v18 = vperm.slane %v5872_v10, 0  ;;  %v1234_v19 = vperm.slane %v5875_v11, 0  ;;  %v1235_v20 = vperm.slane %v5878_v12, 0  ;;  %vm1260_vm15 = vcmp.ge.f32.partialorder %v5857_v5, %v1228_v13 }
 0x3f7   : > { %8649 = vst [vmem:[#allocation16_spill] sm:$0xff] %v5866_v8  ;;  %vm1262_vm1 = vcmp.ge.f32.partialorder %v5857_v5, %v1229_v14  ;;  %vm5891_vm2 = vcmp.ge.f32.partialorder %v5857_v5, %v1230_v15  ;;  %vm5898_vm3 = vcmp.ge.f32.partialorder %v5857_v5, %v1231_v16  ;;  %vm5903_vm4 = vcmp.ge.f32.partialorder %v5857_v5, %v1232_v17 }
 0x3f8   : > { %8650 = vst [vmem:[#allocation17_spill] sm:$0xff] %v5869_v9  ;;  %v1209_v22 = vpop.f32.mrf.mxu0  ;;  %vm5908_vm5 = vcmp.ge.f32.partialorder %v5857_v5, %v1233_v18  ;;  %vm5913_vm6 = vcmp.ge.f32.partialorder %v5857_v5, %v1234_v19  ;;  %vm5918_vm7 = vcmp.ge.f32.partialorder %v5857_v5, %v1235_v20  ;;  %v5923_v31 = vsel %vm1260_vm15, 1.0, %v8483_v30 }
 0x3f9   : > { %8651 = vst [vmem:[#allocation18_spill] sm:$0xff] %v5872_v10  ;;  %v5895_v24 = vadd.f32 %v1209_v22, %v1180_v21  ;;  %v5926_v32 = vsel %vm1262_vm1, 1.0, %v8483_v30  ;;  %v5952_v40 = vsel %vm5891_vm2, 1.0, %v8483_v30  ;;  %v5957_v41 = vsel %vm5898_vm3, 1.0, %v8483_v30 }
 0x3fa   : > { %8652 = vst [vmem:[#allocation19_spill] sm:$0xff] %v5875_v11  ;;  %v5962_v42 = vsel %vm5903_vm4, 1.0, %v8483_v30  ;;  %v5967_v43 = vsel %vm5908_vm5, 1.0, %v8483_v30  ;;  %v5972_v44 = vsel %vm5913_vm6, 1.0, %v8483_v30  ;;  %v5980_v48 = vsel %vm5918_vm7, 1.0, %v8483_v30 }
 0x3fb   : > { %8653 = vst [vmem:[#allocation20_spill] sm:$0xff] %v5878_v12  ;;  %v5929_v33 = vrot.slane %v5895_v24, 1  ;;  %v5932_v34 = vrot.slane %v5895_v24, 2  ;;  %v5935_v35 = vrot.slane %v5895_v24, 3  ;;  %v5938_v36 = vrot.slane %v5895_v24, 4 }
 0x3fc   : > { %v5941_v37 = vrot.slane %v5895_v24, 5  ;;  %v5944_v38 = vrot.slane %v5895_v24, 6  ;;  %v5947_v39 = vrot.slane %v5895_v24, 7  ;;  %8673 = vst [vmem:[#allocation28_spill] sm:$0xff] %v5972_v44  ;;  %v1236_v45 = vperm.slane %v5895_v24, 0 }
 0x3fd   : > { %8666 = vst [vmem:[#allocation21_spill] sm:$0xff] %v5929_v33  ;;  %v1237_v46 = vperm.slane %v5929_v33, 0  ;;  %v1238_v47 = vperm.slane %v5932_v34, 0  ;;  %v1239_v49 = vperm.slane %v5935_v35, 0  ;;  %v1240_v50 = vperm.slane %v5938_v36, 0 }
 0x3fe   : > { %8667 = vst [vmem:[#allocation22_spill] sm:$0xff] %v5932_v34  ;;  %v1241_v51 = vperm.slane %v5941_v37, 0  ;;  %v1242_v53 = vperm.slane %v5944_v38, 0  ;;  %v1243_v54 = vperm.slane %v5947_v39, 0  ;;  %vm5988_vm8 = vcmp.ge.f32.partialorder %v5895_v24, %v1228_v13 }
 0x3ff   : > { %8668 = vst [vmem:[#allocation23_spill] sm:$0xff] %v5935_v35  ;;  %vm5993_vm9 = vcmp.ge.f32.partialorder %v5895_v24, %v1229_v14  ;;  %vm5998_vm10 = vcmp.ge.f32.partialorder %v5895_v24, %v1230_v15  ;;  %vm6003_vm11 = vcmp.ge.f32.partialorder %v5895_v24, %v1231_v16  ;;  %vm6008_vm12 = vcmp.ge.f32.partialorder %v5895_v24, %v1232_v17 }
 0x400   : > { %8669 = vst [vmem:[#allocation24_spill] sm:$0xff] %v5938_v36  ;;  %vm6013_vm13 = vcmp.ge.f32.partialorder %v5895_v24, %v1233_v18  ;;  %vm6018_vm15 = vcmp.ge.f32.partialorder %v5895_v24, %v1234_v19  ;;  %vm6023_vm1 = vcmp.ge.f32.partialorder %v5895_v24, %v1235_v20  ;;  %vm6028_vm2 = vcmp.ge.f32.partialorder %v5857_v5, %v1236_v45 }
 0x401   : > { %8670 = vst [vmem:[#allocation25_spill] sm:$0xff] %v5941_v37  ;;  %vm6033_vm3 = vcmp.ge.f32.partialorder %v5895_v24, %v1236_v45  ;;  %vm6038_vm4 = vcmp.ge.f32.partialorder %v5857_v5, %v1237_v46  ;;  %vm6043_vm5 = vcmp.ge.f32.partialorder %v5895_v24, %v1237_v46  ;;  %vm6048_vm6 = vcmp.ge.f32.partialorder %v5857_v5, %v1238_v47 }
 0x402   : > { %8671 = vst [vmem:[#allocation26_spill] sm:$0xff] %v5944_v38  ;;  %v8698_v3 = vsel %vm6043_vm5, 4294967295, %v8697_v3  ;;  %v8700_v4 = vsel %vm6048_vm6, 4294967295, %v8699_v4  ;;  %vm6053_vm7 = vcmp.ge.f32.partialorder %v5895_v24, %v1238_v47  ;;  %v8701_v13 = vmov 0 }
 0x403   : > { %8672 = vst [vmem:[#allocation27_spill] sm:$0xff] %v5947_v39  ;;  %v8702_v13 = vsel %vm6053_vm7, 4294967295, %v8701_v13  ;;  %vm6058_vm14 = vcmp.ge.f32.partialorder %v5857_v5, %v1239_v49  ;;  %v8703_v14 = vmov 0  ;;  %vm6063_vm0 = vcmp.ge.f32.partialorder %v5895_v24, %v1239_v49 }
 0x404   : > { %8674 = vst [vmem:[#allocation29_spill] sm:$0xff] %v5980_v48  ;;  %v8704_v14 = vsel %vm6058_vm14, 4294967295, %v8703_v14  ;;  %v8705_v15 = vmov 0  ;;  %vm6068_vm5 = vcmp.ge.f32.partialorder %v5857_v5, %v1240_v50  ;;  %vm6073_vm6 = vcmp.ge.f32.partialorder %v5895_v24, %v1240_v50 }
 0x405   : > { %v8706_v15 = vsel %vm6063_vm0, 4294967295, %v8705_v15  ;;  %vm6078_vm7 = vcmp.ge.f32.partialorder %v5857_v5, %v1241_v51  ;;  %vm6083_vm14 = vcmp.ge.f32.partialorder %v5895_v24, %v1241_v51  ;;  %vm6088_vm0 = vcmp.ge.f32.partialorder %v5857_v5, %v1242_v53 }
 0x406   : > { %v6095_v21 = vsel %vm5988_vm8, 1.0, %v8483_v30  ;;  %v6100_v22 = vsel %vm5993_vm9, 1.0, %v8483_v30  ;;  %v6105_v23 = vsel %vm5998_vm10, 1.0, %v8483_v30  ;;  %v6110_v25 = vsel %vm6003_vm11, 1.0, %v8483_v30 }
 0x407   : > { %v6115_v26 = vsel %vm6008_vm12, 1.0, %v8483_v30  ;;  %v6120_v27 = vsel %vm6013_vm13, 1.0, %v8483_v30  ;;  %v6125_v28 = vsel %vm6018_vm15, 1.0, %v8483_v30  ;;  %v6130_v29 = vsel %vm6023_vm1, 1.0, %v8483_v30 }
 0x408   : > { %8717 = vst [vmem:[#allocation30_spill] sm:$0xff] %v6120_v27  ;;  %v6135_v45 = vsel %vm6028_vm2, 1.0, %v8483_v30  ;;  %v6140_v46 = vsel %vm6033_vm3, 1.0, %v8483_v30  ;;  %v6145_v47 = vsel %vm6038_vm4, 1.0, %v8483_v30  ;;  %vm8720_vm8 = vnez %v8698_v3 }
 0x409   : > { %8718 = vst [vmem:[#allocation31_spill] sm:$0xff] %v6125_v28  ;;  %v6150_v49 = vsel %vm8720_vm8, 1.0, %v8483_v30  ;;  %vm8721_vm9 = vnez %v8700_v4  ;;  %vm8722_vm10 = vnez %v8702_v13  ;;  %vm8723_vm11 = vnez %v8704_v14 }
 0x40a   : > { %8719 = vst [vmem:[#allocation32_spill] sm:$0xff] %v6130_v29  ;;  %v6155_v50 = vsel %vm8721_vm9, 1.0, %v8483_v30  ;;  %v6160_v51 = vsel %vm8722_vm10, 1.0, %v8483_v30  ;;  %v6165_v55 = vsel %vm8723_vm11, 1.0, %v8483_v30  ;;  %vm8724_vm12 = vnez %v8706_v15 }
 0x40b   : > { %v6170_v56 = vsel %vm8724_vm12, 1.0, %v8483_v30  ;;  %v6175_v57 = vsel %vm6068_vm5, 1.0, %v8483_v30  ;;  %v6180_v58 = vsel %vm6073_vm6, 1.0, %v8483_v30  ;;  %v6185_v59 = vsel %vm6078_vm7, 1.0, %v8483_v30 }
 0x40c   : > { %8725 = vst [vmem:[#allocation33_spill] sm:$0xff] %v6185_v59  ;;  %v6190_v61 = vsel %vm6083_vm14, 1.0, %v8483_v30  ;;  %v6195_v62 = vsel %vm6088_vm0, 1.0, %v8483_v30  ;;  %v1356_v63 = vadd.f32 %v6095_v21, %v5923_v31  ;;  %vm6200_vm13 = vcmp.ge.f32.partialorder %v5895_v24, %v1242_v53 }
 0x40d   : > { %8726 = vst [vmem:[#allocation34_spill] sm:$0xff] %v6190_v61  ;;  %vm6205_vm15 = vcmp.ge.f32.partialorder %v5857_v5, %v1243_v54  ;;  %vm6210_vm14 = vcmp.ge.f32.partialorder %v5895_v24, %v1243_v54  ;;  %v1363_v3 = vadd.f32 %v6100_v22, %v5926_v32  ;;  %v1370_v4 = vadd.f32 %v6105_v23, %v5952_v40 }
 0x40e   : > { %8727 = vst [vmem:[#allocation35_spill] sm:$0xff] %v6195_v62  ;;  %v1377_v53 = vadd.f32 %v6110_v25, %v5957_v41  ;;  %v1384_v13 = vadd.f32 %v6115_v26, %v5962_v42  ;;  %v1357_v14 = vrot.slane %v1356_v63, 4  ;;  %v1391_v15 = vadd.f32 %v6120_v27, %v5967_v43 }
 0x40f   : > { %v1398_v54 = vadd.f32 %v6125_v28, %v5972_v44  ;;  %v1405_v16 = vadd.f32 %v6130_v29, %v5980_v48  ;;  %v1364_v17 = vrot.slane %v1363_v3, 4  ;;  %v1371_v18 = vrot.slane %v1370_v4, 4 }
 0x410   : > { %v1378_v19 = vrot.slane %v1377_v53, 4  ;;  %v1385_v20 = vrot.slane %v1384_v13, 4  ;;  %v1358_v30 = vadd.f32 %v1357_v14, %v1356_v63  ;;  %v1392_v60 = vrot.slane %v1391_v15, 4 }
 0x411   : > { %v1399_v52 = vrot.slane %v1398_v54, 4  ;;  %v1406_v39 = vrot.slane %v1405_v16, 4  ;;  %v1365_v38 = vadd.f32 %v1364_v17, %v1363_v3  ;;  %v1372_v37 = vadd.f32 %v1371_v18, %v1370_v4 }
 0x412   : > { %v1379_v36 = vadd.f32 %v1378_v19, %v1377_v53  ;;  %v1386_v35 = vadd.f32 %v1385_v20, %v1384_v13  ;;  %v1359_v34 = vrot.slane %v1358_v30, 2  ;;  %v1393_v33 = vadd.f32 %v1392_v60, %v1391_v15 }
 0x413   : > { %v1400_v12 = vadd.f32 %v1399_v52, %v1398_v54  ;;  %v1407_v11 = vadd.f32 %v1406_v39, %v1405_v16  ;;  %v1366_v10 = vrot.slane %v1365_v38, 2  ;;  %v1373_v9 = vrot.slane %v1372_v37, 2 }
 0x414   : > { %v1380_v8 = vrot.slane %v1379_v36, 2  ;;  %v1387_v7 = vrot.slane %v1386_v35, 2  ;;  %v1360_v6 = vadd.f32 %v1359_v34, %v1358_v30  ;;  %v1394_v29 = vrot.slane %v1393_v33, 2 }
 0x415   : > { %v1401_v48 = vrot.slane %v1400_v12, 2  ;;  %v1408_v28 = vrot.slane %v1407_v11, 2  ;;  %v1367_v63 = vadd.f32 %v1366_v10, %v1365_v38  ;;  %v1374_v14 = vadd.f32 %v1373_v9, %v1372_v37 }
 0x416   : > { %v1381_v44 = vadd.f32 %v1380_v8, %v1379_v36  ;;  %v1388_v27 = vadd.f32 %v1387_v7, %v1386_v35  ;;  %v1361_v3 = vrot.slane %v1360_v6, 1  ;;  %v6228_v4 = vadd.f32 %v1394_v29, %v1393_v33 }
 0x417   : > { %v6230_v53 = vadd.f32 %v1401_v48, %v1400_v12  ;;  %v6232_v60 = vadd.f32 %v1408_v28, %v1407_v11  ;;  %v1368_v52 = vrot.slane %v1367_v63, 1  ;;  %v1375_v39 = vrot.slane %v1374_v14, 1 }
 0x418   : > { %v1382_v13 = vrot.slane %v1381_v44, 1  ;;  %v1389_v15 = vrot.slane %v1388_v27, 1  ;;  %v8734_v54 = vmov 0.0   ;;  %v6249_v9 = vadd.f32 %v1361_v3, %v1360_v6 }
 0x419   : > { %v6237_v30 = vsel %vm6200_vm13, 1.0, %v8734_v54  ;;  %v6242_v7 = vsel %vm6205_vm15, 1.0, %v8734_v54  ;;  %v6247_v8 = vsel %vm6210_vm14, 1.0, %v8734_v54  ;;  %v6251_v10 = vadd.f32 %v1368_v52, %v1367_v63 }
 0x41a   : > { %8735 = vst [vmem:[#allocation36_spill] sm:$0xff] %v6237_v30  ;;  %v1396_v11 = vrot.slane %v6228_v4, 1  ;;  %v1403_v12 = vrot.slane %v6230_v53, 1  ;;  %v1410_v33 = vrot.slane %v6232_v60, 1  ;;  %v6256_v34 = vadd.f32 %v1375_v39, %v1374_v14 }
 0x41b   : > { %8736 = vst [vmem:[#allocation37_spill] sm:$0xff] %v6242_v7  ;;  %v6258_v35 = vadd.f32 %v1382_v13, %v1381_v44  ;;  %v6260_v36 = vadd.f32 %v1389_v15, %v1388_v27  ;;  %v1412_v37 = vadd.f32 %v6140_v46, %v6135_v45  ;;  %v1419_v6 = vadd.f32 %v6150_v49, %v6145_v47 }
 0x41c   : > { %8737 = vst [vmem:[#allocation38_spill] sm:$0xff] %v6247_v8  ;;  %v1426_v38 = vadd.f32 %v6160_v51, %v6155_v50  ;;  %v1433_v48 = vadd.f32 %v6170_v56, %v6165_v55  ;;  %v1440_v28 = vadd.f32 %v6180_v58, %v6175_v57  ;;  %v1447_v44 = vadd.f32 %v6190_v61, %v6185_v59 }
 0x41d   : > { %8738 = vst [vmem:[#allocation39_spill] sm:$0xff] %v6249_v9  ;;  %v1413_v29 = vrot.slane %v1412_v37, 4  ;;  %v1454_v27 = vadd.f32 %v6237_v30, %v6195_v62  ;;  %v1461_v0 = vadd.f32 %v6247_v8, %v6242_v7  ;;  %v1420_v1 = vrot.slane %v1419_v6, 4 }
 0x41e   : > { %8739 = vst [vmem:[#allocation40_spill] sm:$0xff] %v6251_v10  ;;  %v1427_v2 = vrot.slane %v1426_v38, 4  ;;  %v1434_v16 = vrot.slane %v1433_v48, 4  ;;  %v1441_v17 = vrot.slane %v1440_v28, 4  ;;  %v1448_v19 = vrot.slane %v1447_v44, 4 }
 0x41f   : > { %8740 = vst [vmem:[#allocation41_spill] sm:$0xff] %v6256_v34  ;;  %v1414_v18 = vadd.f32 %v1413_v29, %v1412_v37  ;;  %v1455_v20 = vrot.slane %v1454_v27, 4  ;;  %v1462_v63 = vrot.slane %v1461_v0, 4  ;;  %v1421_v14 = vadd.f32 %v1420_v1, %v1419_v6 }
 0x420   : > { %8741 = vst [vmem:[#allocation42_spill] sm:$0xff] %v6258_v35  ;;  %v1428_v3 = vadd.f32 %v1427_v2, %v1426_v38  ;;  %v1435_v52 = vadd.f32 %v1434_v16, %v1433_v48  ;;  %v1442_v39 = vadd.f32 %v1441_v17, %v1440_v28  ;;  %v1449_v15 = vadd.f32 %v1448_v19, %v1447_v44 }
 0x421   : > { %8742 = vst [vmem:[#allocation43_spill] sm:$0xff] %v6260_v36  ;;  %v1415_v13 = vrot.slane %v1414_v18, 2  ;;  %v1456_v54 = vadd.f32 %v1455_v20, %v1454_v27  ;;  %v1463_v36 = vadd.f32 %v1462_v63, %v1461_v0  ;;  %v1422_v35 = vrot.slane %v1421_v14, 2 }
 0x422   : > { %v1429_v34 = vrot.slane %v1428_v3, 2  ;;  %v1436_v10 = vrot.slane %v1435_v52, 2  ;;  %v1443_v9 = vrot.slane %v1442_v39, 2  ;;  %v1450_v7 = vrot.slane %v1449_v15, 2 }
 0x423   : > { %v1416_v8 = vadd.f32 %v1415_v13, %v1414_v18  ;;  %v1457_v30 = vrot.slane %v1456_v54, 2  ;;  %v1464_v62 = vrot.slane %v1463_v36, 2  ;;  %v1423_v37 = vadd.f32 %v1422_v35, %v1421_v14  ;;  %v8748_v13 = vld [vmem:[#allocation33_spill] sm:$0xff] }
 0x424   : > { %v1430_v29 = vadd.f32 %v1429_v34, %v1428_v3  ;;  %v1437_v61 = vadd.f32 %v1436_v10, %v1435_v52  ;;  %v1444_v59 = vadd.f32 %v1443_v9, %v1442_v39  ;;  %v1451_v38 = vadd.f32 %v1450_v7, %v1449_v15  ;;  %v8749_v15 = vld [vmem:[#allocation34_spill] sm:$0xff] }
 0x425   : > { %v1417_v6 = vrot.slane %v1416_v8, 1  ;;  %v1458_v48 = vadd.f32 %v1457_v30, %v1456_v54  ;;  %v1465_v28 = vadd.f32 %v1464_v62, %v1463_v36  ;;  %v1424_v1 = vrot.slane %v1423_v37, 1 }
 0x426   : > { %v1431_v44 = vrot.slane %v1430_v29, 1  ;;  %v1438_v27 = vrot.slane %v1437_v61, 1  ;;  %v1445_v0 = vrot.slane %v1444_v59, 1  ;;  %v6279_v2 = vadd.f32 %v1396_v11, %v6228_v4 }
 0x427   : > { %v1452_v16 = vrot.slane %v1451_v38, 1  ;;  %v1459_v17 = vrot.slane %v1458_v48, 1  ;;  %v1466_v18 = vrot.slane %v1465_v28, 1  ;;  %v6282_v19 = vadd.f32 %v1403_v12, %v6230_v53 }
 0x428   : > { %v6285_v10 = vadd.f32 %v1410_v33, %v6232_v60  ;;  %v6287_v9 = vadd.f32 %v1417_v6, %v1416_v8  ;;  %v6289_v54 = vadd.f32 %v1424_v1, %v1423_v37  ;;  %v6291_v62 = vadd.f32 %v1431_v44, %v1430_v29  ;;  %v8750_v37 = vld [vmem:[#allocation35_spill] sm:$0xff] }
 0x429   : > { %v6293_v30 = vadd.f32 %v1438_v27, %v1437_v61  ;;  %v6295_v7 = vadd.f32 %v1445_v0, %v1444_v59  ;;  %v6297_v4 = vadd.f32 %v1452_v16, %v1451_v38  ;;  %v6299_v11 = vadd.f32 %v1459_v17, %v1458_v48 }
 0x42a   : > { %v6301_v34 = vadd.f32 %v1466_v18, %v1465_v28  ;;  %v1468_v53 = vmul.f32 %v5923_v31, %v5857_v5  ;;  %v1469_v60 = vmul.f32 %v6095_v21, %v5895_v24  ;;  %v1470_v8 = vmul.f32 %v5926_v32, %v5857_v5 }
 0x42b   : > { %v1471_v61 = vmul.f32 %v6100_v22, %v5895_v24  ;;  %v1472_v59 = vmul.f32 %v5952_v40, %v5857_v5  ;;  %v1473_v12 = vmul.f32 %v6105_v23, %v5895_v24  ;;  %v1474_v33 = vmul.f32 %v5957_v41, %v5857_v5  ;;  %v8743_v40 = vld [vmem:[#allocation30_spill] sm:$0xff]  ;;  %v8744_v23 = vld [vmem:[#allocation28_spill] sm:$0xff]  ;;  %v8745_v41 = vld [vmem:[#allocation31_spill] sm:$0xff] }
 0x42c   : > { %v1475_v31 = vmul.f32 %v6110_v25, %v5895_v24  ;;  %v1476_v21 = vmul.f32 %v5962_v42, %v5857_v5  ;;  %v1477_v32 = vmul.f32 %v6115_v26, %v5895_v24  ;;  %v1478_v22 = vmul.f32 %v5967_v43, %v5857_v5  ;;  %v8746_v25 = vld [vmem:[#allocation29_spill] sm:$0xff]  ;;  %v8747_v42 = vld [vmem:[#allocation32_spill] sm:$0xff] }
 0x42d   : > { %v1479_v35 = vmul.f32 %v8743_v40, %v5895_v24  ;;  %v1480_v36 = vmul.f32 %v8744_v23, %v5857_v5  ;;  %v1481_v20 = vmul.f32 %v8745_v41, %v5895_v24  ;;  %v1482_v63 = vmul.f32 %v8746_v25, %v5857_v5 }
 0x42e   : > { %v1483_v14 = vmul.f32 %v8747_v42, %v5895_v24  ;;  %v6337_v26 = vmul.f32 %v6135_v45, %v5857_v5  ;;  %v6341_v43 = vmul.f32 %v6140_v46, %v5895_v24  ;;  %v6345_v3 = vmul.f32 %v6145_v47, %v5857_v5 }
 0x42f   : > { %v6349_v52 = vmul.f32 %v6150_v49, %v5895_v24  ;;  %v6353_v39 = vmul.f32 %v6155_v50, %v5857_v5  ;;  %v6357_v45 = vmul.f32 %v6160_v51, %v5895_v24  ;;  %v6361_v46 = vmul.f32 %v6165_v55, %v5857_v5 }
 0x430   : > { %v6365_v47 = vmul.f32 %v6170_v56, %v5895_v24  ;;  %v6369_v49 = vmul.f32 %v6175_v57, %v5857_v5  ;;  %v6373_v50 = vmul.f32 %v6180_v58, %v5895_v24  ;;  %v6377_v51 = vmul.f32 %v8748_v13, %v5857_v5 }
 0x431   : > { %v6381_v55 = vmul.f32 %v8749_v15, %v5895_v24  ;;  %v6385_v56 = vmul.f32 %v8750_v37, %v5857_v5  ;;  %v1500_v29 = vadd.f32 %v1469_v60, %v1468_v53  ;;  %v1507_v6 = vadd.f32 %v1471_v61, %v1470_v8 }
 0x432   : > { %v1514_v57 = vadd.f32 %v1473_v12, %v1472_v59  ;;  %v1521_v38 = vadd.f32 %v1475_v31, %v1474_v33  ;;  %v1528_v48 = vadd.f32 %v1477_v32, %v1476_v21  ;;  %v1535_v58 = vadd.f32 %v1479_v35, %v1478_v22 }
 0x433   : > { %v1501_v28 = vrot.slane %v1500_v29, 4  ;;  %v1542_v1 = vadd.f32 %v1481_v20, %v1480_v36  ;;  %v1549_v44 = vadd.f32 %v1483_v14, %v1482_v63  ;;  %v1508_v27 = vrot.slane %v1507_v6, 4 }
 0x434   : > { %v1515_v0 = vrot.slane %v1514_v57, 4  ;;  %v1522_v16 = vrot.slane %v1521_v38, 4  ;;  %v1529_v17 = vrot.slane %v1528_v48, 4  ;;  %v1536_v40 = vrot.slane %v1535_v58, 4 }
 0x435   : > { %v1502_v18 = vadd.f32 %v1501_v28, %v1500_v29  ;;  %v1543_v23 = vrot.slane %v1542_v1, 4  ;;  %v1550_v41 = vrot.slane %v1549_v44, 4  ;;  %v1509_v25 = vadd.f32 %v1508_v27, %v1507_v6  ;;  %v8752_v27 = vld [vmem:[#allocation37_spill] sm:$0xff] }
 0x436   : > { %v1516_v42 = vadd.f32 %v1515_v0, %v1514_v57  ;;  %v1523_v13 = vadd.f32 %v1522_v16, %v1521_v38  ;;  %v1530_v53 = vadd.f32 %v1529_v17, %v1528_v48  ;;  %v1537_v8 = vadd.f32 %v1536_v40, %v1535_v58  ;;  %v8753_v16 = vld [vmem:[#allocation38_spill] sm:$0xff] }
 0x437   : > { %v1503_v60 = vrot.slane %v1502_v18, 2  ;;  %v1544_v61 = vadd.f32 %v1543_v23, %v1542_v1  ;;  %v1551_v59 = vadd.f32 %v1550_v41, %v1549_v44  ;;  %v1510_v12 = vrot.slane %v1509_v25, 2  ;;  %v8751_v1 = vld [vmem:[#allocation36_spill] sm:$0xff] }
 0x438   : > { %v1517_v33 = vrot.slane %v1516_v42, 2  ;;  %v1524_v31 = vrot.slane %v1523_v13, 2  ;;  %v1531_v21 = vrot.slane %v1530_v53, 2  ;;  %v1538_v22 = vrot.slane %v1537_v8, 2 }
 0x439   : > { %v1504_v32 = vadd.f32 %v1503_v60, %v1502_v18  ;;  %v1545_v35 = vrot.slane %v1544_v61, 2  ;;  %v1552_v36 = vrot.slane %v1551_v59, 2  ;;  %v1511_v20 = vadd.f32 %v1510_v12, %v1509_v25 }
 0x43a   : > { %v1518_v63 = vadd.f32 %v1517_v33, %v1516_v42  ;;  %v1525_v14 = vadd.f32 %v1524_v31, %v1523_v13  ;;  %v1532_v15 = vadd.f32 %v1531_v21, %v1530_v53  ;;  %v6387_v29 = vadd.f32 %v1538_v22, %v1537_v8 }
 0x43b   : > { %v1505_v37 = vrot.slane %v1504_v32, 1  ;;  %v6389_v6 = vadd.f32 %v1545_v35, %v1544_v61  ;;  %v6391_v57 = vadd.f32 %v1552_v36, %v1551_v59  ;;  %v1512_v38 = vrot.slane %v1511_v20, 1 }
 0x43c   : > { %v1519_v48 = vrot.slane %v1518_v63, 1  ;;  %v1526_v28 = vrot.slane %v1525_v14, 1  ;;  %v1533_v58 = vrot.slane %v1532_v15, 1  ;;  %v1497_v44 = vmul.f32 %v8751_v1, %v5895_v24 }
 0x43d   : > { %v1498_v0 = vmul.f32 %v8752_v27, %v5857_v5  ;;  %v1499_v17 = vmul.f32 %v8753_v16, %v5895_v24  ;;  %v6399_v18 = vadd.f32 %v1505_v37, %v1504_v32  ;;  %v6401_v40 = vadd.f32 %v1512_v38, %v1511_v20 }
 0x43e   : > { %v1540_v23 = vrot.slane %v6387_v29, 1  ;;  %v1547_v41 = vrot.slane %v6389_v6, 1  ;;  %v1554_v25 = vrot.slane %v6391_v57, 1  ;;  %v6406_v42 = vadd.f32 %v1519_v48, %v1518_v63 }
 0x43f   : > { %v6408_v13 = vadd.f32 %v1526_v28, %v1525_v14  ;;  %v6410_v53 = vadd.f32 %v1533_v58, %v1532_v15  ;;  %v1556_v60 = vadd.f32 %v6341_v43, %v6337_v26  ;;  %v1563_v8 = vadd.f32 %v6349_v52, %v6345_v3 }
 0x440   : > { %v1570_v61 = vadd.f32 %v6357_v45, %v6353_v39  ;;  %v1577_v59 = vadd.f32 %v6365_v47, %v6361_v46  ;;  %v1584_v12 = vadd.f32 %v6373_v50, %v6369_v49  ;;  %v1591_v31 = vadd.f32 %v6381_v55, %v6377_v51 }
 0x441   : > { %v1557_v33 = vrot.slane %v1556_v60, 4  ;;  %v1598_v21 = vadd.f32 %v1497_v44, %v6385_v56  ;;  %v1605_v32 = vadd.f32 %v1499_v17, %v1498_v0  ;;  %v1564_v26 = vrot.slane %v1563_v8, 4 }
 0x442   : > { %v1571_v43 = vrot.slane %v1570_v61, 4  ;;  %v1578_v22 = vrot.slane %v1577_v59, 4  ;;  %v1585_v3 = vrot.slane %v1584_v12, 4  ;;  %v1592_v35 = vrot.slane %v1591_v31, 4 }
 0x443   : > { %v1558_v52 = vadd.f32 %v1557_v33, %v1556_v60  ;;  %v1599_v39 = vrot.slane %v1598_v21, 4  ;;  %v1606_v45 = vrot.slane %v1605_v32, 4  ;;  %v1565_v36 = vadd.f32 %v1564_v26, %v1563_v8 }
 0x444   : > { %v1572_v46 = vadd.f32 %v1571_v43, %v1570_v61  ;;  %v1579_v47 = vadd.f32 %v1578_v22, %v1577_v59  ;;  %v1586_v20 = vadd.f32 %v1585_v3, %v1584_v12  ;;  %v1593_v50 = vadd.f32 %v1592_v35, %v1591_v31 }
 0x445   : > { %v1559_v49 = vrot.slane %v1558_v52, 2  ;;  %v1600_v63 = vadd.f32 %v1599_v39, %v1598_v21  ;;  %v1607_v14 = vadd.f32 %v1606_v45, %v1605_v32  ;;  %v1566_v51 = vrot.slane %v1565_v36, 2 }
 0x446   : > { %v1573_v55 = vrot.slane %v1572_v46, 2  ;;  %v1580_v56 = vrot.slane %v1579_v47, 2  ;;  %v1587_v15 = vrot.slane %v1586_v20, 2  ;;  %v1594_v38 = vrot.slane %v1593_v50, 2 }
 0x447   : > { %v1560_v37 = vadd.f32 %v1559_v49, %v1558_v52  ;;  %v1601_v48 = vrot.slane %v1600_v63, 2  ;;  %v1608_v28 = vrot.slane %v1607_v14, 2  ;;  %v1567_v58 = vadd.f32 %v1566_v51, %v1565_v36  ;;  %v8759_v49 = vld [vmem:[#allocation16_spill] sm:$0xff]  ;;  %v8762_v51 = vld [vmem:[#allocation43_spill] sm:$0xff] }
 0x448   : > { %v1574_v1 = vadd.f32 %v1573_v55, %v1572_v46  ;;  %v1581_v44 = vadd.f32 %v1580_v56, %v1579_v47  ;;  %v1588_v27 = vadd.f32 %v1587_v15, %v1586_v20  ;;  %v1595_v16 = vadd.f32 %v1594_v38, %v1593_v50  ;;  %v8757_v46 = vld [vmem:[#allocation15_spill] sm:$0xff]  ;;  %v8758_v47 = vld [vmem:[#allocation41_spill] sm:$0xff]  ;;  %v8760_v50 = vld [vmem:[#allocation42_spill] sm:$0xff] }
 0x449   : > { %v1561_v0 = vrot.slane %v1560_v37, 1  ;;  %v1602_v17 = vadd.f32 %v1601_v48, %v1600_v63  ;;  %v1609_v60 = vadd.f32 %v1608_v28, %v1607_v14  ;;  %v1568_v8 = vrot.slane %v1567_v58, 1  ;;  %v8761_v14 = vld [vmem:[#allocation17_spill] sm:$0xff]  ;;  %v8763_v56 = vld [vmem:[#allocation18_spill] sm:$0xff]  ;;  %v8765_v48 = vld [vmem:[#allocation20_spill] sm:$0xff] }
 0x44a   : > { %v1575_v61 = vrot.slane %v1574_v1, 1  ;;  %v1582_v59 = vrot.slane %v1581_v44, 1  ;;  %v1589_v12 = vrot.slane %v1588_v27, 1  ;;  %v6426_v33 = vadd.f32 %v1540_v23, %v6387_v29 }
 0x44b   : > { %v1596_v31 = vrot.slane %v1595_v16, 1  ;;  %v1603_v21 = vrot.slane %v1602_v17, 1  ;;  %v1610_v32 = vrot.slane %v1609_v60, 1  ;;  %v6429_v26 = vadd.f32 %v1547_v41, %v6389_v6  ;;  %v8754_v6 = vld [vmem:[#allocation39_spill] sm:$0xff]  ;;  %v8755_v41 = vld [vmem:[#allocation14_spill] sm:$0xff] }
 0x44c   : > { %v6432_v43 = vadd.f32 %v1554_v25, %v6391_v57  ;;  %v6434_v22 = vadd.f32 %v1561_v0, %v1560_v37  ;;  %v6436_v3 = vadd.f32 %v1568_v8, %v1567_v58  ;;  %v6438_v52 = vadd.f32 %v1575_v61, %v1574_v1  ;;  %v8756_v25 = vld [vmem:[#allocation40_spill] sm:$0xff]  ;;  %v8764_v37 = vld [vmem:[#allocation19_spill] sm:$0xff]  ;;  %v8766_v1 = vld [vmem:[#allocation21_spill] sm:$0xff] }
 0x44d   : > { %v6440_v35 = vadd.f32 %v1582_v59, %v1581_v44  ;;  %v6442_v39 = vadd.f32 %v1589_v12, %v1588_v27  ;;  %v6444_v29 = vadd.f32 %v1596_v31, %v1595_v16  ;;  %v6446_v23 = vadd.f32 %v1603_v21, %v1602_v17  ;;  %v8767_v27 = vld [vmem:[#allocation22_spill] sm:$0xff]  ;;  %v8768_v16 = vld [vmem:[#allocation23_spill] sm:$0xff]  ;;  %v8770_v8 = vld [vmem:[#allocation25_spill] sm:$0xff] }
 0x44e   : > { %v6448_v45 = vadd.f32 %v1610_v32, %v1609_v60  ;;  %v1628_v57 = vmul.f32 %v8754_v6, %v5857_v5  ;;  %v1629_v36 = vmul.f32 %v8756_v25, %v8755_v41  ;;  %v1630_v20 = vmul.f32 %v8758_v47, %v8757_v46  ;;  %v8769_v60 = vld [vmem:[#allocation24_spill] sm:$0xff]  ;;  %v8771_v61 = vld [vmem:[#allocation26_spill] sm:$0xff]  ;;  %v8772_v59 = vld [vmem:[#allocation27_spill] sm:$0xff] }
 0x44f   : > { %v1631_v63 = vmul.f32 %v8760_v50, %v8759_v49  ;;  %v1632_v55 = vmul.f32 %v8762_v51, %v8761_v14  ;;  %v1633_v15 = vmul.f32 %v6279_v2, %v8763_v56  ;;  %v1634_v38 = vmul.f32 %v6282_v19, %v8764_v37 }
 0x450   : > { %v1635_v28 = vmul.f32 %v6285_v10, %v8765_v48  ;;  %v1636_v58 = vmul.f32 %v6287_v9, %v5895_v24  ;;  %v1637_v44 = vmul.f32 %v6289_v54, %v8766_v1  ;;  %v1638_v0 = vmul.f32 %v6291_v62, %v8767_v27 }
 0x451   : > { %v1639_v17 = vmul.f32 %v6293_v30, %v8768_v16  ;;  %v1640_v2 = vmul.f32 %v6295_v7, %v8769_v60  ;;  %v1641_v19 = vmul.f32 %v6297_v4, %v8770_v8  ;;  %v1642_v10 = vmul.f32 %v6299_v11, %v8771_v61 }
 0x452   : > { %v1643_v9 = vmul.f32 %v6301_v34, %v8772_v59  ;;  %v1644_v12 = vadd.f32 1.0, %v1628_v57  ;;  %v1645_v54 = vadd.f32 1.0, %v1629_v36  ;;  %v1646_v31 = vadd.f32 1.0, %v1630_v20 }
 0x453   : > { %v1647_v21 = vadd.f32 1.0, %v1631_v63  ;;  %v1648_v62 = vadd.f32 1.0, %v1632_v55  ;;  %v1649_v32 = vadd.f32 1.0, %v1633_v15  ;;  %v1650_v6 = vadd.f32 1.0, %v1634_v38 }
 0x454   : > { %v1651_v30 = vadd.f32 1.0, %v1635_v28  ;;  %v1652_v25 = vadd.f32 1.0, %v1636_v58  ;;  %v1653_v47 = vadd.f32 1.0, %v1637_v44  ;;  %v1654_v7 = vadd.f32 1.0, %v1638_v0 }
 0x455   : > { %v1655_v50 = vadd.f32 1.0, %v1639_v17  ;;  %v1656_v51 = vadd.f32 1.0, %v1640_v2  ;;  %v1657_v4 = vadd.f32 1.0, %v1641_v19  ;;  %v1658_v8 = vadd.f32 1.0, %v1642_v10 }
 0x456   : > { %v1659_v60 = vadd.f32 1.0, %v1643_v9  ;;  %vm1660_vm0 = vcmp.gt.f32.partialorder %v1644_v12, %v6399_v18  ;;  %vm1661_vm1 = vcmp.gt.f32.partialorder %v1645_v54, %v6401_v40  ;;  %vm1662_vm2 = vcmp.gt.f32.partialorder %v1646_v31, %v6406_v42 }
 0x457   : > { %vm1663_vm3 = vcmp.gt.f32.partialorder %v1647_v21, %v6408_v13  ;;  %vm1664_vm4 = vcmp.gt.f32.partialorder %v1648_v62, %v6410_v53  ;;  %vm1665_vm5 = vcmp.gt.f32.partialorder %v1649_v32, %v6426_v33  ;;  %vm1666_vm6 = vcmp.gt.f32.partialorder %v1650_v6, %v6429_v26 }
 0x458   : > { %vm1667_vm7 = vcmp.gt.f32.partialorder %v1651_v30, %v6432_v43  ;;  %vm1668_vm8 = vcmp.gt.f32.partialorder %v1652_v25, %v6434_v22  ;;  %vm1669_vm9 = vcmp.gt.f32.partialorder %v1653_v47, %v6436_v3  ;;  %vm1670_vm10 = vcmp.gt.f32.partialorder %v1654_v7, %v6438_v52 }
 0x459   : > { %vm1671_vm11 = vcmp.gt.f32.partialorder %v1655_v50, %v6440_v35  ;;  %vm1672_vm12 = vcmp.gt.f32.partialorder %v1656_v51, %v6442_v39  ;;  %vm1673_vm13 = vcmp.gt.f32.partialorder %v1657_v4, %v6444_v29  ;;  %vm1674_vm15 = vcmp.gt.f32.partialorder %v1658_v8, %v6446_v23 }
 0x45a   : > { %vm1675_vm14 = vcmp.gt.f32.partialorder %v1659_v60, %v6448_v45  ;;  %v8773_v11 = vmov 0.0  }
 0x45b   : > { %v4926_v34 = vsel %vm1660_vm0, 1.0, %v8773_v11  ;;  %v4927_v57 = vsel %vm1661_vm1, 1.0, %v8773_v11  ;;  %v4928_v36 = vsel %vm1662_vm2, 1.0, %v8773_v11  ;;  %v4929_v20 = vsel %vm1663_vm3, 1.0, %v8773_v11 }
 0x45c   : > { %v4930_v63 = vsel %vm1664_vm4, 1.0, %v8773_v11  ;;  %v4931_v18 = vsel %vm1665_vm5, 1.0, %v8773_v11  ;;  %v4932_v40 = vsel %vm1666_vm6, 1.0, %v8773_v11  ;;  %v4933_v42 = vsel %vm1667_vm7, 1.0, %v8773_v11 }
 0x45d   : > { %v4934_v13 = vsel %vm1668_vm8, 1.0, %v8773_v11  ;;  %v4935_v53 = vsel %vm1669_vm9, 1.0, %v8773_v11  ;;  %v4936_v33 = vsel %vm1670_vm10, 1.0, %v8773_v11  ;;  %v4937_v26 = vsel %vm1671_vm11, 1.0, %v8773_v11 }
 0x45e   : > { %v4938_v43 = vsel %vm1672_vm12, 1.0, %v8773_v11  ;;  %v1724_v55 = vrot.slane %v4927_v57, 7  ;;  %v4939_v22 = vsel %vm1673_vm13, 1.0, %v8773_v11  ;;  %vm8535_vm0 = vcmask 1041409  }
 0x45f   : > { %v1727_v3 = vrot.slane %v4928_v36, 6  ;;  %vm8534_vm1 = vcmask 1042434   ;;  %v1730_v52 = vrot.slane %v4929_v20, 5  ;;  %vm8533_vm2 = vcmask 1043459  }
 0x460   : > { %v1726_v15 = vsel %vm8535_vm0, %v1724_v55, %v4926_v34  ;;  %vm8532_vm3 = vcmask 1044484   ;;  %v4940_v35 = vsel %vm1674_vm15, 1.0, %v8773_v11  ;;  %v1733_v38 = vrot.slane %v4930_v63, 4 }
 0x461   : > { %v1729_v39 = vsel %vm8534_vm1, %v1727_v3, %v1726_v15  ;;  %vm8531_vm4 = vcmask 1045509   ;;  %v4941_v29 = vsel %vm1675_vm14, 1.0, %v8773_v11  ;;  %v1736_v58 = vrot.slane %v4931_v18, 3 }
 0x462   : > { %v1732_v28 = vsel %vm8533_vm2, %v1730_v52, %v1729_v39  ;;  %vm8530_vm5 = vcmask 1046534   ;;  %v1739_v0 = vrot.slane %v4932_v40, 2  ;;  %v1745_v17 = vrot.slane %v4935_v53, 7 }
 0x463   : > { %v1735_v44 = vsel %vm8532_vm3, %v1733_v38, %v1732_v28  ;;  %v1747_v2 = vrot.slane %v4936_v33, 6  ;;  %v1742_v8 = vrot.slane %v4933_v42, 1  ;;  %vm8529_vm6 = vcmask 1047559  }
 0x464   : > { %v1738_v23 = vsel %vm8531_vm4, %v1736_v58, %v1735_v44  ;;  %v1749_v19 = vrot.slane %v4937_v26, 5  ;;  %v1746_v9 = vsel %vm8535_vm0, %v1745_v17, %v4934_v13  ;;  %v1751_v45 = vrot.slane %v4938_v43, 4 }
 0x465   : > { %v1741_v10 = vsel %vm8530_vm5, %v1739_v0, %v1738_v23  ;;  %v1753_v60 = vrot.slane %v4939_v22, 3  ;;  %v1748_v12 = vsel %vm8534_vm1, %v1747_v2, %v1746_v9  ;;  %v1755_v54 = vrot.slane %v4940_v35, 2 }
 0x466   : > { %v1757_v31 = vrot.slane %v4941_v29, 1  ;;  %v1768_v21 = vmul.f32 %v4926_v34, %v5857_v5  ;;  %v1744_v62 = vsel %vm8529_vm6, %v1742_v8, %v1741_v10  ;;  %v1750_v32 = vsel %vm8533_vm2, %v1749_v19, %v1748_v12 }
 0x467   : > { %v1769_v6 = vmul.f32 %v4927_v57, %v8755_v41  ;;  %v1770_v30 = vmul.f32 %v4928_v36, %v8757_v46  ;;  %v1752_v25 = vsel %vm8532_vm3, %v1751_v45, %v1750_v32  ;;  %v1771_v47 = vmul.f32 %v4929_v20, %v8759_v49  ;;  %v8774_v36 = vld [vmem:[#allocation24_spill] sm:$0xff] }
 0x468   : > { %v1772_v7 = vmul.f32 %v4930_v63, %v8761_v14  ;;  %v1773_v50 = vmul.f32 %v4931_v18, %v8763_v56  ;;  %v1754_v51 = vsel %vm8531_vm4, %v1753_v60, %v1752_v25  ;;  %v1774_v4 = vmul.f32 %v4932_v40, %v8764_v37  ;;  %v8775_v37 = vld [vmem:[#allocation25_spill] sm:$0xff] }
 0x469   : > { %v1775_v34 = vmul.f32 %v4933_v42, %v8765_v48  ;;  %v1777_v55 = vmul.f32 %v4935_v53, %v8766_v1  ;;  %v1756_v41 = vsel %vm8530_vm5, %v1755_v54, %v1754_v51  ;;  %v1776_v46 = vmul.f32 %v4934_v13, %v5895_v24 }
 0x46a   : > { %v1778_v57 = vmul.f32 %v4936_v33, %v8767_v27  ;;  %v1779_v49 = vmul.f32 %v4937_v26, %v8768_v16  ;;  %v1758_v14 = vsel %vm8529_vm6, %v1757_v31, %v1756_v41  ;;  %v1780_v56 = vmul.f32 %v4938_v43, %v8774_v36 }
 0x46b   : > { %v1800_v20 = vrot.slane %v1769_v6, 7  ;;  %v1802_v63 = vrot.slane %v1770_v30, 6  ;;  %v1761_v18 = vadd.f32 %v1758_v14, %v1744_v62  ;;  %v1781_v40 = vmul.f32 %v4939_v22, %v8775_v37 }
 0x46c   : > { %v1782_v48 = vmul.f32 %v4940_v35, %v8771_v61  ;;  %v1783_v1 = vmul.f32 %v4941_v29, %v8772_v59  ;;  %v1804_v13 = vrot.slane %v1771_v47, 5  ;;  %v1806_v53 = vrot.slane %v1772_v7, 4 }
 0x46d   : > { %v1801_v42 = vsel %vm8535_vm0, %v1800_v20, %v1768_v21  ;;  %v1814_v27 = vrot.slane %v1777_v55, 7  ;;  %v1762_v33 = vrot.slane %v1761_v18, 4  ;;  %v1808_v26 = vrot.slane %v1773_v50, 3 }
 0x46e   : > { %v1803_v16 = vsel %vm8534_vm1, %v1802_v63, %v1801_v42  ;;  %v1816_v3 = vrot.slane %v1778_v57, 6  ;;  %v1810_v15 = vrot.slane %v1774_v4, 2  ;;  %v1818_v22 = vrot.slane %v1779_v49, 5  ;;  %v559_v42 = vld [vmem:[%s8646_s4 + $0x18] sm:$0xff] }
 0x46f   : > { %v1805_v43 = vsel %vm8533_vm2, %v1804_v13, %v1803_v16  ;;  %v1815_v52 = vsel %vm8535_vm0, %v1814_v27, %v1776_v46  ;;  %v1763_v39 = vadd.f32 %v1762_v33, %v1761_v18  ;;  %v1820_v35 = vrot.slane %v1780_v56, 4  ;;  %v8778_v18 = vld [vmem:[#allocation12_spill] sm:$0xff]  ;;  %v1920_v13 = vpop.permute.xlu0 %1919  ;;  %v1925_v16 = vpop.permute.xlu2 %1924 }
 0x470   : > { %v1807_v61 = vsel %vm8532_vm3, %v1806_v53, %v1805_v43  ;;  %v1817_v59 = vsel %vm8534_vm1, %v1816_v3, %v1815_v52  ;;  %v1822_v28 = vrot.slane %v1781_v40, 3  ;;  %v1824_v17 = vrot.slane %v1782_v48, 2  ;;  %v8779_v40 = vld [vmem:[#allocation13_spill] sm:$0xff] }
 0x471   : > { %v1809_v38 = vsel %vm8531_vm4, %v1808_v26, %v1807_v61  ;;  %v1819_v29 = vsel %vm8533_vm2, %v1818_v22, %v1817_v59  ;;  %v1764_v58 = vrot.slane %v1763_v39, 2  ;;  %v1812_v2 = vrot.slane %v1775_v34, 1 }
 0x472   : > { %v1811_v44 = vsel %vm8530_vm5, %v1810_v15, %v1809_v38  ;;  %v1821_v0 = vsel %vm8532_vm3, %v1820_v35, %v1819_v29  ;;  %v1826_v8 = vrot.slane %v1783_v1, 1  ;;  %v550_v1 = vld [vmem:[%s8645_s3 + $0x10] sm:$0xff]  ;;  %vm8780_vm11 = vcmask 130048  }
 0x473   : > { %v1823_v23 = vsel %vm8531_vm4, %v1822_v28, %v1821_v0  ;;  %v1765_v19 = vadd.f32 %v1764_v58, %v1763_v39  ;;  %v1813_v9 = vsel %vm8529_vm6, %v1812_v2, %v1811_v44  ;;  %vm8781_vm12 = vmmov %vm8780_vm11 }
 0x474   : > { %v1825_v10 = vsel %vm8530_vm5, %v1824_v17, %v1823_v23  ;;  %vm8782_vm13 = vmmov %vm8780_vm11 }
 0x475   : > { %v1827_v45 = vsel %vm8529_vm6, %v1826_v8, %v1825_v10  ;;  %v1766_v60 = vrot.slane %v1765_v19, 1  ;;  %vm8783_vm15 = vmmov %vm8780_vm11 }
 0x476   : > { %v1830_v12 = vadd.f32 %v1827_v45, %v1813_v9 }
 0x477   : > { %v1767_v54 = vadd.f32 %v1766_v60, %v1765_v19  ;;  %v1886_v60 = vpop.permute.xlu1 %1885 }
 0x478   : > { %v1831_v31 = vrot.slane %v1830_v12, 4 }
 0x479   : > { %5198 = vrcp.f32 %v1767_v54  ;;  %v1849_v7 = vand.u32 2147483648, %v1767_v54  ;;  %v1847_v4 = vand.u32 2147483647, %v1767_v54  ;;  %vm1843_vm8 = vweird.f32 %v1767_v54 }
 0x47a   : > { %v1832_v21 = vadd.f32 %v1831_v31, %v1830_v12 }
 0x47b   : > { %v1850_v55 = vor.u32 1.1754944e-38, %v1849_v7  ;;  %vm1848_vm10 = vcmp.eq.f32.partialorder %v1847_v4, 8.507059e+37  ;;  %v586_v7 = vld [vmem:[%s8469_s7 + $0x30] sm:$0xff]  ;;  %v611_v4 = vld [vmem:[%s8470_s8 + $0x38] sm:$0xff] }
 0x47c   : > { %v1833_v62 = vrot.slane %v1832_v21, 2 }
 0x47e   : > { %v1834_v32 = vadd.f32 %v1833_v62, %v1832_v21  ;;  %v1881_v62 = vpop.permute.xlu2 %1880 }
 0x47f   : > { %v5199_v6 = vpop.eup %5198 }
 0x480   : > { %v1835_v30 = vrot.slane %v1834_v32, 1  ;;  %v1839_v25 = vmul.f32 %v5199_v6, %v1767_v54  ;;  %vm1844_vm7 = vweird.f32 %v5199_v6 }
 0x481   : > { %vm1845_vm9 = vmor %vm1843_vm8, %vm1844_vm7 }
 0x482   : > { %v1840_v47 = vsub.f32 1.0, %v1839_v25  ;;  %v1836_v50 = vadd.f32 %v1835_v30, %v1834_v32 }
 0x484   : > { %v1841_v51 = vmul.f32 %v5199_v6, %v1840_v47  ;;  %v4942_v41 = vadd.f32 -1.0, %v1836_v50  ;;  %v610_v50 = vld [vmem:[%s8470_s8 + $0x30] sm:$0xff] }
 0x486   : > { %v1842_v34 = vadd.f32 %v5199_v6, %v1841_v51  ;;  %v587_v51 = vld [vmem:[%s8469_s7 + $0x38] sm:$0xff] }
 0x488   : > { %v1846_v46 = vsel %vm1845_vm9, %v5199_v6, %v1842_v34  ;;  %v2038_v34 = vpop.permute.xlu1 %2037 }
 0x489   : > { %v1851_v57 = vsel %vm1848_vm10, %v1850_v55, %v1846_v46 }
 0x48a   : > { %v1852_v49 = vmul.f32 %v4942_v41, %v1851_v57  ;;  %v2043_v57 = vpop.permute.xlu0 %2042 }
 0x48c   : > { %v1853_v14 = vperm.slane %v1852_v49, 0 }
 0x48e   : > { %v1855_v36 = vsub.f32 %v5895_v24, %v1853_v14  ;;  %v1854_v56 = vsub.f32 %v5857_v5, %v1853_v14  ;;  %v558_v5 = vld [vmem:[%s8646_s4 + $0x10] sm:$0xff]  ;;  %v551_v24 = vld [vmem:[%s8645_s3 + $0x18] sm:$0xff] }
 0x490   : > { %v6592_v20 = vmax.f32 %v1855_v36, 0.0  ;;  %v6594_v63 = vmax.f32 %v1854_v56, 0.0 }
 0x492   : > { %8776 = vst [vmem:[#allocation30_spill] sm:$0xff] %v6592_v20  ;;  %v1877_v37 = vmul.f32 %v6592_v20, %v8778_v18  ;;  %v1876_v48 = vmul.f32 %v6594_v63, %v8779_v40 }
 0x493   : > { %8777 = vst [vmem:[#allocation28_spill] sm:$0xff] %v6594_v63 }
 0x494   : > { %1908 = vmatpush.msra.mxu1 %v1877_v37  ;;  %1947 = vmatpush.msra.mxu2 %v1877_v37 }
 0x496   : > { %1909 = vmatpush.msra.mxu1 %v1876_v48  ;;  %1948 = vmatpush.msra.mxu2 %v1876_v48 }
 0x497   : > { %4943 = vmatmul.msk.f32.vlgmr.msra.gmra.mxu1 %vm8780_vm11, %v550_v1  ;;  %4945 = vmatmul.msk.f32.vlgmr.msra.gmra.mxu2 %vm8781_vm12, %v558_v5 }
 0x49f   : > { %4944 = vmatmul.msk.f32.gmra.mxu1 %vm8782_vm13, %v551_v24  ;;  %4946 = vmatmul.msk.f32.gmra.mxu2 %vm8783_vm15, %v559_v42 }
 0x514   : > { %v1911_v38 = vpop.f32.mrf.mxu1 }
 0x515   : > { %v1912_v30 = vadd.f32 %v1911_v38, %v1881_v62 }
 0x51a   : > { %v1950_v53 = vpop.f32.mrf.mxu2 }
 0x51b   : > { %v1951_v27 = vadd.f32 %v1950_v53, %v1920_v13 }
 0x51c   : > { %v1914_v10 = vpop.f32.mrf.mxu1 }
 0x51d   : > { %v4947_v33 = vmul.f32 -1.442695, %v1951_v27  ;;  %v1915_v31 = vadd.f32 %v1914_v10, %v1886_v60  ;;  %v588_v60 = vld [vmem:[%s8469_s7 + $0x40] sm:$0xff] }
 0x51f   : > { %5200 = vpow2.f32 %v4947_v33 }
 0x522   : > { %v1953_v26 = vpop.f32.mrf.mxu2 }
 0x523   : > { %v1954_v3 = vadd.f32 %v1953_v26, %v1925_v16 }
 0x525   : > { %v5201_v43 = vpop.eup %5200  ;;  %v4948_v15 = vmul.f32 -1.442695, %v1954_v3 }
 0x526   : > { %v1962_v52 = vadd.f32 1.0, %v5201_v43 }
 0x527   : > { %5202 = vpow2.f32 %v4948_v15 }
 0x528   : > { %5204 = vrcp.f32 %v1962_v52  ;;  %vm1969_vm7 = vweird.f32 %v1962_v52  ;;  %v1975_v2 = vand.u32 2147483648, %v1962_v52  ;;  %v1973_v19 = vand.u32 2147483647, %v1962_v52 }
 0x52a   : > { %v1976_v54 = vor.u32 1.1754944e-38, %v1975_v2  ;;  %vm1974_vm13 = vcmp.eq.f32.partialorder %v1973_v19, 8.507059e+37 }
 0x52d   : > { %v5203_v22 = vpop.eup %5202 }
 0x52e   : > { %v5205_v39 = vpop.eup %5204  ;;  %v1963_v61 = vadd.f32 1.0, %v5203_v22 }
 0x52f   : > { %v1965_v59 = vmul.f32 %v5205_v39, %v1962_v52  ;;  %vm1970_vm14 = vweird.f32 %v5205_v39 }
 0x530   : > { %5206 = vrcp.f32 %v1963_v61  ;;  %v1990_v17 = vand.u32 2147483648, %v1963_v61  ;;  %v1988_v8 = vand.u32 2147483647, %v1963_v61  ;;  %vm1971_vm9 = vmor %vm1969_vm7, %vm1970_vm14  ;;  %vm1984_vm10 = vweird.f32 %v1963_v61 }
 0x531   : > { %v1966_v35 = vsub.f32 1.0, %v1965_v59  ;;  %vm8784_vm14 = vmmov %vm8783_vm15  ;;  %v1999_v59 = vpop.permute.xlu0 %1998 }
 0x532   : > { %v1991_v12 = vor.u32 1.1754944e-38, %v1990_v17  ;;  %vm1989_vm12 = vcmp.eq.f32.partialorder %v1988_v8, 8.507059e+37  ;;  %vm8785_vm7 = vmmov %vm8784_vm14 }
 0x533   : > { %v1967_v29 = vmul.f32 %v5205_v39, %v1966_v35 }
 0x535   : > { %v1968_v0 = vadd.f32 %v5205_v39, %v1967_v29 }
 0x536   : > { %v5207_v28 = vpop.eup %5206 }
 0x537   : > { %v1980_v58 = vmul.f32 %v5207_v28, %v1963_v61  ;;  %vm1985_vm8 = vweird.f32 %v5207_v28  ;;  %v1972_v45 = vsel %vm1971_vm9, %v5205_v39, %v1968_v0 }
 0x538   : > { %vm1986_vm11 = vmor %vm1984_vm10, %vm1985_vm8  ;;  %v1977_v6 = vsel %vm1974_vm13, %v1976_v54, %v1972_v45  ;;  %v589_v54 = vld [vmem:[%s8469_s7 + $0x48] sm:$0xff] }
 0x539   : > { %v1981_v44 = vsub.f32 1.0, %v1980_v58  ;;  %v6620_v47 = vmul.f32 %v1977_v6, %v1912_v30  ;;  %vm8786_vm8 = vmmov %vm8785_vm7  ;;  %v2004_v58 = vpop.permute.xlu2 %2003  ;;  %v2165_v30 = vpop.permute.xlu1 %2164 }
 0x53b   : > { %v1982_v23 = vmul.f32 %v5207_v28, %v1981_v44 }
 0x53d   : > { %v1983_v9 = vadd.f32 %v5207_v28, %v1982_v23 }
 0x53f   : > { %v1987_v21 = vsel %vm1986_vm11, %v5207_v28, %v1983_v9 }
 0x540   : > { %v1992_v32 = vsel %vm1989_vm12, %v1991_v12, %v1987_v21  ;;  %v612_v12 = vld [vmem:[%s8470_s8 + $0x40] sm:$0xff] }
 0x541   : > { %v6616_v25 = vmul.f32 %v1992_v32, %v1915_v31  ;;  %v613_v31 = vld [vmem:[%s8470_s8 + $0x48] sm:$0xff]  ;;  %v2160_v21 = vpop.permute.xlu2 %2159 }
 0x543   : > { %2026 = vmatpush.msra.mxu3 %v6616_v25  ;;  %2065 = vmatpush.msrb.mxu0 %v6616_v25 }
 0x545   : > { %2027 = vmatpush.msra.mxu3 %v6620_v47  ;;  %2066 = vmatpush.msrb.mxu0 %v6620_v47 }
 0x546   : > { %4949 = vmatmul.msk.f32.vlgmr.msra.gmra.mxu3 %vm8783_vm15, %v586_v7  ;;  %4951 = vmatmul.msk.f32.vlgmr.msrb.gmra.mxu0 %vm8784_vm14, %v610_v50 }
 0x54e   : > { %4950 = vmatmul.msk.f32.gmra.mxu3 %vm8785_vm7, %v587_v51  ;;  %4952 = vmatmul.msk.f32.gmra.mxu0 %vm8786_vm8, %v611_v4 }
 0x5c3   : > { %v2068_v55 = vpop.f32.mrf.mxu0 }
 0x5c4   : > { %v2069_v41 = vadd.f32 %v2068_v55, %v2038_v34 }
 0x5c6   : > { %v4953_v46 = vmul.f32 -1.442695, %v2069_v41 }
 0x5c8   : > { %5208 = vpow2.f32 %v4953_v46 }
 0x5c9   : > { %v2029_v13 = vpop.f32.mrf.mxu3 }
 0x5ca   : > { %v2030_v29 = vadd.f32 %v2029_v13, %v1999_v59 }
 0x5cb   : > { %v2071_v49 = vpop.f32.mrf.mxu0 }
 0x5cc   : > { %v2072_v14 = vadd.f32 %v2071_v49, %v2043_v57 }
 0x5ce   : > { %v5209_v36 = vpop.eup %5208  ;;  %v4954_v56 = vmul.f32 -1.442695, %v2072_v14 }
 0x5cf   : > { %v2080_v37 = vadd.f32 1.0, %v5209_v36 }
 0x5d0   : > { %5210 = vpow2.f32 %v4954_v56 }
 0x5d1   : > { %5212 = vrcp.f32 %v2080_v37  ;;  %v2093_v16 = vand.u32 2147483648, %v2080_v37  ;;  %vm2087_vm10 = vweird.f32 %v2080_v37  ;;  %v2091_v26 = vand.u32 2147483647, %v2080_v37  ;;  %v2032_v38 = vpop.f32.mrf.mxu3 }
 0x5d2   : > { %v2033_v17 = vadd.f32 %v2032_v38, %v2004_v58  ;;  %v590_v58 = vld [vmem:[%s8469_s7 + $0x50] sm:$0xff] }
 0x5d3   : > { %v2094_v52 = vor.u32 1.1754944e-38, %v2093_v16  ;;  %vm2092_vm12 = vcmp.eq.f32.partialorder %v2091_v26, 8.507059e+37 }
 0x5d6   : > { %v5211_v48 = vpop.eup %5210 }
 0x5d7   : > { %v5213_v1 = vpop.eup %5212  ;;  %v2081_v5 = vadd.f32 1.0, %v5211_v48 }
 0x5d8   : > { %v2083_v24 = vmul.f32 %v5213_v1, %v2080_v37  ;;  %vm2088_vm9 = vweird.f32 %v5213_v1 }
 0x5d9   : > { %5214 = vrcp.f32 %v2081_v5  ;;  %vm2089_vm11 = vmor %vm2087_vm10, %vm2088_vm9  ;;  %v2108_v22 = vand.u32 2147483648, %v2081_v5  ;;  %v2106_v61 = vand.u32 2147483647, %v2081_v5  ;;  %vm2102_vm15 = vweird.f32 %v2081_v5 }
 0x5da   : > { %v2084_v42 = vsub.f32 1.0, %v2083_v24  ;;  %vm8787_vm9 = vmmov %vm8786_vm8 }
 0x5db   : > { %v2109_v44 = vor.u32 1.1754944e-38, %v2108_v22  ;;  %vm2107_vm7 = vcmp.eq.f32.partialorder %v2106_v61, 8.507059e+37  ;;  %vm8788_vm10 = vmmov %vm8786_vm8 }
 0x5dc   : > { %v2085_v53 = vmul.f32 %v5213_v1, %v2084_v42 }
 0x5de   : > { %v2086_v27 = vadd.f32 %v5213_v1, %v2085_v53 }
 0x5df   : > { %v5215_v33 = vpop.eup %5214 }
 0x5e0   : > { %v2098_v3 = vmul.f32 %v5215_v33, %v2081_v5  ;;  %v2090_v43 = vsel %vm2089_vm11, %v5213_v1, %v2086_v27  ;;  %vm2103_vm13 = vweird.f32 %v5215_v33  ;;  %vm8789_vm11 = vmmov %vm8786_vm8  ;;  %v2121_v27 = vpop.permute.xlu1 %2120 }
 0x5e1   : > { %v2095_v35 = vsel %vm2092_vm12, %v2094_v52, %v2090_v43  ;;  %vm2104_vm14 = vmor %vm2102_vm15, %vm2103_vm13  ;;  %v2126_v43 = vpop.permute.xlu0 %2125 }
 0x5e2   : > { %v2099_v15 = vsub.f32 1.0, %v2098_v3  ;;  %v2112_v0 = vmul.f32 %v2095_v35, %v2030_v29 }
 0x5e4   : > { %v2100_v39 = vmul.f32 %v5215_v33, %v2099_v15  ;;  %v2114_v10 = vadd.f32 %v2112_v0, %v6620_v47  ;;  %v591_v0 = vld [vmem:[%s8469_s7 + $0x58] sm:$0xff] }
 0x5e6   : > { %v2101_v28 = vadd.f32 %v5215_v33, %v2100_v39  ;;  %v6646_v45 = vmul.f32 0.70710677, %v2114_v10 }
 0x5e8   : > { %v2105_v2 = vsel %vm2104_vm14, %v5215_v33, %v2101_v28 }
 0x5e9   : > { %v2110_v23 = vsel %vm2107_vm7, %v2109_v44, %v2105_v2  ;;  %v614_v44 = vld [vmem:[%s8470_s8 + $0x50] sm:$0xff]  ;;  %v6692_v2 = vpop.permute.xlu1 %2366 }
 0x5ea   : > { %v2113_v8 = vmul.f32 %v2110_v23, %v2033_v17  ;;  %v615_v17 = vld [vmem:[%s8470_s8 + $0x58] sm:$0xff] }
 0x5ec   : > { %v2115_v19 = vadd.f32 %v2113_v8, %v6616_v25 }
 0x5ee   : > { %v6642_v9 = vmul.f32 0.70710677, %v2115_v19 }
 0x5f0   : > { %2148 = vmatpush.msrb.mxu1 %v6642_v9  ;;  %2187 = vmatpush.msrb.mxu2 %v6642_v9 }
 0x5f1   : > { %v6694_v23 = vpop.permute.xlu1 %3107 }
 0x5f2   : > { %2149 = vmatpush.msrb.mxu1 %v6646_v45  ;;  %2188 = vmatpush.msrb.mxu2 %v6646_v45  ;;  %8794 = vst [vmem:[#allocation29_spill] sm:$0xff] %v6694_v23 }
 0x5f3   : > { %4955 = vmatmul.msk.f32.vlgmr.msrb.gmra.mxu1 %vm8786_vm8, %v588_v60  ;;  %4957 = vmatmul.msk.f32.vlgmr.msrb.gmra.mxu2 %vm8787_vm9, %v612_v12 }
 0x5f9   : > { %v6696_v8 = vpop.permute.xlu1 %3230 }
 0x5fa   : > { %8795 = vst [vmem:[#allocation32_spill] sm:$0xff] %v6696_v8 }
 0x5fb   : > { %4956 = vmatmul.msk.f32.gmra.mxu1 %vm8788_vm10, %v589_v54  ;;  %4958 = vmatmul.msk.f32.gmra.mxu2 %vm8789_vm11, %v613_v31 }
 0x601   : > { %v6698_v19 = vpop.permute.xlu1 %3186 }
 0x602   : > { %8796 = vst [vmem:[#allocation33_spill] sm:$0xff] %v6698_v19 }
 0x609   : > { %v6700_v10 = vpop.permute.xlu1 %3313 }
 0x60a   : > { %8797 = vst [vmem:[#allocation34_spill] sm:$0xff] %v6700_v10 }
 0x670   : > { %v2151_v57 = vpop.f32.mrf.mxu1 }
 0x671   : > { %v2152_v26 = vadd.f32 %v2151_v57, %v2121_v27 }
 0x676   : > { %v2190_v62 = vpop.f32.mrf.mxu2 }
 0x677   : > { %v2191_v32 = vadd.f32 %v2190_v62, %v2160_v21 }
 0x678   : > { %v2154_v33 = vpop.f32.mrf.mxu1 }
 0x679   : > { %v4959_v6 = vmul.f32 -1.442695, %v2191_v32  ;;  %v2155_v52 = vadd.f32 %v2154_v33, %v2126_v43  ;;  %v2248_v43 = vpop.permute.xlu0 %2247 }
 0x67b   : > { %5216 = vpow2.f32 %v4959_v6  ;;  %v2287_v6 = vpop.permute.xlu2 %2286 }
 0x67e   : > { %v2193_v25 = vpop.f32.mrf.mxu2 }
 0x67f   : > { %v2194_v47 = vadd.f32 %v2193_v25, %v2165_v30 }
 0x681   : > { %v5217_v7 = vpop.eup %5216  ;;  %v4960_v50 = vmul.f32 -1.442695, %v2194_v47 }
 0x682   : > { %v2202_v51 = vadd.f32 1.0, %v5217_v7 }
 0x683   : > { %5218 = vpow2.f32 %v4960_v50 }
 0x684   : > { %5220 = vrcp.f32 %v2202_v51  ;;  %v2215_v56 = vand.u32 2147483648, %v2202_v51  ;;  %vm2209_vm13 = vweird.f32 %v2202_v51  ;;  %v2213_v48 = vand.u32 2147483647, %v2202_v51 }
 0x686   : > { %v2216_v42 = vor.u32 1.1754944e-38, %v2215_v56  ;;  %vm2214_vm7 = vcmp.eq.f32.partialorder %v2213_v48, 8.507059e+37 }
 0x689   : > { %v5219_v4 = vpop.eup %5218 }
 0x68a   : > { %v5221_v34 = vpop.eup %5220  ;;  %v2203_v55 = vadd.f32 1.0, %v5219_v4 }
 0x68b   : > { %v2205_v41 = vmul.f32 %v5221_v34, %v2202_v51  ;;  %vm2210_vm12 = vweird.f32 %v5221_v34 }
 0x68c   : > { %5222 = vrcp.f32 %v2203_v55  ;;  %vm2211_vm15 = vmor %vm2209_vm13, %vm2210_vm12  ;;  %v2230_v24 = vand.u32 2147483648, %v2203_v55  ;;  %v2228_v53 = vand.u32 2147483647, %v2203_v55  ;;  %vm2224_vm8 = vweird.f32 %v2203_v55 }
 0x68d   : > { %v2206_v46 = vsub.f32 1.0, %v2205_v41  ;;  %vm8791_vm12 = vmmov %vm8789_vm11 }
 0x68e   : > { %v2231_v15 = vor.u32 1.1754944e-38, %v2230_v24  ;;  %vm2229_vm10 = vcmp.eq.f32.partialorder %v2228_v53, 8.507059e+37  ;;  %vm8792_vm13 = vmmov %vm8789_vm11 }
 0x68f   : > { %v2207_v49 = vmul.f32 %v5221_v34, %v2206_v46 }
 0x691   : > { %v2208_v14 = vadd.f32 %v5221_v34, %v2207_v49 }
 0x692   : > { %v5223_v36 = vpop.eup %5222 }
 0x693   : > { %v2220_v37 = vmul.f32 %v5223_v36, %v2203_v55  ;;  %v2212_v5 = vsel %vm2211_vm15, %v5221_v34, %v2208_v14  ;;  %vm2225_vm14 = vweird.f32 %v5223_v36  ;;  %vm8793_vm15 = vmmov %vm8789_vm11 }
 0x694   : > { %v2217_v16 = vsel %vm2214_vm7, %v2216_v42, %v2212_v5  ;;  %vm2226_vm9 = vmor %vm2224_vm8, %vm2225_vm14 }
 0x695   : > { %v2221_v1 = vsub.f32 1.0, %v2220_v37  ;;  %v2234_v39 = vmul.f32 %v2217_v16, %v2152_v26 }
 0x697   : > { %v2222_v13 = vmul.f32 %v5223_v36, %v2221_v1  ;;  %v2236_v38 = vadd.f32 %v2234_v39, %v6646_v45 }
 0x699   : > { %v2223_v3 = vadd.f32 %v5223_v36, %v2222_v13  ;;  %v6672_v28 = vmul.f32 0.70710677, %v2236_v38  ;;  %v678_v38 = vld [vmem:[%s8473_s11 + $0x10] sm:$0xff] }
 0x69b   : > { %v2227_v22 = vsel %vm2226_vm9, %v5223_v36, %v2223_v3  ;;  %8790 = vst [vmem:[#allocation31_spill] sm:$0xff] %v6672_v28 }
 0x69c   : > { %v2232_v61 = vsel %vm2229_vm10, %v2231_v15, %v2227_v22 }
 0x69d   : > { %v2235_v59 = vmul.f32 %v2232_v61, %v2155_v52 }
 0x69f   : > { %v2237_v35 = vadd.f32 %v2235_v59, %v6642_v9  ;;  %v6702_v9 = vpop.permute.xlu1 %3435 }
 0x6a0   : > { %8798 = vst [vmem:[#allocation35_spill] sm:$0xff] %v6702_v9 }
 0x6a1   : > { %v6668_v29 = vmul.f32 0.70710677, %v2237_v35 }
 0x6a3   : > { %2270 = vmatpush.msrb.mxu3 %v6668_v29  ;;  %2309 = vmatpush.msra.mxu0 %v6668_v29 }
 0x6a5   : > { %2271 = vmatpush.msrb.mxu3 %v6672_v28  ;;  %2310 = vmatpush.msra.mxu0 %v6672_v28 }
 0x6a6   : > { %4961 = vmatmul.msk.f32.vlgmr.msrb.gmra.mxu3 %vm8789_vm11, %v590_v58  ;;  %4963 = vmatmul.msk.f32.vlgmr.msra.gmra.mxu0 %vm8791_vm12, %v614_v44  ;;  %v679_v58 = vld [vmem:[%s8473_s11 + $0x18] sm:$0xff] }
 0x6a7   : > { %v6704_v45 = vpop.permute.xlu1 %4296 }
 0x6a8   : > { %8799 = vst [vmem:[#allocation36_spill] sm:$0xff] %v6704_v45 }
 0x6ae   : > { %4962 = vmatmul.msk.f32.gmra.mxu3 %vm8792_vm13, %v591_v0  ;;  %4964 = vmatmul.msk.f32.gmra.mxu0 %vm8793_vm15, %v615_v17  ;;  %vm8804_vm15 = vcmask 64512   ;;  %v8537_v0 = vsub.f32 1.3, %v6594_v63 }
 0x6af   : > { %v6706_v60 = vpop.permute.xlu1 %4252 }
 0x6b0   : > { %8800 = vst [vmem:[#allocation37_spill] sm:$0xff] %v6706_v60 }
 0x6b7   : > { %v6708_v12 = vpop.permute.xlu1 %4375 }
 0x6b8   : > { %8801 = vst [vmem:[#allocation38_spill] sm:$0xff] %v6708_v12 }
 0x6bf   : > { %v6710_v54 = vpop.permute.xlu1 %4531 }
 0x6c0   : > { %8802 = vst [vmem:[#allocation39_spill] sm:$0xff] %v6710_v54 }
 0x6c7   : > { %v2282_v31 = vpop.permute.xlu1 %2281 }
 0x6cf   : > { %v2243_v37 = vpop.permute.xlu1 %2242 }
 0x723   : > { %v2312_v21 = vpop.f32.mrf.mxu0 }
 0x724   : > { %v2313_v62 = vadd.f32 %v2312_v21, %v2282_v31 }
 0x726   : > { %v4965_v32 = vmul.f32 -1.442695, %v2313_v62 }
 0x728   : > { %5224 = vpow2.f32 %v4965_v32 }
 0x729   : > { %v2273_v46 = vpop.f32.mrf.mxu3 }
 0x72a   : > { %v2274_v1 = vadd.f32 %v2273_v46, %v2243_v37  ;;  %v8536_v46 = vsub.f32 1.3, %v6592_v20  ;;  %v8856_v37 = vmov 0 }
 0x72b   : > { %v2315_v30 = vpop.f32.mrf.mxu0 }
 0x72c   : > { %v2316_v25 = vadd.f32 %v2315_v30, %v2287_v6 }
 0x72e   : > { %v5225_v47 = vpop.eup %5224  ;;  %v4966_v7 = vmul.f32 -1.442695, %v2316_v25 }
 0x72f   : > { %v2324_v50 = vadd.f32 1.0, %v5225_v47 }
 0x730   : > { %5226 = vpow2.f32 %v4966_v7 }
 0x731   : > { %5228 = vrcp.f32 %v2324_v50  ;;  %v2337_v57 = vand.u32 2147483648, %v2324_v50  ;;  %v2335_v14 = vand.u32 2147483647, %v2324_v50  ;;  %vm2331_vm7 = vweird.f32 %v2324_v50  ;;  %v2276_v26 = vpop.f32.mrf.mxu3 }
 0x732   : > { %v2277_v52 = vadd.f32 %v2276_v26, %v2248_v43 }
 0x733   : > { %v2338_v48 = vor.u32 1.1754944e-38, %v2337_v57  ;;  %vm2336_vm9 = vcmp.eq.f32.partialorder %v2335_v14, 8.507059e+37 }
 0x736   : > { %v5227_v51 = vpop.eup %5226 }
 0x737   : > { %v5229_v4 = vpop.eup %5228  ;;  %v2325_v34 = vadd.f32 1.0, %v5227_v51 }
 0x738   : > { %v2327_v55 = vmul.f32 %v5229_v4, %v2324_v50  ;;  %vm2332_vm14 = vweird.f32 %v5229_v4  ;;  %v2372_v50 = vpop.permute.xlu2 %2371 }
 0x739   : > { %5230 = vrcp.f32 %v2325_v34  ;;  %vm2333_vm8 = vmor %vm2331_vm7, %vm2332_vm14  ;;  %v2352_v27 = vand.u32 2147483648, %v2325_v34  ;;  %v2350_v16 = vand.u32 2147483647, %v2325_v34  ;;  %vm2346_vm11 = vweird.f32 %v2325_v34 }
 0x73a   : > { %v2328_v41 = vsub.f32 1.0, %v2327_v55  ;;  %vm8805_vm14 = vmmov %vm8804_vm15 }
 0x73b   : > { %v2353_v15 = vor.u32 1.1754944e-38, %v2352_v27  ;;  %vm2351_vm13 = vcmp.eq.f32.partialorder %v2350_v16, 8.507059e+37 }
 0x73c   : > { %v2329_v49 = vmul.f32 %v5229_v4, %v2328_v41 }
 0x73e   : > { %v2330_v36 = vadd.f32 %v5229_v4, %v2329_v49 }
 0x73f   : > { %v5231_v56 = vpop.eup %5230 }
 0x740   : > { %v2334_v5 = vsel %vm2333_vm8, %v5229_v4, %v2330_v36  ;;  %v2342_v24 = vmul.f32 %v5231_v56, %v2325_v34  ;;  %vm2347_vm10 = vweird.f32 %v5231_v56 }
 0x741   : > { %v2339_v42 = vsel %vm2336_vm9, %v2338_v48, %v2334_v5  ;;  %vm2348_vm12 = vmor %vm2346_vm11, %vm2347_vm10 }
 0x742   : > { %v6712_v13 = vmul.f32 %v2339_v42, %v2274_v1  ;;  %v2343_v53 = vsub.f32 1.0, %v2342_v24 }
 0x744   : > { %8803 = vst [vmem:[#allocation14_spill] sm:$0xff] %v6712_v13  ;;  %v2344_v33 = vmul.f32 %v5231_v56, %v2343_v53 }
 0x746   : > { %v2345_v3 = vadd.f32 %v5231_v56, %v2344_v33 }
 0x748   : > { %v2349_v22 = vsel %vm2348_vm12, %v5231_v56, %v2345_v3  ;;  %v8854_v56 = vmov 0 }
 0x749   : > { %v2354_v39 = vsel %vm2351_vm13, %v2353_v15, %v2349_v22 }
 0x74a   : > { %v2357_v61 = vmul.f32 %v2354_v39, %v2277_v52 }
 0x74c   : > { %v2359_v59 = vadd.f32 %v2357_v61, %v6668_v29 }
 0x74e   : > { %v2361_v35 = vmul.f32 0.70710677, %v2359_v59 }
 0x750   : > { %2395 = vmatpush.msra.mxu1 %v2361_v35 }
 0x751   : > { %4967 = vmatmul.msk.f32.vlgmr.msra.gmra.mxu1 %vm8804_vm15, %v678_v38 }
 0x759   : > { %4968 = vmatmul.msk.f32.gmra.mxu1 %vm8805_vm14, %v679_v58 }
 0x7ce   : > { %v2397_v44 = vpop.f32.mrf.mxu1 }
 0x7cf   : > { %v2398_v17 = vadd.f32 %v2397_v44, %v6692_v2 }
 0x7d1   : > { %v6727_v29 = vmul.f32 %v2398_v17, %v8537_v0 }
 0x7d3   : > { %v6730_v31 = vrot.slane %v6727_v29, 1  ;;  %v6733_v21 = vrot.slane %v6727_v29, 2  ;;  %v6736_v62 = vrot.slane %v6727_v29, 3  ;;  %v6739_v32 = vrot.slane %v6727_v29, 4 }
 0x7d4   : > { %v6742_v6 = vrot.slane %v6727_v29, 5  ;;  %v6745_v2 = vrot.slane %v6727_v29, 6  ;;  %v6748_v30 = vrot.slane %v6727_v29, 7  ;;  %v2421_v25 = vperm.slane %v6727_v29, 0 }
 0x7d5   : > { %8806 = vst [vmem:[#allocation40_spill] sm:$0xff] %v6730_v31  ;;  %v2422_v47 = vperm.slane %v6730_v31, 0  ;;  %v2423_v7 = vperm.slane %v6733_v21, 0  ;;  %v2424_v4 = vperm.slane %v6736_v62, 0  ;;  %v2425_v34 = vperm.slane %v6739_v32, 0 }
 0x7d6   : > { %8807 = vst [vmem:[#allocation15_spill] sm:$0xff] %v6733_v21  ;;  %v2400_v51 = vpop.f32.mrf.mxu1  ;;  %v2426_v55 = vperm.slane %v6742_v6, 0  ;;  %v2427_v41 = vperm.slane %v6745_v2, 0  ;;  %v2428_v49 = vperm.slane %v6748_v30, 0  ;;  %vm2453_vm7 = vcmp.ge.f32.partialorder %v6727_v29, %v2421_v25 }
 0x7d7   : > { %8808 = vst [vmem:[#allocation41_spill] sm:$0xff] %v6736_v62  ;;  %v2401_v57 = vadd.f32 %v2400_v51, %v2372_v50  ;;  %vm2455_vm8 = vcmp.ge.f32.partialorder %v6727_v29, %v2422_v47  ;;  %vm2457_vm9 = vcmp.ge.f32.partialorder %v6727_v29, %v2423_v7  ;;  %vm2459_vm10 = vcmp.ge.f32.partialorder %v6727_v29, %v2424_v4 }
 0x7d8   : > { %8809 = vst [vmem:[#allocation16_spill] sm:$0xff] %v6739_v32  ;;  %vm6768_vm11 = vcmp.ge.f32.partialorder %v6727_v29, %v2425_v34  ;;  %vm6773_vm12 = vcmp.ge.f32.partialorder %v6727_v29, %v2426_v55  ;;  %vm6778_vm13 = vcmp.ge.f32.partialorder %v6727_v29, %v2427_v41  ;;  %vm6804_vm15 = vcmp.ge.f32.partialorder %v6727_v29, %v2428_v49 }
 0x7d9   : > { %8810 = vst [vmem:[#allocation42_spill] sm:$0xff] %v6742_v6  ;;  %v6761_v14 = vmul.f32 %v2401_v57, %v8536_v46  ;;  %v6809_v16 = vsel %vm2453_vm7, 1.0, %v8773_v11  ;;  %v6812_v26 = vsel %vm2455_vm8, 1.0, %v8773_v11  ;;  %v6815_v3 = vsel %vm2457_vm9, 1.0, %v8773_v11 }
 0x7da   : > { %8811 = vst [vmem:[#allocation17_spill] sm:$0xff] %v6745_v2  ;;  %v6818_v43 = vsel %vm2459_vm10, 1.0, %v8773_v11  ;;  %v6824_v52 = vsel %vm6768_vm11, 1.0, %v8773_v11  ;;  %v6829_v22 = vsel %vm6773_vm12, 1.0, %v8773_v11  ;;  %v6834_v39 = vsel %vm6778_vm13, 1.0, %v8773_v11 }
 0x7db   : > { %8812 = vst [vmem:[#allocation43_spill] sm:$0xff] %v6748_v30  ;;  %v6783_v48 = vrot.slane %v6761_v14, 1  ;;  %v6786_v1 = vrot.slane %v6761_v14, 2  ;;  %v6789_v5 = vrot.slane %v6761_v14, 3  ;;  %v6792_v24 = vrot.slane %v6761_v14, 4 }
 0x7dc   : > { %v6795_v42 = vrot.slane %v6761_v14, 5  ;;  %v6798_v53 = vrot.slane %v6761_v14, 6  ;;  %v6801_v27 = vrot.slane %v6761_v14, 7  ;;  %v2429_v15 = vperm.slane %v6761_v14, 0  ;;  %8828 = vst [vmem:[#allocation27_spill] sm:$0xff] %v6829_v22 }
 0x7dd   : > { %8819 = vst [vmem:[#allocation18_spill] sm:$0xff] %v6783_v48  ;;  %v2430_v61 = vperm.slane %v6783_v48, 0  ;;  %v2431_v59 = vperm.slane %v6786_v1, 0  ;;  %v2432_v35 = vperm.slane %v6789_v5, 0  ;;  %v2433_v38 = vperm.slane %v6792_v24, 0 }
 0x7de   : > { %8820 = vst [vmem:[#allocation19_spill] sm:$0xff] %v6786_v1  ;;  %v2434_v58 = vperm.slane %v6795_v42, 0  ;;  %v2435_v44 = vperm.slane %v6798_v53, 0  ;;  %v2436_v17 = vperm.slane %v6801_v27, 0  ;;  %vm6844_vm14 = vcmp.ge.f32.partialorder %v6761_v14, %v2421_v25 }
 0x7df   : > { %8821 = vst [vmem:[#allocation20_spill] sm:$0xff] %v6789_v5  ;;  %vm6849_vm7 = vcmp.ge.f32.partialorder %v6761_v14, %v2422_v47  ;;  %vm6854_vm8 = vcmp.ge.f32.partialorder %v6761_v14, %v2423_v7  ;;  %vm6859_vm9 = vcmp.ge.f32.partialorder %v6761_v14, %v2424_v4  ;;  %vm6864_vm10 = vcmp.ge.f32.partialorder %v6761_v14, %v2425_v34 }
 0x7e0   : > { %8822 = vst [vmem:[#allocation21_spill] sm:$0xff] %v6792_v24  ;;  %vm6869_vm11 = vcmp.ge.f32.partialorder %v6761_v14, %v2426_v55  ;;  %vm6874_vm12 = vcmp.ge.f32.partialorder %v6761_v14, %v2427_v41  ;;  %vm6879_vm13 = vcmp.ge.f32.partialorder %v6761_v14, %v2428_v49  ;;  %vm6884_vm6 = vcmp.ge.f32.partialorder %v6727_v29, %v2429_v15 }
 0x7e1   : > { %8823 = vst [vmem:[#allocation22_spill] sm:$0xff] %v6795_v42  ;;  %vm6889_vm5 = vcmp.ge.f32.partialorder %v6761_v14, %v2429_v15  ;;  %vm6894_vm4 = vcmp.ge.f32.partialorder %v6727_v29, %v2430_v61  ;;  %v8850_v41 = vmov 0  ;;  %vm6899_vm3 = vcmp.ge.f32.partialorder %v6761_v14, %v2430_v61 }
 0x7e2   : > { %8824 = vst [vmem:[#allocation23_spill] sm:$0xff] %v6798_v53  ;;  %v8851_v41 = vsel %vm6894_vm4, 4294967295, %v8850_v41  ;;  %v8852_v49 = vmov 0  ;;  %vm6904_vm2 = vcmp.ge.f32.partialorder %v6727_v29, %v2431_v59  ;;  %vm6909_vm1 = vcmp.ge.f32.partialorder %v6761_v14, %v2431_v59 }
 0x7e3   : > { %8825 = vst [vmem:[#allocation26_spill] sm:$0xff] %v6801_v27  ;;  %v8853_v49 = vsel %vm6899_vm3, 4294967295, %v8852_v49  ;;  %v8855_v56 = vsel %vm6904_vm2, 4294967295, %v8854_v56  ;;  %v8857_v37 = vsel %vm6909_vm1, 4294967295, %v8856_v37  ;;  %vm6914_vm0 = vcmp.ge.f32.partialorder %v6727_v29, %v2432_v35 }
 0x7e4   : > { %8829 = vst [vmem:[#allocation24_spill] sm:$0xff] %v6834_v39  ;;  %v8858_v15 = vmov 0  ;;  %vm6919_vm4 = vcmp.ge.f32.partialorder %v6761_v14, %v2432_v35  ;;  %vm6924_vm3 = vcmp.ge.f32.partialorder %v6727_v29, %v2433_v38  ;;  %vm6929_vm2 = vcmp.ge.f32.partialorder %v6761_v14, %v2433_v38 }
 0x7e5   : > { %v8859_v15 = vsel %vm6914_vm0, 4294967295, %v8858_v15  ;;  %vm6934_vm1 = vcmp.ge.f32.partialorder %v6727_v29, %v2434_v58  ;;  %vm6939_vm0 = vcmp.ge.f32.partialorder %v6761_v14, %v2434_v58  ;;  %v6946_v54 = vsel %vm6844_vm14, 1.0, %v8773_v11 }
 0x7e6   : > { %v6951_v38 = vsel %vm6849_vm7, 1.0, %v8773_v11  ;;  %v6956_v12 = vsel %vm6854_vm8, 1.0, %v8773_v11  ;;  %v6961_v58 = vsel %vm6859_vm9, 1.0, %v8773_v11  ;;  %v6966_v50 = vsel %vm6864_vm10, 1.0, %v8773_v11 }
 0x7e7   : > { %8870 = vst [vmem:[#allocation25_spill] sm:$0xff] %v6966_v50  ;;  %v6971_v51 = vsel %vm6869_vm11, 1.0, %v8773_v11  ;;  %v6976_v57 = vsel %vm6874_vm12, 1.0, %v8773_v11  ;;  %v6981_v36 = vsel %vm6804_vm15, 1.0, %v8773_v11  ;;  %v6986_v25 = vsel %vm6879_vm13, 1.0, %v8773_v11 }
 0x7e8   : > { %8871 = vst [vmem:[#allocation44_spill] sm:$0xff] %v6971_v51  ;;  %v6991_v47 = vsel %vm6884_vm6, 1.0, %v8773_v11  ;;  %v6996_v7 = vsel %vm6889_vm5, 1.0, %v8773_v11  ;;  %vm8875_vm14 = vnez %v8851_v41  ;;  %vm8876_vm15 = vnez %v8853_v49 }
 0x7e9   : > { %8872 = vst [vmem:[#allocation45_spill] sm:$0xff] %v6976_v57  ;;  %v7001_v33 = vsel %vm8875_vm14, 1.0, %v8773_v11  ;;  %v7006_v4 = vsel %vm8876_vm15, 1.0, %v8773_v11  ;;  %vm8877_vm7 = vnez %v8855_v56  ;;  %vm8878_vm6 = vnez %v8857_v37 }
 0x7ea   : > { %8873 = vst [vmem:[#allocation46_spill] sm:$0xff] %v6981_v36  ;;  %v7011_v34 = vsel %vm8877_vm7, 1.0, %v8773_v11  ;;  %v7016_v55 = vsel %vm8878_vm6, 1.0, %v8773_v11  ;;  %vm8879_vm5 = vnez %v8859_v15  ;;  %v7026_v49 = vsel %vm6919_vm4, 1.0, %v8773_v11 }
 0x7eb   : > { %8874 = vst [vmem:[#allocation47_spill] sm:$0xff] %v6986_v25  ;;  %v7021_v41 = vsel %vm8879_vm5, 1.0, %v8773_v11  ;;  %v7031_v56 = vsel %vm6924_vm3, 1.0, %v8773_v11  ;;  %v7036_v37 = vsel %vm6929_vm2, 1.0, %v8773_v11  ;;  %v7041_v15 = vsel %vm6934_vm1, 1.0, %v8773_v11 }
 0x7ec   : > { %8880 = vst [vmem:[#allocation48_spill] sm:$0xff] %v7036_v37  ;;  %v7046_v61 = vsel %vm6939_vm0, 1.0, %v8773_v11  ;;  %vm7049_vm4 = vcmp.ge.f32.partialorder %v6727_v29, %v2435_v44  ;;  %vm7054_vm3 = vcmp.ge.f32.partialorder %v6761_v14, %v2435_v44  ;;  %vm7059_vm2 = vcmp.ge.f32.partialorder %v6727_v29, %v2436_v17 }
 0x7ed   : > { %8881 = vst [vmem:[#allocation49_spill] sm:$0xff] %v7041_v15  ;;  %vm7064_vm1 = vcmp.ge.f32.partialorder %v6761_v14, %v2436_v17  ;;  %v2549_v60 = vadd.f32 %v6946_v54, %v6809_v16  ;;  %v2556_v45 = vadd.f32 %v6951_v38, %v6812_v26  ;;  %v2563_v44 = vadd.f32 %v6956_v12, %v6815_v3 }
 0x7ee   : > { %8882 = vst [vmem:[#allocation50_spill] sm:$0xff] %v7046_v61  ;;  %v2570_v20 = vadd.f32 %v6961_v58, %v6818_v43  ;;  %v2577_v63 = vadd.f32 %v6966_v50, %v6824_v52  ;;  %v2584_v17 = vadd.f32 %v6971_v51, %v6829_v22  ;;  %v2591_v13 = vadd.f32 %v6976_v57, %v6834_v39 }
 0x7ef   : > { %v2598_v28 = vadd.f32 %v6986_v25, %v6981_v36  ;;  %v2550_v9 = vrot.slane %v2549_v60, 4  ;;  %v2557_v10 = vrot.slane %v2556_v45, 4  ;;  %v2564_v19 = vrot.slane %v2563_v44, 4 }
 0x7f0   : > { %v2571_v8 = vrot.slane %v2570_v20, 4  ;;  %v2578_v23 = vrot.slane %v2577_v63, 4  ;;  %v2585_v40 = vrot.slane %v2584_v17, 4  ;;  %v2592_v18 = vrot.slane %v2591_v13, 4 }
 0x7f1   : > { %v2599_v27 = vrot.slane %v2598_v28, 4  ;;  %v2551_v53 = vadd.f32 %v2550_v9, %v2549_v60  ;;  %v2558_v42 = vadd.f32 %v2557_v10, %v2556_v45  ;;  %v2565_v24 = vadd.f32 %v2564_v19, %v2563_v44 }
 0x7f2   : > { %v2572_v5 = vadd.f32 %v2571_v8, %v2570_v20  ;;  %v2579_v1 = vadd.f32 %v2578_v23, %v2577_v63  ;;  %v2586_v48 = vadd.f32 %v2585_v40, %v2584_v17  ;;  %v2593_v30 = vadd.f32 %v2592_v18, %v2591_v13 }
 0x7f3   : > { %v2600_v2 = vadd.f32 %v2599_v27, %v2598_v28  ;;  %v2552_v6 = vrot.slane %v2551_v53, 2  ;;  %v2559_v32 = vrot.slane %v2558_v42, 2  ;;  %v2566_v62 = vrot.slane %v2565_v24, 2 }
 0x7f4   : > { %v2573_v21 = vrot.slane %v2572_v5, 2  ;;  %v2580_v31 = vrot.slane %v2579_v1, 2  ;;  %v2587_v25 = vrot.slane %v2586_v48, 2  ;;  %v2594_v36 = vrot.slane %v2593_v30, 2 }
 0x7f5   : > { %v2601_v57 = vrot.slane %v2600_v2, 2  ;;  %v2553_v39 = vadd.f32 %v2552_v6, %v2551_v53  ;;  %v2560_v51 = vadd.f32 %v2559_v32, %v2558_v42  ;;  %v2567_v22 = vadd.f32 %v2566_v62, %v2565_v24 }
 0x7f6   : > { %v2574_v50 = vadd.f32 %v2573_v21, %v2572_v5  ;;  %v7084_v9 = vadd.f32 %v2580_v31, %v2579_v1  ;;  %v7086_v19 = vadd.f32 %v2587_v25, %v2586_v48  ;;  %v7088_v20 = vadd.f32 %v2594_v36, %v2593_v30 }
 0x7f7   : > { %v7090_v63 = vadd.f32 %v2601_v57, %v2600_v2  ;;  %v2554_v18 = vrot.slane %v2553_v39, 1  ;;  %v2561_v40 = vrot.slane %v2560_v51, 1  ;;  %v2568_v28 = vrot.slane %v2567_v22, 1 }
 0x7f8   : > { %v2575_v23 = vrot.slane %v2574_v50, 1  ;;  %v7095_v8 = vsel %vm7049_vm4, 1.0, %v8773_v11  ;;  %v7100_v10 = vsel %vm7054_vm3, 1.0, %v8773_v11  ;;  %v7105_v45 = vsel %vm7059_vm2, 1.0, %v8773_v11 }
 0x7f9   : > { %8891 = vst [vmem:[#allocation51_spill] sm:$0xff] %v7095_v8  ;;  %v7110_v60 = vsel %vm7064_vm1, 1.0, %v8773_v11  ;;  %v2582_v13 = vrot.slane %v7084_v9, 1  ;;  %v2589_v31 = vrot.slane %v7086_v19, 1  ;;  %v2596_v21 = vrot.slane %v7088_v20, 1 }
 0x7fa   : > { %8892 = vst [vmem:[#allocation52_spill] sm:$0xff] %v7100_v10  ;;  %v2603_v62 = vrot.slane %v7090_v63, 1  ;;  %v7116_v32 = vadd.f32 %v2554_v18, %v2553_v39  ;;  %v7118_v6 = vadd.f32 %v2561_v40, %v2560_v51  ;;  %v7120_v2 = vadd.f32 %v2568_v28, %v2567_v22 }
 0x7fb   : > { %8893 = vst [vmem:[#allocation53_spill] sm:$0xff] %v7105_v45  ;;  %v7122_v30 = vadd.f32 %v2575_v23, %v2574_v50  ;;  %v2605_v48 = vadd.f32 %v6996_v7, %v6991_v47  ;;  %v2612_v1 = vadd.f32 %v7006_v4, %v7001_v33  ;;  %v2619_v5 = vadd.f32 %v7016_v55, %v7011_v34 }
 0x7fc   : > { %8894 = vst [vmem:[#allocation54_spill] sm:$0xff] %v7110_v60  ;;  %v2626_v24 = vadd.f32 %v7026_v49, %v7021_v41  ;;  %v2633_v42 = vadd.f32 %v7036_v37, %v7031_v56  ;;  %v2640_v53 = vadd.f32 %v7046_v61, %v7041_v15  ;;  %v2647_v27 = vadd.f32 %v7100_v10, %v7095_v8 }
 0x7fd   : > { %8895 = vst [vmem:[#allocation55_spill] sm:$0xff] %v7116_v32  ;;  %v2654_v22 = vadd.f32 %v7110_v60, %v7105_v45  ;;  %v2606_v39 = vrot.slane %v2605_v48, 4  ;;  %v2613_v50 = vrot.slane %v2612_v1, 4  ;;  %v2620_v51 = vrot.slane %v2619_v5, 4 }
 0x7fe   : > { %8896 = vst [vmem:[#allocation56_spill] sm:$0xff] %v7118_v6  ;;  %v2627_v57 = vrot.slane %v2626_v24, 4  ;;  %v2634_v36 = vrot.slane %v2633_v42, 4  ;;  %v2641_v25 = vrot.slane %v2640_v53, 4  ;;  %v2648_v46 = vrot.slane %v2647_v27, 4 }
 0x7ff   : > { %8897 = vst [vmem:[#allocation57_spill] sm:$0xff] %v7120_v2  ;;  %v2655_v59 = vrot.slane %v2654_v22, 4  ;;  %v2607_v0 = vadd.f32 %v2606_v39, %v2605_v48  ;;  %v2614_v35 = vadd.f32 %v2613_v50, %v2612_v1  ;;  %v2621_v44 = vadd.f32 %v2620_v51, %v2619_v5 }
 0x800   : > { %8898 = vst [vmem:[#allocation58_spill] sm:$0xff] %v7122_v30  ;;  %v2628_v17 = vadd.f32 %v2627_v57, %v2626_v24  ;;  %v2635_v18 = vadd.f32 %v2634_v36, %v2633_v42  ;;  %v2642_v40 = vadd.f32 %v2641_v25, %v2640_v53  ;;  %v2649_v28 = vadd.f32 %v2648_v46, %v2647_v27 }
 0x801   : > { %v2656_v23 = vadd.f32 %v2655_v59, %v2654_v22  ;;  %v2608_v11 = vrot.slane %v2607_v0, 2  ;;  %v2615_v30 = vrot.slane %v2614_v35, 2  ;;  %v2622_v2 = vrot.slane %v2621_v44, 2 }
 0x802   : > { %v2629_v6 = vrot.slane %v2628_v17, 2  ;;  %v2636_v32 = vrot.slane %v2635_v18, 2  ;;  %v2643_v60 = vrot.slane %v2642_v40, 2  ;;  %v2650_v45 = vrot.slane %v2649_v28, 2 }
 0x803   : > { %v2657_v10 = vrot.slane %v2656_v23, 2  ;;  %v2609_v8 = vadd.f32 %v2608_v11, %v2607_v0  ;;  %v2616_v61 = vadd.f32 %v2615_v30, %v2614_v35  ;;  %v2623_v15 = vadd.f32 %v2622_v2, %v2621_v44 }
 0x804   : > { %v2630_v37 = vadd.f32 %v2629_v6, %v2628_v17  ;;  %v2637_v48 = vadd.f32 %v2636_v32, %v2635_v18  ;;  %v2644_v1 = vadd.f32 %v2643_v60, %v2642_v40  ;;  %v2651_v5 = vadd.f32 %v2650_v45, %v2649_v28 }
 0x805   : > { %v2658_v24 = vadd.f32 %v2657_v10, %v2656_v23  ;;  %v2610_v42 = vrot.slane %v2609_v8, 1  ;;  %v2617_v53 = vrot.slane %v2616_v61, 1  ;;  %v2624_v27 = vrot.slane %v2623_v15, 1  ;;  %v8906_v23 = vld [vmem:[#allocation48_spill] sm:$0xff] }
 0x806   : > { %v2631_v22 = vrot.slane %v2630_v37, 1  ;;  %v2638_v39 = vrot.slane %v2637_v48, 1  ;;  %v2645_v50 = vrot.slane %v2644_v1, 1  ;;  %v2652_v51 = vrot.slane %v2651_v5, 1 }
 0x807   : > { %v2659_v57 = vrot.slane %v2658_v24, 1  ;;  %v7141_v36 = vadd.f32 %v2582_v13, %v7084_v9  ;;  %v7144_v11 = vadd.f32 %v2589_v31, %v7086_v19  ;;  %v7147_v6 = vadd.f32 %v2596_v21, %v7088_v20 }
 0x808   : > { %v7150_v45 = vadd.f32 %v2603_v62, %v7090_v63  ;;  %v7152_v10 = vadd.f32 %v2610_v42, %v2609_v8  ;;  %v7154_v60 = vadd.f32 %v2617_v53, %v2616_v61  ;;  %v7156_v32 = vadd.f32 %v2624_v27, %v2623_v15 }
 0x809   : > { %v7158_v2 = vadd.f32 %v2631_v22, %v2630_v37  ;;  %v7160_v30 = vadd.f32 %v2638_v39, %v2637_v48  ;;  %v7162_v9 = vadd.f32 %v2645_v50, %v2644_v1  ;;  %v7164_v19 = vadd.f32 %v2652_v51, %v2651_v5  ;;  %v8907_v48 = vld [vmem:[#allocation49_spill] sm:$0xff]  ;;  %v8908_v1 = vld [vmem:[#allocation50_spill] sm:$0xff] }
 0x80a   : > { %v7166_v13 = vadd.f32 %v2659_v57, %v2658_v24  ;;  %v2661_v20 = vmul.f32 %v6809_v16, %v6727_v29  ;;  %v2662_v63 = vmul.f32 %v6946_v54, %v6761_v14  ;;  %v2663_v15 = vmul.f32 %v6812_v26, %v6727_v29  ;;  %v8899_v26 = vld [vmem:[#allocation25_spill] sm:$0xff] }
 0x80b   : > { %v2664_v37 = vmul.f32 %v6951_v38, %v6761_v14  ;;  %v2665_v61 = vmul.f32 %v6815_v3, %v6727_v29  ;;  %v2666_v8 = vmul.f32 %v6956_v12, %v6761_v14  ;;  %v2667_v31 = vmul.f32 %v6818_v43, %v6727_v29  ;;  %v8900_v38 = vld [vmem:[#allocation27_spill] sm:$0xff]  ;;  %v8901_v3 = vld [vmem:[#allocation44_spill] sm:$0xff]  ;;  %v8903_v43 = vld [vmem:[#allocation45_spill] sm:$0xff] }
 0x80c   : > { %v2668_v16 = vmul.f32 %v6961_v58, %v6761_v14  ;;  %v2669_v54 = vmul.f32 %v6824_v52, %v6727_v29  ;;  %v2670_v21 = vmul.f32 %v8899_v26, %v6761_v14  ;;  %v2671_v62 = vmul.f32 %v8900_v38, %v6727_v29  ;;  %v8902_v12 = vld [vmem:[#allocation24_spill] sm:$0xff]  ;;  %v8904_v58 = vld [vmem:[#allocation46_spill] sm:$0xff]  ;;  %v8905_v52 = vld [vmem:[#allocation47_spill] sm:$0xff] }
 0x80d   : > { %v2672_v25 = vmul.f32 %v8901_v3, %v6761_v14  ;;  %v2673_v46 = vmul.f32 %v8902_v12, %v6727_v29  ;;  %v2674_v59 = vmul.f32 %v8903_v43, %v6761_v14  ;;  %v2675_v0 = vmul.f32 %v8904_v58, %v6727_v29 }
 0x80e   : > { %v2676_v35 = vmul.f32 %v8905_v52, %v6761_v14  ;;  %v7202_v44 = vmul.f32 %v6991_v47, %v6727_v29  ;;  %v7206_v17 = vmul.f32 %v6996_v7, %v6761_v14  ;;  %v7210_v18 = vmul.f32 %v7001_v33, %v6727_v29 }
 0x80f   : > { %v7214_v40 = vmul.f32 %v7006_v4, %v6761_v14  ;;  %v7218_v28 = vmul.f32 %v7011_v34, %v6727_v29  ;;  %v7222_v47 = vmul.f32 %v7016_v55, %v6761_v14  ;;  %v7226_v7 = vmul.f32 %v7021_v41, %v6727_v29 }
 0x810   : > { %v7230_v33 = vmul.f32 %v7026_v49, %v6761_v14  ;;  %v7234_v4 = vmul.f32 %v7031_v56, %v6727_v29  ;;  %v7238_v34 = vmul.f32 %v8906_v23, %v6761_v14  ;;  %v7242_v55 = vmul.f32 %v8907_v48, %v6727_v29 }
 0x811   : > { %v2688_v41 = vmul.f32 %v8908_v1, %v6761_v14  ;;  %v2693_v5 = vadd.f32 %v2662_v63, %v2661_v20  ;;  %v2700_v24 = vadd.f32 %v2664_v37, %v2663_v15  ;;  %v2707_v42 = vadd.f32 %v2666_v8, %v2665_v61 }
 0x812   : > { %v2714_v49 = vadd.f32 %v2668_v16, %v2667_v31  ;;  %v2721_v53 = vadd.f32 %v2670_v21, %v2669_v54  ;;  %v2728_v27 = vadd.f32 %v2672_v25, %v2671_v62  ;;  %v2735_v22 = vadd.f32 %v2674_v59, %v2673_v46 }
 0x813   : > { %v2742_v56 = vadd.f32 %v2676_v35, %v2675_v0  ;;  %v2694_v39 = vrot.slane %v2693_v5, 4  ;;  %v2701_v50 = vrot.slane %v2700_v24, 4  ;;  %v2708_v51 = vrot.slane %v2707_v42, 4 }
 0x814   : > { %v2715_v57 = vrot.slane %v2714_v49, 4  ;;  %v2722_v26 = vrot.slane %v2721_v53, 4  ;;  %v2729_v38 = vrot.slane %v2728_v27, 4  ;;  %v2736_v3 = vrot.slane %v2735_v22, 4 }
 0x815   : > { %v2743_v12 = vrot.slane %v2742_v56, 4  ;;  %v2695_v43 = vadd.f32 %v2694_v39, %v2693_v5  ;;  %v2702_v58 = vadd.f32 %v2701_v50, %v2700_v24  ;;  %v2709_v52 = vadd.f32 %v2708_v51, %v2707_v42  ;;  %v8910_v39 = vld [vmem:[#allocation52_spill] sm:$0xff]  ;;  %v8911_v51 = vld [vmem:[#allocation53_spill] sm:$0xff] }
 0x816   : > { %v2716_v23 = vadd.f32 %v2715_v57, %v2714_v49  ;;  %v2723_v20 = vadd.f32 %v2722_v26, %v2721_v53  ;;  %v2730_v63 = vadd.f32 %v2729_v38, %v2728_v27  ;;  %v2737_v15 = vadd.f32 %v2736_v3, %v2735_v22  ;;  %v8909_v22 = vld [vmem:[#allocation51_spill] sm:$0xff]  ;;  %v8912_v26 = vld [vmem:[#allocation54_spill] sm:$0xff] }
 0x817   : > { %v2744_v37 = vadd.f32 %v2743_v12, %v2742_v56  ;;  %v2696_v61 = vrot.slane %v2695_v43, 2  ;;  %v2703_v8 = vrot.slane %v2702_v58, 2  ;;  %v2710_v31 = vrot.slane %v2709_v52, 2 }
 0x818   : > { %v2717_v16 = vrot.slane %v2716_v23, 2  ;;  %v2724_v54 = vrot.slane %v2723_v20, 2  ;;  %v2731_v21 = vrot.slane %v2730_v63, 2  ;;  %v2738_v62 = vrot.slane %v2737_v15, 2 }
 0x819   : > { %v2745_v25 = vrot.slane %v2744_v37, 2  ;;  %v2697_v46 = vadd.f32 %v2696_v61, %v2695_v43  ;;  %v2704_v59 = vadd.f32 %v2703_v8, %v2702_v58  ;;  %v2711_v0 = vadd.f32 %v2710_v31, %v2709_v52 }
 0x81a   : > { %v2718_v35 = vadd.f32 %v2717_v16, %v2716_v23  ;;  %v7246_v48 = vadd.f32 %v2724_v54, %v2723_v20  ;;  %v7248_v1 = vadd.f32 %v2731_v21, %v2730_v63  ;;  %v7250_v5 = vadd.f32 %v2738_v62, %v2737_v15 }
 0x81b   : > { %v7252_v24 = vadd.f32 %v2745_v25, %v2744_v37  ;;  %v2698_v42 = vrot.slane %v2697_v46, 1  ;;  %v2705_v49 = vrot.slane %v2704_v59, 1  ;;  %v2712_v53 = vrot.slane %v2711_v0, 1 }
 0x81c   : > { %v2719_v27 = vrot.slane %v2718_v35, 1  ;;  %v2689_v56 = vmul.f32 %v8909_v22, %v6727_v29  ;;  %v2690_v50 = vmul.f32 %v8910_v39, %v6761_v14  ;;  %v2691_v57 = vmul.f32 %v8911_v51, %v6727_v29 }
 0x81d   : > { %v2692_v38 = vmul.f32 %v8912_v26, %v6761_v14  ;;  %v2726_v3 = vrot.slane %v7246_v48, 1  ;;  %v2733_v12 = vrot.slane %v7248_v1, 1  ;;  %v2740_v43 = vrot.slane %v7250_v5, 1 }
 0x81e   : > { %v2747_v58 = vrot.slane %v7252_v24, 1  ;;  %v7266_v52 = vadd.f32 %v2698_v42, %v2697_v46  ;;  %v7268_v23 = vadd.f32 %v2705_v49, %v2704_v59  ;;  %v7270_v20 = vadd.f32 %v2712_v53, %v2711_v0 }
 0x81f   : > { %v7272_v63 = vadd.f32 %v2719_v27, %v2718_v35  ;;  %v2749_v15 = vadd.f32 %v7206_v17, %v7202_v44  ;;  %v2756_v37 = vadd.f32 %v7214_v40, %v7210_v18  ;;  %v2763_v61 = vadd.f32 %v7222_v47, %v7218_v28 }
 0x820   : > { %v2770_v8 = vadd.f32 %v7230_v33, %v7226_v7  ;;  %v2777_v31 = vadd.f32 %v7238_v34, %v7234_v4  ;;  %v2784_v16 = vadd.f32 %v2688_v41, %v7242_v55  ;;  %v2791_v54 = vadd.f32 %v2690_v50, %v2689_v56 }
 0x821   : > { %v2798_v21 = vadd.f32 %v2692_v38, %v2691_v57  ;;  %v2750_v62 = vrot.slane %v2749_v15, 4  ;;  %v2757_v25 = vrot.slane %v2756_v37, 4  ;;  %v2764_v46 = vrot.slane %v2763_v61, 4 }
 0x822   : > { %v2771_v44 = vrot.slane %v2770_v8, 4  ;;  %v2778_v17 = vrot.slane %v2777_v31, 4  ;;  %v2785_v59 = vrot.slane %v2784_v16, 4  ;;  %v2792_v18 = vrot.slane %v2791_v54, 4 }
 0x823   : > { %v2799_v40 = vrot.slane %v2798_v21, 4  ;;  %v2751_v0 = vadd.f32 %v2750_v62, %v2749_v15  ;;  %v2758_v28 = vadd.f32 %v2757_v25, %v2756_v37  ;;  %v2765_v47 = vadd.f32 %v2764_v46, %v2763_v61 }
 0x824   : > { %v2772_v35 = vadd.f32 %v2771_v44, %v2770_v8  ;;  %v2779_v7 = vadd.f32 %v2778_v17, %v2777_v31  ;;  %v2786_v33 = vadd.f32 %v2785_v59, %v2784_v16  ;;  %v2793_v42 = vadd.f32 %v2792_v18, %v2791_v54 }
 0x825   : > { %v2800_v4 = vadd.f32 %v2799_v40, %v2798_v21  ;;  %v2752_v34 = vrot.slane %v2751_v0, 2  ;;  %v2759_v55 = vrot.slane %v2758_v28, 2  ;;  %v2766_v41 = vrot.slane %v2765_v47, 2 }
 0x826   : > { %v2773_v49 = vrot.slane %v2772_v35, 2  ;;  %v2780_v53 = vrot.slane %v2779_v7, 2  ;;  %v2787_v27 = vrot.slane %v2786_v33, 2  ;;  %v2794_v22 = vrot.slane %v2793_v42, 2 }
 0x827   : > { %v2801_v56 = vrot.slane %v2800_v4, 2  ;;  %v2753_v39 = vadd.f32 %v2752_v34, %v2751_v0  ;;  %v2760_v50 = vadd.f32 %v2759_v55, %v2758_v28  ;;  %v2767_v51 = vadd.f32 %v2766_v41, %v2765_v47  ;;  %v8920_v55 = vld [vmem:[#allocation16_spill] sm:$0xff] }
 0x828   : > { %v2774_v57 = vadd.f32 %v2773_v49, %v2772_v35  ;;  %v2781_v26 = vadd.f32 %v2780_v53, %v2779_v7  ;;  %v2788_v38 = vadd.f32 %v2787_v27, %v2786_v33  ;;  %v2795_v15 = vadd.f32 %v2794_v22, %v2793_v42  ;;  %v8916_v35 = vld [vmem:[#allocation15_spill] sm:$0xff]  ;;  %v8917_v7 = vld [vmem:[#allocation57_spill] sm:$0xff]  ;;  %v8921_v49 = vld [vmem:[#allocation42_spill] sm:$0xff] }
 0x829   : > { %v2802_v37 = vadd.f32 %v2801_v56, %v2800_v4  ;;  %v2754_v61 = vrot.slane %v2753_v39, 1  ;;  %v2761_v8 = vrot.slane %v2760_v50, 1  ;;  %v2768_v31 = vrot.slane %v2767_v51, 1  ;;  %v8918_v42 = vld [vmem:[#allocation41_spill] sm:$0xff]  ;;  %v8919_v4 = vld [vmem:[#allocation58_spill] sm:$0xff]  ;;  %v8923_v56 = vld [vmem:[#allocation43_spill] sm:$0xff] }
 0x82a   : > { %v2775_v16 = vrot.slane %v2774_v57, 1  ;;  %v2782_v54 = vrot.slane %v2781_v26, 1  ;;  %v2789_v21 = vrot.slane %v2788_v38, 1  ;;  %v2796_v62 = vrot.slane %v2795_v15, 1  ;;  %v8922_v27 = vld [vmem:[#allocation17_spill] sm:$0xff] }
 0x82b   : > { %v2803_v25 = vrot.slane %v2802_v37, 1  ;;  %v7286_v46 = vadd.f32 %v2726_v3, %v7246_v48  ;;  %v7289_v44 = vadd.f32 %v2733_v12, %v7248_v1  ;;  %v7292_v17 = vadd.f32 %v2740_v43, %v7250_v5  ;;  %v8913_v5 = vld [vmem:[#allocation55_spill] sm:$0xff]  ;;  %v8914_v12 = vld [vmem:[#allocation40_spill] sm:$0xff] }
 0x82c   : > { %v7295_v59 = vadd.f32 %v2747_v58, %v7252_v24  ;;  %v7297_v18 = vadd.f32 %v2754_v61, %v2753_v39  ;;  %v7299_v40 = vadd.f32 %v2761_v8, %v2760_v50  ;;  %v7301_v0 = vadd.f32 %v2768_v31, %v2767_v51  ;;  %v8915_v43 = vld [vmem:[#allocation56_spill] sm:$0xff]  ;;  %v8924_v51 = vld [vmem:[#allocation18_spill] sm:$0xff]  ;;  %v8929_v8 = vld [vmem:[#allocation23_spill] sm:$0xff] }
 0x82d   : > { %v7303_v28 = vadd.f32 %v2775_v16, %v2774_v57  ;;  %v7305_v47 = vadd.f32 %v2782_v54, %v2781_v26  ;;  %v7307_v48 = vadd.f32 %v2789_v21, %v2788_v38  ;;  %v7309_v1 = vadd.f32 %v2796_v62, %v2795_v15  ;;  %v8925_v26 = vld [vmem:[#allocation19_spill] sm:$0xff]  ;;  %v8926_v15 = vld [vmem:[#allocation20_spill] sm:$0xff]  ;;  %v8928_v61 = vld [vmem:[#allocation22_spill] sm:$0xff] }
 0x82e   : > { %v7311_v3 = vadd.f32 %v2803_v25, %v2802_v37  ;;  %v2821_v24 = vmul.f32 %v8913_v5, %v6727_v29  ;;  %v2822_v58 = vmul.f32 %v8915_v43, %v8914_v12  ;;  %v2823_v33 = vmul.f32 %v8917_v7, %v8916_v35  ;;  %v8927_v37 = vld [vmem:[#allocation21_spill] sm:$0xff]  ;;  %v8930_v31 = vld [vmem:[#allocation26_spill] sm:$0xff] }
 0x82f   : > { %v2824_v34 = vmul.f32 %v8919_v4, %v8918_v42  ;;  %v2825_v41 = vmul.f32 %v7141_v36, %v8920_v55  ;;  %v2826_v53 = vmul.f32 %v7144_v11, %v8921_v49  ;;  %v2827_v22 = vmul.f32 %v7147_v6, %v8922_v27 }
 0x830   : > { %v2828_v39 = vmul.f32 %v7150_v45, %v8923_v56  ;;  %v2829_v50 = vmul.f32 %v7152_v10, %v6761_v14  ;;  %v2830_v57 = vmul.f32 %v7154_v60, %v8924_v51  ;;  %v2831_v38 = vmul.f32 %v7156_v32, %v8925_v26 }
 0x831   : > { %v2832_v36 = vmul.f32 %v7158_v2, %v8926_v15  ;;  %v2833_v11 = vmul.f32 %v7160_v30, %v8927_v37  ;;  %v2834_v6 = vmul.f32 %v7162_v9, %v8928_v61  ;;  %v2835_v45 = vmul.f32 %v7164_v19, %v8929_v8 }
 0x832   : > { %v2836_v10 = vmul.f32 %v7166_v13, %v8930_v31  ;;  %v2837_v16 = vadd.f32 1.0, %v2821_v24  ;;  %v2838_v60 = vadd.f32 1.0, %v2822_v58  ;;  %v2839_v54 = vadd.f32 1.0, %v2823_v33 }
 0x833   : > { %v2840_v21 = vadd.f32 1.0, %v2824_v34  ;;  %v2841_v32 = vadd.f32 1.0, %v2825_v41  ;;  %v2842_v62 = vadd.f32 1.0, %v2826_v53  ;;  %v2843_v25 = vadd.f32 1.0, %v2827_v22 }
 0x834   : > { %v2844_v2 = vadd.f32 1.0, %v2828_v39  ;;  %v2845_v5 = vadd.f32 1.0, %v2829_v50  ;;  %v2846_v43 = vadd.f32 1.0, %v2830_v57  ;;  %v2847_v30 = vadd.f32 1.0, %v2831_v38 }
 0x835   : > { %v2848_v7 = vadd.f32 1.0, %v2832_v36  ;;  %v2849_v4 = vadd.f32 1.0, %v2833_v11  ;;  %v2850_v9 = vadd.f32 1.0, %v2834_v6  ;;  %v2851_v61 = vadd.f32 1.0, %v2835_v45 }
 0x836   : > { %v2852_v37 = vadd.f32 1.0, %v2836_v10  ;;  %vm2853_vm0 = vcmp.gt.f32.partialorder %v2837_v16, %v7266_v52  ;;  %vm2854_vm8 = vcmp.gt.f32.partialorder %v2838_v60, %v7268_v23  ;;  %vm2855_vm9 = vcmp.gt.f32.partialorder %v2839_v54, %v7270_v20 }
 0x837   : > { %vm2856_vm10 = vcmp.gt.f32.partialorder %v2840_v21, %v7272_v63  ;;  %vm2857_vm11 = vcmp.gt.f32.partialorder %v2841_v32, %v7286_v46  ;;  %vm2858_vm12 = vcmp.gt.f32.partialorder %v2842_v62, %v7289_v44  ;;  %vm2859_vm13 = vcmp.gt.f32.partialorder %v2843_v25, %v7292_v17 }
 0x838   : > { %vm2860_vm14 = vcmp.gt.f32.partialorder %v2844_v2, %v7295_v59  ;;  %vm2861_vm15 = vcmp.gt.f32.partialorder %v2845_v5, %v7297_v18  ;;  %vm2862_vm7 = vcmp.gt.f32.partialorder %v2846_v43, %v7299_v40  ;;  %vm2863_vm6 = vcmp.gt.f32.partialorder %v2847_v30, %v7301_v0 }
 0x839   : > { %vm2864_vm5 = vcmp.gt.f32.partialorder %v2848_v7, %v7303_v28  ;;  %vm2865_vm4 = vcmp.gt.f32.partialorder %v2849_v4, %v7305_v47  ;;  %vm2866_vm3 = vcmp.gt.f32.partialorder %v2850_v9, %v7307_v48  ;;  %vm2867_vm2 = vcmp.gt.f32.partialorder %v2851_v61, %v7309_v1 }
 0x83a   : > { %vm2868_vm1 = vcmp.gt.f32.partialorder %v2852_v37, %v7311_v3  ;;  %v8931_v19 = vmov 0.0  }
 0x83b   : > { %v5001_v13 = vsel %vm2853_vm0, 1.0, %v8931_v19  ;;  %v5002_v40 = vsel %vm2854_vm8, 1.0, %v8931_v19  ;;  %v5003_v24 = vsel %vm2855_vm9, 1.0, %v8931_v19  ;;  %v5004_v58 = vsel %vm2856_vm10, 1.0, %v8931_v19 }
 0x83c   : > { %v5005_v33 = vsel %vm2857_vm11, 1.0, %v8931_v19  ;;  %v5006_v52 = vsel %vm2858_vm12, 1.0, %v8931_v19  ;;  %v5007_v23 = vsel %vm2859_vm13, 1.0, %v8931_v19  ;;  %v5010_v34 = vsel %vm2862_vm7, 1.0, %v8931_v19 }
 0x83d   : > { %v5008_v20 = vsel %vm2860_vm14, 1.0, %v8931_v19  ;;  %v5009_v63 = vsel %vm2861_vm15, 1.0, %v8931_v19  ;;  %v5011_v46 = vsel %vm2863_vm6, 1.0, %v8931_v19  ;;  %v5012_v44 = vsel %vm2864_vm5, 1.0, %v8931_v19 }
 0x83e   : > { %v5013_v17 = vsel %vm2865_vm4, 1.0, %v8931_v19  ;;  %v5014_v59 = vsel %vm2866_vm3, 1.0, %v8931_v19  ;;  %v2917_v41 = vrot.slane %v5002_v40, 7  ;;  %v2919_v53 = vrot.slane %v5003_v24, 6 }
 0x83f   : > { %v5015_v18 = vsel %vm2867_vm2, 1.0, %v8931_v19  ;;  %v5016_v0 = vsel %vm2868_vm1, 1.0, %v8931_v19  ;;  %v2921_v28 = vrot.slane %v5004_v58, 5  ;;  %v2931_v22 = vrot.slane %v5010_v34, 7 }
 0x840   : > { %vm8932_vm0 = vcmask 1041409   ;;  %v2923_v47 = vrot.slane %v5005_v33, 4  ;;  %v2925_v50 = vrot.slane %v5006_v52, 3  ;;  %v2933_v57 = vrot.slane %v5011_v46, 6 }
 0x841   : > { %v2918_v39 = vsel %vm8932_vm0, %v2917_v41, %v5001_v13  ;;  %vm8933_vm8 = vcmask 1042434   ;;  %v2927_v38 = vrot.slane %v5007_v23, 2  ;;  %vm8934_vm9 = vmmov %vm8932_vm0  ;;  %v2935_v11 = vrot.slane %v5012_v44, 5 }
 0x842   : > { %v2920_v48 = vsel %vm8933_vm8, %v2919_v53, %v2918_v39  ;;  %v2932_v36 = vsel %vm8934_vm9, %v2931_v22, %v5009_v63  ;;  %vm8935_vm10 = vcmask 1043459   ;;  %v2929_v61 = vrot.slane %v5008_v20, 1  ;;  %vm8936_vm11 = vmmov %vm8933_vm8 }
 0x843   : > { %v2922_v1 = vsel %vm8935_vm10, %v2921_v28, %v2920_v48  ;;  %v2934_v6 = vsel %vm8936_vm11, %v2933_v57, %v2932_v36  ;;  %v2937_v3 = vrot.slane %v5013_v17, 4  ;;  %vm8937_vm12 = vcmask 1044484   ;;  %vm8938_vm13 = vmmov %vm8935_vm10 }
 0x844   : > { %v2924_v37 = vsel %vm8937_vm12, %v2923_v47, %v2922_v1  ;;  %v2936_v45 = vsel %vm8938_vm13, %v2935_v11, %v2934_v6  ;;  %v2939_v10 = vrot.slane %v5014_v59, 3  ;;  %v2941_v16 = vrot.slane %v5015_v18, 2  ;;  %vm8940_vm15 = vmmov %vm8937_vm12 }
 0x845   : > { %vm8939_vm14 = vcmask 1045509   ;;  %v2938_v54 = vsel %vm8940_vm15, %v2937_v3, %v2936_v45  ;;  %v2943_v21 = vrot.slane %v5016_v0, 1  ;;  %v2954_v32 = vmul.f32 %v5001_v13, %v6727_v29  ;;  %vm8948_vm2 = vmmov %vm8932_vm0 }
 0x846   : > { %v2926_v60 = vsel %vm8939_vm14, %v2925_v50, %v2924_v37  ;;  %vm8941_vm7 = vcmask 1046534   ;;  %vm8942_vm6 = vmmov %vm8939_vm14  ;;  %v2955_v2 = vmul.f32 %v5002_v40, %v8914_v12  ;;  %v2956_v5 = vmul.f32 %v5003_v24, %v8916_v35 }
 0x847   : > { %v2928_v62 = vsel %vm8941_vm7, %v2927_v38, %v2926_v60  ;;  %v2940_v25 = vsel %vm8942_vm6, %v2939_v10, %v2938_v54  ;;  %vm8943_vm5 = vmmov %vm8941_vm7  ;;  %v2957_v30 = vmul.f32 %v5004_v58, %v8918_v42  ;;  %v2958_v7 = vmul.f32 %v5005_v33, %v8920_v55  ;;  %v8946_v55 = vld [vmem:[#allocation21_spill] sm:$0xff] }
 0x848   : > { %v2942_v43 = vsel %vm8943_vm5, %v2941_v16, %v2940_v25  ;;  %v2959_v4 = vmul.f32 %v5006_v52, %v8921_v49  ;;  %vm8944_vm4 = vcmask 1047559   ;;  %v2963_v41 = vmul.f32 %v5010_v34, %v8924_v51  ;;  %v8947_v52 = vld [vmem:[#allocation22_spill] sm:$0xff]  ;;  %vm8949_vm1 = vmmov %vm8933_vm8 }
 0x849   : > { %v2930_v9 = vsel %vm8944_vm4, %v2929_v61, %v2928_v62  ;;  %vm8945_vm3 = vmmov %vm8944_vm4  ;;  %v2964_v53 = vmul.f32 %v5011_v46, %v8925_v26  ;;  %v2960_v12 = vmul.f32 %v5007_v23, %v8922_v27  ;;  %v2961_v35 = vmul.f32 %v5008_v20, %v8923_v56 }
 0x84a   : > { %v2944_v13 = vsel %vm8945_vm3, %v2943_v21, %v2942_v43  ;;  %v2962_v40 = vmul.f32 %v5009_v63, %v6761_v14  ;;  %v2965_v42 = vmul.f32 %v5012_v44, %v8926_v15  ;;  %v2966_v24 = vmul.f32 %v5013_v17, %v8946_v55  ;;  %vm8950_vm0 = vmmov %vm8935_vm10 }
 0x84b   : > { %v2947_v28 = vadd.f32 %v2944_v13, %v2930_v9  ;;  %v2986_v49 = vrot.slane %v2955_v2, 7  ;;  %v2988_v58 = vrot.slane %v2956_v5, 6  ;;  %v2967_v22 = vmul.f32 %v5014_v59, %v8947_v52  ;;  %vm8951_vm8 = vmmov %vm8948_vm2  ;;  %v8963_v52 = vld [vmem:[#allocation13_spill] sm:$0xff] }
 0x84c   : > { %v2968_v51 = vmul.f32 %v5015_v18, %v8929_v8  ;;  %v2969_v26 = vmul.f32 %v5016_v0, %v8930_v31  ;;  %v2990_v27 = vrot.slane %v2957_v30, 5  ;;  %v3000_v23 = vrot.slane %v2963_v41, 7  ;;  %vm8952_vm9 = vmmov %vm8937_vm12 }
 0x84d   : > { %v2948_v33 = vrot.slane %v2947_v28, 4  ;;  %v2987_v34 = vsel %vm8948_vm2, %v2986_v49, %v2954_v32  ;;  %v3002_v56 = vrot.slane %v2964_v53, 6  ;;  %v2992_v15 = vrot.slane %v2958_v7, 4  ;;  %vm8953_vm10 = vmmov %vm8949_vm1 }
 0x84e   : > { %v2989_v63 = vsel %vm8949_vm1, %v2988_v58, %v2987_v34  ;;  %v2994_v46 = vrot.slane %v2959_v4, 3  ;;  %v2996_v17 = vrot.slane %v2960_v12, 2  ;;  %v3001_v39 = vsel %vm8951_vm8, %v3000_v23, %v2962_v40  ;;  %vm8954_vm11 = vmmov %vm8942_vm6  ;;  %v8962_v58 = vld [vmem:[#allocation12_spill] sm:$0xff] }
 0x84f   : > { %v2949_v20 = vadd.f32 %v2948_v33, %v2947_v28  ;;  %v2991_v44 = vsel %vm8950_vm0, %v2990_v27, %v2989_v63  ;;  %v3004_v59 = vrot.slane %v2965_v42, 5  ;;  %v3003_v31 = vsel %vm8953_vm10, %v3002_v56, %v3001_v39  ;;  %vm8955_vm12 = vmmov %vm8950_vm0  ;;  %v8969_v39 = vld [vmem:[#allocation29_spill] sm:$0xff] }
 0x850   : > { %v2993_v8 = vsel %vm8952_vm9, %v2992_v15, %v2991_v44  ;;  %v3006_v18 = vrot.slane %v2966_v24, 4  ;;  %v3008_v57 = vrot.slane %v2967_v22, 3  ;;  %vm8956_vm13 = vmmov %vm8943_vm5  ;;  %v3010_v11 = vrot.slane %v2968_v51, 2  ;;  %v552_v51 = vld [vmem:[%s8645_s3 + $0x20] sm:$0xff] }
 0x851   : > { %v2950_v47 = vrot.slane %v2949_v20, 2  ;;  %v2995_v0 = vsel %vm8954_vm11, %v2994_v46, %v2993_v8  ;;  %v3005_v50 = vsel %vm8955_vm12, %v3004_v59, %v3003_v31  ;;  %vm8957_vm14 = vmmov %vm8952_vm9  ;;  %v2998_v1 = vrot.slane %v2961_v35, 1  ;;  %v3113_v8 = vpop.permute.xlu0 %3112 }
 0x852   : > { %v2997_v38 = vsel %vm8956_vm13, %v2996_v17, %v2995_v0  ;;  %v3007_v36 = vsel %vm8957_vm14, %v3006_v18, %v3005_v50  ;;  %vm8958_vm15 = vmmov %vm8942_vm6  ;;  %v3012_v6 = vrot.slane %v2969_v26, 1  ;;  %vm8964_vm0 = vcmask 130048   ;;  %v561_v26 = vld [vmem:[%s8646_s4 + $0x28] sm:$0xff] }
 0x853   : > { %v2951_v48 = vadd.f32 %v2950_v47, %v2949_v20  ;;  %v3009_v61 = vsel %vm8958_vm15, %v3008_v57, %v3007_v36  ;;  %vm8959_vm7 = vmmov %vm8943_vm5 }
 0x854   : > { %v3011_v37 = vsel %vm8959_vm7, %v3010_v11, %v3009_v61  ;;  %vm8960_vm6 = vmmov %vm8945_vm3 }
 0x855   : > { %v2952_v3 = vrot.slane %v2951_v48, 1  ;;  %v2999_v45 = vsel %vm8960_vm6, %v2998_v1, %v2997_v38  ;;  %vm8961_vm5 = vmmov %vm8945_vm3 }
 0x856   : > { %v3013_v10 = vsel %vm8961_vm5, %v3012_v6, %v3011_v37  ;;  %vm8965_vm8 = vmmov %vm8964_vm0 }
 0x857   : > { %v2953_v16 = vadd.f32 %v2952_v3, %v2951_v48  ;;  %v3016_v60 = vadd.f32 %v3013_v10, %v2999_v45  ;;  %vm8966_vm9 = vmmov %vm8964_vm0 }
 0x858   : > { %vm8967_vm10 = vmmov %vm8964_vm0 }
 0x859   : > { %v3017_v54 = vrot.slane %v3016_v60, 4  ;;  %5232 = vrcp.f32 %v2953_v16  ;;  %v3035_v30 = vand.u32 2147483648, %v2953_v16  ;;  %v3033_v9 = vand.u32 2147483647, %v2953_v16 }
 0x85a   : > { %vm3029_vm3 = vweird.f32 %v2953_v16 }
 0x85b   : > { %v3018_v21 = vadd.f32 %v3017_v54, %v3016_v60  ;;  %v3036_v41 = vor.u32 1.1754944e-38, %v3035_v30  ;;  %vm3034_vm1 = vcmp.eq.f32.partialorder %v3033_v9, 8.507059e+37  ;;  %v3069_v9 = vpop.permute.xlu0 %3068 }
 0x85d   : > { %v3019_v32 = vrot.slane %v3018_v21, 2 }
 0x85f   : > { %v5233_v62 = vpop.eup %5232  ;;  %v3020_v25 = vadd.f32 %v3019_v32, %v3018_v21 }
 0x860   : > { %v3025_v2 = vmul.f32 %v5233_v62, %v2953_v16  ;;  %vm3030_vm4 = vweird.f32 %v5233_v62 }
 0x861   : > { %v3021_v5 = vrot.slane %v3020_v25, 1  ;;  %vm3031_vm2 = vmor %vm3029_vm3, %vm3030_vm4 }
 0x862   : > { %v3026_v43 = vsub.f32 1.0, %v3025_v2  ;;  %vm8970_vm4 = vmmov %vm8964_vm0 }
 0x863   : > { %v3022_v7 = vadd.f32 %v3021_v5, %v3020_v25  ;;  %v3074_v5 = vpop.permute.xlu2 %3073  ;;  %vm8971_vm3 = vmmov %vm8964_vm0 }
 0x864   : > { %v3027_v4 = vmul.f32 %v5233_v62, %v3026_v43 }
 0x865   : > { %v5017_v53 = vadd.f32 -1.0, %v3022_v7 }
 0x866   : > { %v3028_v13 = vadd.f32 %v5233_v62, %v3027_v4 }
 0x868   : > { %v3032_v28 = vsel %vm3031_vm2, %v5233_v62, %v3028_v13  ;;  %vm8972_vm2 = vmmov %vm8964_vm0 }
 0x869   : > { %v3037_v12 = vsel %vm3034_vm1, %v3036_v41, %v3032_v28  ;;  %vm8973_vm1 = vmmov %vm8964_vm0 }
 0x86a   : > { %v3038_v35 = vmul.f32 %v5017_v53, %v3037_v12 }
 0x86c   : > { %v3039_v40 = vperm.slane %v3038_v35, 0  ;;  %v592_v35 = vld [vmem:[%s8469_s7 + $0x60] sm:$0xff] }
 0x86e   : > { %v3041_v42 = vsub.f32 %v6761_v14, %v3039_v40  ;;  %v3040_v55 = vsub.f32 %v6727_v29, %v3039_v40  ;;  %v560_v29 = vld [vmem:[%s8646_s4 + $0x20] sm:$0xff]  ;;  %v553_v14 = vld [vmem:[%s8645_s3 + $0x28] sm:$0xff] }
 0x86f   : > { %v616_v40 = vld [vmem:[%s8470_s8 + $0x60] sm:$0xff] }
 0x870   : > { %v7453_v24 = vmax.f32 %v3041_v42, 0.0  ;;  %v7455_v49 = vmax.f32 %v3040_v55, 0.0  ;;  %v593_v42 = vld [vmem:[%s8469_s7 + $0x68] sm:$0xff] }
 0x871   : > { %v617_v55 = vld [vmem:[%s8470_s8 + $0x68] sm:$0xff] }
 0x872   : > { %v3065_v33 = vmul.f32 %v7453_v24, %v8962_v58  ;;  %v3064_v22 = vmul.f32 %v7455_v49, %v8963_v52  ;;  %v3044_v34 = vadd.f32 1e-15, %v7455_v49  ;;  %v3045_v27 = vadd.f32 1e-15, %v7453_v24 }
 0x874   : > { %3096 = vmatpush.msra.mxu2 %v3065_v33  ;;  %3135 = vmatpush.msra.mxu3 %v3065_v33  ;;  %5234 = vlog2.f32 %v3044_v34  ;;  %v3226_v33 = vpop.permute.xlu2 %3225 }
 0x875   : > { %5236 = vlog2.f32 %v3045_v27 }
 0x876   : > { %3097 = vmatpush.msra.mxu2 %v3064_v22  ;;  %3136 = vmatpush.msra.mxu3 %v3064_v22 }
 0x877   : > { %5018 = vmatmul.msk.f32.vlgmr.msra.gmra.mxu2 %vm8964_vm0, %v552_v51  ;;  %5020 = vmatmul.msk.f32.vlgmr.msra.gmra.mxu3 %vm8965_vm8, %v560_v29 }
 0x87a   : > { %v5235_v23 = vpop.eup %5234 }
 0x87b   : > { %v5237_v56 = vpop.eup %5236  ;;  %v3047_v20 = vmul.f32 0.6931472, %v5235_v23 }
 0x87c   : > { %v3049_v63 = vmul.f32 0.6931472, %v5237_v56 }
 0x87d   : > { %v3050_v15 = vmul.f32 %v3047_v20, %v7455_v49 }
 0x87e   : > { %v3051_v46 = vmul.f32 %v3049_v63, %v7453_v24 }
 0x87f   : > { %5019 = vmatmul.msk.f32.gmra.mxu2 %vm8966_vm9, %v553_v14  ;;  %5021 = vmatmul.msk.f32.gmra.mxu3 %vm8967_vm10, %v561_v26  ;;  %v8974_v26 = vld [vmem:[#allocation32_spill] sm:$0xff] }
 0x880   : > { %v7481_v44 = vadd.f32 %v3051_v46, %v3050_v15 }
 0x882   : > { %8968 = vst [vmem:[#allocation25_spill] sm:$0xff] %v7481_v44 }
 0x8fa   : > { %v3138_v17 = vpop.f32.mrf.mxu3  ;;  %v3099_v61 = vpop.f32.mrf.mxu2 }
 0x8fb   : > { %v3139_v59 = vadd.f32 %v3138_v17, %v8969_v39  ;;  %v3100_v53 = vadd.f32 %v3099_v61, %v3069_v9 }
 0x8fd   : > { %v5022_v47 = vmul.f32 -1.442695, %v3139_v59 }
 0x8ff   : > { %5238 = vpow2.f32 %v5022_v47 }
 0x902   : > { %v3141_v31 = vpop.f32.mrf.mxu3  ;;  %v3102_v62 = vpop.f32.mrf.mxu2 }
 0x903   : > { %v3142_v18 = vadd.f32 %v3141_v31, %v3113_v8  ;;  %v3103_v7 = vadd.f32 %v3102_v62, %v3074_v5 }
 0x905   : > { %v5239_v0 = vpop.eup %5238  ;;  %v5023_v50 = vmul.f32 -1.442695, %v3142_v18 }
 0x906   : > { %v3150_v57 = vadd.f32 1.0, %v5239_v0 }
 0x907   : > { %5240 = vpow2.f32 %v5023_v50 }
 0x908   : > { %5242 = vrcp.f32 %v3150_v57  ;;  %vm3157_vm12 = vweird.f32 %v3150_v57  ;;  %v3163_v60 = vand.u32 2147483648, %v3150_v57  ;;  %v3161_v32 = vand.u32 2147483647, %v3150_v57 }
 0x90a   : > { %v3164_v30 = vor.u32 1.1754944e-38, %v3163_v60  ;;  %vm3162_vm5 = vcmp.eq.f32.partialorder %v3161_v32, 8.507059e+37 }
 0x90d   : > { %v5241_v48 = vpop.eup %5240 }
 0x90e   : > { %v5243_v38 = vpop.eup %5242  ;;  %v3151_v36 = vadd.f32 1.0, %v5241_v48 }
 0x90f   : > { %v3153_v11 = vmul.f32 %v5243_v38, %v3150_v57  ;;  %vm3158_vm11 = vweird.f32 %v5243_v38 }
 0x910   : > { %5244 = vrcp.f32 %v3151_v36  ;;  %v3178_v16 = vand.u32 2147483648, %v3151_v36  ;;  %v3176_v21 = vand.u32 2147483647, %v3151_v36  ;;  %vm3159_vm14 = vmor %vm3157_vm12, %vm3158_vm11  ;;  %vm3172_vm15 = vweird.f32 %v3151_v36 }
 0x911   : > { %v3154_v1 = vsub.f32 1.0, %v3153_v11 }
 0x912   : > { %v3179_v43 = vor.u32 1.1754944e-38, %v3178_v16  ;;  %vm3177_vm6 = vcmp.eq.f32.partialorder %v3176_v21, 8.507059e+37 }
 0x913   : > { %v3155_v6 = vmul.f32 %v5243_v38, %v3154_v1 }
 0x915   : > { %v3156_v10 = vadd.f32 %v5243_v38, %v3155_v6  ;;  %v8975_v6 = vld [vmem:[#allocation33_spill] sm:$0xff] }
 0x916   : > { %v5245_v3 = vpop.eup %5244 }
 0x917   : > { %v3168_v37 = vmul.f32 %v5245_v3, %v3151_v36  ;;  %vm3173_vm13 = vweird.f32 %v5245_v3  ;;  %v3160_v2 = vsel %vm3159_vm14, %v5243_v38, %v3156_v10 }
 0x918   : > { %vm3174_vm7 = vmor %vm3172_vm15, %vm3173_vm13  ;;  %v3165_v41 = vsel %vm3162_vm5, %v3164_v30, %v3160_v2  ;;  %v618_v30 = vld [vmem:[%s8470_s8 + $0x70] sm:$0xff] }
 0x919   : > { %v3169_v45 = vsub.f32 1.0, %v3168_v37  ;;  %v3182_v12 = vmul.f32 %v3165_v41, %v3100_v53  ;;  %vm8976_vm15 = vmmov %vm8973_vm1 }
 0x91a   : > { %vm8979_vm5 = vmmov %vm8973_vm1 }
 0x91b   : > { %v3170_v54 = vmul.f32 %v5245_v3, %v3169_v45  ;;  %v3192_v45 = vpop.permute.xlu0 %3191 }
 0x91d   : > { %v3171_v25 = vadd.f32 %v5245_v3, %v3170_v54 }
 0x91f   : > { %v3175_v4 = vsel %vm3174_vm7, %v5245_v3, %v3171_v25  ;;  %vm8977_vm7 = vmmov %vm8973_vm1 }
 0x920   : > { %v3180_v13 = vsel %vm3177_vm6, %v3179_v43, %v3175_v4  ;;  %v594_v43 = vld [vmem:[%s8469_s7 + $0x70] sm:$0xff]  ;;  %v619_v4 = vld [vmem:[%s8470_s8 + $0x78] sm:$0xff]  ;;  %vm8978_vm6 = vmmov %vm8973_vm1 }
 0x921   : > { %v7484_v28 = vmul.f32 %v3180_v13, %v3103_v7  ;;  %v595_v7 = vld [vmem:[%s8469_s7 + $0x78] sm:$0xff] }
 0x923   : > { %3214 = vmatpush.msrb.mxu0 %v7484_v28  ;;  %3253 = vmatpush.msrb.mxu1 %v7484_v28  ;;  %v3348_v9 = vpop.permute.xlu0 %3347 }
 0x925   : > { %3215 = vmatpush.msrb.mxu0 %v3182_v12  ;;  %3254 = vmatpush.msrb.mxu1 %v3182_v12 }
 0x926   : > { %5024 = vmatmul.msk.f32.vlgmr.msrb.gmra.mxu0 %vm8970_vm4, %v592_v35  ;;  %5026 = vmatmul.msk.f32.vlgmr.msrb.gmra.mxu1 %vm8971_vm3, %v616_v40 }
 0x92e   : > { %5025 = vmatmul.msk.f32.gmra.mxu0 %vm8972_vm2, %v593_v42  ;;  %5027 = vmatmul.msk.f32.gmra.mxu1 %vm8973_vm1, %v617_v55 }
 0x9a3   : > { %v3256_v22 = vpop.f32.mrf.mxu1  ;;  %v3217_v39 = vpop.f32.mrf.mxu0 }
 0x9a4   : > { %v3257_v51 = vadd.f32 %v3256_v22, %v3226_v33  ;;  %v3218_v3 = vadd.f32 %v3217_v39, %v8975_v6 }
 0x9a6   : > { %v5028_v29 = vmul.f32 -1.442695, %v3257_v51 }
 0x9a8   : > { %5246 = vpow2.f32 %v5028_v29 }
 0x9ab   : > { %v3259_v14 = vpop.f32.mrf.mxu1  ;;  %v3220_v1 = vpop.f32.mrf.mxu0 }
 0x9ac   : > { %v3260_v34 = vadd.f32 %v3259_v14, %v8974_v26  ;;  %v3221_v16 = vadd.f32 %v3220_v1, %v3192_v45 }
 0x9ae   : > { %v5247_v27 = vpop.eup %5246  ;;  %v5029_v23 = vmul.f32 -1.442695, %v3260_v34 }
 0x9af   : > { %v3268_v56 = vadd.f32 1.0, %v5247_v27 }
 0x9b0   : > { %5248 = vpow2.f32 %v5029_v23 }
 0x9b1   : > { %5250 = vrcp.f32 %v3268_v56  ;;  %v3281_v31 = vand.u32 2147483648, %v3268_v56  ;;  %vm3275_vm8 = vweird.f32 %v3268_v56  ;;  %v3279_v0 = vand.u32 2147483647, %v3268_v56 }
 0x9b3   : > { %v3282_v38 = vor.u32 1.1754944e-38, %v3281_v31  ;;  %vm3280_vm11 = vcmp.eq.f32.partialorder %v3279_v0, 8.507059e+37 }
 0x9b6   : > { %v5249_v20 = vpop.eup %5248 }
 0x9b7   : > { %v5251_v63 = vpop.eup %5250  ;;  %v3269_v15 = vadd.f32 1.0, %v5249_v20 }
 0x9b8   : > { %v3271_v46 = vmul.f32 %v5251_v63, %v3268_v56  ;;  %vm3276_vm0 = vweird.f32 %v5251_v63 }
 0x9b9   : > { %5252 = vrcp.f32 %v3269_v15  ;;  %vm3277_vm9 = vmor %vm3275_vm8, %vm3276_vm0  ;;  %v3296_v48 = vand.u32 2147483648, %v3269_v15  ;;  %v3294_v11 = vand.u32 2147483647, %v3269_v15  ;;  %vm3290_vm12 = vweird.f32 %v3269_v15 }
 0x9ba   : > { %v3272_v17 = vsub.f32 1.0, %v3271_v46 }
 0x9bb   : > { %v3297_v10 = vor.u32 1.1754944e-38, %v3296_v48  ;;  %vm3295_vm14 = vcmp.eq.f32.partialorder %v3294_v11, 8.507059e+37  ;;  %v8980_v48 = vld [vmem:[#allocation34_spill] sm:$0xff] }
 0x9bc   : > { %v3273_v59 = vmul.f32 %v5251_v63, %v3272_v17 }
 0x9be   : > { %v3274_v47 = vadd.f32 %v5251_v63, %v3273_v59 }
 0x9bf   : > { %v5253_v8 = vpop.eup %5252 }
 0x9c0   : > { %v3286_v18 = vmul.f32 %v5253_v8, %v3269_v15  ;;  %v3278_v57 = vsel %vm3277_vm9, %v5251_v63, %v3274_v47  ;;  %vm3291_vm10 = vweird.f32 %v5253_v8 }
 0x9c1   : > { %v3283_v61 = vsel %vm3280_vm11, %v3282_v38, %v3278_v57  ;;  %vm3292_vm13 = vmor %vm3290_vm12, %vm3291_vm10 }
 0x9c2   : > { %v3287_v50 = vsub.f32 1.0, %v3286_v18  ;;  %v3300_v54 = vmul.f32 %v3283_v61, %v3218_v3  ;;  %vm8981_vm11 = vmmov %vm8979_vm5 }
 0x9c3   : > { %vm8982_vm12 = vmmov %vm8979_vm5 }
 0x9c4   : > { %v3288_v36 = vmul.f32 %v5253_v8, %v3287_v50  ;;  %v3302_v25 = vadd.f32 %v3300_v54, %v3182_v12  ;;  %v621_v54 = vld [vmem:[%s8470_s8 + $0x88] sm:$0xff] }
 0x9c6   : > { %v3289_v37 = vadd.f32 %v5253_v8, %v3288_v36  ;;  %v7511_v5 = vmul.f32 0.70710677, %v3302_v25 }
 0x9c8   : > { %v3293_v60 = vsel %vm3292_vm13, %v5253_v8, %v3289_v37  ;;  %vm8983_vm13 = vmmov %vm8979_vm5 }
 0x9c9   : > { %v3298_v21 = vsel %vm3295_vm14, %v3297_v10, %v3293_v60  ;;  %v596_v10 = vld [vmem:[%s8469_s7 + $0x80] sm:$0xff]  ;;  %v597_v60 = vld [vmem:[%s8469_s7 + $0x88] sm:$0xff]  ;;  %vm8984_vm14 = vmmov %vm8979_vm5 }
 0x9ca   : > { %v3301_v32 = vmul.f32 %v3298_v21, %v3221_v16  ;;  %v620_v16 = vld [vmem:[%s8470_s8 + $0x80] sm:$0xff] }
 0x9cc   : > { %v3303_v62 = vadd.f32 %v3301_v32, %v7484_v28  ;;  %v3353_v28 = vpop.permute.xlu2 %3352 }
 0x9ce   : > { %v7507_v2 = vmul.f32 0.70710677, %v3303_v62 }
 0x9d0   : > { %3336 = vmatpush.msrb.mxu2 %v7507_v2  ;;  %3375 = vmatpush.msrb.mxu3 %v7507_v2 }
 0x9d2   : > { %3337 = vmatpush.msrb.mxu2 %v7511_v5  ;;  %3376 = vmatpush.msrb.mxu3 %v7511_v5 }
 0x9d3   : > { %5030 = vmatmul.msk.f32.vlgmr.msrb.gmra.mxu2 %vm8976_vm15, %v594_v43  ;;  %5032 = vmatmul.msk.f32.vlgmr.msrb.gmra.mxu3 %vm8977_vm7, %v618_v30 }
 0x9d4   : > { %v3309_v8 = vpop.permute.xlu2 %3308 }
 0x9db   : > { %5031 = vmatmul.msk.f32.gmra.mxu2 %vm8978_vm6, %v595_v7  ;;  %5033 = vmatmul.msk.f32.gmra.mxu3 %vm8979_vm5, %v619_v4 }
 0x9dc   : > { %v7554_v21 = vpop.permute.xlu2 %3554 }
 0x9e4   : > { %v7556_v32 = vpop.permute.xlu2 %4291 }
 0x9e5   : > { %8985 = vst [vmem:[#allocation27_spill] sm:$0xff] %v7556_v32 }
 0x9ec   : > { %v7558_v25 = vpop.permute.xlu2 %4414 }
 0x9ed   : > { %8986 = vst [vmem:[#allocation44_spill] sm:$0xff] %v7558_v25 }
 0x9f4   : > { %v7560_v7 = vpop.permute.xlu2 %4370 }
 0x9f5   : > { %8987 = vst [vmem:[#allocation24_spill] sm:$0xff] %v7560_v7 }
 0xa56   : > { %v3378_v13 = vpop.f32.mrf.mxu3  ;;  %v3339_v26 = vpop.f32.mrf.mxu2 }
 0xa57   : > { %v3379_v41 = vadd.f32 %v3378_v13, %v3348_v9  ;;  %v3340_v0 = vadd.f32 %v3339_v26, %v3309_v8 }
 0xa59   : > { %v5034_v53 = vmul.f32 -1.442695, %v3379_v41  ;;  %v7562_v41 = vpop.permute.xlu2 %4497 }
 0xa5a   : > { %8988 = vst [vmem:[#allocation45_spill] sm:$0xff] %v7562_v41 }
 0xa5b   : > { %5254 = vpow2.f32 %v5034_v53 }
 0xa5e   : > { %v3381_v12 = vpop.f32.mrf.mxu3  ;;  %v3342_v31 = vpop.f32.mrf.mxu2 }
 0xa5f   : > { %v3382_v35 = vadd.f32 %v3381_v12, %v3353_v28  ;;  %v3343_v38 = vadd.f32 %v3342_v31, %v8980_v48 }
 0xa61   : > { %v5255_v40 = vpop.eup %5254  ;;  %v5035_v42 = vmul.f32 -1.442695, %v3382_v35 }
 0xa62   : > { %v3390_v55 = vadd.f32 1.0, %v5255_v40 }
 0xa63   : > { %5256 = vpow2.f32 %v5035_v42 }
 0xa64   : > { %5258 = vrcp.f32 %v3390_v55  ;;  %v3403_v56 = vand.u32 2147483648, %v3390_v55  ;;  %vm3397_vm3 = vweird.f32 %v3390_v55  ;;  %v3401_v63 = vand.u32 2147483647, %v3390_v55 }
 0xa66   : > { %v3404_v39 = vor.u32 1.1754944e-38, %v3403_v56  ;;  %vm3402_vm0 = vcmp.eq.f32.partialorder %v3401_v63, 8.507059e+37 }
 0xa69   : > { %v5257_v33 = vpop.eup %5256 }
 0xa6a   : > { %v5259_v22 = vpop.eup %5258  ;;  %v3391_v51 = vadd.f32 1.0, %v5257_v33  ;;  %v3470_v33 = vpop.permute.xlu2 %3469 }
 0xa6b   : > { %v3393_v29 = vmul.f32 %v5259_v22, %v3390_v55  ;;  %vm3398_vm4 = vweird.f32 %v5259_v22 }
 0xa6c   : > { %5260 = vrcp.f32 %v3391_v51  ;;  %vm3399_vm2 = vmor %vm3397_vm3, %vm3398_vm4  ;;  %v3418_v17 = vand.u32 2147483648, %v3391_v51  ;;  %v3416_v47 = vand.u32 2147483647, %v3391_v51  ;;  %vm3412_vm8 = vweird.f32 %v3391_v51 }
 0xa6d   : > { %v3394_v14 = vsub.f32 1.0, %v3393_v29  ;;  %vm8990_vm4 = vcmask 64512  }
 0xa6e   : > { %v3419_v57 = vor.u32 1.1754944e-38, %v3418_v17  ;;  %vm3417_vm10 = vcmp.eq.f32.partialorder %v3416_v47, 8.507059e+37  ;;  %v681_v17 = vld [vmem:[%s8473_s11 + $0x28] sm:$0xff]  ;;  %vm8991_vm3 = vmmov %vm8990_vm4 }
 0xa6f   : > { %v3395_v34 = vmul.f32 %v5259_v22, %v3394_v14  ;;  %v8989_v14 = vld [vmem:[#allocation35_spill] sm:$0xff] }
 0xa71   : > { %v3396_v27 = vadd.f32 %v5259_v22, %v3395_v34 }
 0xa72   : > { %v5261_v23 = vpop.eup %5260 }
 0xa73   : > { %v3408_v20 = vmul.f32 %v5261_v23, %v3391_v51  ;;  %v3400_v46 = vsel %vm3399_vm2, %v5259_v22, %v3396_v27  ;;  %vm3413_vm1 = vweird.f32 %v5261_v23 }
 0xa74   : > { %v3405_v18 = vsel %vm3402_vm0, %v3404_v39, %v3400_v46  ;;  %vm3414_vm9 = vmor %vm3412_vm8, %vm3413_vm1 }
 0xa75   : > { %v3409_v15 = vsub.f32 1.0, %v3408_v20  ;;  %v3422_v11 = vmul.f32 %v3405_v18, %v3340_v0 }
 0xa77   : > { %v3410_v59 = vmul.f32 %v5261_v23, %v3409_v15  ;;  %v3424_v3 = vadd.f32 %v3422_v11, %v7511_v5  ;;  %v680_v15 = vld [vmem:[%s8473_s11 + $0x20] sm:$0xff] }
 0xa79   : > { %v3411_v50 = vadd.f32 %v5261_v23, %v3410_v59  ;;  %v7534_v45 = vmul.f32 0.70710677, %v3424_v3 }
 0xa7b   : > { %v3415_v36 = vsel %vm3414_vm9, %v5261_v23, %v3411_v50 }
 0xa7c   : > { %v3420_v1 = vsel %vm3417_vm10, %v3419_v57, %v3415_v36  ;;  %v3431_v57 = vpop.permute.xlu2 %3430  ;;  %v8993_v36 = vld [vmem:[#allocation14_spill] sm:$0xff] }
 0xa7d   : > { %v3423_v61 = vmul.f32 %v3420_v1, %v3343_v38  ;;  %v8992_v38 = vld [vmem:[#allocation31_spill] sm:$0xff] }
 0xa7e   : > { %v2358_v11 = vadd.f32 %v8993_v36, %v8992_v38 }
 0xa7f   : > { %v3425_v6 = vadd.f32 %v3423_v61, %v7507_v2  ;;  %v3475_v2 = vpop.permute.xlu0 %3474 }
 0xa81   : > { %v3427_v37 = vmul.f32 0.70710677, %v3425_v6 }
 0xa83   : > { %3458 = vmatpush.msra.mxu0 %v3427_v37  ;;  %3497 = vmatpush.msra.mxu1 %v3427_v37 }
 0xa85   : > { %3459 = vmatpush.msra.mxu0 %v7534_v45  ;;  %3498 = vmatpush.msra.mxu1 %v7534_v45 }
 0xa86   : > { %5036 = vmatmul.msk.f32.vlgmr.msra.gmra.mxu0 %vm8981_vm11, %v596_v10  ;;  %5038 = vmatmul.msk.f32.vlgmr.msra.gmra.mxu1 %vm8982_vm12, %v620_v16 }
 0xa8e   : > { %5037 = vmatmul.msk.f32.gmra.mxu0 %vm8983_vm13, %v597_v60  ;;  %5039 = vmatmul.msk.f32.gmra.mxu1 %vm8984_vm14, %v621_v54 }
 0xb03   : > { %v3500_v62 = vpop.f32.mrf.mxu1  ;;  %v3461_v13 = vpop.f32.mrf.mxu0 }
 0xb04   : > { %v3501_v51 = vadd.f32 %v3500_v62, %v3470_v33  ;;  %v3462_v1 = vadd.f32 %v3461_v13, %v3431_v57  ;;  %v3560_v33 = vpop.permute.xlu0 %3559 }
 0xb06   : > { %v5040_v56 = vmul.f32 -1.442695, %v3501_v51 }
 0xb0b   : > { %v3503_v5 = vpop.f32.mrf.mxu1  ;;  %v3464_v55 = vpop.f32.mrf.mxu0 }
 0xb0c   : > { %v3504_v43 = vadd.f32 %v3503_v5, %v3475_v2  ;;  %v3465_v26 = vadd.f32 %v3464_v55, %v8989_v14  ;;  %v3060_v2 = vsub.f32 1.3, %v7455_v49 }
 0xb0e   : > { %v5041_v30 = vmul.f32 -1.442695, %v3504_v43  ;;  %v8995_v43 = vld [vmem:[#allocation28_spill] sm:$0xff] }
 0xb10   : > { %5262 = vpow2.f32 %v5041_v30  ;;  %v8996_v30 = vsub.f32 1.3, %v8995_v43 }
 0xb16   : > { %v5263_v4 = vpop.eup %5262 }
 0xb17   : > { %v3513_v9 = vadd.f32 1.0, %v5263_v4  ;;  %v3062_v4 = vmul.f32 %v3060_v2, %v8996_v30 }
 0xb19   : > { %5264 = vrcp.f32 %v3513_v9  ;;  %v3540_v35 = vand.u32 2147483648, %v3513_v9  ;;  %v3538_v42 = vand.u32 2147483647, %v3513_v9  ;;  %vm3534_vm7 = vweird.f32 %v3513_v9 }
 0xb1a   : > { %5266 = vpow2.f32 %v5040_v56 }
 0xb1b   : > { %v3541_v29 = vor.u32 1.1754944e-38, %v3540_v35  ;;  %vm3539_vm5 = vcmp.eq.f32.partialorder %v3538_v42, 8.507059e+37 }
 0xb1f   : > { %v5265_v53 = vpop.eup %5264 }
 0xb20   : > { %v3530_v28 = vmul.f32 %v5265_v53, %v3513_v9  ;;  %vm3535_vm15 = vweird.f32 %v5265_v53  ;;  %v5267_v46 = vpop.eup %5266 }
 0xb21   : > { %vm3536_vm6 = vmor %vm3534_vm7, %vm3535_vm15  ;;  %v3512_v39 = vadd.f32 1.0, %v5267_v46 }
 0xb22   : > { %v3531_v12 = vsub.f32 1.0, %v3530_v28 }
 0xb23   : > { %5268 = vrcp.f32 %v3512_v39  ;;  %v3525_v18 = vand.u32 2147483648, %v3512_v39  ;;  %v3523_v50 = vand.u32 2147483647, %v3512_v39  ;;  %vm3519_vm1 = vweird.f32 %v3512_v39 }
 0xb24   : > { %v3532_v40 = vmul.f32 %v5265_v53, %v3531_v12 }
 0xb25   : > { %v3526_v48 = vor.u32 1.1754944e-38, %v3525_v18  ;;  %vm3524_vm8 = vcmp.eq.f32.partialorder %v3523_v50, 8.507059e+37 }
 0xb26   : > { %v3533_v22 = vadd.f32 %v5265_v53, %v3532_v40 }
 0xb28   : > { %v3537_v34 = vsel %vm3536_vm6, %v5265_v53, %v3533_v22  ;;  %v3061_v53 = vsub.f32 1.3, %v7453_v24 }
 0xb29   : > { %v3542_v27 = vsel %vm3539_vm5, %v3541_v29, %v3537_v34  ;;  %v5269_v59 = vpop.eup %5268  ;;  %v9004_v34 = vld [vmem:[#allocation30_spill] sm:$0xff] }
 0xb2a   : > { %v3545_v23 = vmul.f32 %v3542_v27, %v3465_v26  ;;  %v3515_v47 = vmul.f32 %v5269_v59, %v3512_v39  ;;  %vm3520_vm2 = vweird.f32 %v5269_v59  ;;  %v9005_v27 = vsub.f32 1.3, %v9004_v34 }
 0xb2b   : > { %vm3521_vm0 = vmor %vm3519_vm1, %vm3520_vm2 }
 0xb2c   : > { %v3547_v20 = vadd.f32 %v3545_v23, %v3427_v37  ;;  %v3516_v8 = vsub.f32 1.0, %v3515_v47  ;;  %v2360_v37 = vmul.f32 0.70710677, %v2358_v11  ;;  %v3063_v23 = vmul.f32 %v3061_v53, %v9005_v27 }
 0xb2d   : > { %v9051_v27 = vmov 0 }
 0xb2e   : > { %v3549_v63 = vmul.f32 0.70710677, %v3547_v20  ;;  %v3517_v31 = vmul.f32 %v5269_v59, %v3516_v8  ;;  %v2362_v60 = vmax.f32 %v2360_v37, 0.0 }
 0xb30   : > { %3583 = vmatpush.msra.mxu2 %v3549_v63  ;;  %v3518_v0 = vadd.f32 %v5269_v59, %v3517_v31 }
 0xb31   : > { %5042 = vmatmul.msk.f32.vlgmr.msra.gmra.mxu2 %vm8990_vm4, %v680_v15 }
 0xb32   : > { %v3522_v61 = vsel %vm3521_vm0, %v5269_v59, %v3518_v0 }
 0xb33   : > { %v3527_v6 = vsel %vm3524_vm8, %v3526_v48, %v3522_v61 }
 0xb34   : > { %v3544_v3 = vmul.f32 %v3527_v6, %v3462_v1 }
 0xb36   : > { %v3546_v10 = vadd.f32 %v3544_v3, %v7534_v45 }
 0xb38   : > { %v3548_v16 = vmul.f32 0.70710677, %v3546_v10 }
 0xb39   : > { %5043 = vmatmul.msk.f32.gmra.mxu2 %vm8991_vm3, %v681_v17 }
 0xb3a   : > { %v3550_v54 = vmax.f32 %v3548_v16, 0.0 }
 0xb3c   : > { %v7576_v62 = vadd.f32 %v3550_v54, %v2362_v60 }
 0xb3e   : > { %8994 = vst [vmem:[#allocation46_spill] sm:$0xff] %v7576_v62 }
 0xbb4   : > { %v3585_v5 = vpop.f32.mrf.mxu2 }
 0xbb5   : > { %v3586_v9 = vadd.f32 %v3585_v5, %v7554_v21 }
 0xbb7   : > { %v7582_v13 = vmul.f32 %v3586_v9, %v3062_v4 }
 0xbb9   : > { %v7586_v28 = vrot.slane %v7582_v13, 1  ;;  %v7589_v45 = vrot.slane %v7582_v13, 2  ;;  %v7592_v12 = vrot.slane %v7582_v13, 3  ;;  %v7595_v49 = vrot.slane %v7582_v13, 4 }
 0xbba   : > { %v7598_v35 = vrot.slane %v7582_v13, 5  ;;  %v7601_v21 = vrot.slane %v7582_v13, 6  ;;  %v7604_v24 = vrot.slane %v7582_v13, 7  ;;  %v3609_v40 = vperm.slane %v7582_v13, 0 }
 0xbbb   : > { %8997 = vst [vmem:[#allocation47_spill] sm:$0xff] %v7586_v28  ;;  %v3610_v42 = vperm.slane %v7586_v28, 0  ;;  %v3611_v55 = vperm.slane %v7589_v45, 0  ;;  %v3612_v51 = vperm.slane %v7592_v12, 0  ;;  %v3613_v29 = vperm.slane %v7595_v49, 0 }
 0xbbc   : > { %8998 = vst [vmem:[#allocation48_spill] sm:$0xff] %v7589_v45  ;;  %v3588_v22 = vpop.f32.mrf.mxu2  ;;  %v3614_v14 = vperm.slane %v7598_v35, 0  ;;  %v3615_v26 = vperm.slane %v7601_v21, 0  ;;  %v3616_v20 = vperm.slane %v7604_v24, 0  ;;  %vm3641_vm9 = vcmp.ge.f32.partialorder %v7582_v13, %v3609_v40 }
 0xbbd   : > { %8999 = vst [vmem:[#allocation49_spill] sm:$0xff] %v7592_v12  ;;  %v3589_v56 = vadd.f32 %v3588_v22, %v3560_v33  ;;  %vm3643_vm10 = vcmp.ge.f32.partialorder %v7582_v13, %v3610_v42  ;;  %vm3645_vm11 = vcmp.ge.f32.partialorder %v7582_v13, %v3611_v55  ;;  %vm3647_vm12 = vcmp.ge.f32.partialorder %v7582_v13, %v3612_v51 }
 0xbbe   : > { %9000 = vst [vmem:[#allocation50_spill] sm:$0xff] %v7595_v49  ;;  %vm7623_vm13 = vcmp.ge.f32.partialorder %v7582_v13, %v3613_v29  ;;  %vm7628_vm14 = vcmp.ge.f32.partialorder %v7582_v13, %v3614_v14  ;;  %vm7633_vm15 = vcmp.ge.f32.partialorder %v7582_v13, %v3615_v26  ;;  %vm7659_vm7 = vcmp.ge.f32.partialorder %v7582_v13, %v3616_v20 }
 0xbbf   : > { %9001 = vst [vmem:[#allocation51_spill] sm:$0xff] %v7598_v35  ;;  %v7616_v63 = vmul.f32 %v3589_v56, %v3063_v23  ;;  %v7664_v57 = vsel %vm3641_vm9, 1.0, %v8931_v19  ;;  %v7667_v48 = vsel %vm3643_vm10, 1.0, %v8931_v19  ;;  %v7670_v38 = vsel %vm3645_vm11, 1.0, %v8931_v19 }
 0xbc0   : > { %9002 = vst [vmem:[#allocation52_spill] sm:$0xff] %v7601_v21  ;;  %v7673_v36 = vsel %vm3647_vm12, 1.0, %v8931_v19  ;;  %v7679_v1 = vsel %vm7623_vm13, 1.0, %v8931_v19  ;;  %v7684_v61 = vsel %vm7628_vm14, 1.0, %v8931_v19  ;;  %v7689_v6 = vsel %vm7633_vm15, 1.0, %v8931_v19 }
 0xbc1   : > { %9003 = vst [vmem:[#allocation53_spill] sm:$0xff] %v7604_v24  ;;  %v7638_v39 = vrot.slane %v7616_v63, 1  ;;  %v7641_v59 = vrot.slane %v7616_v63, 2  ;;  %v7644_v47 = vrot.slane %v7616_v63, 3  ;;  %v7647_v8 = vrot.slane %v7616_v63, 4 }
 0xbc2   : > { %v7650_v31 = vrot.slane %v7616_v63, 5  ;;  %v7653_v18 = vrot.slane %v7616_v63, 6  ;;  %v7656_v0 = vrot.slane %v7616_v63, 7  ;;  %v3617_v11 = vperm.slane %v7616_v63, 0  ;;  %9021 = vst [vmem:[#allocation58_spill] sm:$0xff] %v7684_v61 }
 0xbc3   : > { %9012 = vst [vmem:[#allocation54_spill] sm:$0xff] %v7638_v39  ;;  %v3618_v3 = vperm.slane %v7638_v39, 0  ;;  %v3619_v37 = vperm.slane %v7641_v59, 0  ;;  %v3620_v10 = vperm.slane %v7644_v47, 0  ;;  %v3621_v16 = vperm.slane %v7647_v8, 0 }
 0xbc4   : > { %9013 = vst [vmem:[#allocation55_spill] sm:$0xff] %v7641_v59  ;;  %v3622_v60 = vperm.slane %v7650_v31, 0  ;;  %v3623_v54 = vperm.slane %v7653_v18, 0  ;;  %v3624_v2 = vperm.slane %v7656_v0, 0  ;;  %vm7699_vm6 = vcmp.ge.f32.partialorder %v7616_v63, %v3609_v40 }
 0xbc5   : > { %9014 = vst [vmem:[#allocation40_spill] sm:$0xff] %v7644_v47  ;;  %vm7704_vm5 = vcmp.ge.f32.partialorder %v7616_v63, %v3610_v42  ;;  %vm7709_vm4 = vcmp.ge.f32.partialorder %v7616_v63, %v3611_v55  ;;  %vm7714_vm3 = vcmp.ge.f32.partialorder %v7616_v63, %v3612_v51  ;;  %vm7719_vm2 = vcmp.ge.f32.partialorder %v7616_v63, %v3613_v29 }
 0xbc6   : > { %9015 = vst [vmem:[#allocation56_spill] sm:$0xff] %v7647_v8  ;;  %vm7724_vm1 = vcmp.ge.f32.partialorder %v7616_v63, %v3614_v14  ;;  %vm7729_vm0 = vcmp.ge.f32.partialorder %v7616_v63, %v3615_v26  ;;  %vm7734_vm8 = vcmp.ge.f32.partialorder %v7616_v63, %v3616_v20  ;;  %vm7739_vm9 = vcmp.ge.f32.partialorder %v7582_v13, %v3617_v11 }
 0xbc7   : > { %9016 = vst [vmem:[#allocation15_spill] sm:$0xff] %v7650_v31  ;;  %vm7744_vm10 = vcmp.ge.f32.partialorder %v7616_v63, %v3617_v11  ;;  %vm7749_vm11 = vcmp.ge.f32.partialorder %v7582_v13, %v3618_v3  ;;  %v9043_v51 = vmov 0  ;;  %vm7754_vm12 = vcmp.ge.f32.partialorder %v7616_v63, %v3618_v3 }
 0xbc8   : > { %9017 = vst [vmem:[#allocation57_spill] sm:$0xff] %v7653_v18  ;;  %v9044_v51 = vsel %vm7749_vm11, 4294967295, %v9043_v51  ;;  %v9045_v29 = vmov 0  ;;  %vm7759_vm13 = vcmp.ge.f32.partialorder %v7582_v13, %v3619_v37  ;;  %v9047_v14 = vmov 0 }
 0xbc9   : > { %9018 = vst [vmem:[#allocation41_spill] sm:$0xff] %v7656_v0  ;;  %v9046_v29 = vsel %vm7754_vm12, 4294967295, %v9045_v29  ;;  %v9048_v14 = vsel %vm7759_vm13, 4294967295, %v9047_v14  ;;  %vm7764_vm14 = vcmp.ge.f32.partialorder %v7616_v63, %v3619_v37  ;;  %v9049_v26 = vmov 0 }
 0xbca   : > { %9022 = vst [vmem:[#allocation16_spill] sm:$0xff] %v7689_v6  ;;  %v9050_v26 = vsel %vm7764_vm14, 4294967295, %v9049_v26  ;;  %vm7769_vm15 = vcmp.ge.f32.partialorder %v7582_v13, %v3620_v10  ;;  %vm7774_vm11 = vcmp.ge.f32.partialorder %v7616_v63, %v3620_v10  ;;  %vm7779_vm12 = vcmp.ge.f32.partialorder %v7582_v13, %v3621_v16 }
 0xbcb   : > { %v9052_v27 = vsel %vm7769_vm15, 4294967295, %v9051_v27  ;;  %vm7784_vm13 = vcmp.ge.f32.partialorder %v7616_v63, %v3621_v16  ;;  %vm7789_vm14 = vcmp.ge.f32.partialorder %v7582_v13, %v3622_v60  ;;  %vm7794_vm15 = vcmp.ge.f32.partialorder %v7616_v63, %v3622_v60 }
 0xbcc   : > { %v7801_v17 = vsel %vm7699_vm6, 1.0, %v8931_v19  ;;  %v7806_v11 = vsel %vm7704_vm5, 1.0, %v8931_v19  ;;  %v7811_v3 = vsel %vm7709_vm4, 1.0, %v8931_v19  ;;  %v7816_v37 = vsel %vm7714_vm3, 1.0, %v8931_v19 }
 0xbcd   : > { %v7821_v10 = vsel %vm7719_vm2, 1.0, %v8931_v19  ;;  %v7826_v16 = vsel %vm7724_vm1, 1.0, %v8931_v19  ;;  %v7831_v60 = vsel %vm7729_vm0, 1.0, %v8931_v19  ;;  %v7836_v5 = vsel %vm7659_vm7, 1.0, %v8931_v19 }
 0xbce   : > { %9063 = vst [vmem:[#allocation42_spill] sm:$0xff] %v7821_v10  ;;  %v7841_v30 = vsel %vm7734_vm8, 1.0, %v8931_v19  ;;  %v7846_v4 = vsel %vm7739_vm9, 1.0, %v8931_v19  ;;  %v7851_v9 = vsel %vm7744_vm10, 1.0, %v8931_v19  ;;  %vm9068_vm6 = vnez %v9044_v51 }
 0xbcf   : > { %9064 = vst [vmem:[#allocation17_spill] sm:$0xff] %v7826_v16  ;;  %v7856_v50 = vsel %vm9068_vm6, 1.0, %v8931_v19  ;;  %vm9069_vm7 = vnez %v9046_v29  ;;  %vm9070_vm5 = vnez %v9048_v14  ;;  %vm9071_vm4 = vnez %v9050_v26 }
 0xbd0   : > { %9065 = vst [vmem:[#allocation43_spill] sm:$0xff] %v7831_v60  ;;  %v7861_v53 = vsel %vm9069_vm7, 1.0, %v8931_v19  ;;  %v7866_v40 = vsel %vm9070_vm5, 1.0, %v8931_v19  ;;  %v7871_v42 = vsel %vm9071_vm4, 1.0, %v8931_v19  ;;  %vm9072_vm3 = vnez %v9052_v27 }
 0xbd1   : > { %9066 = vst [vmem:[#allocation18_spill] sm:$0xff] %v7836_v5  ;;  %v7876_v55 = vsel %vm9072_vm3, 1.0, %v8931_v19  ;;  %v7881_v33 = vsel %vm7774_vm11, 1.0, %v8931_v19  ;;  %v7886_v22 = vsel %vm7779_vm12, 1.0, %v8931_v19  ;;  %v7891_v51 = vsel %vm7784_vm13, 1.0, %v8931_v19 }
 0xbd2   : > { %9067 = vst [vmem:[#allocation19_spill] sm:$0xff] %v7841_v30  ;;  %v7896_v29 = vsel %vm7789_vm14, 1.0, %v8931_v19  ;;  %v7901_v14 = vsel %vm7794_vm15, 1.0, %v8931_v19  ;;  %vm7904_vm2 = vcmp.ge.f32.partialorder %v7582_v13, %v3623_v54  ;;  %vm7909_vm1 = vcmp.ge.f32.partialorder %v7616_v63, %v3623_v54 }
 0xbd3   : > { %9073 = vst [vmem:[#allocation20_spill] sm:$0xff] %v7891_v51  ;;  %vm7914_vm0 = vcmp.ge.f32.partialorder %v7582_v13, %v3624_v2  ;;  %vm7919_vm8 = vcmp.ge.f32.partialorder %v7616_v63, %v3624_v2  ;;  %v3737_v20 = vadd.f32 %v7801_v17, %v7664_v57  ;;  %v3744_v15 = vadd.f32 %v7806_v11, %v7667_v48 }
 0xbd4   : > { %9074 = vst [vmem:[#allocation23_spill] sm:$0xff] %v7896_v29  ;;  %v3751_v54 = vadd.f32 %v7811_v3, %v7670_v38  ;;  %v3758_v46 = vadd.f32 %v7816_v37, %v7673_v36  ;;  %v3765_v62 = vadd.f32 %v7821_v10, %v7679_v1  ;;  %v3772_v2 = vadd.f32 %v7826_v16, %v7684_v61 }
 0xbd5   : > { %9075 = vst [vmem:[#allocation26_spill] sm:$0xff] %v7901_v14  ;;  %v3779_v41 = vadd.f32 %v7831_v60, %v7689_v6  ;;  %v3786_v7 = vadd.f32 %v7841_v30, %v7836_v5  ;;  %v3738_v25 = vrot.slane %v3737_v20, 4  ;;  %v3745_v32 = vrot.slane %v3744_v15, 4 }
 0xbd6   : > { %v3752_v44 = vrot.slane %v3751_v54, 4  ;;  %v3759_v52 = vrot.slane %v3758_v46, 4  ;;  %v3766_v58 = vrot.slane %v3765_v62, 4  ;;  %v3773_v34 = vrot.slane %v3772_v2, 4 }
 0xbd7   : > { %v3780_v43 = vrot.slane %v3779_v41, 4  ;;  %v3787_v0 = vrot.slane %v3786_v7, 4  ;;  %v3739_v18 = vadd.f32 %v3738_v25, %v3737_v20  ;;  %v3746_v31 = vadd.f32 %v3745_v32, %v3744_v15 }
 0xbd8   : > { %v3753_v8 = vadd.f32 %v3752_v44, %v3751_v54  ;;  %v3760_v47 = vadd.f32 %v3759_v52, %v3758_v46  ;;  %v3767_v59 = vadd.f32 %v3766_v58, %v3765_v62  ;;  %v3774_v39 = vadd.f32 %v3773_v34, %v3772_v2 }
 0xbd9   : > { %v3781_v24 = vadd.f32 %v3780_v43, %v3779_v41  ;;  %v3788_v21 = vadd.f32 %v3787_v0, %v3786_v7  ;;  %v3740_v35 = vrot.slane %v3739_v18, 2  ;;  %v3747_v49 = vrot.slane %v3746_v31, 2 }
 0xbda   : > { %v3754_v12 = vrot.slane %v3753_v8, 2  ;;  %v3761_v45 = vrot.slane %v3760_v47, 2  ;;  %v3768_v28 = vrot.slane %v3767_v59, 2  ;;  %v3775_v30 = vrot.slane %v3774_v39, 2 }
 0xbdb   : > { %v3782_v5 = vrot.slane %v3781_v24, 2  ;;  %v3789_v60 = vrot.slane %v3788_v21, 2  ;;  %v3741_v6 = vadd.f32 %v3740_v35, %v3739_v18  ;;  %v3748_v16 = vadd.f32 %v3747_v49, %v3746_v31 }
 0xbdc   : > { %v3755_v61 = vadd.f32 %v3754_v12, %v3753_v8  ;;  %v3762_v10 = vadd.f32 %v3761_v45, %v3760_v47  ;;  %v7939_v25 = vadd.f32 %v3768_v28, %v3767_v59  ;;  %v7941_v44 = vadd.f32 %v3775_v30, %v3774_v39 }
 0xbdd   : > { %v7943_v58 = vadd.f32 %v3782_v5, %v3781_v24  ;;  %v7945_v52 = vadd.f32 %v3789_v60, %v3788_v21  ;;  %v3742_v32 = vrot.slane %v3741_v6, 1  ;;  %v3749_v7 = vrot.slane %v3748_v16, 1 }
 0xbde   : > { %v3756_v41 = vrot.slane %v3755_v61, 1  ;;  %v3763_v62 = vrot.slane %v3762_v10, 1  ;;  %v7950_v43 = vsel %vm7904_vm2, 1.0, %v8931_v19  ;;  %v7955_v28 = vsel %vm7909_vm1, 1.0, %v8931_v19 }
 0xbdf   : > { %9084 = vst [vmem:[#allocation21_spill] sm:$0xff] %v7950_v43  ;;  %v7960_v45 = vsel %vm7914_vm0, 1.0, %v8931_v19  ;;  %v7965_v12 = vsel %vm7919_vm8, 1.0, %v8931_v19  ;;  %v3770_v49 = vrot.slane %v7939_v25, 1  ;;  %v3777_v35 = vrot.slane %v7941_v44, 1 }
 0xbe0   : > { %9085 = vst [vmem:[#allocation22_spill] sm:$0xff] %v7955_v28  ;;  %v3784_v21 = vrot.slane %v7943_v58, 1  ;;  %v3791_v24 = vrot.slane %v7945_v52, 1  ;;  %v7971_v34 = vadd.f32 %v3742_v32, %v3741_v6  ;;  %v7973_v39 = vadd.f32 %v3749_v7, %v3748_v16 }
 0xbe1   : > { %9086 = vst [vmem:[#allocation29_spill] sm:$0xff] %v7960_v45  ;;  %v7975_v59 = vadd.f32 %v3756_v41, %v3755_v61  ;;  %v7977_v47 = vadd.f32 %v3763_v62, %v3762_v10  ;;  %v3793_v8 = vadd.f32 %v7851_v9, %v7846_v4  ;;  %v3800_v31 = vadd.f32 %v7861_v53, %v7856_v50 }
 0xbe2   : > { %9087 = vst [vmem:[#allocation32_spill] sm:$0xff] %v7965_v12  ;;  %v3807_v18 = vadd.f32 %v7871_v42, %v7866_v40  ;;  %v3814_v0 = vadd.f32 %v7881_v33, %v7876_v55  ;;  %v3821_v6 = vadd.f32 %v7891_v51, %v7886_v22  ;;  %v3828_v61 = vadd.f32 %v7901_v14, %v7896_v29 }
 0xbe3   : > { %9088 = vst [vmem:[#allocation33_spill] sm:$0xff] %v7971_v34  ;;  %v3835_v10 = vadd.f32 %v7955_v28, %v7950_v43  ;;  %v3842_v16 = vadd.f32 %v7965_v12, %v7960_v45  ;;  %v3794_v60 = vrot.slane %v3793_v8, 4  ;;  %v3801_v5 = vrot.slane %v3800_v31, 4 }
 0xbe4   : > { %9089 = vst [vmem:[#allocation34_spill] sm:$0xff] %v7973_v39  ;;  %v3808_v30 = vrot.slane %v3807_v18, 4  ;;  %v3815_v26 = vrot.slane %v3814_v0, 4  ;;  %v3822_v27 = vrot.slane %v3821_v6, 4  ;;  %v3829_v23 = vrot.slane %v3828_v61, 4 }
 0xbe5   : > { %9090 = vst [vmem:[#allocation35_spill] sm:$0xff] %v7975_v59  ;;  %v3836_v56 = vrot.slane %v3835_v10, 4  ;;  %v3843_v20 = vrot.slane %v3842_v16, 4  ;;  %v3795_v15 = vadd.f32 %v3794_v60, %v3793_v8  ;;  %v3802_v54 = vadd.f32 %v3801_v5, %v3800_v31 }
 0xbe6   : > { %9091 = vst [vmem:[#allocation31_spill] sm:$0xff] %v7977_v47  ;;  %v3809_v46 = vadd.f32 %v3808_v30, %v3807_v18  ;;  %v3816_v2 = vadd.f32 %v3815_v26, %v3814_v0  ;;  %v3823_v32 = vadd.f32 %v3822_v27, %v3821_v6  ;;  %v3830_v7 = vadd.f32 %v3829_v23, %v3828_v61 }
 0xbe7   : > { %v3837_v41 = vadd.f32 %v3836_v56, %v3835_v10  ;;  %v3844_v62 = vadd.f32 %v3843_v20, %v3842_v16  ;;  %v3796_v19 = vrot.slane %v3795_v15, 2  ;;  %v3803_v47 = vrot.slane %v3802_v54, 2 }
 0xbe8   : > { %v3810_v59 = vrot.slane %v3809_v46, 2  ;;  %v3817_v39 = vrot.slane %v3816_v2, 2  ;;  %v3824_v34 = vrot.slane %v3823_v32, 2  ;;  %v3831_v12 = vrot.slane %v3830_v7, 2 }
 0xbe9   : > { %v3838_v45 = vrot.slane %v3837_v41, 2  ;;  %v3845_v28 = vrot.slane %v3844_v62, 2  ;;  %v3797_v43 = vadd.f32 %v3796_v19, %v3795_v15  ;;  %v3804_v14 = vadd.f32 %v3803_v47, %v3802_v54 }
 0xbea   : > { %v3811_v29 = vadd.f32 %v3810_v59, %v3809_v46  ;;  %v3818_v51 = vadd.f32 %v3817_v39, %v3816_v2  ;;  %v3825_v8 = vadd.f32 %v3824_v34, %v3823_v32  ;;  %v3832_v31 = vadd.f32 %v3831_v12, %v3830_v7 }
 0xbeb   : > { %v3839_v18 = vadd.f32 %v3838_v45, %v3837_v41  ;;  %v3846_v0 = vadd.f32 %v3845_v28, %v3844_v62  ;;  %v3798_v6 = vrot.slane %v3797_v43, 1  ;;  %v3805_v61 = vrot.slane %v3804_v14, 1  ;;  %v9099_v62 = vld [vmem:[#allocation20_spill] sm:$0xff] }
 0xbec   : > { %v3812_v10 = vrot.slane %v3811_v29, 1  ;;  %v3819_v16 = vrot.slane %v3818_v51, 1  ;;  %v3826_v60 = vrot.slane %v3825_v8, 1  ;;  %v3833_v5 = vrot.slane %v3832_v31, 1 }
 0xbed   : > { %v3840_v30 = vrot.slane %v3839_v18, 1  ;;  %v3847_v26 = vrot.slane %v3846_v0, 1  ;;  %v7996_v27 = vadd.f32 %v3770_v49, %v7939_v25  ;;  %v7999_v19 = vadd.f32 %v3777_v35, %v7941_v44 }
 0xbee   : > { %v8002_v39 = vadd.f32 %v3784_v21, %v7943_v58  ;;  %v8005_v45 = vadd.f32 %v3791_v24, %v7945_v52  ;;  %v8007_v28 = vadd.f32 %v3798_v6, %v3797_v43  ;;  %v8009_v12 = vadd.f32 %v3805_v61, %v3804_v14 }
 0xbef   : > { %v8011_v34 = vadd.f32 %v3812_v10, %v3811_v29  ;;  %v8013_v59 = vadd.f32 %v3819_v16, %v3818_v51  ;;  %v8015_v47 = vadd.f32 %v3826_v60, %v3825_v8  ;;  %v8017_v25 = vadd.f32 %v3833_v5, %v3832_v31  ;;  %v9100_v8 = vld [vmem:[#allocation23_spill] sm:$0xff]  ;;  %v9101_v31 = vld [vmem:[#allocation26_spill] sm:$0xff] }
 0xbf0   : > { %v8019_v44 = vadd.f32 %v3840_v30, %v3839_v18  ;;  %v8021_v49 = vadd.f32 %v3847_v26, %v3846_v0  ;;  %v3849_v58 = vmul.f32 %v7664_v57, %v7582_v13  ;;  %v3850_v52 = vmul.f32 %v7801_v17, %v7616_v63 }
 0xbf1   : > { %v3851_v29 = vmul.f32 %v7667_v48, %v7582_v13  ;;  %v3852_v51 = vmul.f32 %v7806_v11, %v7616_v63  ;;  %v3853_v14 = vmul.f32 %v7670_v38, %v7582_v13  ;;  %v3854_v43 = vmul.f32 %v7811_v3, %v7616_v63  ;;  %v9092_v48 = vld [vmem:[#allocation42_spill] sm:$0xff]  ;;  %v9094_v38 = vld [vmem:[#allocation17_spill] sm:$0xff]  ;;  %v9095_v3 = vld [vmem:[#allocation16_spill] sm:$0xff] }
 0xbf2   : > { %v3855_v35 = vmul.f32 %v7673_v36, %v7582_v13  ;;  %v3856_v57 = vmul.f32 %v7816_v37, %v7616_v63  ;;  %v3857_v17 = vmul.f32 %v7679_v1, %v7582_v13  ;;  %v3858_v21 = vmul.f32 %v9092_v48, %v7616_v63  ;;  %v9093_v11 = vld [vmem:[#allocation58_spill] sm:$0xff]  ;;  %v9096_v36 = vld [vmem:[#allocation43_spill] sm:$0xff] }
 0xbf3   : > { %v3859_v24 = vmul.f32 %v9093_v11, %v7582_v13  ;;  %v3860_v23 = vmul.f32 %v9094_v38, %v7616_v63  ;;  %v3861_v56 = vmul.f32 %v9095_v3, %v7582_v13  ;;  %v3862_v20 = vmul.f32 %v9096_v36, %v7616_v63  ;;  %v9097_v37 = vld [vmem:[#allocation18_spill] sm:$0xff]  ;;  %v9098_v1 = vld [vmem:[#allocation19_spill] sm:$0xff] }
 0xbf4   : > { %v3863_v15 = vmul.f32 %v9097_v37, %v7582_v13  ;;  %v3864_v54 = vmul.f32 %v9098_v1, %v7616_v63  ;;  %v8057_v46 = vmul.f32 %v7846_v4, %v7582_v13  ;;  %v8061_v2 = vmul.f32 %v7851_v9, %v7616_v63 }
 0xbf5   : > { %v8065_v32 = vmul.f32 %v7856_v50, %v7582_v13  ;;  %v8069_v7 = vmul.f32 %v7861_v53, %v7616_v63  ;;  %v8073_v41 = vmul.f32 %v7866_v40, %v7582_v13  ;;  %v8077_v4 = vmul.f32 %v7871_v42, %v7616_v63 }
 0xbf6   : > { %v8081_v9 = vmul.f32 %v7876_v55, %v7582_v13  ;;  %v8085_v50 = vmul.f32 %v7881_v33, %v7616_v63  ;;  %v8089_v53 = vmul.f32 %v7886_v22, %v7582_v13  ;;  %v8093_v40 = vmul.f32 %v9099_v62, %v7616_v63 }
 0xbf7   : > { %v8097_v42 = vmul.f32 %v9100_v8, %v7582_v13  ;;  %v3876_v55 = vmul.f32 %v9101_v31, %v7616_v63  ;;  %v3881_v18 = vadd.f32 %v3850_v52, %v3849_v58  ;;  %v3888_v0 = vadd.f32 %v3852_v51, %v3851_v29 }
 0xbf8   : > { %v3895_v6 = vadd.f32 %v3854_v43, %v3853_v14  ;;  %v3902_v33 = vadd.f32 %v3856_v57, %v3855_v35  ;;  %v3909_v61 = vadd.f32 %v3858_v21, %v3857_v17  ;;  %v3916_v10 = vadd.f32 %v3860_v23, %v3859_v24 }
 0xbf9   : > { %v3923_v16 = vadd.f32 %v3862_v20, %v3861_v56  ;;  %v3930_v22 = vadd.f32 %v3864_v54, %v3863_v15  ;;  %v3882_v60 = vrot.slane %v3881_v18, 4  ;;  %v3889_v5 = vrot.slane %v3888_v0, 4 }
 0xbfa   : > { %v3896_v30 = vrot.slane %v3895_v6, 4  ;;  %v3903_v26 = vrot.slane %v3902_v33, 4  ;;  %v3910_v48 = vrot.slane %v3909_v61, 4  ;;  %v3917_v11 = vrot.slane %v3916_v10, 4 }
 0xbfb   : > { %v3924_v38 = vrot.slane %v3923_v16, 4  ;;  %v3931_v3 = vrot.slane %v3930_v22, 4  ;;  %v3883_v36 = vadd.f32 %v3882_v60, %v3881_v18  ;;  %v3890_v37 = vadd.f32 %v3889_v5, %v3888_v0  ;;  %v9103_v60 = vld [vmem:[#allocation22_spill] sm:$0xff] }
 0xbfc   : > { %v3897_v1 = vadd.f32 %v3896_v30, %v3895_v6  ;;  %v3904_v62 = vadd.f32 %v3903_v26, %v3902_v33  ;;  %v3911_v58 = vadd.f32 %v3910_v48, %v3909_v61  ;;  %v3918_v52 = vadd.f32 %v3917_v11, %v3916_v10  ;;  %v9104_v30 = vld [vmem:[#allocation29_spill] sm:$0xff]  ;;  %v9105_v48 = vld [vmem:[#allocation32_spill] sm:$0xff] }
 0xbfd   : > { %v3925_v29 = vadd.f32 %v3924_v38, %v3923_v16  ;;  %v3932_v51 = vadd.f32 %v3931_v3, %v3930_v22  ;;  %v3884_v14 = vrot.slane %v3883_v36, 2  ;;  %v3891_v43 = vrot.slane %v3890_v37, 2  ;;  %v9102_v16 = vld [vmem:[#allocation21_spill] sm:$0xff] }
 0xbfe   : > { %v3898_v35 = vrot.slane %v3897_v1, 2  ;;  %v3905_v57 = vrot.slane %v3904_v62, 2  ;;  %v3912_v17 = vrot.slane %v3911_v58, 2  ;;  %v3919_v21 = vrot.slane %v3918_v52, 2 }
 0xbff   : > { %v3926_v24 = vrot.slane %v3925_v29, 2  ;;  %v3933_v23 = vrot.slane %v3932_v51, 2  ;;  %v3885_v56 = vadd.f32 %v3884_v14, %v3883_v36  ;;  %v3892_v20 = vadd.f32 %v3891_v43, %v3890_v37 }
 0xc00   : > { %v3899_v15 = vadd.f32 %v3898_v35, %v3897_v1  ;;  %v3906_v54 = vadd.f32 %v3905_v57, %v3904_v62  ;;  %v8101_v8 = vadd.f32 %v3912_v17, %v3911_v58  ;;  %v8103_v31 = vadd.f32 %v3919_v21, %v3918_v52 }
 0xc01   : > { %v8105_v18 = vadd.f32 %v3926_v24, %v3925_v29  ;;  %v8107_v0 = vadd.f32 %v3933_v23, %v3932_v51  ;;  %v3886_v6 = vrot.slane %v3885_v56, 1  ;;  %v3893_v33 = vrot.slane %v3892_v20, 1 }
 0xc02   : > { %v3900_v61 = vrot.slane %v3899_v15, 1  ;;  %v3907_v10 = vrot.slane %v3906_v54, 1  ;;  %v3877_v22 = vmul.f32 %v9102_v16, %v7582_v13  ;;  %v3878_v5 = vmul.f32 %v9103_v60, %v7616_v63 }
 0xc03   : > { %v3879_v26 = vmul.f32 %v9104_v30, %v7582_v13  ;;  %v3880_v11 = vmul.f32 %v9105_v48, %v7616_v63  ;;  %v3914_v38 = vrot.slane %v8101_v8, 1  ;;  %v3921_v3 = vrot.slane %v8103_v31, 1 }
 0xc04   : > { %v3928_v36 = vrot.slane %v8105_v18, 1  ;;  %v3935_v37 = vrot.slane %v8107_v0, 1  ;;  %v8121_v1 = vadd.f32 %v3886_v6, %v3885_v56  ;;  %v8123_v62 = vadd.f32 %v3893_v33, %v3892_v20 }
 0xc05   : > { %v8125_v58 = vadd.f32 %v3900_v61, %v3899_v15  ;;  %v8127_v52 = vadd.f32 %v3907_v10, %v3906_v54  ;;  %v3937_v29 = vadd.f32 %v8061_v2, %v8057_v46  ;;  %v3944_v51 = vadd.f32 %v8069_v7, %v8065_v32 }
 0xc06   : > { %v3951_v14 = vadd.f32 %v8077_v4, %v8073_v41  ;;  %v3958_v43 = vadd.f32 %v8085_v50, %v8081_v9  ;;  %v3965_v35 = vadd.f32 %v8093_v40, %v8089_v53  ;;  %v3972_v57 = vadd.f32 %v3876_v55, %v8097_v42 }
 0xc07   : > { %v3979_v17 = vadd.f32 %v3878_v5, %v3877_v22  ;;  %v3986_v21 = vadd.f32 %v3880_v11, %v3879_v26  ;;  %v3938_v24 = vrot.slane %v3937_v29, 4  ;;  %v3945_v23 = vrot.slane %v3944_v51, 4 }
 0xc08   : > { %v3952_v56 = vrot.slane %v3951_v14, 4  ;;  %v3959_v46 = vrot.slane %v3958_v43, 4  ;;  %v3966_v2 = vrot.slane %v3965_v35, 4  ;;  %v3973_v20 = vrot.slane %v3972_v57, 4 }
 0xc09   : > { %v3980_v32 = vrot.slane %v3979_v17, 4  ;;  %v3987_v7 = vrot.slane %v3986_v21, 4  ;;  %v3939_v15 = vadd.f32 %v3938_v24, %v3937_v29  ;;  %v3946_v41 = vadd.f32 %v3945_v23, %v3944_v51 }
 0xc0a   : > { %v3953_v4 = vadd.f32 %v3952_v56, %v3951_v14  ;;  %v3960_v54 = vadd.f32 %v3959_v46, %v3958_v43  ;;  %v3967_v9 = vadd.f32 %v3966_v2, %v3965_v35  ;;  %v3974_v50 = vadd.f32 %v3973_v20, %v3972_v57 }
 0xc0b   : > { %v3981_v6 = vadd.f32 %v3980_v32, %v3979_v17  ;;  %v3988_v53 = vadd.f32 %v3987_v7, %v3986_v21  ;;  %v3940_v40 = vrot.slane %v3939_v15, 2  ;;  %v3947_v42 = vrot.slane %v3946_v41, 2 }
 0xc0c   : > { %v3954_v55 = vrot.slane %v3953_v4, 2  ;;  %v3961_v33 = vrot.slane %v3960_v54, 2  ;;  %v3968_v61 = vrot.slane %v3967_v9, 2  ;;  %v3975_v10 = vrot.slane %v3974_v50, 2 }
 0xc0d   : > { %v3982_v16 = vrot.slane %v3981_v6, 2  ;;  %v3989_v22 = vrot.slane %v3988_v53, 2  ;;  %v3941_v60 = vadd.f32 %v3940_v40, %v3939_v15  ;;  %v3948_v5 = vadd.f32 %v3947_v42, %v3946_v41  ;;  %v9113_v42 = vld [vmem:[#allocation50_spill] sm:$0xff] }
 0xc0e   : > { %v3955_v30 = vadd.f32 %v3954_v55, %v3953_v4  ;;  %v3962_v26 = vadd.f32 %v3961_v33, %v3960_v54  ;;  %v3969_v48 = vadd.f32 %v3968_v61, %v3967_v9  ;;  %v3976_v11 = vadd.f32 %v3975_v10, %v3974_v50  ;;  %v9109_v54 = vld [vmem:[#allocation48_spill] sm:$0xff]  ;;  %v9110_v9 = vld [vmem:[#allocation35_spill] sm:$0xff] }
 0xc0f   : > { %v3983_v29 = vadd.f32 %v3982_v16, %v3981_v6  ;;  %v3990_v51 = vadd.f32 %v3989_v22, %v3988_v53  ;;  %v3942_v14 = vrot.slane %v3941_v60, 1  ;;  %v3949_v43 = vrot.slane %v3948_v5, 1  ;;  %v9111_v6 = vld [vmem:[#allocation49_spill] sm:$0xff]  ;;  %v9112_v53 = vld [vmem:[#allocation31_spill] sm:$0xff]  ;;  %v9115_v10 = vld [vmem:[#allocation52_spill] sm:$0xff] }
 0xc10   : > { %v3956_v35 = vrot.slane %v3955_v30, 1  ;;  %v3963_v57 = vrot.slane %v3962_v26, 1  ;;  %v3970_v17 = vrot.slane %v3969_v48, 1  ;;  %v3977_v21 = vrot.slane %v3976_v11, 1  ;;  %v9114_v33 = vld [vmem:[#allocation51_spill] sm:$0xff]  ;;  %v9116_v22 = vld [vmem:[#allocation53_spill] sm:$0xff] }
 0xc11   : > { %v3984_v24 = vrot.slane %v3983_v29, 1  ;;  %v3991_v23 = vrot.slane %v3990_v51, 1  ;;  %v8141_v56 = vadd.f32 %v3914_v38, %v8101_v8  ;;  %v8144_v46 = vadd.f32 %v3921_v3, %v8103_v31  ;;  %v9107_v3 = vld [vmem:[#allocation47_spill] sm:$0xff] }
 0xc12   : > { %v8147_v2 = vadd.f32 %v3928_v36, %v8105_v18  ;;  %v8150_v20 = vadd.f32 %v3935_v37, %v8107_v0  ;;  %v8152_v32 = vadd.f32 %v3942_v14, %v3941_v60  ;;  %v8154_v7 = vadd.f32 %v3949_v43, %v3948_v5  ;;  %v9106_v18 = vld [vmem:[#allocation33_spill] sm:$0xff]  ;;  %v9108_v36 = vld [vmem:[#allocation34_spill] sm:$0xff]  ;;  %v9121_v14 = vld [vmem:[#allocation15_spill] sm:$0xff] }
 0xc13   : > { %v8156_v15 = vadd.f32 %v3956_v35, %v3955_v30  ;;  %v8158_v41 = vadd.f32 %v3963_v57, %v3962_v26  ;;  %v8160_v4 = vadd.f32 %v3970_v17, %v3969_v48  ;;  %v8162_v8 = vadd.f32 %v3977_v21, %v3976_v11  ;;  %v9117_v30 = vld [vmem:[#allocation54_spill] sm:$0xff]  ;;  %v9118_v48 = vld [vmem:[#allocation55_spill] sm:$0xff]  ;;  %v9122_v43 = vld [vmem:[#allocation57_spill] sm:$0xff] }
 0xc14   : > { %v8164_v31 = vadd.f32 %v3984_v24, %v3983_v29  ;;  %v8166_v38 = vadd.f32 %v3991_v23, %v3990_v51  ;;  %v4009_v0 = vmul.f32 %v9106_v18, %v7582_v13  ;;  %v4010_v37 = vmul.f32 %v9108_v36, %v9107_v3  ;;  %v9119_v29 = vld [vmem:[#allocation40_spill] sm:$0xff]  ;;  %v9123_v35 = vld [vmem:[#allocation41_spill] sm:$0xff] }
 0xc15   : > { %v4011_v50 = vmul.f32 %v9110_v9, %v9109_v54  ;;  %v4012_v40 = vmul.f32 %v9112_v53, %v9111_v6  ;;  %v4013_v55 = vmul.f32 %v7996_v27, %v9113_v42  ;;  %v4014_v61 = vmul.f32 %v7999_v19, %v9114_v33  ;;  %v9120_v51 = vld [vmem:[#allocation56_spill] sm:$0xff] }
 0xc16   : > { %v4015_v16 = vmul.f32 %v8002_v39, %v9115_v10  ;;  %v4016_v60 = vmul.f32 %v8005_v45, %v9116_v22  ;;  %v4017_v5 = vmul.f32 %v8007_v28, %v7616_v63  ;;  %v4018_v26 = vmul.f32 %v8009_v12, %v9117_v30 }
 0xc17   : > { %v4019_v11 = vmul.f32 %v8011_v34, %v9118_v48  ;;  %v4020_v27 = vmul.f32 %v8013_v59, %v9119_v29  ;;  %v4021_v19 = vmul.f32 %v8015_v47, %v9120_v51  ;;  %v4022_v39 = vmul.f32 %v8017_v25, %v9121_v14 }
 0xc18   : > { %v4023_v45 = vmul.f32 %v8019_v44, %v9122_v43  ;;  %v4024_v28 = vmul.f32 %v8021_v49, %v9123_v35  ;;  %v4025_v57 = vadd.f32 1.0, %v4009_v0  ;;  %v4026_v12 = vadd.f32 1.0, %v4010_v37 }
 0xc19   : > { %v4027_v17 = vadd.f32 1.0, %v4011_v50  ;;  %v4028_v21 = vadd.f32 1.0, %v4012_v40  ;;  %v4029_v34 = vadd.f32 1.0, %v4013_v55  ;;  %v4030_v24 = vadd.f32 1.0, %v4014_v61 }
 0xc1a   : > { %v4031_v23 = vadd.f32 1.0, %v4015_v16  ;;  %v4032_v59 = vadd.f32 1.0, %v4016_v60  ;;  %v4033_v18 = vadd.f32 1.0, %v4017_v5  ;;  %v4034_v36 = vadd.f32 1.0, %v4018_v26 }
 0xc1b   : > { %v4035_v47 = vadd.f32 1.0, %v4019_v11  ;;  %v4036_v9 = vadd.f32 1.0, %v4020_v27  ;;  %v4037_v53 = vadd.f32 1.0, %v4021_v19  ;;  %v4038_v25 = vadd.f32 1.0, %v4022_v39 }
 0xc1c   : > { %v4039_v14 = vadd.f32 1.0, %v4023_v45  ;;  %v4040_v51 = vadd.f32 1.0, %v4024_v28  ;;  %vm4041_vm9 = vcmp.gt.f32.partialorder %v4025_v57, %v8121_v1  ;;  %vm4042_vm10 = vcmp.gt.f32.partialorder %v4026_v12, %v8123_v62 }
 0xc1d   : > { %vm4043_vm11 = vcmp.gt.f32.partialorder %v4027_v17, %v8125_v58  ;;  %vm4044_vm12 = vcmp.gt.f32.partialorder %v4028_v21, %v8127_v52  ;;  %vm4045_vm13 = vcmp.gt.f32.partialorder %v4029_v34, %v8141_v56  ;;  %vm4046_vm14 = vcmp.gt.f32.partialorder %v4030_v24, %v8144_v46 }
 0xc1e   : > { %vm4047_vm15 = vcmp.gt.f32.partialorder %v4031_v23, %v8147_v2  ;;  %vm4048_vm6 = vcmp.gt.f32.partialorder %v4032_v59, %v8150_v20  ;;  %vm4049_vm7 = vcmp.gt.f32.partialorder %v4033_v18, %v8152_v32  ;;  %vm4050_vm5 = vcmp.gt.f32.partialorder %v4034_v36, %v8154_v7 }
 0xc1f   : > { %vm4051_vm4 = vcmp.gt.f32.partialorder %v4035_v47, %v8156_v15  ;;  %vm4052_vm3 = vcmp.gt.f32.partialorder %v4036_v9, %v8158_v41  ;;  %vm4053_vm2 = vcmp.gt.f32.partialorder %v4037_v53, %v8160_v4  ;;  %vm4054_vm1 = vcmp.gt.f32.partialorder %v4038_v25, %v8162_v8 }
 0xc20   : > { %vm4055_vm0 = vcmp.gt.f32.partialorder %v4039_v14, %v8164_v31  ;;  %vm4056_vm8 = vcmp.gt.f32.partialorder %v4040_v51, %v8166_v38  ;;  %v9124_v44 = vmov 0.0  }
 0xc21   : > { %v5076_v49 = vsel %vm4041_vm9, 1.0, %v9124_v44  ;;  %v5077_v7 = vsel %vm4042_vm10, 1.0, %v9124_v44  ;;  %v5078_v0 = vsel %vm4043_vm11, 1.0, %v9124_v44  ;;  %v5079_v37 = vsel %vm4044_vm12, 1.0, %v9124_v44 }
 0xc22   : > { %v5080_v50 = vsel %vm4045_vm13, 1.0, %v9124_v44  ;;  %v5081_v1 = vsel %vm4046_vm14, 1.0, %v9124_v44  ;;  %v5082_v62 = vsel %vm4047_vm15, 1.0, %v9124_v44  ;;  %v5085_v40 = vsel %vm4050_vm5, 1.0, %v9124_v44 }
 0xc23   : > { %v5083_v58 = vsel %vm4048_vm6, 1.0, %v9124_v44  ;;  %v5084_v52 = vsel %vm4049_vm7, 1.0, %v9124_v44  ;;  %v5086_v56 = vsel %vm4051_vm4, 1.0, %v9124_v44  ;;  %v5087_v46 = vsel %vm4052_vm3, 1.0, %v9124_v44 }
 0xc24   : > { %v5088_v2 = vsel %vm4053_vm2, 1.0, %v9124_v44  ;;  %v5089_v20 = vsel %vm4054_vm1, 1.0, %v9124_v44  ;;  %v4105_v55 = vrot.slane %v5077_v7, 7  ;;  %v4107_v61 = vrot.slane %v5078_v0, 6 }
 0xc25   : > { %v5090_v32 = vsel %vm4055_vm0, 1.0, %v9124_v44  ;;  %v5091_v15 = vsel %vm4056_vm8, 1.0, %v9124_v44  ;;  %v4109_v41 = vrot.slane %v5079_v37, 5  ;;  %v4119_v16 = vrot.slane %v5085_v40, 7 }
 0xc26   : > { %vm9125_vm9 = vcmask 1041409   ;;  %v4111_v4 = vrot.slane %v5080_v50, 4  ;;  %v4113_v5 = vrot.slane %v5081_v1, 3  ;;  %v4121_v26 = vrot.slane %v5086_v56, 6 }
 0xc27   : > { %v4106_v60 = vsel %vm9125_vm9, %v4105_v55, %v5076_v49  ;;  %vm9126_vm10 = vcmask 1042434   ;;  %v4115_v11 = vrot.slane %v5082_v62, 2  ;;  %vm9127_vm11 = vmmov %vm9125_vm9  ;;  %v4123_v19 = vrot.slane %v5087_v46, 5 }
 0xc28   : > { %v4108_v8 = vsel %vm9126_vm10, %v4107_v61, %v4106_v60  ;;  %v4120_v27 = vsel %vm9127_vm11, %v4119_v16, %v5084_v52  ;;  %vm9128_vm12 = vcmask 1043459   ;;  %v4117_v14 = vrot.slane %v5083_v58, 1  ;;  %vm9129_vm13 = vmmov %vm9126_vm10 }
 0xc29   : > { %v4110_v31 = vsel %vm9128_vm12, %v4109_v41, %v4108_v8  ;;  %v4122_v39 = vsel %vm9129_vm13, %v4121_v26, %v4120_v27  ;;  %v4125_v38 = vrot.slane %v5088_v2, 4  ;;  %vm9130_vm14 = vcmask 1044484   ;;  %vm9131_vm15 = vmmov %vm9128_vm12 }
 0xc2a   : > { %v4112_v51 = vsel %vm9130_vm14, %v4111_v4, %v4110_v31  ;;  %v4124_v45 = vsel %vm9131_vm15, %v4123_v19, %v4122_v39  ;;  %v4127_v28 = vrot.slane %v5089_v20, 3  ;;  %v4129_v57 = vrot.slane %v5090_v32, 2  ;;  %vm9133_vm7 = vmmov %vm9130_vm14 }
 0xc2b   : > { %vm9132_vm6 = vcmask 1045509   ;;  %v4126_v17 = vsel %vm9133_vm7, %v4125_v38, %v4124_v45  ;;  %v4131_v21 = vrot.slane %v5091_v15, 1  ;;  %v4142_v34 = vmul.f32 %v5076_v49, %v7582_v13  ;;  %vm9141_vm0 = vmmov %vm9125_vm9 }
 0xc2c   : > { %v4114_v12 = vsel %vm9132_vm6, %v4113_v5, %v4112_v51  ;;  %vm9134_vm5 = vcmask 1046534   ;;  %vm9135_vm4 = vmmov %vm9132_vm6  ;;  %v4143_v59 = vmul.f32 %v5077_v7, %v9107_v3  ;;  %v4144_v18 = vmul.f32 %v5078_v0, %v9109_v54 }
 0xc2d   : > { %v4116_v24 = vsel %vm9134_vm5, %v4115_v11, %v4114_v12  ;;  %v4128_v23 = vsel %vm9135_vm4, %v4127_v28, %v4126_v17  ;;  %vm9136_vm3 = vmmov %vm9134_vm5  ;;  %v4145_v47 = vmul.f32 %v5079_v37, %v9111_v6  ;;  %v4146_v9 = vmul.f32 %v5080_v50, %v9113_v42  ;;  %v9139_v42 = vld [vmem:[#allocation56_spill] sm:$0xff] }
 0xc2e   : > { %v4130_v36 = vsel %vm9136_vm3, %v4129_v57, %v4128_v23  ;;  %v4147_v53 = vmul.f32 %v5081_v1, %v9114_v33  ;;  %vm9137_vm2 = vcmask 1047559   ;;  %v4151_v49 = vmul.f32 %v5085_v40, %v9117_v30  ;;  %v9140_v1 = vld [vmem:[#allocation15_spill] sm:$0xff]  ;;  %vm9142_vm8 = vmmov %vm9126_vm10  ;;  %v9156_v23 = vld [vmem:[#allocation30_spill] sm:$0xff] }
 0xc2f   : > { %v4118_v25 = vsel %vm9137_vm2, %v4117_v14, %v4116_v24  ;;  %vm9138_vm1 = vmmov %vm9137_vm2  ;;  %v4152_v55 = vmul.f32 %v5086_v56, %v9118_v48  ;;  %v4148_v3 = vmul.f32 %v5082_v62, %v9115_v10  ;;  %v4149_v54 = vmul.f32 %v5083_v58, %v9116_v22 }
 0xc30   : > { %v4132_v44 = vsel %vm9138_vm1, %v4131_v21, %v4130_v36  ;;  %v4150_v7 = vmul.f32 %v5084_v52, %v7616_v63  ;;  %v4153_v6 = vmul.f32 %v5087_v46, %v9119_v29  ;;  %v4154_v0 = vmul.f32 %v5088_v2, %v9139_v42  ;;  %vm9143_vm9 = vmmov %vm9128_vm12  ;;  %v9155_v21 = vld [vmem:[#allocation28_spill] sm:$0xff] }
 0xc31   : > { %v4135_v61 = vadd.f32 %v4132_v44, %v4118_v25  ;;  %v4174_v33 = vrot.slane %v4143_v59, 7  ;;  %v4176_v37 = vrot.slane %v4144_v18, 6  ;;  %v4155_v41 = vmul.f32 %v5089_v20, %v9140_v1  ;;  %vm9144_vm10 = vmmov %vm9141_vm0 }
 0xc32   : > { %v4156_v30 = vmul.f32 %v5090_v32, %v9122_v43  ;;  %v4157_v48 = vmul.f32 %v5091_v15, %v9123_v35  ;;  %v4178_v10 = vrot.slane %v4145_v47, 5  ;;  %v4188_v62 = vrot.slane %v4151_v49, 7  ;;  %vm9145_vm11 = vmmov %vm9133_vm7 }
 0xc33   : > { %v4136_v50 = vrot.slane %v4135_v61, 4  ;;  %v4175_v40 = vsel %vm9141_vm0, %v4174_v33, %v4142_v34  ;;  %v4190_v22 = vrot.slane %v4152_v55, 6  ;;  %v4180_v29 = vrot.slane %v4146_v9, 4  ;;  %vm9146_vm12 = vmmov %vm9142_vm8 }
 0xc34   : > { %v4177_v52 = vsel %vm9142_vm8, %v4176_v37, %v4175_v40  ;;  %v4182_v56 = vrot.slane %v4147_v53, 3  ;;  %v4184_v2 = vrot.slane %v4148_v3, 2  ;;  %v4189_v16 = vsel %vm9144_vm10, %v4188_v62, %v4150_v7  ;;  %vm9147_vm13 = vmmov %vm9135_vm4 }
 0xc35   : > { %v4137_v58 = vadd.f32 %v4136_v50, %v4135_v61  ;;  %v4179_v46 = vsel %vm9143_vm9, %v4178_v10, %v4177_v52  ;;  %v4192_v20 = vrot.slane %v4153_v6, 5  ;;  %v4191_v35 = vsel %vm9146_vm12, %v4190_v22, %v4189_v16  ;;  %vm9148_vm14 = vmmov %vm9143_vm9  ;;  %v9159_v16 = vld [vmem:[#allocation25_spill] sm:$0xff] }
 0xc36   : > { %v4181_v43 = vsel %vm9145_vm11, %v4180_v29, %v4179_v46  ;;  %v4194_v32 = vrot.slane %v4154_v0, 4  ;;  %v4196_v5 = vrot.slane %v4155_v41, 3  ;;  %vm9149_vm15 = vmmov %vm9136_vm3  ;;  %v4198_v27 = vrot.slane %v4156_v30, 2  ;;  %v9158_v46 = vld [vmem:[#allocation13_spill] sm:$0xff] }
 0xc37   : > { %v4138_v60 = vrot.slane %v4137_v58, 2  ;;  %v4183_v15 = vsel %vm9147_vm13, %v4182_v56, %v4181_v43  ;;  %v4193_v4 = vsel %vm9148_vm14, %v4192_v20, %v4191_v35  ;;  %vm9150_vm6 = vmmov %vm9133_vm7  ;;  %v4186_v19 = vrot.slane %v4149_v54, 1 }
 0xc38   : > { %v4185_v8 = vsel %vm9149_vm15, %v4184_v2, %v4183_v15  ;;  %v4195_v11 = vsel %vm9150_vm6, %v4194_v32, %v4193_v4  ;;  %vm9151_vm7 = vmmov %vm9135_vm4  ;;  %v4200_v14 = vrot.slane %v4157_v48, 1  ;;  %v1858_v34 = vadd.f32 1e-15, %v9155_v21 }
 0xc39   : > { %v4139_v26 = vadd.f32 %v4138_v60, %v4137_v58  ;;  %v4197_v31 = vsel %vm9151_vm7, %v4196_v5, %v4195_v11  ;;  %vm9152_vm5 = vmmov %vm9136_vm3  ;;  %v1859_v59 = vadd.f32 1e-15, %v9156_v23  ;;  %v9157_v58 = vld [vmem:[#allocation12_spill] sm:$0xff]  ;;  %v3053_v20 = vrot.slane %v9159_v16, 4 }
 0xc3a   : > { %v4199_v38 = vsel %vm9152_vm5, %v4198_v27, %v4197_v31  ;;  %vm9153_vm4 = vmmov %vm9138_vm1  ;;  %vm9160_vm9 = vcmask 130048  }
 0xc3b   : > { %v4140_v39 = vrot.slane %v4139_v26, 1  ;;  %v4187_v51 = vsel %vm9153_vm4, %v4186_v19, %v4185_v8  ;;  %vm9154_vm3 = vmmov %vm9138_vm1  ;;  %v3054_v43 = vadd.f32 %v3053_v20, %v9159_v16  ;;  %v563_v8 = vld [vmem:[%s8646_s4 + $0x38] sm:$0xff] }
 0xc3c   : > { %v4201_v45 = vsel %vm9154_vm3, %v4200_v14, %v4199_v38  ;;  %vm9161_vm10 = vmmov %vm9160_vm9 }
 0xc3d   : > { %v4141_v28 = vadd.f32 %v4140_v39, %v4139_v26  ;;  %v4204_v57 = vadd.f32 %v4201_v45, %v4187_v51  ;;  %v555_v26 = vld [vmem:[%s8645_s3 + $0x38] sm:$0xff]  ;;  %v3055_v11 = vrot.slane %v3054_v43, 2  ;;  %vm9162_vm11 = vmmov %vm9160_vm9 }
 0xc3e   : > { %vm9163_vm12 = vmmov %vm9160_vm9 }
 0xc3f   : > { %v4205_v12 = vrot.slane %v4204_v57, 4  ;;  %5270 = vrcp.f32 %v4141_v28  ;;  %v4223_v25 = vand.u32 2147483648, %v4141_v28  ;;  %v4221_v55 = vand.u32 2147483647, %v4141_v28 }
 0xc40   : > { %5272 = vlog2.f32 %v1858_v34  ;;  %vm4217_vm1 = vweird.f32 %v4141_v28  ;;  %v3056_v14 = vadd.f32 %v3055_v11, %v3054_v43 }
 0xc41   : > { %v4206_v17 = vadd.f32 %v4205_v12, %v4204_v57  ;;  %5274 = vlog2.f32 %v1859_v59  ;;  %v4224_v7 = vor.u32 1.1754944e-38, %v4223_v25  ;;  %vm4222_vm8 = vcmp.eq.f32.partialorder %v4221_v55, 8.507059e+37 }
 0xc42   : > { %v3057_v45 = vrot.slane %v3056_v14, 1 }
 0xc43   : > { %v4207_v24 = vrot.slane %v4206_v17, 2 }
 0xc45   : > { %v5271_v18 = vpop.eup %5270  ;;  %v4208_v36 = vadd.f32 %v4207_v24, %v4206_v17  ;;  %v3058_v17 = vadd.f32 %v3057_v45, %v3056_v14  ;;  %v9171_v14 = vld [vmem:[#allocation44_spill] sm:$0xff] }
 0xc46   : > { %v4213_v47 = vmul.f32 %v5271_v18, %v4141_v28  ;;  %vm4218_vm2 = vweird.f32 %v5271_v18  ;;  %v5273_v61 = vpop.eup %5272 }
 0xc47   : > { %v4209_v9 = vrot.slane %v4208_v36, 1  ;;  %v5275_v54 = vpop.eup %5274  ;;  %vm4219_vm0 = vmor %vm4217_vm1, %vm4218_vm2  ;;  %v1861_v37 = vmul.f32 0.6931472, %v5273_v61 }
 0xc48   : > { %v4214_v53 = vsub.f32 1.0, %v4213_v47  ;;  %v1863_v50 = vmul.f32 0.6931472, %v5275_v54  ;;  %v9164_v47 = vld [vmem:[#allocation27_spill] sm:$0xff]  ;;  %vm9167_vm2 = vmmov %vm9160_vm9 }
 0xc49   : > { %v4210_v44 = vadd.f32 %v4209_v9, %v4208_v36  ;;  %v1864_v48 = vmul.f32 %v1861_v37, %v9155_v21  ;;  %vm9168_vm1 = vmmov %vm9167_vm2 }
 0xc4a   : > { %v4215_v49 = vmul.f32 %v5271_v18, %v4214_v53  ;;  %v1865_v40 = vmul.f32 %v1863_v50, %v9156_v23 }
 0xc4b   : > { %v5092_v6 = vadd.f32 -1.0, %v4210_v44  ;;  %v9165_v44 = vld [vmem:[#allocation36_spill] sm:$0xff] }
 0xc4c   : > { %v4216_v3 = vadd.f32 %v5271_v18, %v4215_v49  ;;  %v1866_v56 = vadd.f32 %v1865_v40, %v1864_v48 }
 0xc4e   : > { %v4220_v42 = vsel %vm4219_vm0, %v5271_v18, %v4216_v3  ;;  %v1867_v60 = vrot.slane %v1866_v56, 4  ;;  %vm9169_vm0 = vmmov %vm9168_vm1 }
 0xc4f   : > { %v4225_v0 = vsel %vm4222_vm8, %v4224_v7, %v4220_v42  ;;  %vm9170_vm8 = vmmov %vm9169_vm0 }
 0xc50   : > { %v4226_v33 = vmul.f32 %v5092_v6, %v4225_v0  ;;  %v1868_v32 = vadd.f32 %v1867_v60, %v1866_v56  ;;  %v4258_v56 = vpop.permute.xlu0 %4257  ;;  %v9166_v60 = vld [vmem:[#allocation37_spill] sm:$0xff] }
 0xc52   : > { %v4227_v1 = vperm.slane %v4226_v33, 0  ;;  %v1869_v31 = vrot.slane %v1868_v32, 2 }
 0xc54   : > { %v4229_v41 = vsub.f32 %v7616_v63, %v4227_v1  ;;  %v4228_v30 = vsub.f32 %v7582_v13, %v4227_v1  ;;  %v554_v13 = vld [vmem:[%s8645_s3 + $0x30] sm:$0xff]  ;;  %v1870_v38 = vadd.f32 %v1869_v31, %v1868_v32  ;;  %s5328_s3 = scalar_lea.hbm %s8477_s15, 2 }
 0xc55   : > { %v562_v63 = vld [vmem:[%s8646_s4 + $0x30] sm:$0xff]  ;;  %p5330_p3 = scmp.lt.s32.totalorder %s5328_s3, %s5324_s2 }
 0xc56   : > { %v4231_v10 = vmax.f32 %v4229_v41, 0.0  ;;  %v4230_v62 = vmax.f32 %v4228_v30, 0.0  ;;  %v1871_v57 = vrot.slane %v1870_v38, 1 }
 0xc57   : > { %p5331_p4 = por %p5330_p3, %p5329_p2 }
 0xc58   : > { %v4233_v22 = vadd.f32 1e-15, %v4231_v10  ;;  %v4249_v52 = vmul.f32 %v4231_v10, %v9157_v58  ;;  %v4232_v29 = vadd.f32 1e-15, %v4230_v62  ;;  %v4248_v2 = vmul.f32 %v4230_v62, %v9158_v46 }
 0xc59   : > { %v1872_v34 = vadd.f32 %v1871_v57, %v1870_v38  ;;  %p5332_p5 = pnand %p5331_p4, %p5327_p1 }
 0xc5a   : > { %5276 = vlog2.f32 %v4233_v22  ;;  %4280 = vmatpush.msra.mxu3 %v4249_v52  ;;  %4319 = vmatpush.msrb.mxu0 %v4249_v52 }
 0xc5b   : > { %5278 = vlog2.f32 %v4232_v29  ;;  %v3059_v23 = vadd.f32 %v3058_v17, %v1872_v34 }
 0xc5c   : > { %4281 = vmatpush.msra.mxu3 %v4248_v2  ;;  %4320 = vmatpush.msrb.mxu0 %v4248_v2 }
 0xc5d   : > { %5093 = vmatmul.msk.f32.vlgmr.msra.gmra.mxu3 %vm9160_vm9, %v554_v13  ;;  %5095 = vmatmul.msk.f32.vlgmr.msrb.gmra.mxu0 %vm9161_vm10, %v562_v63 }
 0xc60   : > { %v5277_v35 = vpop.eup %5276 }
 0xc61   : > { %v5279_v15 = vpop.eup %5278  ;;  %v4237_v4 = vmul.f32 0.6931472, %v5277_v35 }
 0xc62   : > { %v4235_v5 = vmul.f32 0.6931472, %v5279_v15  ;;  %v598_v15 = vld [vmem:[%s8469_s7 + $0x90] sm:$0xff] }
 0xc63   : > { %v4239_v27 = vmul.f32 %v4237_v4, %v4231_v10  ;;  %v622_v4 = vld [vmem:[%s8470_s8 + $0x90] sm:$0xff] }
 0xc64   : > { %v4238_v19 = vmul.f32 %v4235_v5, %v4230_v62  ;;  %v599_v5 = vld [vmem:[%s8469_s7 + $0x98] sm:$0xff] }
 0xc65   : > { %5094 = vmatmul.msk.f32.gmra.mxu3 %vm9162_vm11, %v555_v26  ;;  %5096 = vmatmul.msk.f32.gmra.mxu0 %vm9163_vm12, %v563_v8  ;;  %v623_v26 = vld [vmem:[%s8470_s8 + $0x98] sm:$0xff]  ;;  %v4410_v8 = vpop.permute.xlu0 %4409 }
 0xc66   : > { %v4240_v39 = vadd.f32 %v4239_v27, %v4238_v19 }
 0xc68   : > { %v4241_v51 = vrot.slane %v4240_v39, 4 }
 0xc6a   : > { %v4242_v28 = vadd.f32 %v4241_v51, %v4240_v39 }
 0xc6c   : > { %v4243_v12 = vrot.slane %v4242_v28, 2 }
 0xc6e   : > { %v4244_v21 = vadd.f32 %v4243_v12, %v4242_v28 }
 0xc70   : > { %v4245_v24 = vrot.slane %v4244_v21, 1 }
 0xc72   : > { %v4246_v59 = vadd.f32 %v4245_v24, %v4244_v21 }
 0xc74   : > { %v4247_v18 = vadd.f32 %v4246_v59, %v3059_v23 }
 0xc76   : > { %4734 = vst [vmem:[%s541_s30] sm:$0x1] %v4247_v18 }
 0xcda   : > { %v4322_v36 = vpop.f32.mrf.mxu0 }
 0xcdb   : > { %v4323_v9 = vadd.f32 %v4322_v36, %v9164_v47 }
 0xcdd   : > { %v5097_v53 = vmul.f32 -1.442695, %v4323_v9 }
 0xcdf   : > { %5280 = vpow2.f32 %v5097_v53 }
 0xce0   : > { %v4283_v33 = vpop.f32.mrf.mxu3 }
 0xce1   : > { %v4284_v43 = vadd.f32 %v4283_v33, %v9166_v60 }
 0xce2   : > { %v4325_v25 = vpop.f32.mrf.mxu0 }
 0xce3   : > { %v4326_v49 = vadd.f32 %v4325_v25, %v9165_v44 }
 0xce5   : > { %v5281_v55 = vpop.eup %5280  ;;  %v5098_v61 = vmul.f32 -1.442695, %v4326_v49 }
 0xce6   : > { %v4334_v3 = vadd.f32 1.0, %v5281_v55 }
 0xce7   : > { %5282 = vpow2.f32 %v5098_v61 }
 0xce8   : > { %5284 = vrcp.f32 %v4334_v3  ;;  %vm4341_vm14 = vweird.f32 %v4334_v3  ;;  %v4347_v48 = vand.u32 2147483648, %v4334_v3  ;;  %v4345_v10 = vand.u32 2147483647, %v4334_v3  ;;  %v4286_v58 = vpop.f32.mrf.mxu3 }
 0xce9   : > { %v4287_v13 = vadd.f32 %v4286_v58, %v4258_v56  ;;  %v601_v58 = vld [vmem:[%s8469_s7 + $0xa8] sm:$0xff] }
 0xcea   : > { %v4348_v46 = vor.u32 1.1754944e-38, %v4347_v48  ;;  %vm4346_vm4 = vcmp.eq.f32.partialorder %v4345_v10, 8.507059e+37  ;;  %v9178_v56 = vld [vmem:[#allocation39_spill] sm:$0xff] }
 0xced   : > { %v5283_v54 = vpop.eup %5282 }
 0xcee   : > { %v5285_v7 = vpop.eup %5284  ;;  %v4335_v6 = vadd.f32 1.0, %v5283_v54  ;;  %v9172_v54 = vld [vmem:[#allocation24_spill] sm:$0xff] }
 0xcef   : > { %v4337_v42 = vmul.f32 %v5285_v7, %v4334_v3  ;;  %vm4342_vm13 = vweird.f32 %v5285_v7 }
 0xcf0   : > { %5286 = vrcp.f32 %v4335_v6  ;;  %v4362_v40 = vand.u32 2147483648, %v4335_v6  ;;  %v4360_v22 = vand.u32 2147483647, %v4335_v6  ;;  %vm4343_vm6 = vmor %vm4341_vm14, %vm4342_vm13  ;;  %vm4356_vm7 = vweird.f32 %v4335_v6 }
 0xcf1   : > { %v4338_v0 = vsub.f32 1.0, %v4337_v42 }
 0xcf2   : > { %v4363_v2 = vor.u32 1.1754944e-38, %v4362_v40  ;;  %vm4361_vm3 = vcmp.eq.f32.partialorder %v4360_v22, 8.507059e+37  ;;  %v624_v22 = vld [vmem:[%s8470_s8 + $0xa0] sm:$0xff] }
 0xcf3   : > { %v4339_v37 = vmul.f32 %v5285_v7, %v4338_v0  ;;  %v9173_v0 = vld [vmem:[#allocation38_spill] sm:$0xff] }
 0xcf5   : > { %v4340_v41 = vadd.f32 %v5285_v7, %v4339_v37 }
 0xcf6   : > { %v5287_v50 = vpop.eup %5286 }
 0xcf7   : > { %v4352_v1 = vmul.f32 %v5287_v50, %v4335_v6  ;;  %vm4357_vm15 = vweird.f32 %v5287_v50  ;;  %v4344_v52 = vsel %vm4343_vm6, %v5285_v7, %v4340_v41 }
 0xcf8   : > { %vm4358_vm5 = vmor %vm4356_vm7, %vm4357_vm15  ;;  %v4349_v16 = vsel %vm4346_vm4, %v4348_v46, %v4344_v52  ;;  %v625_v52 = vld [vmem:[%s8470_s8 + $0xa8] sm:$0xff] }
 0xcf9   : > { %v4353_v30 = vsub.f32 1.0, %v4352_v1  ;;  %v8340_v32 = vmul.f32 %v4349_v16, %v4284_v43  ;;  %vm9174_vm7 = vmmov %vm9169_vm0 }
 0xcfa   : > { %vm9176_vm4 = vmmov %vm9169_vm0 }
 0xcfb   : > { %v4354_v62 = vmul.f32 %v5287_v50, %v4353_v30 }
 0xcfd   : > { %v4355_v29 = vadd.f32 %v5287_v50, %v4354_v62  ;;  %v600_v62 = vld [vmem:[%s8469_s7 + $0xa0] sm:$0xff] }
 0xcff   : > { %v4359_v63 = vsel %vm4358_vm5, %v5287_v50, %v4355_v29  ;;  %vm9175_vm5 = vmmov %vm9169_vm0 }
 0xd00   : > { %v4364_v20 = vsel %vm4361_vm3, %v4363_v2, %v4359_v63  ;;  %vm9177_vm3 = vmmov %vm9169_vm0 }
 0xd01   : > { %v8338_v35 = vmul.f32 %v4364_v20, %v4287_v13  ;;  %v4537_v13 = vpop.permute.xlu0 %4536 }
 0xd03   : > { %4398 = vmatpush.msrb.mxu1 %v8338_v35  ;;  %4437 = vmatpush.msrb.mxu2 %v8338_v35 }
 0xd05   : > { %4399 = vmatpush.msrb.mxu1 %v8340_v32  ;;  %4438 = vmatpush.msrb.mxu2 %v8340_v32 }
 0xd06   : > { %5099 = vmatmul.msk.f32.vlgmr.msrb.gmra.mxu1 %vm9167_vm2, %v598_v15  ;;  %5101 = vmatmul.msk.f32.vlgmr.msrb.gmra.mxu2 %vm9168_vm1, %v622_v4 }
 0xd0e   : > { %5100 = vmatmul.msk.f32.gmra.mxu1 %vm9169_vm0, %v599_v5  ;;  %5102 = vmatmul.msk.f32.gmra.mxu2 %vm9170_vm8, %v623_v26 }
 0xd83   : > { %v4401_v34 = vpop.f32.mrf.mxu1 }
 0xd84   : > { %v4402_v7 = vadd.f32 %v4401_v34, %v9172_v54 }
 0xd89   : > { %v4440_v11 = vpop.f32.mrf.mxu2 }
 0xd8a   : > { %v4441_v27 = vadd.f32 %v4440_v11, %v4410_v8 }
 0xd8b   : > { %v4404_v61 = vpop.f32.mrf.mxu1 }
 0xd8c   : > { %v5103_v19 = vmul.f32 -1.442695, %v4441_v27  ;;  %v4405_v33 = vadd.f32 %v4404_v61, %v9173_v0  ;;  %v602_v61 = vld [vmem:[%s8469_s7 + $0xb0] sm:$0xff]  ;;  %v627_v0 = vld [vmem:[%s8470_s8 + $0xb8] sm:$0xff] }
 0xd8e   : > { %5288 = vpow2.f32 %v5103_v19 }
 0xd91   : > { %v4443_v31 = vpop.f32.mrf.mxu2 }
 0xd92   : > { %v4444_v39 = vadd.f32 %v4443_v31, %v9171_v14 }
 0xd94   : > { %v5289_v38 = vpop.eup %5288  ;;  %v5104_v51 = vmul.f32 -1.442695, %v4444_v39 }
 0xd95   : > { %v4452_v45 = vadd.f32 1.0, %v5289_v38 }
 0xd96   : > { %5290 = vpow2.f32 %v5104_v51 }
 0xd97   : > { %5292 = vrcp.f32 %v4452_v45  ;;  %v4465_v18 = vand.u32 2147483648, %v4452_v45  ;;  %vm4459_vm10 = vweird.f32 %v4452_v45  ;;  %v4463_v47 = vand.u32 2147483647, %v4452_v45 }
 0xd99   : > { %v4466_v44 = vor.u32 1.1754944e-38, %v4465_v18  ;;  %vm4464_vm13 = vcmp.eq.f32.partialorder %v4463_v47, 8.507059e+37  ;;  %v9179_v18 = vld [vmem:[#allocation45_spill] sm:$0xff] }
 0xd9c   : > { %v5291_v28 = vpop.eup %5290 }
 0xd9d   : > { %v5293_v57 = vpop.eup %5292  ;;  %v4453_v12 = vadd.f32 1.0, %v5291_v28 }
 0xd9e   : > { %v4455_v17 = vmul.f32 %v5293_v57, %v4452_v45  ;;  %vm4460_vm9 = vweird.f32 %v5293_v57 }
 0xd9f   : > { %5294 = vrcp.f32 %v4453_v12  ;;  %vm4461_vm11 = vmor %vm4459_vm10, %vm4460_vm9  ;;  %v4480_v25 = vand.u32 2147483648, %v4453_v12  ;;  %v4478_v55 = vand.u32 2147483647, %v4453_v12  ;;  %vm4474_vm14 = vweird.f32 %v4453_v12 }
 0xda0   : > { %v4456_v21 = vsub.f32 1.0, %v4455_v17 }
 0xda1   : > { %v4481_v42 = vor.u32 1.1754944e-38, %v4480_v25  ;;  %vm4479_vm6 = vcmp.eq.f32.partialorder %v4478_v55, 8.507059e+37 }
 0xda2   : > { %v4457_v24 = vmul.f32 %v5293_v57, %v4456_v21 }
 0xda4   : > { %v4458_v23 = vadd.f32 %v5293_v57, %v4457_v24 }
 0xda5   : > { %v5295_v59 = vpop.eup %5294 }
 0xda6   : > { %v4470_v36 = vmul.f32 %v5295_v59, %v4453_v12  ;;  %v4462_v53 = vsel %vm4461_vm11, %v5293_v57, %v4458_v23  ;;  %vm4475_vm12 = vweird.f32 %v5295_v59  ;;  %v4493_v12 = vpop.permute.xlu0 %4492 }
 0xda7   : > { %v4467_v3 = vsel %vm4464_vm13, %v4466_v44, %v4462_v53  ;;  %vm4476_vm15 = vmor %vm4474_vm14, %vm4475_vm12 }
 0xda8   : > { %v4471_v9 = vsub.f32 1.0, %v4470_v36  ;;  %v4484_v50 = vmul.f32 %v4467_v3, %v4402_v7  ;;  %v626_v3 = vld [vmem:[%s8470_s8 + $0xb0] sm:$0xff]  ;;  %vm9180_vm13 = vmmov %vm9177_vm3 }
 0xda9   : > { %vm9181_vm14 = vmmov %vm9177_vm3 }
 0xdaa   : > { %v4472_v49 = vmul.f32 %v5295_v59, %v4471_v9  ;;  %v4486_v48 = vadd.f32 %v4484_v50, %v8340_v32 }
 0xdac   : > { %v4473_v6 = vadd.f32 %v5295_v59, %v4472_v49  ;;  %v4488_v10 = vmul.f32 0.70710677, %v4486_v48 }
 0xdae   : > { %v4477_v37 = vsel %vm4476_vm15, %v5295_v59, %v4473_v6  ;;  %v4652_v54 = vpop.permute.xlu0 %4651  ;;  %vm9182_vm15 = vmmov %vm9177_vm3 }
 0xdaf   : > { %v4482_v1 = vsel %vm4479_vm6, %v4481_v42, %v4477_v37  ;;  %vm9183_vm6 = vmmov %vm9177_vm3 }
 0xdb0   : > { %v4485_v41 = vmul.f32 %v4482_v1, %v4405_v33  ;;  %v603_v33 = vld [vmem:[%s8469_s7 + $0xb8] sm:$0xff] }
 0xdb2   : > { %v4487_v30 = vadd.f32 %v4485_v41, %v8338_v35 }
 0xdb4   : > { %v8367_v40 = vmul.f32 0.70710677, %v4487_v30 }
 0xdb6   : > { %4520 = vmatpush.msrb.mxu3 %v8367_v40  ;;  %4559 = vmatpush.msra.mxu0 %v8367_v40 }
 0xdb8   : > { %4521 = vmatpush.msrb.mxu3 %v4488_v10  ;;  %4560 = vmatpush.msra.mxu0 %v4488_v10 }
 0xdb9   : > { %5105 = vmatmul.msk.f32.vlgmr.msrb.gmra.mxu3 %vm9174_vm7, %v600_v62  ;;  %5107 = vmatmul.msk.f32.vlgmr.msra.gmra.mxu0 %vm9175_vm5, %v624_v22 }
 0xdc1   : > { %5106 = vmatmul.msk.f32.gmra.mxu3 %vm9176_vm4, %v601_v58  ;;  %5108 = vmatmul.msk.f32.gmra.mxu0 %vm9177_vm3, %v625_v52  ;;  %v4615_v58 = vpop.permute.xlu0 %4614 }
 0xe36   : > { %v4562_v29 = vpop.f32.mrf.mxu0 }
 0xe37   : > { %v4563_v46 = vadd.f32 %v4562_v29, %v9178_v56 }
 0xe39   : > { %v5109_v2 = vmul.f32 -1.442695, %v4563_v46 }
 0xe3b   : > { %5296 = vpow2.f32 %v5109_v2 }
 0xe3c   : > { %v4523_v26 = vpop.f32.mrf.mxu3 }
 0xe3d   : > { %v4524_v34 = vadd.f32 %v4523_v26, %v4493_v12 }
 0xe3e   : > { %v4565_v63 = vpop.f32.mrf.mxu0 }
 0xe3f   : > { %v4566_v16 = vadd.f32 %v4565_v63, %v4537_v13 }
 0xe41   : > { %v5297_v20 = vpop.eup %5296  ;;  %v5110_v60 = vmul.f32 -1.442695, %v4566_v16 }
 0xe42   : > { %v4574_v43 = vadd.f32 1.0, %v5297_v20  ;;  %v9184_v20 = vld [vmem:[#allocation46_spill] sm:$0xff] }
 0xe43   : > { %5298 = vpow2.f32 %v5110_v60 }
 0xe44   : > { %5300 = vrcp.f32 %v4574_v43  ;;  %v4587_v19 = vand.u32 2147483648, %v4574_v43  ;;  %vm4581_vm1 = vweird.f32 %v4574_v43  ;;  %v4585_v31 = vand.u32 2147483647, %v4574_v43  ;;  %v4526_v21 = vpop.f32.mrf.mxu3 }
 0xe45   : > { %v4527_v36 = vadd.f32 %v4526_v21, %v9179_v18 }
 0xe46   : > { %v4588_v51 = vor.u32 1.1754944e-38, %v4587_v19  ;;  %vm4586_vm8 = vcmp.eq.f32.partialorder %v4585_v31, 8.507059e+37 }
 0xe49   : > { %v5299_v35 = vpop.eup %5298 }
 0xe4a   : > { %v5301_v32 = vpop.eup %5300  ;;  %v4575_v15 = vadd.f32 1.0, %v5299_v35 }
 0xe4b   : > { %v4577_v4 = vmul.f32 %v5301_v32, %v4574_v43  ;;  %vm4582_vm2 = vweird.f32 %v5301_v32  ;;  %v688_v43 = vld [vmem:[%s8475_s13] sm:$0xf] }
 0xe4c   : > { %5302 = vrcp.f32 %v4575_v15  ;;  %vm4583_vm0 = vmor %vm4581_vm1, %vm4582_vm2  ;;  %v4602_v45 = vand.u32 2147483648, %v4575_v15  ;;  %v4600_v57 = vand.u32 2147483647, %v4575_v15  ;;  %vm4596_vm10 = vweird.f32 %v4575_v15 }
 0xe4d   : > { %v4578_v5 = vsub.f32 1.0, %v4577_v4  ;;  %vm9185_vm2 = vcmask 64512  }
 0xe4e   : > { %v4603_v23 = vor.u32 1.1754944e-38, %v4602_v45  ;;  %vm4601_vm12 = vcmp.eq.f32.partialorder %v4600_v57, 8.507059e+37 }
 0xe4f   : > { %v4579_v8 = vmul.f32 %v5301_v32, %v4578_v5 }
 0xe51   : > { %v4580_v11 = vadd.f32 %v5301_v32, %v4579_v8 }
 0xe52   : > { %v5303_v27 = vpop.eup %5302 }
 0xe53   : > { %v4592_v14 = vmul.f32 %v5303_v27, %v4575_v15  ;;  %v4584_v39 = vsel %vm4583_vm0, %v5301_v32, %v4580_v11  ;;  %vm4597_vm9 = vweird.f32 %v5303_v27 }
 0xe54   : > { %v4589_v17 = vsel %vm4586_vm8, %v4588_v51, %v4584_v39  ;;  %vm4598_vm11 = vmor %vm4596_vm10, %vm4597_vm9 }
 0xe55   : > { %v4593_v38 = vsub.f32 1.0, %v4592_v14  ;;  %v4606_v59 = vmul.f32 %v4589_v17, %v4524_v34 }
 0xe57   : > { %v4594_v28 = vmul.f32 %v5303_v27, %v4593_v38  ;;  %v4608_v44 = vadd.f32 %v4606_v59, %v4488_v10 }
 0xe59   : > { %v4595_v24 = vadd.f32 %v5303_v27, %v4594_v28  ;;  %v4610_v55 = vmul.f32 0.70710677, %v4608_v44 }
 0xe5b   : > { %v4599_v47 = vsel %vm4598_vm11, %v5303_v27, %v4595_v24 }
 0xe5c   : > { %v4604_v9 = vsel %vm4601_vm12, %v4603_v23, %v4599_v47 }
 0xe5d   : > { %v4607_v53 = vmul.f32 %v4604_v9, %v4527_v36 }
 0xe5f   : > { %v4609_v25 = vadd.f32 %v4607_v53, %v8367_v40 }
 0xe61   : > { %v4611_v49 = vmul.f32 0.70710677, %v4609_v25 }
 0xe63   : > { %4641 = vmatpush.msra.mxu1 %v4611_v49  ;;  %4678 = vmatpush.msra.mxu2 %v4611_v49 }
 0xe65   : > { %4642 = vmatpush.msra.mxu1 %v4610_v55  ;;  %4679 = vmatpush.msra.mxu2 %v4610_v55 }
 0xe66   : > { %5111 = vmatmul.msk.f32.vlgmr.msra.gmra.mxu1 %vm9180_vm13, %v602_v61  ;;  %5113 = vmatmul.msk.f32.vlgmr.msra.gmra.mxu2 %vm9181_vm14, %v626_v3 }
 0xe6e   : > { %5114 = vmatmul.msk.f32.gmra.mxu2 %vm9182_vm15, %v627_v0  ;;  %5112 = vmatmul.msk.f32.gmra.mxu1 %vm9183_vm6, %v603_v33 }
 0xee3   : > { %v4644_v62 = vpop.f32.mrf.mxu1 }
 0xee4   : > { %v4645_v29 = vadd.f32 %v4644_v62, %v4615_v58 }
 0xee9   : > { %v4681_v7 = vpop.f32.mrf.mxu2 }
 0xeea   : > { %v4682_v6 = vadd.f32 %v4681_v7, %v4652_v54 }
 0xeec   : > { %v5115_v42 = vmul.f32 -1.442695, %v4682_v6 }
 0xeee   : > { %5304 = vpow2.f32 %v5115_v42 }
 0xef4   : > { %v5305_v37 = vpop.eup %5304 }
 0xef5   : > { %v4689_v50 = vadd.f32 1.0, %v5305_v37 }
 0xef7   : > { %5306 = vrcp.f32 %v4689_v50  ;;  %v4701_v48 = vand.u32 2147483648, %v4689_v50  ;;  %v4699_v10 = vand.u32 2147483647, %v4689_v50  ;;  %vm4695_vm5 = vweird.f32 %v4689_v50 }
 0xef9   : > { %v4702_v52 = vor.u32 1.1754944e-38, %v4701_v48  ;;  %vm4700_vm3 = vcmp.eq.f32.partialorder %v4699_v10, 8.507059e+37 }
 0xefd   : > { %v5307_v1 = vpop.eup %5306 }
 0xefe   : > { %v4691_v41 = vmul.f32 %v5307_v1, %v4689_v50  ;;  %vm4696_vm7 = vweird.f32 %v5307_v1 }
 0xeff   : > { %vm4697_vm4 = vmor %vm4695_vm5, %vm4696_vm7 }
 0xf00   : > { %v4692_v30 = vsub.f32 1.0, %v4691_v41 }
 0xf02   : > { %v4693_v40 = vmul.f32 %v5307_v1, %v4692_v30 }
 0xf04   : > { %v4694_v22 = vadd.f32 %v5307_v1, %v4693_v40 }
 0xf06   : > { %v4698_v56 = vsel %vm4697_vm4, %v5307_v1, %v4694_v22 }
 0xf07   : > { %v4703_v46 = vsel %vm4700_vm3, %v4702_v52, %v4698_v56 }
 0xf08   : > { %v4705_v2 = vmul.f32 %v4703_v46, %v4645_v29 }
 0xf0a   : > { %v4706_v13 = vadd.f32 %v4705_v2, %v4610_v55 }
 0xf0c   : > { %v4707_v63 = vmul.f32 0.70710677, %v4706_v13 }
 0xf0e   : > { %v4708_v16 = vmax.f32 %v4707_v63, 0.0 }
 0xf10   : > { %v4709_v60 = vadd.f32 %v4708_v16, %v9184_v20 }
 0xf12   : > { %4728 = vmatpush.msra.mxu3 %v4709_v60 }
 0xf13   : > { %5116 = vmatmul.msk.f32.vlgmr.msra.gmra.mxu3 %vm9185_vm2, %v688_v43 }
 0xf14   : > { %5335 = shalt.err (!%p5332_p5)
}
 0xf15   : > { %5122 = dma.vmem_to_hbm [thread:$0]  (%p5525_p6), %s4766_s26, 16, %s4768_s20, %s4741_s24   ;;  %v4647_v35 = vpop.f32.mrf.mxu1  ;;  %v4684_v32 = vpop.f32.mrf.mxu2 }
 0xf16   : > { %s4868_s30 = sshll.u32 %s5670_s0, 2  ;;  %s5118_s27 = sshll.u32 %s5507_s22, 2 }
 0xf17   : > { %s4750_s4 = scalar_lea.hbm %s8476_s14, %s5118_s27  ;;  %s535_s1 = scalar_lea.vmem [#allocation3], %s4868_s30 }
 0xf18   : > { %s4752_s2 = sshll.u32 %s535_s1, 4  ;;  %s4754_s3 = sshll.u32 %s4750_s4, 4  ;;  %s4753_s2 = int_to_ptr.vmem [resolvable:$true] %s4752_s2  ;;  %s4755_s3 = int_to_ptr.hbm [resolvable:$true] %s4754_s3 }
 0xf19   : > { %s4736_s23 = scalar_lea.sflag [#allocation4], %s5670_s0  ;;  %s5350_s16 = sshra.s32 %s4755_s3, 4  ;;  %s5351_s16 = int_to_ptr.hbm [resolvable:$true] %s5350_s16 }
 0xf1a   : > { %s5352_s26 = scalar_lea.hbm %s5351_s16, 4  ;;  %s5356_s24 = scalar_lea.hbm %s8476_s14, 8 }
 0xf1b   : > { %p5353_p7 = scmp.ne.s32.totalorder %s5351_s16, %s5352_s26  ;;  %p5357_p12 = scmp.lt.s32.totalorder %s5351_s16, %s8476_s14 }
 0xf1c   : > { %p5358_p13 = scmp.lt.s32.totalorder %s5356_s24, %s5352_s26 }
 0xf1d   : > { %p5354_p10 = pnand %p5353_p7, %p5525_p6 }
 0xf1e   : > { %p5359_p0 = por %p5358_p13, %p5357_p12 }
 0xf1f   : > { %p5355_p11 = pneg %p5354_p10 }
 0xf21   : > { %p5360_p1 = pnand %p5359_p0, %p5355_p11 }
 0xf96   : > { %v4730_v15 = vpop.f32.mrf.mxu3 }
 0xf97   : > { %4733 = vst [vmem:[%s535_s1] sm:$0xf] %v4730_v15 }
 0xf98   : > { %5363 = shalt.err (!%p5360_p1)
}
 0xf99   : > { %5121 = dma.vmem_to_hbm [thread:$0]  (%p5525_p6), %s4753_s2, 64, %s4755_s3, %s4736_s23  }
 0xf9a PF: > { %s4779_s0 = sand.u32 1, %s5390_s18   ;;  %p5126_p2 = pnand %p4863_p9, %p5529_p8 }
 0xf9b   : > { %s4780_s17 = scalar_lea.sflag [#allocation4], %s4779_s0 }
 0xf9c   : > { %p5127_p3 = pneg %p5126_p2 }
 0xf9e   : > { %5381 = dma.done.wait (%p5127_p3), %s4780_s17, 64  }
 0xf9f   : > { %5383 = vsyncadd (%p5127_p3), %s4780_s17, 4294967232  ;;  %s4790_s25 = scalar_lea.sflag [#allocation6], %s4779_s0 }
 0xfa0   : > { %5385 = dma.done.wait (%p5127_p3), %s4790_s25, 16  }
 0xfa1   : > { %5387 = vsyncadd (%p5127_p3), %s4790_s25, 4294967280  ;;  %s9186_s21 = sld [smem:[#allocation10_spill]]  ;;  %s9189_s18 = smov %s5394_s19 }
 0xfa2   : > { %s9187_s4 = sld [smem:[#allocation9_spill]] }
 0xfa3   : > { %s9188_s20 = sld [smem:[#allocation11_spill]] }
 0xfa7   : > { %p29_p6 = scmp.ge.s32.totalorder %s9186_s21, 4  }
 0xfa8   : > { %s9190_s19 = smov %s9187_s4 }
 0xfa9   :  { %31 = sbr.rel (!%p29_p6) target bundleno = 11 (0xb), region = 171 }
 0xfae   :  { %4795 = vsyncpa [#allocation4], 1 }
 0xfaf   :  { %4797 = vsyncpa [#allocation4 + $0x1], 1 }
 0xfb0   :  { %4798 = vsyncpa [#allocation6], 1 }
 0xfb1   :  { %4800 = vsyncpa [#allocation6 + $0x1], 1 }

</bundles_post_ra>
